<compile_context>
chip_gen: v7x
topology: tpu7x:2x2x1
jax: 0.10.0
libtpu: 0.0.40
codegen_flags: <defaults>
</compile_context>

<pallas_src>
import functools

import numpy as np
import jax
import jax.numpy as jnp
from jax.experimental import pallas as pl
from jax.experimental.pallas import tpu as pltpu


# ----------------------------------------------------------------------------
# Pallas kernels
# ----------------------------------------------------------------------------
def _conv_s2d_kernel(x_ref, w_ref, b_ref, o_ref, *, starts, m_out):
    """Fused Conv2d(4,4,stride=2,pad=1) + bias + leaky_relu for one image.

    x_ref: (1, R_pad, 4*Cin) f32  -- zero-padded, 2x2 space-to-depth, row-flattened
    w_ref: (4, 4*Cin, Cout)  bf16 -- one weight slab per 2x2 window offset (oi,oj)
    b_ref: (1, Cout)         f32
    o_ref: (1, m_out, Cout)  f32  -- "slab" layout: row m = r*(Wo+1)+s (col s=Wo is junk)
    """
    acc = None
    for widx, st in enumerate(starts):
        xw = x_ref[0, pl.ds(st, m_out), :].astype(jnp.bfloat16)
        d = jnp.dot(xw, w_ref[widx], preferred_element_type=jnp.float32)
        acc = d if acc is None else acc + d
    acc = acc + b_ref[...]
    o_ref[0] = jnp.where(acc >= 0.0, acc, 0.01 * acc)  # leaky_relu, PyTorch slope


def _fc_heads_kernel(x_ref, wf_ref, bf_ref, wh_ref, bh_ref, eps_ref,
                     z_ref, mu_ref, lv_ref, *, lp):
    """fc1 + [mean | sigmoid(std)] heads + reparameterize, fused in one kernel."""
    h = jnp.dot(x_ref[...].astype(jnp.bfloat16), wf_ref[...],
                preferred_element_type=jnp.float32) + bf_ref[...]
    y = jnp.dot(h, wh_ref[...], preferred_element_type=jnp.float32) + bh_ref[...]
    mu = y[:, :lp]
    lv = 1.0 / (1.0 + jnp.exp(-y[:, lp:]))      # sigmoid ("logvar" per the module)
    z = mu + eps_ref[...] * jnp.exp(0.5 * lv)
    z_ref[...] = z
    mu_ref[...] = mu
    lv_ref[...] = lv


# ----------------------------------------------------------------------------
# Thin XLA glue: pad + 2x2 space-to-depth (≈1x data, no im2col amplification)
# ----------------------------------------------------------------------------
def _space_to_depth(x_nhwc):
    n, h, w, c = x_nhwc.shape
    ho, wo = h // 2, w // 2
    xp = jnp.pad(x_nhwc, ((0, 0), (1, 1), (1, 1), (0, 0)))          # pad=1
    xs = xp.reshape(n, ho + 1, 2, wo + 1, 2, c)                     # (n,i,pi,j,pj,c)
    xs = xs.transpose(0, 1, 3, 2, 4, 5).reshape(n, (ho + 1) * (wo + 1), 4 * c)
    r = (ho + 1) * (wo + 1)
    r_pad = ((r + 1 + 7) // 8) * 8      # +1 row so the last window slice stays in-bounds
    xs = jnp.pad(xs, ((0, 0), (0, r_pad - r), (0, 0)))
    return xs, ho, wo


def conv_layer(x_nhwc, w_packed, b_packed, keep_slab=False):
    xs, ho, wo = _space_to_depth(x_nhwc)
    n, r_pad, k4 = xs.shape
    cout = w_packed.shape[-1]
    m_out = ho * (wo + 1)                       # slab rows (one junk column per row)
    starts = (0, 1, wo + 1, wo + 2)             # window offsets (oi,oj) in {0,1}^2
    kernel = functools.partial(_conv_s2d_kernel, starts=starts, m_out=m_out)
    y = pl.pallas_call(
        kernel,
        out_shape=jax.ShapeDtypeStruct((n, m_out, cout), jnp.float32),
        grid=(n,),
        in_specs=[pl.BlockSpec((1, r_pad, k4), lambda i: (i, 0, 0)),
                  pl.BlockSpec((4, k4, cout), lambda i: (0, 0, 0)),
                  pl.BlockSpec((1, cout), lambda i: (0, 0))],
        out_specs=pl.BlockSpec((1, m_out, cout), lambda i: (i, 0, 0)),
        compiler_params=pltpu.CompilerParams(dimension_semantics=("parallel",)),
    )(xs, w_packed, b_packed)
    if keep_slab:
        return y                                               # (n, ho*(wo+1), cout)
    return y.reshape(n, ho, wo + 1, cout)[:, :, :wo, :]         # drop junk column


def fc_heads(x_flat, eps, wf, bf, wh, bh):
    n, kc = x_flat.shape
    latent = eps.shape[1]
    lp = wh.shape[1] // 2
    tm = 8
    n_pad = ((n + tm - 1) // tm) * tm
    x_p = jnp.pad(x_flat, ((0, n_pad - n), (0, 0)))
    eps_p = jnp.pad(eps, ((0, n_pad - n), (0, lp - latent)))
    kernel = functools.partial(_fc_heads_kernel, lp=lp)
    z, mu, lv = pl.pallas_call(
        kernel,
        out_shape=(jax.ShapeDtypeStruct((n_pad, lp), jnp.float32),) * 3,
        grid=(n_pad // tm,),
        in_specs=[pl.BlockSpec((tm, kc), lambda i: (i, 0)),
                  pl.BlockSpec((kc, wf.shape[1]), lambda i: (0, 0)),
                  pl.BlockSpec((1, wf.shape[1]), lambda i: (0, 0)),
                  pl.BlockSpec((wh.shape[0], 2 * lp), lambda i: (0, 0)),
                  pl.BlockSpec((1, 2 * lp), lambda i: (0, 0)),
                  pl.BlockSpec((tm, lp), lambda i: (i, 0))],
        out_specs=(pl.BlockSpec((tm, lp), lambda i: (i, 0)),) * 3,
        compiler_params=pltpu.CompilerParams(dimension_semantics=("parallel",)),
    )(x_p, wf, bf, wh, bh, eps_p)
    return z[:n, :latent], mu[:n, :latent], lv[:n, :latent]


# ----------------------------------------------------------------------------
# Parameter init (raw PyTorch layout) and one-time packing for the kernels
# ----------------------------------------------------------------------------
def init_params(key, in_channels, latent_dim, size):
    scaling = size // 32
    flat = scaling * 4 * scaling * 4 * 256
    ks = jax.random.split(key, 12)

    def u(k, shape, fan_in):
        bound = 1.0 / np.sqrt(fan_in)
        return jax.random.uniform(k, shape, jnp.float32, -bound, bound)

    return {
        "conv1_w": u(ks[0], (64, in_channels, 4, 4), in_channels * 16),
        "conv1_b": u(ks[1], (64,), in_channels * 16),
        "conv2_w": u(ks[2], (128, 64, 4, 4), 64 * 16),
        "conv2_b": u(ks[3], (128,), 64 * 16),
        "conv3_w": u(ks[4], (256, 128, 4, 4), 128 * 16),
        "conv3_b": u(ks[5], (256,), 128 * 16),
        "fc1_w": u(ks[6], (512, flat), flat),
        "fc1_b": u(ks[7], (512,), flat),
        "mean_w": u(ks[8], (latent_dim, 512), 512),
        "mean_b": u(ks[9], (latent_dim,), 512),
        "std_w": u(ks[10], (latent_dim, 512), 512),
        "std_b": u(ks[11], (latent_dim,), 512),
    }


def _pack_conv(w_oihw, b, cin_pad=None, cout_pad=None):
    o, c, kh, kw = w_oihw.shape
    assert kh == 4 and kw == 4
    if cin_pad is not None and cin_pad > c:
        w_oihw = jnp.pad(w_oihw, ((0, 0), (0, cin_pad - c), (0, 0), (0, 0)))
        c = cin_pad
    if cout_pad is not None and cout_pad > o:
        w_oihw = jnp.pad(w_oihw, ((0, cout_pad - o), (0, 0), (0, 0), (0, 0)))
        b = jnp.pad(b, (0, cout_pad - o))
        o = cout_pad
    # tap (ki,kj) -> window (oi,oj)=(ki//2,kj//2), phase (pi,pj)=(ki%2,kj%2)
    w = w_oihw.reshape(o, c, 2, 2, 2, 2)          # (O, C, oi, pi, oj, pj)
    w = w.transpose(2, 4, 3, 5, 1, 0)             # (oi, oj, pi, pj, C, O)
    w = w.reshape(4, 4 * c, o)                    # K order matches space-to-depth
    return w.astype(jnp.bfloat16), b.reshape(1, o).astype(jnp.float32)


def pack_params(params, in_channels, latent_dim, size):
    scaling = size // 32
    ho3 = wo3 = 4 * scaling
    packed = {}
    packed["conv1_w"], packed["conv1_b"] = _pack_conv(
        params["conv1_w"], params["conv1_b"], cout_pad=128)   # lane-dense 64->128
    packed["conv2_w"], packed["conv2_b"] = _pack_conv(
        params["conv2_w"], params["conv2_b"], cin_pad=128)
    packed["conv3_w"], packed["conv3_b"] = _pack_conv(
        params["conv3_w"], params["conv3_b"], cin_pad=128)
    # fc1: rows permuted to the NHWC slab flatten of conv3; zero rows for the
    # slab's junk column so conv3's slab output can be consumed without slicing.
    w = params["fc1_w"].reshape(512, 256, ho3, wo3).transpose(2, 3, 1, 0)
    w = jnp.pad(w, ((0, 0), (0, 1), (0, 0), (0, 0)))
    packed["fc1_w"] = w.reshape(ho3 * (wo3 + 1) * 256, 512).astype(jnp.bfloat16)
    packed["fc1_b"] = params["fc1_b"].reshape(1, 512).astype(jnp.float32)
    # heads: mean | std packed side by side, each lane-padded to lp (>=128).
    lp = max(128, ((latent_dim + 127) // 128) * 128)
    wh = jnp.zeros((512, 2 * lp), jnp.float32)
    wh = wh.at[:, :latent_dim].set(params["mean_w"].T)
    wh = wh.at[:, lp:lp + latent_dim].set(params["std_w"].T)
    bh = jnp.zeros((2 * lp,), jnp.float32)
    bh = bh.at[:latent_dim].set(params["mean_b"])
    bh = bh.at[lp:lp + latent_dim].set(params["std_b"])
    packed["heads_w"] = wh
    packed["heads_b"] = bh.reshape(1, 2 * lp)
    return packed


# ----------------------------------------------------------------------------
# Forward pass (matches ConvolutionalEncoder.forward semantics)
# ----------------------------------------------------------------------------
def encoder_forward(packed, x_nchw, eps):
    n = x_nchw.shape[0]
    x = jnp.transpose(x_nchw, (0, 2, 3, 1))                         # NCHW -> NHWC
    x = conv_layer(x, packed["conv1_w"], packed["conv1_b"])
    x = conv_layer(x, packed["conv2_w"], packed["conv2_b"])
    x = conv_layer(x, packed["conv3_w"], packed["conv3_b"], keep_slab=True)
    x_flat = x.reshape(n, -1)               # slab flatten; fc1_w rows already match
    return fc_heads(x_flat, eps, packed["fc1_w"], packed["fc1_b"],
                    packed["heads_w"], packed["heads_b"])


# ----------------------------------------------------------------------------
# Pure-JAX reference (for correctness check only)
# ----------------------------------------------------------------------------
def reference_forward(params, x, eps):
    def conv(x, w, b):
        y = jax.lax.conv_general_dilated(
            x, w, (2, 2), ((1, 1), (1, 1)),
            dimension_numbers=("NCHW", "OIHW", "NCHW"),
            precision=jax.lax.Precision.HIGHEST)
        return jax.nn.leaky_relu(y + b[None, :, None, None], 0.01)

    x = conv(x, params["conv1_w"], params["conv1_b"])
    x = conv(x, params["conv2_w"], params["conv2_b"])
    x = conv(x, params["conv3_w"], params["conv3_b"])
    x = x.reshape(x.shape[0], -1)
    h = jnp.dot(x, params["fc1_w"].T, precision=jax.lax.Precision.HIGHEST) + params["fc1_b"]
    mu = jnp.dot(h, params["mean_w"].T, precision=jax.lax.Precision.HIGHEST) + params["mean_b"]
    lv = jax.nn.sigmoid(
        jnp.dot(h, params["std_w"].T, precision=jax.lax.Precision.HIGHEST) + params["std_b"])
    z = mu + eps * jnp.exp(0.5 * lv)
    return z, mu, lv


if __name__ == "__main__":
    # Smallest valid spatial size is 32 (size // 32 must be >= 1 for fc1 shape).
    batch, in_channels, latent_dim, size = 2, 4, 8, 32

    key = jax.random.PRNGKey(0)
    kx, keps, kp = jax.random.split(key, 3)
    x = jax.random.normal(kx, (batch, in_channels, size, size), jnp.float32)
    # eps is the reparameterization noise (torch.randn_like), generated once here.
    eps = jax.random.normal(keps, (batch, latent_dim), jnp.float32)
    params = init_params(kp, in_channels, latent_dim, size)
    packed = pack_params(params, in_channels, latent_dim, size)   # one-time weight packing

    fwd = jax.jit(encoder_forward)
    z, mu, logvar = fwd(packed, x, eps)
    jax.block_until_ready((z, mu, logvar))

    z_r, mu_r, lv_r = reference_forward(params, x, eps)
    np.testing.assert_allclose(np.asarray(mu), np.asarray(mu_r), rtol=5e-2, atol=5e-2)
    np.testing.assert_allclose(np.asarray(logvar), np.asarray(lv_r), rtol=5e-2, atol=5e-2)
    np.testing.assert_allclose(np.asarray(z), np.asarray(z_r), rtol=5e-2, atol=5e-2)

    print("KERNEL_OK")
</pallas_src>

<mosaic_0001>
module attributes {stable_mosaic.version = 11 : i64} {
  func.func @_conv_s2d_kernel(%arg0: i32, %arg1: memref<1x296x16xf32, #tpu.memory_space<vmem>>, %arg2: memref<4x16x128xbf16, #tpu.memory_space<vmem>>, %arg3: memref<1x128xf32, #tpu.memory_space<vmem>>, %arg4: memref<1x272x128xf32, #tpu.memory_space<vmem>>) attributes {dimension_semantics = [#tpu.dimension_semantics<parallel>], iteration_bounds = array<i64: 2>, scalar_prefetch = 0 : i64, scratch_operands = 0 : i64, tpu.core_type = #tpu.core_type<tc>, window_params = [{transform_indices = @transform_0, window_bounds = array<i64: 1, 296, 16>}, {pipeline_mode = #tpu.pipeline_mode<synchronous>, transform_indices = @transform_1, window_bounds = array<i64: 4, 16, 128>}, {pipeline_mode = #tpu.pipeline_mode<synchronous>, transform_indices = @transform_2, window_bounds = array<i64: 1, 128>}, {transform_indices = @transform_3, window_bounds = array<i64: 1, 272, 128>}]} {
    %c0 = arith.constant 0 : index
    %c0_0 = arith.constant 0 : index
    %c0_1 = arith.constant 0 : index
    %0 = vector.load %arg1[%c0, %c0_0, %c0_1] : memref<1x296x16xf32, #tpu.memory_space<vmem>>, vector<1x272x16xf32>
    %1 = vector.shape_cast %0 : vector<1x272x16xf32> to vector<272x16xf32>
    %2 = arith.truncf %1 : vector<272x16xf32> to vector<272x16xbf16>
    %c0_2 = arith.constant 0 : index
    %c0_3 = arith.constant 0 : index
    %c0_4 = arith.constant 0 : index
    %3 = vector.load %arg2[%c0_2, %c0_3, %c0_4] : memref<4x16x128xbf16, #tpu.memory_space<vmem>>, vector<1x16x128xbf16>
    %4 = vector.shape_cast %3 : vector<1x16x128xbf16> to vector<16x128xbf16>
    %cst = arith.constant dense<0.000000e+00> : vector<272x128xf32>
    %5 = tpu.matmul %2, %4, %cst {dimension_numbers = #tpu.dot_dimension_numbers<[1], [0], [0], [1], [0, 0, 1, 1], [], []>} : vector<272x16xbf16>, vector<16x128xbf16>, vector<272x128xf32> -> vector<272x128xf32>
    %c0_5 = arith.constant 0 : index
    %c1 = arith.constant 1 : index
    %c0_6 = arith.constant 0 : index
    %6 = vector.load %arg1[%c0_5, %c1, %c0_6] : memref<1x296x16xf32, #tpu.memory_space<vmem>>, vector<1x272x16xf32>
    %7 = vector.shape_cast %6 : vector<1x272x16xf32> to vector<272x16xf32>
    %8 = arith.truncf %7 : vector<272x16xf32> to vector<272x16xbf16>
    %c1_7 = arith.constant 1 : index
    %c0_8 = arith.constant 0 : index
    %c0_9 = arith.constant 0 : index
    %9 = vector.load %arg2[%c1_7, %c0_8, %c0_9] : memref<4x16x128xbf16, #tpu.memory_space<vmem>>, vector<1x16x128xbf16>
    %10 = vector.shape_cast %9 : vector<1x16x128xbf16> to vector<16x128xbf16>
    %cst_10 = arith.constant dense<0.000000e+00> : vector<272x128xf32>
    %11 = tpu.matmul %8, %10, %cst_10 {dimension_numbers = #tpu.dot_dimension_numbers<[1], [0], [0], [1], [0, 0, 1, 1], [], []>} : vector<272x16xbf16>, vector<16x128xbf16>, vector<272x128xf32> -> vector<272x128xf32>
    %12 = arith.addf %5, %11 : vector<272x128xf32>
    %c0_11 = arith.constant 0 : index
    %c17 = arith.constant 17 : index
    %c0_12 = arith.constant 0 : index
    %13 = vector.load %arg1[%c0_11, %c17, %c0_12] : memref<1x296x16xf32, #tpu.memory_space<vmem>>, vector<1x272x16xf32>
    %14 = vector.shape_cast %13 : vector<1x272x16xf32> to vector<272x16xf32>
    %15 = arith.truncf %14 : vector<272x16xf32> to vector<272x16xbf16>
    %c2 = arith.constant 2 : index
    %c0_13 = arith.constant 0 : index
    %c0_14 = arith.constant 0 : index
    %16 = vector.load %arg2[%c2, %c0_13, %c0_14] : memref<4x16x128xbf16, #tpu.memory_space<vmem>>, vector<1x16x128xbf16>
    %17 = vector.shape_cast %16 : vector<1x16x128xbf16> to vector<16x128xbf16>
    %cst_15 = arith.constant dense<0.000000e+00> : vector<272x128xf32>
    %18 = tpu.matmul %15, %17, %cst_15 {dimension_numbers = #tpu.dot_dimension_numbers<[1], [0], [0], [1], [0, 0, 1, 1], [], []>} : vector<272x16xbf16>, vector<16x128xbf16>, vector<272x128xf32> -> vector<272x128xf32>
    %19 = arith.addf %12, %18 : vector<272x128xf32>
    %c0_16 = arith.constant 0 : index
    %c18 = arith.constant 18 : index
    %c0_17 = arith.constant 0 : index
    %20 = vector.load %arg1[%c0_16, %c18, %c0_17] : memref<1x296x16xf32, #tpu.memory_space<vmem>>, vector<1x272x16xf32>
    %21 = vector.shape_cast %20 : vector<1x272x16xf32> to vector<272x16xf32>
    %22 = arith.truncf %21 : vector<272x16xf32> to vector<272x16xbf16>
    %c3 = arith.constant 3 : index
    %c0_18 = arith.constant 0 : index
    %c0_19 = arith.constant 0 : index
    %23 = vector.load %arg2[%c3, %c0_18, %c0_19] : memref<4x16x128xbf16, #tpu.memory_space<vmem>>, vector<1x16x128xbf16>
    %24 = vector.shape_cast %23 : vector<1x16x128xbf16> to vector<16x128xbf16>
    %cst_20 = arith.constant dense<0.000000e+00> : vector<272x128xf32>
    %25 = tpu.matmul %22, %24, %cst_20 {dimension_numbers = #tpu.dot_dimension_numbers<[1], [0], [0], [1], [0, 0, 1, 1], [], []>} : vector<272x16xbf16>, vector<16x128xbf16>, vector<272x128xf32> -> vector<272x128xf32>
    %26 = arith.addf %19, %25 : vector<272x128xf32>
    %c0_21 = arith.constant 0 : index
    %c0_22 = arith.constant 0 : index
    %27 = vector.load %arg3[%c0_21, %c0_22] : memref<1x128xf32, #tpu.memory_space<vmem>>, vector<1x128xf32>
    %28 = vector.broadcast %27 : vector<1x128xf32> to vector<272x128xf32>
    %29 = arith.addf %26, %28 : vector<272x128xf32>
    %cst_23 = arith.constant 0.000000e+00 : f32
    %30 = vector.broadcast %cst_23 : f32 to vector<272x128xf32>
    %31 = arith.cmpf oge, %29, %30 : vector<272x128xf32>
    %cst_24 = arith.constant 0.00999999977 : f32
    %32 = vector.broadcast %cst_24 : f32 to vector<272x128xf32>
    %33 = arith.mulf %32, %29 : vector<272x128xf32>
    %34 = arith.select %31, %29, %33 : vector<272x128xi1>, vector<272x128xf32>
    %c0_25 = arith.constant 0 : index
    %c0_26 = arith.constant 0 : index
    %c0_27 = arith.constant 0 : index
    %35 = vector.load %arg4[%c0_25, %c0_26, %c0_27] : memref<1x272x128xf32, #tpu.memory_space<vmem>>, vector<1x272x128xf32>
    %36 = vector.shape_cast %35 : vector<1x272x128xf32> to vector<272x128xf32>
    %37 = vector.shape_cast %34 : vector<272x128xf32> to vector<1x272x128xf32>
    tpu.vector_store %arg4[%c0_25, %c0_26, %c0_27], %37 {strides = array<i32>} : memref<1x272x128xf32, #tpu.memory_space<vmem>>, vector<1x272x128xf32>,
    return
  }
  func.func @transform_0(%arg0: i32) -> (i32, i32, i32) {
    %c0_i32 = arith.constant 0 : i32
    %c0_i32_0 = arith.constant 0 : i32
    %c0_i32_1 = arith.constant 0 : i32
    return %arg0, %c0_i32, %c0_i32_0 : i32, i32, i32
  }
  func.func @transform_1(%arg0: i32) -> (i32, i32, i32) {
    %c0_i32 = arith.constant 0 : i32
    %c0_i32_0 = arith.constant 0 : i32
    %c0_i32_1 = arith.constant 0 : i32
    %c0_i32_2 = arith.constant 0 : i32
    return %c0_i32, %c0_i32_0, %c0_i32_1 : i32, i32, i32
  }
  func.func @transform_2(%arg0: i32) -> (i32, i32) {
    %c0_i32 = arith.constant 0 : i32
    %c0_i32_0 = arith.constant 0 : i32
    %c0_i32_1 = arith.constant 0 : i32
    return %c0_i32, %c0_i32_0 : i32, i32
  }
  func.func @transform_3(%arg0: i32) -> (i32, i32, i32) {
    %c0_i32 = arith.constant 0 : i32
    %c0_i32_0 = arith.constant 0 : i32
    %c0_i32_1 = arith.constant 0 : i32
    return %arg0, %c0_i32, %c0_i32_0 : i32, i32, i32
  }
}

module attributes {stable_mosaic.version = 11 : i64} {
  func.func @_conv_s2d_kernel(%arg0: i32, %arg1: memref<1x88x512xf32, #tpu.memory_space<vmem>>, %arg2: memref<4x512x128xbf16, #tpu.memory_space<vmem>>, %arg3: memref<1x128xf32, #tpu.memory_space<vmem>>, %arg4: memref<1x72x128xf32, #tpu.memory_space<vmem>>) attributes {dimension_semantics = [#tpu.dimension_semantics<parallel>], iteration_bounds = array<i64: 2>, scalar_prefetch = 0 : i64, scratch_operands = 0 : i64, tpu.core_type = #tpu.core_type<tc>, window_params = [{transform_indices = @transform_0, window_bounds = array<i64: 1, 88, 512>}, {pipeline_mode = #tpu.pipeline_mode<synchronous>, transform_indices = @transform_1, window_bounds = array<i64: 4, 512, 128>}, {pipeline_mode = #tpu.pipeline_mode<synchronous>, transform_indices = @transform_2, window_bounds = array<i64: 1, 128>}, {transform_indices = @transform_3, window_bounds = array<i64: 1, 72, 128>}]} {
    %c0 = arith.constant 0 : index
    %c0_0 = arith.constant 0 : index
    %c0_1 = arith.constant 0 : index
    %0 = vector.load %arg1[%c0, %c0_0, %c0_1] : memref<1x88x512xf32, #tpu.memory_space<vmem>>, vector<1x72x512xf32>
    %1 = vector.shape_cast %0 : vector<1x72x512xf32> to vector<72x512xf32>
    %2 = arith.truncf %1 : vector<72x512xf32> to vector<72x512xbf16>
    %c0_2 = arith.constant 0 : index
    %c0_3 = arith.constant 0 : index
    %c0_4 = arith.constant 0 : index
    %3 = vector.load %arg2[%c0_2, %c0_3, %c0_4] : memref<4x512x128xbf16, #tpu.memory_space<vmem>>, vector<1x512x128xbf16>
    %4 = vector.shape_cast %3 : vector<1x512x128xbf16> to vector<512x128xbf16>
    %cst = arith.constant dense<0.000000e+00> : vector<72x128xf32>
    %5 = tpu.matmul %2, %4, %cst {dimension_numbers = #tpu.dot_dimension_numbers<[1], [0], [0], [1], [0, 0, 1, 1], [], []>} : vector<72x512xbf16>, vector<512x128xbf16>, vector<72x128xf32> -> vector<72x128xf32>
    %c0_5 = arith.constant 0 : index
    %c1 = arith.constant 1 : index
    %c0_6 = arith.constant 0 : index
    %6 = vector.load %arg1[%c0_5, %c1, %c0_6] : memref<1x88x512xf32, #tpu.memory_space<vmem>>, vector<1x72x512xf32>
    %7 = vector.shape_cast %6 : vector<1x72x512xf32> to vector<72x512xf32>
    %8 = arith.truncf %7 : vector<72x512xf32> to vector<72x512xbf16>
    %c1_7 = arith.constant 1 : index
    %c0_8 = arith.constant 0 : index
    %c0_9 = arith.constant 0 : index
    %9 = vector.load %arg2[%c1_7, %c0_8, %c0_9] : memref<4x512x128xbf16, #tpu.memory_space<vmem>>, vector<1x512x128xbf16>
    %10 = vector.shape_cast %9 : vector<1x512x128xbf16> to vector<512x128xbf16>
    %cst_10 = arith.constant dense<0.000000e+00> : vector<72x128xf32>
    %11 = tpu.matmul %8, %10, %cst_10 {dimension_numbers = #tpu.dot_dimension_numbers<[1], [0], [0], [1], [0, 0, 1, 1], [], []>} : vector<72x512xbf16>, vector<512x128xbf16>, vector<72x128xf32> -> vector<72x128xf32>
    %12 = arith.addf %5, %11 : vector<72x128xf32>
    %c0_11 = arith.constant 0 : index
    %c9 = arith.constant 9 : index
    %c0_12 = arith.constant 0 : index
    %13 = vector.load %arg1[%c0_11, %c9, %c0_12] : memref<1x88x512xf32, #tpu.memory_space<vmem>>, vector<1x72x512xf32>
    %14 = vector.shape_cast %13 : vector<1x72x512xf32> to vector<72x512xf32>
    %15 = arith.truncf %14 : vector<72x512xf32> to vector<72x512xbf16>
    %c2 = arith.constant 2 : index
    %c0_13 = arith.constant 0 : index
    %c0_14 = arith.constant 0 : index
    %16 = vector.load %arg2[%c2, %c0_13, %c0_14] : memref<4x512x128xbf16, #tpu.memory_space<vmem>>, vector<1x512x128xbf16>
    %17 = vector.shape_cast %16 : vector<1x512x128xbf16> to vector<512x128xbf16>
    %cst_15 = arith.constant dense<0.000000e+00> : vector<72x128xf32>
    %18 = tpu.matmul %15, %17, %cst_15 {dimension_numbers = #tpu.dot_dimension_numbers<[1], [0], [0], [1], [0, 0, 1, 1], [], []>} : vector<72x512xbf16>, vector<512x128xbf16>, vector<72x128xf32> -> vector<72x128xf32>
    %19 = arith.addf %12, %18 : vector<72x128xf32>
    %c0_16 = arith.constant 0 : index
    %c10 = arith.constant 10 : index
    %c0_17 = arith.constant 0 : index
    %20 = vector.load %arg1[%c0_16, %c10, %c0_17] : memref<1x88x512xf32, #tpu.memory_space<vmem>>, vector<1x72x512xf32>
    %21 = vector.shape_cast %20 : vector<1x72x512xf32> to vector<72x512xf32>
    %22 = arith.truncf %21 : vector<72x512xf32> to vector<72x512xbf16>
    %c3 = arith.constant 3 : index
    %c0_18 = arith.constant 0 : index
    %c0_19 = arith.constant 0 : index
    %23 = vector.load %arg2[%c3, %c0_18, %c0_19] : memref<4x512x128xbf16, #tpu.memory_space<vmem>>, vector<1x512x128xbf16>
    %24 = vector.shape_cast %23 : vector<1x512x128xbf16> to vector<512x128xbf16>
    %cst_20 = arith.constant dense<0.000000e+00> : vector<72x128xf32>
    %25 = tpu.matmul %22, %24, %cst_20 {dimension_numbers = #tpu.dot_dimension_numbers<[1], [0], [0], [1], [0, 0, 1, 1], [], []>} : vector<72x512xbf16>, vector<512x128xbf16>, vector<72x128xf32> -> vector<72x128xf32>
    %26 = arith.addf %19, %25 : vector<72x128xf32>
    %c0_21 = arith.constant 0 : index
    %c0_22 = arith.constant 0 : index
    %27 = vector.load %arg3[%c0_21, %c0_22] : memref<1x128xf32, #tpu.memory_space<vmem>>, vector<1x128xf32>
    %28 = vector.broadcast %27 : vector<1x128xf32> to vector<72x128xf32>
    %29 = arith.addf %26, %28 : vector<72x128xf32>
    %cst_23 = arith.constant 0.000000e+00 : f32
    %30 = vector.broadcast %cst_23 : f32 to vector<72x128xf32>
    %31 = arith.cmpf oge, %29, %30 : vector<72x128xf32>
    %cst_24 = arith.constant 0.00999999977 : f32
    %32 = vector.broadcast %cst_24 : f32 to vector<72x128xf32>
    %33 = arith.mulf %32, %29 : vector<72x128xf32>
    %34 = arith.select %31, %29, %33 : vector<72x128xi1>, vector<72x128xf32>
    %c0_25 = arith.constant 0 : index
    %c0_26 = arith.constant 0 : index
    %c0_27 = arith.constant 0 : index
    %35 = vector.load %arg4[%c0_25, %c0_26, %c0_27] : memref<1x72x128xf32, #tpu.memory_space<vmem>>, vector<1x72x128xf32>
    %36 = vector.shape_cast %35 : vector<1x72x128xf32> to vector<72x128xf32>
    %37 = vector.shape_cast %34 : vector<72x128xf32> to vector<1x72x128xf32>
    tpu.vector_store %arg4[%c0_25, %c0_26, %c0_27], %37 {strides = array<i32>} : memref<1x72x128xf32, #tpu.memory_space<vmem>>, vector<1x72x128xf32>,
    return
  }
  func.func @transform_0(%arg0: i32) -> (i32, i32, i32) {
    %c0_i32 = arith.constant 0 : i32
    %c0_i32_0 = arith.constant 0 : i32
    %c0_i32_1 = arith.constant 0 : i32
    return %arg0, %c0_i32, %c0_i32_0 : i32, i32, i32
  }
  func.func @transform_1(%arg0: i32) -> (i32, i32, i32) {
    %c0_i32 = arith.constant 0 : i32
    %c0_i32_0 = arith.constant 0 : i32
    %c0_i32_1 = arith.constant 0 : i32
    %c0_i32_2 = arith.constant 0 : i32
    return %c0_i32, %c0_i32_0, %c0_i32_1 : i32, i32, i32
  }
  func.func @transform_2(%arg0: i32) -> (i32, i32) {
    %c0_i32 = arith.constant 0 : i32
    %c0_i32_0 = arith.constant 0 : i32
    %c0_i32_1 = arith.constant 0 : i32
    return %c0_i32, %c0_i32_0 : i32, i32
  }
  func.func @transform_3(%arg0: i32) -> (i32, i32, i32) {
    %c0_i32 = arith.constant 0 : i32
    %c0_i32_0 = arith.constant 0 : i32
    %c0_i32_1 = arith.constant 0 : i32
    return %arg0, %c0_i32, %c0_i32_0 : i32, i32, i32
  }
}

module attributes {stable_mosaic.version = 11 : i64} {
  func.func @_conv_s2d_kernel(%arg0: i32, %arg1: memref<1x32x512xf32, #tpu.memory_space<vmem>>, %arg2: memref<4x512x256xbf16, #tpu.memory_space<vmem>>, %arg3: memref<1x256xf32, #tpu.memory_space<vmem>>, %arg4: memref<1x20x256xf32, #tpu.memory_space<vmem>>) attributes {dimension_semantics = [#tpu.dimension_semantics<parallel>], iteration_bounds = array<i64: 2>, scalar_prefetch = 0 : i64, scratch_operands = 0 : i64, tpu.core_type = #tpu.core_type<tc>, window_params = [{transform_indices = @transform_0, window_bounds = array<i64: 1, 32, 512>}, {pipeline_mode = #tpu.pipeline_mode<synchronous>, transform_indices = @transform_1, window_bounds = array<i64: 4, 512, 256>}, {pipeline_mode = #tpu.pipeline_mode<synchronous>, transform_indices = @transform_2, window_bounds = array<i64: 1, 256>}, {transform_indices = @transform_3, window_bounds = array<i64: 1, 20, 256>}]} {
    %c0 = arith.constant 0 : index
    %c0_0 = arith.constant 0 : index
    %c0_1 = arith.constant 0 : index
    %0 = vector.load %arg1[%c0, %c0_0, %c0_1] : memref<1x32x512xf32, #tpu.memory_space<vmem>>, vector<1x20x512xf32>
    %1 = vector.shape_cast %0 : vector<1x20x512xf32> to vector<20x512xf32>
    %2 = arith.truncf %1 : vector<20x512xf32> to vector<20x512xbf16>
    %c0_2 = arith.constant 0 : index
    %c0_3 = arith.constant 0 : index
    %c0_4 = arith.constant 0 : index
    %3 = vector.load %arg2[%c0_2, %c0_3, %c0_4] : memref<4x512x256xbf16, #tpu.memory_space<vmem>>, vector<1x512x256xbf16>
    %4 = vector.shape_cast %3 : vector<1x512x256xbf16> to vector<512x256xbf16>
    %cst = arith.constant dense<0.000000e+00> : vector<20x256xf32>
    %5 = tpu.matmul %2, %4, %cst {dimension_numbers = #tpu.dot_dimension_numbers<[1], [0], [0], [1], [0, 0, 1, 1], [], []>} : vector<20x512xbf16>, vector<512x256xbf16>, vector<20x256xf32> -> vector<20x256xf32>
    %c0_5 = arith.constant 0 : index
    %c1 = arith.constant 1 : index
    %c0_6 = arith.constant 0 : index
    %6 = vector.load %arg1[%c0_5, %c1, %c0_6] : memref<1x32x512xf32, #tpu.memory_space<vmem>>, vector<1x20x512xf32>
    %7 = vector.shape_cast %6 : vector<1x20x512xf32> to vector<20x512xf32>
    %8 = arith.truncf %7 : vector<20x512xf32> to vector<20x512xbf16>
    %c1_7 = arith.constant 1 : index
    %c0_8 = arith.constant 0 : index
    %c0_9 = arith.constant 0 : index
    %9 = vector.load %arg2[%c1_7, %c0_8, %c0_9] : memref<4x512x256xbf16, #tpu.memory_space<vmem>>, vector<1x512x256xbf16>
    %10 = vector.shape_cast %9 : vector<1x512x256xbf16> to vector<512x256xbf16>
    %cst_10 = arith.constant dense<0.000000e+00> : vector<20x256xf32>
    %11 = tpu.matmul %8, %10, %cst_10 {dimension_numbers = #tpu.dot_dimension_numbers<[1], [0], [0], [1], [0, 0, 1, 1], [], []>} : vector<20x512xbf16>, vector<512x256xbf16>, vector<20x256xf32> -> vector<20x256xf32>
    %12 = arith.addf %5, %11 : vector<20x256xf32>
    %c0_11 = arith.constant 0 : index
    %c5 = arith.constant 5 : index
    %c0_12 = arith.constant 0 : index
    %13 = vector.load %arg1[%c0_11, %c5, %c0_12] : memref<1x32x512xf32, #tpu.memory_space<vmem>>, vector<1x20x512xf32>
    %14 = vector.shape_cast %13 : vector<1x20x512xf32> to vector<20x512xf32>
    %15 = arith.truncf %14 : vector<20x512xf32> to vector<20x512xbf16>
    %c2 = arith.constant 2 : index
    %c0_13 = arith.constant 0 : index
    %c0_14 = arith.constant 0 : index
    %16 = vector.load %arg2[%c2, %c0_13, %c0_14] : memref<4x512x256xbf16, #tpu.memory_space<vmem>>, vector<1x512x256xbf16>
    %17 = vector.shape_cast %16 : vector<1x512x256xbf16> to vector<512x256xbf16>
    %cst_15 = arith.constant dense<0.000000e+00> : vector<20x256xf32>
    %18 = tpu.matmul %15, %17, %cst_15 {dimension_numbers = #tpu.dot_dimension_numbers<[1], [0], [0], [1], [0, 0, 1, 1], [], []>} : vector<20x512xbf16>, vector<512x256xbf16>, vector<20x256xf32> -> vector<20x256xf32>
    %19 = arith.addf %12, %18 : vector<20x256xf32>
    %c0_16 = arith.constant 0 : index
    %c6 = arith.constant 6 : index
    %c0_17 = arith.constant 0 : index
    %20 = vector.load %arg1[%c0_16, %c6, %c0_17] : memref<1x32x512xf32, #tpu.memory_space<vmem>>, vector<1x20x512xf32>
    %21 = vector.shape_cast %20 : vector<1x20x512xf32> to vector<20x512xf32>
    %22 = arith.truncf %21 : vector<20x512xf32> to vector<20x512xbf16>
    %c3 = arith.constant 3 : index
    %c0_18 = arith.constant 0 : index
    %c0_19 = arith.constant 0 : index
    %23 = vector.load %arg2[%c3, %c0_18, %c0_19] : memref<4x512x256xbf16, #tpu.memory_space<vmem>>, vector<1x512x256xbf16>
    %24 = vector.shape_cast %23 : vector<1x512x256xbf16> to vector<512x256xbf16>
    %cst_20 = arith.constant dense<0.000000e+00> : vector<20x256xf32>
    %25 = tpu.matmul %22, %24, %cst_20 {dimension_numbers = #tpu.dot_dimension_numbers<[1], [0], [0], [1], [0, 0, 1, 1], [], []>} : vector<20x512xbf16>, vector<512x256xbf16>, vector<20x256xf32> -> vector<20x256xf32>
    %26 = arith.addf %19, %25 : vector<20x256xf32>
    %c0_21 = arith.constant 0 : index
    %c0_22 = arith.constant 0 : index
    %27 = vector.load %arg3[%c0_21, %c0_22] : memref<1x256xf32, #tpu.memory_space<vmem>>, vector<1x256xf32>
    %28 = vector.broadcast %27 : vector<1x256xf32> to vector<20x256xf32>
    %29 = arith.addf %26, %28 : vector<20x256xf32>
    %cst_23 = arith.constant 0.000000e+00 : f32
    %30 = vector.broadcast %cst_23 : f32 to vector<20x256xf32>
    %31 = arith.cmpf oge, %29, %30 : vector<20x256xf32>
    %cst_24 = arith.constant 0.00999999977 : f32
    %32 = vector.broadcast %cst_24 : f32 to vector<20x256xf32>
    %33 = arith.mulf %32, %29 : vector<20x256xf32>
    %34 = arith.select %31, %29, %33 : vector<20x256xi1>, vector<20x256xf32>
    %c0_25 = arith.constant 0 : index
    %c0_26 = arith.constant 0 : index
    %c0_27 = arith.constant 0 : index
    %35 = vector.load %arg4[%c0_25, %c0_26, %c0_27] : memref<1x20x256xf32, #tpu.memory_space<vmem>>, vector<1x20x256xf32>
    %36 = vector.shape_cast %35 : vector<1x20x256xf32> to vector<20x256xf32>
    %37 = vector.shape_cast %34 : vector<20x256xf32> to vector<1x20x256xf32>
    tpu.vector_store %arg4[%c0_25, %c0_26, %c0_27], %37 {strides = array<i32>} : memref<1x20x256xf32, #tpu.memory_space<vmem>>, vector<1x20x256xf32>,
    return
  }
  func.func @transform_0(%arg0: i32) -> (i32, i32, i32) {
    %c0_i32 = arith.constant 0 : i32
    %c0_i32_0 = arith.constant 0 : i32
    %c0_i32_1 = arith.constant 0 : i32
    return %arg0, %c0_i32, %c0_i32_0 : i32, i32, i32
  }
  func.func @transform_1(%arg0: i32) -> (i32, i32, i32) {
    %c0_i32 = arith.constant 0 : i32
    %c0_i32_0 = arith.constant 0 : i32
    %c0_i32_1 = arith.constant 0 : i32
    %c0_i32_2 = arith.constant 0 : i32
    return %c0_i32, %c0_i32_0, %c0_i32_1 : i32, i32, i32
  }
  func.func @transform_2(%arg0: i32) -> (i32, i32) {
    %c0_i32 = arith.constant 0 : i32
    %c0_i32_0 = arith.constant 0 : i32
    %c0_i32_1 = arith.constant 0 : i32
    return %c0_i32, %c0_i32_0 : i32, i32
  }
  func.func @transform_3(%arg0: i32) -> (i32, i32, i32) {
    %c0_i32 = arith.constant 0 : i32
    %c0_i32_0 = arith.constant 0 : i32
    %c0_i32_1 = arith.constant 0 : i32
    return %arg0, %c0_i32, %c0_i32_0 : i32, i32, i32
  }
}

module attributes {stable_mosaic.version = 11 : i64} {
  func.func @_fc_heads_kernel(%arg0: i32, %arg1: memref<8x5120xf32, #tpu.memory_space<vmem>>, %arg2: memref<5120x512xbf16, #tpu.memory_space<vmem>>, %arg3: memref<1x512xf32, #tpu.memory_space<vmem>>, %arg4: memref<512x256xf32, #tpu.memory_space<vmem>>, %arg5: memref<1x256xf32, #tpu.memory_space<vmem>>, %arg6: memref<8x128xf32, #tpu.memory_space<vmem>>, %arg7: memref<8x128xf32, #tpu.memory_space<vmem>>, %arg8: memref<8x128xf32, #tpu.memory_space<vmem>>, %arg9: memref<8x128xf32, #tpu.memory_space<vmem>>) attributes {dimension_semantics = [#tpu.dimension_semantics<parallel>], iteration_bounds = array<i64: 1>, scalar_prefetch = 0 : i64, scratch_operands = 0 : i64, tpu.core_type = #tpu.core_type<tc>, window_params = [{transform_indices = @transform_0, window_bounds = array<i64: 8, 5120>}, {pipeline_mode = #tpu.pipeline_mode<synchronous>, transform_indices = @transform_1, window_bounds = array<i64: 5120, 512>}, {pipeline_mode = #tpu.pipeline_mode<synchronous>, transform_indices = @transform_2, window_bounds = array<i64: 1, 512>}, {pipeline_mode = #tpu.pipeline_mode<synchronous>, transform_indices = @transform_3, window_bounds = array<i64: 512, 256>}, {pipeline_mode = #tpu.pipeline_mode<synchronous>, transform_indices = @transform_4, window_bounds = array<i64: 1, 256>}, {transform_indices = @transform_5, window_bounds = array<i64: 8, 128>}, {transform_indices = @transform_6, window_bounds = array<i64: 8, 128>}, {transform_indices = @transform_7, window_bounds = array<i64: 8, 128>}, {transform_indices = @transform_8, window_bounds = array<i64: 8, 128>}]} {
    %c0 = arith.constant 0 : index
    %c0_0 = arith.constant 0 : index
    %0 = vector.load %arg1[%c0, %c0_0] : memref<8x5120xf32, #tpu.memory_space<vmem>>, vector<8x5120xf32>
    %1 = arith.truncf %0 : vector<8x5120xf32> to vector<8x5120xbf16>
    %c0_1 = arith.constant 0 : index
    %c0_2 = arith.constant 0 : index
    %2 = vector.load %arg2[%c0_1, %c0_2] : memref<5120x512xbf16, #tpu.memory_space<vmem>>, vector<5120x512xbf16>
    %cst = arith.constant dense<0.000000e+00> : vector<8x512xf32>
    %3 = tpu.matmul %1, %2, %cst {dimension_numbers = #tpu.dot_dimension_numbers<[1], [0], [0], [1], [0, 0, 1, 1], [], []>} : vector<8x5120xbf16>, vector<5120x512xbf16>, vector<8x512xf32> -> vector<8x512xf32>
    %c0_3 = arith.constant 0 : index
    %c0_4 = arith.constant 0 : index
    %4 = vector.load %arg3[%c0_3, %c0_4] : memref<1x512xf32, #tpu.memory_space<vmem>>, vector<1x512xf32>
    %5 = vector.broadcast %4 : vector<1x512xf32> to vector<8x512xf32>
    %6 = arith.addf %3, %5 : vector<8x512xf32>
    %c0_5 = arith.constant 0 : index
    %c0_6 = arith.constant 0 : index
    %7 = vector.load %arg4[%c0_5, %c0_6] : memref<512x256xf32, #tpu.memory_space<vmem>>, vector<512x256xf32>
    %cst_7 = arith.constant dense<0.000000e+00> : vector<8x256xf32>
    %8 = tpu.matmul %6, %7, %cst_7 {dimension_numbers = #tpu.dot_dimension_numbers<[1], [0], [0], [1], [0, 0, 1, 1], [], []>} : vector<8x512xf32>, vector<512x256xf32>, vector<8x256xf32> -> vector<8x256xf32>
    %c0_8 = arith.constant 0 : index
    %c0_9 = arith.constant 0 : index
    %9 = vector.load %arg5[%c0_8, %c0_9] : memref<1x256xf32, #tpu.memory_space<vmem>>, vector<1x256xf32>
    %10 = vector.broadcast %9 : vector<1x256xf32> to vector<8x256xf32>
    %11 = arith.addf %8, %10 : vector<8x256xf32>
    %12 = vector.extract_strided_slice %11 {offsets = [0, 0], sizes = [8, 128], strides = [1, 1]} : vector<8x256xf32> to vector<8x128xf32>
    %13 = vector.extract_strided_slice %11 {offsets = [0, 128], sizes = [8, 128], strides = [1, 1]} : vector<8x256xf32> to vector<8x128xf32>
    %cst_10 = arith.constant 0.000000e+00 : f32
    %14 = vector.broadcast %cst_10 : f32 to vector<8x128xf32>
    %15 = arith.subf %14, %13 : vector<8x128xf32>
    %16 = math.exp %15 : vector<8x128xf32>
    %cst_11 = arith.constant 1.000000e+00 : f32
    %17 = vector.broadcast %cst_11 : f32 to vector<8x128xf32>
    %18 = arith.addf %17, %16 : vector<8x128xf32>
    %cst_12 = arith.constant 1.000000e+00 : f32
    %19 = vector.broadcast %cst_12 : f32 to vector<8x128xf32>
    %20 = arith.divf %19, %18 : vector<8x128xf32>
    %c0_13 = arith.constant 0 : index
    %c0_14 = arith.constant 0 : index
    %21 = vector.load %arg6[%c0_13, %c0_14] : memref<8x128xf32, #tpu.memory_space<vmem>>, vector<8x128xf32>
    %cst_15 = arith.constant 5.000000e-01 : f32
    %22 = vector.broadcast %cst_15 : f32 to vector<8x128xf32>
    %23 = arith.mulf %22, %20 : vector<8x128xf32>
    %24 = math.exp %23 : vector<8x128xf32>
    %25 = arith.mulf %21, %24 : vector<8x128xf32>
    %26 = arith.addf %12, %25 : vector<8x128xf32>
    %c0_16 = arith.constant 0 : index
    %c0_17 = arith.constant 0 : index
    %27 = vector.load %arg7[%c0_16, %c0_17] : memref<8x128xf32, #tpu.memory_space<vmem>>, vector<8x128xf32>
    tpu.vector_store %arg7[%c0_16, %c0_17], %26 {strides = array<i32>} : memref<8x128xf32, #tpu.memory_space<vmem>>, vector<8x128xf32>,
    %c0_18 = arith.constant 0 : index
    %c0_19 = arith.constant 0 : index
    %28 = vector.load %arg8[%c0_18, %c0_19] : memref<8x128xf32, #tpu.memory_space<vmem>>, vector<8x128xf32>
    tpu.vector_store %arg8[%c0_18, %c0_19], %12 {strides = array<i32>} : memref<8x128xf32, #tpu.memory_space<vmem>>, vector<8x128xf32>,
    %c0_20 = arith.constant 0 : index
    %c0_21 = arith.constant 0 : index
    %29 = vector.load %arg9[%c0_20, %c0_21] : memref<8x128xf32, #tpu.memory_space<vmem>>, vector<8x128xf32>
    tpu.vector_store %arg9[%c0_20, %c0_21], %20 {strides = array<i32>} : memref<8x128xf32, #tpu.memory_space<vmem>>, vector<8x128xf32>,
    return
  }
  func.func @transform_0(%arg0: i32) -> (i32, i32) {
    %c0_i32 = arith.constant 0 : i32
    %c0_i32_0 = arith.constant 0 : i32
    return %arg0, %c0_i32 : i32, i32
  }
  func.func @transform_1(%arg0: i32) -> (i32, i32) {
    %c0_i32 = arith.constant 0 : i32
    %c0_i32_0 = arith.constant 0 : i32
    %c0_i32_1 = arith.constant 0 : i32
    return %c0_i32, %c0_i32_0 : i32, i32
  }
  func.func @transform_2(%arg0: i32) -> (i32, i32) {
    %c0_i32 = arith.constant 0 : i32
    %c0_i32_0 = arith.constant 0 : i32
    %c0_i32_1 = arith.constant 0 : i32
    return %c0_i32, %c0_i32_0 : i32, i32
  }
  func.func @transform_3(%arg0: i32) -> (i32, i32) {
    %c0_i32 = arith.constant 0 : i32
    %c0_i32_0 = arith.constant 0 : i32
    %c0_i32_1 = arith.constant 0 : i32
    return %c0_i32, %c0_i32_0 : i32, i32
  }
  func.func @transform_4(%arg0: i32) -> (i32, i32) {
    %c0_i32 = arith.constant 0 : i32
    %c0_i32_0 = arith.constant 0 : i32
    %c0_i32_1 = arith.constant 0 : i32
    return %c0_i32, %c0_i32_0 : i32, i32
  }
  func.func @transform_5(%arg0: i32) -> (i32, i32) {
    %c0_i32 = arith.constant 0 : i32
    %c0_i32_0 = arith.constant 0 : i32
    return %arg0, %c0_i32 : i32, i32
  }
  func.func @transform_6(%arg0: i32) -> (i32, i32) {
    %c0_i32 = arith.constant 0 : i32
    %c0_i32_0 = arith.constant 0 : i32
    return %arg0, %c0_i32 : i32, i32
  }
  func.func @transform_7(%arg0: i32) -> (i32, i32) {
    %c0_i32 = arith.constant 0 : i32
    %c0_i32_0 = arith.constant 0 : i32
    return %arg0, %c0_i32 : i32, i32
  }
  func.func @transform_8(%arg0: i32) -> (i32, i32) {
    %c0_i32 = arith.constant 0 : i32
    %c0_i32_0 = arith.constant 0 : i32
    return %arg0, %c0_i32 : i32, i32
  }
}

</mosaic_0001>

<bundles_post_ra>
// kernel: encoder_forward.4
= control target key start
LH: loop header
LB: loop body
LE: loop exit
PB: predicated region body
PF: predicated region fallthrough
CT: control target
= control target key end

     0   :  { %s2078_s12 = smov 0   ;;  %s2666_s0 = inlined_call_operand.vmem [shape: f32[2,296,16], index: 0, kind: input, shape index: {}]   ;;  %s2667_s1 = inlined_call_operand.vmem [shape: bf16[4,16,128], index: 1, kind: input, shape index: {}]   ;;  %s2668_s2 = inlined_call_operand.vmem [shape: f32[1,128], index: 2, kind: input, shape index: {}]   ;;  %s2669_s3 = inlined_call_operand.vmem [shape: f32[2,272,128], index: 3, kind: output, shape index: {}]  }
   0x1 LB: > { %s1592_s13 = sadd.s32 4294967295, %s2054_s12   ;;  %p1596_p0 = scmp.ge.s32.totalorder %s2054_s12, 1  ;;  %s2054_s12 = sphi %s2078_s12, %s13_s12  }
   0x2   : > { %p137_p1 = scmp.lt.s32.totalorder %s2054_s12, 3 }
   0x4   : > { %p138_p2 = pnand %p1596_p0, %p137_p1 }
   0x5   : > { %v2044_v0 = vld [vmem:[%s2667_s1 + $0x8] sm:$0xff] (!%p138_p2)   ;;  %v2056_v1 = vmov (!%p138_p2), 0.0   ;;  %v2045_v2 = vld [vmem:[%s2667_s1] sm:$0xff] (!%p138_p2)   ;;  %vm2057_vm0 = vmmov (!%p138_p2), 0   ;;  %p161_p3 = scmp.lt.s32.totalorder (!%p138_p2), %s1592_s13, 1  ;;  %v2046_v3 = vld [vmem:[%s2667_s1 + $0x10] sm:$0xff] (!%p138_p2)  }
   0x6   : > { %141 = sbr.rel (%p138_p2) target bundleno = 508 (0x1fc), region = 32  ;;  %1752 = vmatprep.subr.bf16.mxu0 (!%p138_p2), %v2056_v1  ;;  %1822 = vmatprep.subr.bf16.mxu1 (!%p138_p2), %v2056_v1  ;;  %vm285_vm1 = vcmask (!%p138_p2), 130048   ;;  %v2047_v9 = vld [vmem:[%s2667_s1 + $0x18] sm:$0xff] (!%p138_p2)  }
   0x7   : > { %1753 = vmatpush3.bf16.msra.mxu0 (!%p138_p2), %v2044_v0  ;;  %1754 = vmatprep.mubr.msk.bf16.mxu0 (!%p138_p2), %vm2057_vm0, %v2056_v1 }
   0x8   : > { %1823 = vmatpush3.bf16.msra.mxu1 (!%p138_p2), %v2045_v2  ;;  %1824 = vmatprep.mubr.msk.bf16.mxu1 (!%p138_p2), %vm2057_vm0, %v2056_v1 }
   0x9   : > { %1892 = vmatprep.subr.bf16.mxu0 (!%p138_p2), %v2056_v1  ;;  %1962 = vmatprep.subr.bf16.mxu1 (!%p138_p2), %v2056_v1 }
   0xd   : > { %s2671_s13 = smov (!%p161_p3, %s1592_s13), 1 }
   0xe   : > { %s2032_s18 = smul.u32 296, %s2671_s13 }
   0xf   : > { %s2033_s28 = smul.u32 272, %s2671_s13 }
  0x10   : > { %s2106_s21 = scalar_lea.vmem %s2666_s0, %s2032_s18 }
  0x11   : > { %v225_v4 = vld [vmem:[%s2106_s21 + $0x1] sm:$0xff]  ;;  %v226_v5 = vld [vmem:[%s2106_s21 + $0x9] sm:$0xff]  ;;  %v227_v11 = vld [vmem:[%s2106_s21 + $0x11] sm:$0xff]  ;;  %s2562_s4 = scalar_lea.vmem %s2669_s3, %s2033_s28 }
  0x12   : > { %v172_v6 = vld [vmem:[%s2106_s21] sm:$0xff]  ;;  %v259_v7 = vpack.c.bf16 %v226_v5, %v225_v4  ;;  %v173_v8 = vld [vmem:[%s2106_s21 + $0x8] sm:$0xff]  ;;  %v174_v13 = vld [vmem:[%s2106_s21 + $0x10] sm:$0xff] }
  0x13   : > { %v206_v10 = vpack.c.bf16 %v173_v8, %v172_v6  ;;  %v228_v12 = vld [vmem:[%s2106_s21 + $0x19] sm:$0xff]  ;;  %v229_v17 = vld [vmem:[%s2106_s21 + $0x21] sm:$0xff]  ;;  %v230_v18 = vld [vmem:[%s2106_s21 + $0x29] sm:$0xff] }
  0x14   : > { %1755 = vmatmul.mubr.msk.bf16.vlgmr.msra.gmra.mrb[0].mxu0 %vm285_vm1, %v259_v7  ;;  %v175_v14 = vld [vmem:[%s2106_s21 + $0x18] sm:$0xff]  ;;  %v2128_v15 = vpack.c.bf16 %v228_v12, %v227_v11  ;;  %v176_v19 = vld [vmem:[%s2106_s21 + $0x20] sm:$0xff]  ;;  %v177_v20 = vld [vmem:[%s2106_s21 + $0x28] sm:$0xff]  ;;  %v2141_v21 = vpack.c.bf16 %v230_v18, %v229_v17 }
  0x15   : > { %1825 = vmatmul.mubr.msk.bf16.vlgmr.msra.gmra.mrb[0].mxu1 %vm285_vm1, %v206_v10  ;;  %1893 = vmatpush3.bf16.msra.mxu0 %v2046_v3  ;;  %v207_v16 = vpack.c.bf16 %v175_v14, %v174_v13  ;;  %v208_v22 = vpack.c.bf16 %v177_v20, %v176_v19  ;;  %v231_v23 = vld [vmem:[%s2106_s21 + $0x31] sm:$0xff]  ;;  %v232_v24 = vld [vmem:[%s2106_s21 + $0x39] sm:$0xff]  ;;  %v233_v29 = vld [vmem:[%s2106_s21 + $0x41] sm:$0xff] }
  0x16   : > { %1963 = vmatpush3.bf16.msra.mxu1 %v2047_v9  ;;  %1758 = vmatprep.mubr.msk.bf16.mxu0 %vm2057_vm0, %v2056_v1  ;;  %v178_v25 = vld [vmem:[%s2106_s21 + $0x30] sm:$0xff]  ;;  %v179_v26 = vld [vmem:[%s2106_s21 + $0x38] sm:$0xff]  ;;  %v2154_v27 = vpack.c.bf16 %v232_v24, %v231_v23  ;;  %v180_v31 = vld [vmem:[%s2106_s21 + $0x40] sm:$0xff] }
  0x17   : > { %1828 = vmatprep.mubr.msk.bf16.mxu1 %vm2057_vm0, %v2056_v1  ;;  %v209_v28 = vpack.c.bf16 %v179_v26, %v178_v25  ;;  %v234_v30 = vld [vmem:[%s2106_s21 + $0x49] sm:$0xff]  ;;  %v235_v35 = vld [vmem:[%s2106_s21 + $0x51] sm:$0xff]  ;;  %v236_v36 = vld [vmem:[%s2106_s21 + $0x59] sm:$0xff] }
  0x18   : > { %v181_v32 = vld [vmem:[%s2106_s21 + $0x48] sm:$0xff]  ;;  %v2167_v33 = vpack.c.bf16 %v234_v30, %v233_v29  ;;  %v182_v37 = vld [vmem:[%s2106_s21 + $0x50] sm:$0xff]  ;;  %v183_v38 = vld [vmem:[%s2106_s21 + $0x58] sm:$0xff]  ;;  %v2180_v39 = vpack.c.bf16 %v236_v36, %v235_v35 }
  0x19   : > { %v210_v34 = vpack.c.bf16 %v181_v32, %v180_v31  ;;  %v211_v40 = vpack.c.bf16 %v183_v38, %v182_v37  ;;  %v237_v41 = vld [vmem:[%s2106_s21 + $0x61] sm:$0xff]  ;;  %v238_v42 = vld [vmem:[%s2106_s21 + $0x69] sm:$0xff]  ;;  %v239_v47 = vld [vmem:[%s2106_s21 + $0x71] sm:$0xff] }
  0x1a   : > { %v184_v43 = vld [vmem:[%s2106_s21 + $0x60] sm:$0xff]  ;;  %v185_v44 = vld [vmem:[%s2106_s21 + $0x68] sm:$0xff]  ;;  %v2193_v45 = vpack.c.bf16 %v238_v42, %v237_v41  ;;  %v186_v49 = vld [vmem:[%s2106_s21 + $0x70] sm:$0xff] }
  0x1b   : > { %v212_v46 = vpack.c.bf16 %v185_v44, %v184_v43  ;;  %v240_v48 = vld [vmem:[%s2106_s21 + $0x79] sm:$0xff]  ;;  %v241_v53 = vld [vmem:[%s2106_s21 + $0x81] sm:$0xff]  ;;  %v242_v54 = vld [vmem:[%s2106_s21 + $0x89] sm:$0xff] }
  0x1c   : > { %1759 = vmatmul.mubr.msk.bf16.gmra.mrb[4].mxu0 %vm285_vm1, %v2128_v15  ;;  %v187_v50 = vld [vmem:[%s2106_s21 + $0x78] sm:$0xff]  ;;  %v2206_v51 = vpack.c.bf16 %v240_v48, %v239_v47  ;;  %v188_v55 = vld [vmem:[%s2106_s21 + $0x80] sm:$0xff]  ;;  %v189_v56 = vld [vmem:[%s2106_s21 + $0x88] sm:$0xff]  ;;  %v2219_v57 = vpack.c.bf16 %v242_v54, %v241_v53 }
  0x1d   : > { %1829 = vmatmul.mubr.msk.bf16.gmra.mrb[4].mxu1 %vm285_vm1, %v207_v16  ;;  %1762 = vmatprep.mubr.msk.bf16.mxu0 %vm2057_vm0, %v2056_v1  ;;  %v213_v52 = vpack.c.bf16 %v187_v50, %v186_v49  ;;  %v214_v58 = vpack.c.bf16 %v189_v56, %v188_v55  ;;  %v243_v59 = vld [vmem:[%s2106_s21 + $0x91] sm:$0xff]  ;;  %v244_v60 = vld [vmem:[%s2106_s21 + $0x99] sm:$0xff]  ;;  %v245_v2 = vld [vmem:[%s2106_s21 + $0xa1] sm:$0xff] }
  0x1e   : > { %1832 = vmatprep.mubr.msk.bf16.mxu1 %vm2057_vm0, %v2056_v1  ;;  %v190_v61 = vld [vmem:[%s2106_s21 + $0x90] sm:$0xff]  ;;  %v191_v62 = vld [vmem:[%s2106_s21 + $0x98] sm:$0xff]  ;;  %v2232_v63 = vpack.c.bf16 %v244_v60, %v243_v59  ;;  %v192_v4 = vld [vmem:[%s2106_s21 + $0xa0] sm:$0xff] }
  0x1f   : > { %v215_v0 = vpack.c.bf16 %v191_v62, %v190_v61  ;;  %v246_v3 = vld [vmem:[%s2106_s21 + $0xa9] sm:$0xff]  ;;  %v247_v8 = vld [vmem:[%s2106_s21 + $0xb1] sm:$0xff]  ;;  %v248_v9 = vld [vmem:[%s2106_s21 + $0xb9] sm:$0xff] }
  0x20   : > { %v193_v5 = vld [vmem:[%s2106_s21 + $0xa8] sm:$0xff]  ;;  %v2245_v6 = vpack.c.bf16 %v246_v3, %v245_v2  ;;  %v194_v10 = vld [vmem:[%s2106_s21 + $0xb0] sm:$0xff]  ;;  %v195_v11 = vld [vmem:[%s2106_s21 + $0xb8] sm:$0xff]  ;;  %v2258_v12 = vpack.c.bf16 %v248_v9, %v247_v8 }
  0x21   : > { %v216_v7 = vpack.c.bf16 %v193_v5, %v192_v4  ;;  %v217_v13 = vpack.c.bf16 %v195_v11, %v194_v10  ;;  %v249_v14 = vld [vmem:[%s2106_s21 + $0xc1] sm:$0xff]  ;;  %v250_v16 = vld [vmem:[%s2106_s21 + $0xc9] sm:$0xff]  ;;  %v252_v23 = vld [vmem:[%s2106_s21 + $0xd9] sm:$0xff] }
  0x22   : > { %v196_v17 = vld [vmem:[%s2106_s21 + $0xc0] sm:$0xff]  ;;  %v197_v18 = vld [vmem:[%s2106_s21 + $0xc8] sm:$0xff]  ;;  %v2271_v19 = vpack.c.bf16 %v250_v16, %v249_v14  ;;  %v198_v24 = vld [vmem:[%s2106_s21 + $0xd0] sm:$0xff] }
  0x23   : > { %v218_v20 = vpack.c.bf16 %v197_v18, %v196_v17  ;;  %v199_v25 = vld [vmem:[%s2106_s21 + $0xd8] sm:$0xff]  ;;  %v253_v29 = vld [vmem:[%s2106_s21 + $0xe1] sm:$0xff]  ;;  %v254_v30 = vld [vmem:[%s2106_s21 + $0xe9] sm:$0xff] }
  0x24   : > { %1763 = vmatmul.mubr.msk.bf16.gmra.mrb[8].mxu0 %vm285_vm1, %v2141_v21  ;;  %v200_v31 = vld [vmem:[%s2106_s21 + $0xe0] sm:$0xff]  ;;  %v201_v32 = vld [vmem:[%s2106_s21 + $0xe8] sm:$0xff]  ;;  %v255_v36 = vld [vmem:[%s2106_s21 + $0xf1] sm:$0xff] }
  0x25   : > { %1833 = vmatmul.mubr.msk.bf16.gmra.mrb[8].mxu1 %vm285_vm1, %v208_v22  ;;  %1766 = vmatprep.mubr.msk.bf16.mxu0 %vm2057_vm0, %v2056_v1  ;;  %v251_v22 = vld [vmem:[%s2106_s21 + $0xd1] sm:$0xff]  ;;  %v220_v35 = vpack.c.bf16 %v201_v32, %v200_v31  ;;  %v256_v37 = vld [vmem:[%s2106_s21 + $0xf9] sm:$0xff]  ;;  %v257_v43 = vld [vmem:[%s2106_s21 + $0x101] sm:$0xff] }
  0x26   : > { %1836 = vmatprep.mubr.msk.bf16.mxu1 %vm2057_vm0, %v2056_v1  ;;  %v2284_v26 = vpack.c.bf16 %v252_v23, %v251_v22  ;;  %v202_v38 = vld [vmem:[%s2106_s21 + $0xf0] sm:$0xff]  ;;  %v2310_v41 = vpack.c.bf16 %v256_v37, %v255_v36  ;;  %v205_v47 = vld [vmem:[%s2106_s21 + $0x108] sm:$0xff]  ;;  %v1055_v62 = vld [vmem:[%s2106_s21 + $0x5a] sm:$0xff] }
  0x27   : > { %v258_v44 = vld [vmem:[%s2106_s21 + $0x109] sm:$0xff]  ;;  %v1046_v50 = vld [vmem:[%s2106_s21 + $0x12] sm:$0xff]  ;;  %v1059_v4 = vld [vmem:[%s2106_s21 + $0x7a] sm:$0xff] }
  0x28   : > { %v2323_v48 = vpack.c.bf16 %v258_v44, %v257_v43  ;;  %v1048_v54 = vld [vmem:[%s2106_s21 + $0x22] sm:$0xff]  ;;  %v1049_v55 = vld [vmem:[%s2106_s21 + $0x2a] sm:$0xff]  ;;  %v1063_v9 = vld [vmem:[%s2106_s21 + $0x9a] sm:$0xff] }
  0x29   : > { %v1081_v56 = vpack.c.bf16 %v1049_v55, %v1048_v54  ;;  %v1053_v60 = vld [vmem:[%s2106_s21 + $0x4a] sm:$0xff]  ;;  %v1067_v14 = vld [vmem:[%s2106_s21 + $0xba] sm:$0xff] }
  0x2a   : > { %v1057_v2 = vld [vmem:[%s2106_s21 + $0x6a] sm:$0xff] }
  0x2b   : > { %v1065_v11 = vld [vmem:[%s2106_s21 + $0xaa] sm:$0xff] }
  0x2c   : > { %1767 = vmatmul.mubr.msk.bf16.gmra.mrb[12].mxu0 %vm285_vm1, %v2154_v27  ;;  %v1069_v31 = vld [vmem:[%s2106_s21 + $0xca] sm:$0xff] }
  0x2d   : > { %1837 = vmatmul.mubr.msk.bf16.gmra.mrb[12].mxu1 %vm285_vm1, %v209_v28  ;;  %1770 = vmatprep.mubr.msk.bf16.mxu0 %vm2057_vm0, %v2056_v1  ;;  %v219_v28 = vpack.c.bf16 %v199_v25, %v198_v24 }
  0x2e   : > { %1840 = vmatprep.mubr.msk.bf16.mxu1 %vm2057_vm0, %v2056_v1 }
  0x34   : > { %1771 = vmatmul.mubr.msk.bf16.gmra.mrb[16].mxu0 %vm285_vm1, %v2167_v33 }
  0x35   : > { %1841 = vmatmul.mubr.msk.bf16.gmra.mrb[16].mxu1 %vm285_vm1, %v210_v34  ;;  %1774 = vmatprep.mubr.msk.bf16.mxu0 %vm2057_vm0, %v2056_v1  ;;  %v2297_v34 = vpack.c.bf16 %v254_v30, %v253_v29  ;;  %v1068_v30 = vld [vmem:[%s2106_s21 + $0xc2] sm:$0xff] }
  0x36   : > { %1844 = vmatprep.mubr.msk.bf16.mxu1 %vm2057_vm0, %v2056_v1 }
  0x3c   : > { %1775 = vmatmul.mubr.msk.bf16.gmra.mrb[20].mxu0 %vm285_vm1, %v2180_v39 }
  0x3d   : > { %1845 = vmatmul.mubr.msk.bf16.gmra.mrb[20].mxu1 %vm285_vm1, %v211_v40  ;;  %1778 = vmatprep.mubr.msk.bf16.mxu0 %vm2057_vm0, %v2056_v1  ;;  %v203_v40 = vld [vmem:[%s2106_s21 + $0xf8] sm:$0xff] }
  0x3e   : > { %1848 = vmatprep.mubr.msk.bf16.mxu1 %vm2057_vm0, %v2056_v1  ;;  %v221_v42 = vpack.c.bf16 %v203_v40, %v202_v38 }
  0x44   : > { %1779 = vmatmul.mubr.msk.bf16.gmra.mrb[24].mxu0 %vm285_vm1, %v2193_v45 }
  0x45   : > { %1849 = vmatmul.mubr.msk.bf16.gmra.mrb[24].mxu1 %vm285_vm1, %v212_v46  ;;  %1782 = vmatprep.mubr.msk.bf16.mxu0 %vm2057_vm0, %v2056_v1  ;;  %v204_v46 = vld [vmem:[%s2106_s21 + $0x100] sm:$0xff] }
  0x46   : > { %1852 = vmatprep.mubr.msk.bf16.mxu1 %vm2057_vm0, %v2056_v1  ;;  %v222_v49 = vpack.c.bf16 %v205_v47, %v204_v46  ;;  %v1070_v47 = vld [vmem:[%s2106_s21 + $0xd2] sm:$0xff] }
  0x4c   : > { %1783 = vmatmul.mubr.msk.bf16.gmra.mrb[28].mxu0 %vm285_vm1, %v2206_v51 }
  0x4d   : > { %1853 = vmatmul.mubr.msk.bf16.gmra.mrb[28].mxu1 %vm285_vm1, %v213_v52  ;;  %1786 = vmatprep.mubr.msk.bf16.mxu0 %vm2057_vm0, %v2056_v1  ;;  %v1047_v52 = vld [vmem:[%s2106_s21 + $0x1a] sm:$0xff] }
  0x4e   : > { %1856 = vmatprep.mubr.msk.bf16.mxu1 %vm2057_vm0, %v2056_v1  ;;  %v1080_v53 = vpack.c.bf16 %v1047_v52, %v1046_v50 }
  0x54   : > { %1787 = vmatmul.mubr.msk.bf16.gmra.mrb[32].mxu0 %vm285_vm1, %v2219_v57 }
  0x55   : > { %1857 = vmatmul.mubr.msk.bf16.gmra.mrb[32].mxu1 %vm285_vm1, %v214_v58  ;;  %1790 = vmatprep.mubr.msk.bf16.mxu0 %vm2057_vm0, %v2056_v1  ;;  %v1051_v58 = vld [vmem:[%s2106_s21 + $0x3a] sm:$0xff] }
  0x56   : > { %1860 = vmatprep.mubr.msk.bf16.mxu1 %vm2057_vm0, %v2056_v1 }
  0x5c   : > { %1791 = vmatmul.mubr.msk.bf16.gmra.mrb[36].mxu0 %vm285_vm1, %v2232_v63 }
  0x5d   : > { %1861 = vmatmul.mubr.msk.bf16.gmra.mrb[36].mxu1 %vm285_vm1, %v215_v0  ;;  %1794 = vmatprep.mubr.msk.bf16.mxu0 %vm2057_vm0, %v2056_v1 }
  0x5e   : > { %1864 = vmatprep.mubr.msk.bf16.mxu1 %vm2057_vm0, %v2056_v1 }
  0x64   : > { %1795 = vmatmul.mubr.msk.bf16.gmra.mrb[40].mxu0 %vm285_vm1, %v2245_v6 }
  0x65   : > { %1865 = vmatmul.mubr.msk.bf16.gmra.mrb[40].mxu1 %vm285_vm1, %v216_v7  ;;  %1798 = vmatprep.mubr.msk.bf16.mxu0 %vm2057_vm0, %v2056_v1  ;;  %v1061_v7 = vld [vmem:[%s2106_s21 + $0x8a] sm:$0xff] }
  0x66   : > { %1868 = vmatprep.mubr.msk.bf16.mxu1 %vm2057_vm0, %v2056_v1 }
  0x6c   : > { %1799 = vmatmul.mubr.msk.bf16.gmra.mrb[44].mxu0 %vm285_vm1, %v2258_v12 }
  0x6d   : > { %1869 = vmatmul.mubr.msk.bf16.gmra.mrb[44].mxu1 %vm285_vm1, %v217_v13  ;;  %1802 = vmatprep.mubr.msk.bf16.mxu0 %vm2057_vm0, %v2056_v1 }
  0x6e   : > { %1872 = vmatprep.mubr.msk.bf16.mxu1 %vm2057_vm0, %v2056_v1 }
  0x74   : > { %1803 = vmatmul.mubr.msk.bf16.gmra.mrb[48].mxu0 %vm285_vm1, %v2271_v19 }
  0x75   : > { %1873 = vmatmul.mubr.msk.bf16.gmra.mrb[48].mxu1 %vm285_vm1, %v218_v20  ;;  %1806 = vmatprep.mubr.msk.bf16.mxu0 %vm2057_vm0, %v2056_v1 }
  0x76   : > { %1876 = vmatprep.mubr.msk.bf16.mxu1 %vm2057_vm0, %v2056_v1 }
  0x7c   : > { %1807 = vmatmul.mubr.msk.bf16.gmra.mrb[52].mxu0 %vm285_vm1, %v2284_v26 }
  0x7d   : > { %1877 = vmatmul.mubr.msk.bf16.gmra.mrb[52].mxu1 %vm285_vm1, %v219_v28  ;;  %1810 = vmatprep.mubr.msk.bf16.mxu0 %vm2057_vm0, %v2056_v1 }
  0x7e   : > { %1880 = vmatprep.mubr.msk.bf16.mxu1 %vm2057_vm0, %v2056_v1 }
  0x84   : > { %1811 = vmatmul.mubr.msk.bf16.gmra.mrb[56].mxu0 %vm285_vm1, %v2297_v34 }
  0x85   : > { %1881 = vmatmul.mubr.msk.bf16.gmra.mrb[56].mxu1 %vm285_vm1, %v220_v35  ;;  %1814 = vmatprep.mubr.msk.bf16.mxu0 %vm2057_vm0, %v2056_v1 }
  0x86   : > { %1884 = vmatprep.mubr.msk.bf16.mxu1 %vm2057_vm0, %v2056_v1 }
  0x8c   : > { %1815 = vmatmul.mubr.msk.bf16.gmra.mrb[60].mxu0 %vm285_vm1, %v2310_v41 }
  0x8d   : > { %1885 = vmatmul.mubr.msk.bf16.gmra.mrb[60].mxu1 %vm285_vm1, %v221_v42  ;;  %1818 = vmatprep.mubr.msk.bf16.mxu0 %vm2057_vm0, %v2056_v1 }
  0x8e   : > { %1888 = vmatprep.mubr.msk.bf16.mxu1 %vm2057_vm0, %v2056_v1 }
  0x94   : > { %1819 = vmatmul.mubr.msk.bf16.gmra.mrb[64].mxu0 %vm285_vm1, %v2323_v48 }
  0x95   : > { %1889 = vmatmul.mubr.msk.bf16.gmra.mrb[64].mxu1 %vm285_vm1, %v222_v49  ;;  %1894 = vmatprep.mubr.msk.bf16.mxu0 %vm2057_vm0, %v2056_v1  ;;  %v1071_v49 = vld [vmem:[%s2106_s21 + $0xda] sm:$0xff] }
  0x96   : > { %1964 = vmatprep.mubr.msk.bf16.mxu1 %vm2057_vm0, %v2056_v1 }
  0x9c   : > { %1895 = vmatmul.mubr.msk.bf16.vlgmr.msra.gmra.mrb[68].mxu0 %vm285_vm1, %v2128_v15  ;;  %v1050_v15 = vld [vmem:[%s2106_s21 + $0x32] sm:$0xff] }
  0x9d   : > { %1965 = vmatmul.mubr.msk.bf16.vlgmr.msra.gmra.mrb[68].mxu1 %vm285_vm1, %v1080_v53  ;;  %1898 = vmatprep.mubr.msk.bf16.mxu0 %vm2057_vm0, %v2056_v1  ;;  %v1082_v59 = vpack.c.bf16 %v1051_v58, %v1050_v15 }
  0x9e   : > { %1968 = vmatprep.mubr.msk.bf16.mxu1 %vm2057_vm0, %v2056_v1 }
  0xa4   : > { %1899 = vmatmul.mubr.msk.bf16.gmra.mrb[72].mxu0 %vm285_vm1, %v2141_v21  ;;  %v1052_v21 = vld [vmem:[%s2106_s21 + $0x42] sm:$0xff] }
  0xa5   : > { %1969 = vmatmul.mubr.msk.bf16.gmra.mrb[72].mxu1 %vm285_vm1, %v1081_v56  ;;  %1902 = vmatprep.mubr.msk.bf16.mxu0 %vm2057_vm0, %v2056_v1  ;;  %v1083_v61 = vpack.c.bf16 %v1053_v60, %v1052_v21  ;;  %v1072_v60 = vld [vmem:[%s2106_s21 + $0xe2] sm:$0xff] }
  0xa6   : > { %1972 = vmatprep.mubr.msk.bf16.mxu1 %vm2057_vm0, %v2056_v1 }
  0xac   : > { %1903 = vmatmul.mubr.msk.bf16.gmra.mrb[76].mxu0 %vm285_vm1, %v2154_v27  ;;  %v1054_v27 = vld [vmem:[%s2106_s21 + $0x52] sm:$0xff] }
  0xad   : > { %1973 = vmatmul.mubr.msk.bf16.gmra.mrb[76].mxu1 %vm285_vm1, %v1082_v59  ;;  %1906 = vmatprep.mubr.msk.bf16.mxu0 %vm2057_vm0, %v2056_v1  ;;  %v1084_v0 = vpack.c.bf16 %v1055_v62, %v1054_v27 }
  0xae   : > { %1976 = vmatprep.mubr.msk.bf16.mxu1 %vm2057_vm0, %v2056_v1 }
  0xb4   : > { %1907 = vmatmul.mubr.msk.bf16.gmra.mrb[80].mxu0 %vm285_vm1, %v2167_v33  ;;  %v1056_v33 = vld [vmem:[%s2106_s21 + $0x62] sm:$0xff] }
  0xb5   : > { %1977 = vmatmul.mubr.msk.bf16.gmra.mrb[80].mxu1 %vm285_vm1, %v1083_v61  ;;  %1910 = vmatprep.mubr.msk.bf16.mxu0 %vm2057_vm0, %v2056_v1  ;;  %v1085_v3 = vpack.c.bf16 %v1057_v2, %v1056_v33  ;;  %v1073_v61 = vld [vmem:[%s2106_s21 + $0xea] sm:$0xff] }
  0xb6   : > { %1980 = vmatprep.mubr.msk.bf16.mxu1 %vm2057_vm0, %v2056_v1 }
  0xbc   : > { %1911 = vmatmul.mubr.msk.bf16.gmra.mrb[84].mxu0 %vm285_vm1, %v2180_v39  ;;  %v1058_v39 = vld [vmem:[%s2106_s21 + $0x72] sm:$0xff] }
  0xbd   : > { %1981 = vmatmul.mubr.msk.bf16.gmra.mrb[84].mxu1 %vm285_vm1, %v1084_v0  ;;  %1914 = vmatprep.mubr.msk.bf16.mxu0 %vm2057_vm0, %v2056_v1  ;;  %v1086_v5 = vpack.c.bf16 %v1059_v4, %v1058_v39 }
  0xbe   : > { %1984 = vmatprep.mubr.msk.bf16.mxu1 %vm2057_vm0, %v2056_v1 }
  0xc4   : > { %1915 = vmatmul.mubr.msk.bf16.gmra.mrb[88].mxu0 %vm285_vm1, %v2193_v45  ;;  %v1060_v45 = vld [vmem:[%s2106_s21 + $0x82] sm:$0xff] }
  0xc5   : > { %1985 = vmatmul.mubr.msk.bf16.gmra.mrb[88].mxu1 %vm285_vm1, %v1085_v3  ;;  %1918 = vmatprep.mubr.msk.bf16.mxu0 %vm2057_vm0, %v2056_v1  ;;  %v1087_v8 = vpack.c.bf16 %v1061_v7, %v1060_v45  ;;  %v1074_v7 = vld [vmem:[%s2106_s21 + $0xf2] sm:$0xff] }
  0xc6   : > { %1988 = vmatprep.mubr.msk.bf16.mxu1 %vm2057_vm0, %v2056_v1 }
  0xcc   : > { %1919 = vmatmul.mubr.msk.bf16.gmra.mrb[92].mxu0 %vm285_vm1, %v2206_v51  ;;  %v1062_v51 = vld [vmem:[%s2106_s21 + $0x92] sm:$0xff] }
  0xcd   : > { %1989 = vmatmul.mubr.msk.bf16.gmra.mrb[92].mxu1 %vm285_vm1, %v1086_v5  ;;  %1922 = vmatprep.mubr.msk.bf16.mxu0 %vm2057_vm0, %v2056_v1  ;;  %v1088_v10 = vpack.c.bf16 %v1063_v9, %v1062_v51 }
  0xce   : > { %1992 = vmatprep.mubr.msk.bf16.mxu1 %vm2057_vm0, %v2056_v1 }
  0xd4   : > { %1923 = vmatmul.mubr.msk.bf16.gmra.mrb[96].mxu0 %vm285_vm1, %v2219_v57  ;;  %v1064_v57 = vld [vmem:[%s2106_s21 + $0xa2] sm:$0xff] }
  0xd5   : > { %1993 = vmatmul.mubr.msk.bf16.gmra.mrb[96].mxu1 %vm285_vm1, %v1087_v8  ;;  %1926 = vmatprep.mubr.msk.bf16.mxu0 %vm2057_vm0, %v2056_v1  ;;  %v1089_v13 = vpack.c.bf16 %v1065_v11, %v1064_v57  ;;  %v1075_v8 = vld [vmem:[%s2106_s21 + $0xfa] sm:$0xff] }
  0xd6   : > { %1996 = vmatprep.mubr.msk.bf16.mxu1 %vm2057_vm0, %v2056_v1 }
  0xdc   : > { %1927 = vmatmul.mubr.msk.bf16.gmra.mrb[100].mxu0 %vm285_vm1, %v2232_v63  ;;  %v1066_v63 = vld [vmem:[%s2106_s21 + $0xb2] sm:$0xff] }
  0xdd   : > { %1997 = vmatmul.mubr.msk.bf16.gmra.mrb[100].mxu1 %vm285_vm1, %v1088_v10  ;;  %1930 = vmatprep.mubr.msk.bf16.mxu0 %vm2057_vm0, %v2056_v1 }
  0xde   : > { %2000 = vmatprep.mubr.msk.bf16.mxu1 %vm2057_vm0, %v2056_v1 }
  0xe4   : > { %1931 = vmatmul.mubr.msk.bf16.gmra.mrb[104].mxu0 %vm285_vm1, %v2245_v6  ;;  %v1090_v6 = vpack.c.bf16 %v1067_v14, %v1066_v63 }
  0xe5   : > { %2001 = vmatmul.mubr.msk.bf16.gmra.mrb[104].mxu1 %vm285_vm1, %v1089_v13  ;;  %1934 = vmatprep.mubr.msk.bf16.mxu0 %vm2057_vm0, %v2056_v1 }
  0xe6   : > { %2004 = vmatprep.mubr.msk.bf16.mxu1 %vm2057_vm0, %v2056_v1 }
  0xe7   : > { %v371_v16 = vpop.f32.mrb[0].mxu0 }
  0xe8   : > { %v597_v17 = vpop.f32.mrb[0].mxu1  ;;  %v1756_v18 = vpop.f32.mrb[1].mxu0 }
  0xe9   : > { %v2424_v20 = vadd.f32 %v597_v17, %v371_v16  ;;  %v1826_v22 = vpop.f32.mrb[1].mxu1  ;;  %v374_v23 = vpop.f32.mrb[2].mxu0  ;;  %v1076_v18 = vld [vmem:[%s2106_s21 + $0x102] sm:$0xff] }
  0xea   : > { %v600_v24 = vpop.f32.mrb[2].mxu1  ;;  %v1757_v25 = vpop.f32.mrb[3].mxu0  ;;  %v1077_v22 = vld [vmem:[%s2106_s21 + $0x10a] sm:$0xff] }
  0xeb   : > { %v2426_v28 = vadd.f32 %v600_v24, %v374_v23  ;;  %v1827_v29 = vpop.f32.mrb[3].mxu1 }
  0xec   : > { %1935 = vmatmul.mubr.msk.bf16.gmra.mrb[108].mxu0 %vm285_vm1, %v2258_v12  ;;  %v1091_v12 = vpack.c.bf16 %v1069_v31, %v1068_v30  ;;  %v1095_v30 = vpack.c.bf16 %v1077_v22, %v1076_v18 }
  0xed   : > { %2005 = vmatmul.mubr.msk.bf16.gmra.mrb[108].mxu1 %vm285_vm1, %v1090_v6  ;;  %1938 = vmatprep.mubr.msk.bf16.mxu0 %vm2057_vm0, %v2056_v1 }
  0xee   : > { %2008 = vmatprep.mubr.msk.bf16.mxu1 %vm2057_vm0, %v2056_v1 }
  0xef   : > { %v379_v32 = vpop.f32.mrb[4].mxu0 }
  0xf0   : > { %v605_v35 = vpop.f32.mrb[4].mxu1  ;;  %v1760_v36 = vpop.f32.mrb[5].mxu0 }
  0xf1   : > { %v2437_v37 = vadd.f32 %v605_v35, %v379_v32  ;;  %v1830_v38 = vpop.f32.mrb[5].mxu1  ;;  %v382_v40 = vpop.f32.mrb[6].mxu0 }
  0xf2   : > { %v608_v42 = vpop.f32.mrb[6].mxu1  ;;  %v1761_v43 = vpop.f32.mrb[7].mxu0  ;;  %v764_v38 = vld [vmem:[%s2106_s21 + $0x111] sm:$0xff] }
  0xf3   : > { %v2439_v44 = vadd.f32 %v608_v42, %v382_v40  ;;  %v1831_v46 = vpop.f32.mrb[7].mxu1  ;;  %v765_v40 = vld [vmem:[%s2106_s21 + $0x119] sm:$0xff] }
  0xf4   : > { %1939 = vmatmul.mubr.msk.bf16.gmra.mrb[112].mxu0 %vm285_vm1, %v2271_v19  ;;  %v1092_v19 = vpack.c.bf16 %v1071_v49, %v1070_v47  ;;  %v1079_v42 = vld [vmem:[%s2106_s21 + $0x11a] sm:$0xff]  ;;  %v782_v49 = vpack.c.bf16 %v765_v40, %v764_v38 }
  0xf5   : > { %2009 = vmatmul.mubr.msk.bf16.gmra.mrb[112].mxu1 %vm285_vm1, %v1091_v12  ;;  %1942 = vmatprep.mubr.msk.bf16.mxu0 %vm2057_vm0, %v2056_v1  ;;  %v1078_v12 = vld [vmem:[%s2106_s21 + $0x112] sm:$0xff] }
  0xf6   : > { %2012 = vmatprep.mubr.msk.bf16.mxu1 %vm2057_vm0, %v2056_v1 }
  0xf7   : > { %v387_v50 = vpop.f32.mrb[8].mxu0 }
  0xf8   : > { %v613_v52 = vpop.f32.mrb[8].mxu1  ;;  %v1764_v53 = vpop.f32.mrb[9].mxu0 }
  0xf9   : > { %v2450_v54 = vadd.f32 %v613_v52, %v387_v50  ;;  %v1834_v55 = vpop.f32.mrb[9].mxu1  ;;  %v390_v56 = vpop.f32.mrb[10].mxu0  ;;  %v1096_v53 = vpack.c.bf16 %v1079_v42, %v1078_v12 }
  0xfa   : > { %v616_v15 = vpop.f32.mrb[10].mxu1  ;;  %v1765_v58 = vpop.f32.mrb[11].mxu0 }
  0xfb   : > { %v2452_v59 = vadd.f32 %v616_v15, %v390_v56  ;;  %v1835_v21 = vpop.f32.mrb[11].mxu1 }
  0xfc   : > { %1943 = vmatmul.mubr.msk.bf16.gmra.mrb[116].mxu0 %vm285_vm1, %v2284_v26  ;;  %v1093_v26 = vpack.c.bf16 %v1073_v61, %v1072_v60 }
  0xfd   : > { %2013 = vmatmul.mubr.msk.bf16.gmra.mrb[116].mxu1 %vm285_vm1, %v1092_v19  ;;  %1946 = vmatprep.mubr.msk.bf16.mxu0 %vm2057_vm0, %v2056_v1 }
  0xfe   : > { %2016 = vmatprep.mubr.msk.bf16.mxu1 %vm2057_vm0, %v2056_v1 }
  0xff   : > { %v395_v27 = vpop.f32.mrb[12].mxu0 }
 0x100   : > { %v621_v62 = vpop.f32.mrb[12].mxu1  ;;  %v1768_v0 = vpop.f32.mrb[13].mxu0 }
 0x101   : > { %v2463_v33 = vadd.f32 %v621_v62, %v395_v27  ;;  %v1838_v2 = vpop.f32.mrb[13].mxu1  ;;  %v398_v3 = vpop.f32.mrb[14].mxu0 }
 0x102   : > { %v624_v39 = vpop.f32.mrb[14].mxu1  ;;  %v1769_v4 = vpop.f32.mrb[15].mxu0 }
 0x103   : > { %v2465_v5 = vadd.f32 %v624_v39, %v398_v3  ;;  %v1839_v45 = vpop.f32.mrb[15].mxu1 }
 0x104   : > { %1947 = vmatmul.mubr.msk.bf16.gmra.mrb[120].mxu0 %vm285_vm1, %v2297_v34  ;;  %v1094_v34 = vpack.c.bf16 %v1075_v8, %v1074_v7 }
 0x105   : > { %2017 = vmatmul.mubr.msk.bf16.gmra.mrb[120].mxu1 %vm285_vm1, %v1093_v26  ;;  %1950 = vmatprep.mubr.msk.bf16.mxu0 %vm2057_vm0, %v2056_v1 }
 0x106   : > { %2020 = vmatprep.mubr.msk.bf16.mxu1 %vm2057_vm0, %v2056_v1 }
 0x107   : > { %v403_v51 = vpop.f32.mrb[16].mxu0 }
 0x108   : > { %v629_v9 = vpop.f32.mrb[16].mxu1  ;;  %v1772_v10 = vpop.f32.mrb[17].mxu0 }
 0x109   : > { %v2476_v57 = vadd.f32 %v629_v9, %v403_v51  ;;  %v1842_v11 = vpop.f32.mrb[17].mxu1  ;;  %v406_v13 = vpop.f32.mrb[18].mxu0 }
 0x10a   : > { %v632_v63 = vpop.f32.mrb[18].mxu1  ;;  %v1773_v14 = vpop.f32.mrb[19].mxu0 }
 0x10b   : > { %v2478_v16 = vadd.f32 %v632_v63, %v406_v13  ;;  %v1843_v17 = vpop.f32.mrb[19].mxu1 }
 0x10c   : > { %1951 = vmatmul.mubr.msk.bf16.gmra.mrb[124].mxu0 %vm285_vm1, %v2310_v41 }
 0x10d   : > { %2021 = vmatmul.mubr.msk.bf16.gmra.mrb[124].mxu1 %vm285_vm1, %v1094_v34  ;;  %1954 = vmatprep.mubr.msk.bf16.mxu0 %vm2057_vm0, %v2056_v1 }
 0x10e   : > { %2024 = vmatprep.mubr.msk.bf16.mxu1 %vm2057_vm0, %v2056_v1 }
 0x10f   : > { %v411_v23 = vpop.f32.mrb[20].mxu0 }
 0x110   : > { %v637_v6 = vpop.f32.mrb[20].mxu1  ;;  %v1776_v24 = vpop.f32.mrb[21].mxu0 }
 0x111   : > { %v2489_v25 = vadd.f32 %v637_v6, %v411_v23  ;;  %v1846_v41 = vpop.f32.mrb[21].mxu1  ;;  %v414_v29 = vpop.f32.mrb[22].mxu0 }
 0x112   : > { %v640_v31 = vpop.f32.mrb[22].mxu1  ;;  %v1777_v32 = vpop.f32.mrb[23].mxu0 }
 0x113   : > { %v2491_v35 = vadd.f32 %v640_v31, %v414_v29  ;;  %v1847_v36 = vpop.f32.mrb[23].mxu1 }
 0x114   : > { %1955 = vmatmul.mubr.msk.bf16.gmra.mrb[128].mxu0 %vm285_vm1, %v2323_v48 }
 0x115   : > { %2025 = vmatmul.mubr.msk.bf16.gmra.mrb[128].mxu1 %vm285_vm1, %v1095_v30  ;;  %1958 = vmatprep.mubr.msk.bf16.mxu0 %vm2057_vm0, %v2056_v1 }
 0x116   : > { %2028 = vmatprep.mubr.msk.bf16.mxu1 %vm2057_vm0, %v2056_v1 }
 0x117   : > { %v419_v43 = vpop.f32.mrb[24].mxu0 }
 0x118   : > { %v645_v46 = vpop.f32.mrb[24].mxu1  ;;  %v1780_v47 = vpop.f32.mrb[25].mxu0 }
 0x119   : > { %v2504_v50 = vadd.f32 %v645_v46, %v419_v43  ;;  %v1850_v52 = vpop.f32.mrb[25].mxu1  ;;  %v422_v48 = vpop.f32.mrb[26].mxu0 }
 0x11a   : > { %v648_v55 = vpop.f32.mrb[26].mxu1  ;;  %v1781_v56 = vpop.f32.mrb[27].mxu0 }
 0x11b   : > { %v2506_v19 = vadd.f32 %v648_v55, %v422_v48  ;;  %v1851_v15 = vpop.f32.mrb[27].mxu1 }
 0x11c   : > { %1959 = vmatmul.mubr.msk.bf16.gmra.mrb[132].mxu0 %vm285_vm1, %v782_v49 }
 0x11d   : > { %2029 = vmatmul.mubr.msk.bf16.gmra.mrb[132].mxu1 %vm285_vm1, %v1096_v53 }
 0x11f   : > { %v427_v1 = vpop.f32.mrb[28].mxu0 }
 0x120   : > { %v653_v58 = vpop.f32.mrb[28].mxu1  ;;  %v1784_v21 = vpop.f32.mrb[29].mxu0 }
 0x121   : > { %v2510_v60 = vadd.f32 %v653_v58, %v427_v1  ;;  %v1854_v61 = vpop.f32.mrb[29].mxu1  ;;  %v430_v27 = vpop.f32.mrb[30].mxu0 }
 0x122   : > { %v656_v62 = vpop.f32.mrb[30].mxu1  ;;  %v1785_v0 = vpop.f32.mrb[31].mxu0 }
 0x123   : > { %v2512_v2 = vadd.f32 %v656_v62, %v430_v27  ;;  %v1855_v3 = vpop.f32.mrb[31].mxu1 }
 0x127   : > { %v435_v26 = vpop.f32.mrb[32].mxu0 }
 0x128   : > { %v661_v39 = vpop.f32.mrb[32].mxu1  ;;  %v1788_v4 = vpop.f32.mrb[33].mxu0 }
 0x129   : > { %v2514_v45 = vadd.f32 %v661_v39, %v435_v26  ;;  %v1858_v7 = vpop.f32.mrb[33].mxu1  ;;  %v438_v8 = vpop.f32.mrb[34].mxu0 }
 0x12a   : > { %v664_v51 = vpop.f32.mrb[34].mxu1  ;;  %v1789_v9 = vpop.f32.mrb[35].mxu0 }
 0x12b   : > { %v2516_v10 = vadd.f32 %v664_v51, %v438_v8  ;;  %v1859_v11 = vpop.f32.mrb[35].mxu1 }
 0x12f   : > { %v443_v13 = vpop.f32.mrb[36].mxu0 }
 0x130   : > { %v669_v34 = vpop.f32.mrb[36].mxu1  ;;  %v1792_v63 = vpop.f32.mrb[37].mxu0 }
 0x131   : > { %v2518_v14 = vadd.f32 %v669_v34, %v443_v13  ;;  %v1862_v17 = vpop.f32.mrb[37].mxu1  ;;  %v446_v18 = vpop.f32.mrb[38].mxu0 }
 0x132   : > { %v672_v22 = vpop.f32.mrb[38].mxu1  ;;  %v1793_v23 = vpop.f32.mrb[39].mxu0 }
 0x133   : > { %v2520_v6 = vadd.f32 %v672_v22, %v446_v18  ;;  %v1863_v24 = vpop.f32.mrb[39].mxu1 }
 0x137   : > { %v451_v41 = vpop.f32.mrb[40].mxu0 }
 0x138   : > { %v677_v29 = vpop.f32.mrb[40].mxu1  ;;  %v1796_v30 = vpop.f32.mrb[41].mxu0 }
 0x139   : > { %v2522_v31 = vadd.f32 %v677_v29, %v451_v41  ;;  %v1866_v32 = vpop.f32.mrb[41].mxu1  ;;  %v454_v36 = vpop.f32.mrb[42].mxu0 }
 0x13a   : > { %v680_v38 = vpop.f32.mrb[42].mxu1  ;;  %v1797_v40 = vpop.f32.mrb[43].mxu0 }
 0x13b   : > { %v2524_v12 = vadd.f32 %v680_v38, %v454_v36  ;;  %v1867_v42 = vpop.f32.mrb[43].mxu1 }
 0x13f   : > { %v459_v43 = vpop.f32.mrb[44].mxu0 }
 0x140   : > { %v685_v46 = vpop.f32.mrb[44].mxu1  ;;  %v1800_v47 = vpop.f32.mrb[45].mxu0 }
 0x141   : > { %v2526_v49 = vadd.f32 %v685_v46, %v459_v43  ;;  %v1870_v52 = vpop.f32.mrb[45].mxu1  ;;  %v462_v48 = vpop.f32.mrb[46].mxu0 }
 0x142   : > { %v688_v53 = vpop.f32.mrb[46].mxu1  ;;  %v1801_v55 = vpop.f32.mrb[47].mxu0 }
 0x143   : > { %v2528_v56 = vadd.f32 %v688_v53, %v462_v48  ;;  %v1871_v15 = vpop.f32.mrb[47].mxu1 }
 0x147   : > { %v467_v1 = vpop.f32.mrb[48].mxu0 }
 0x148   : > { %v693_v58 = vpop.f32.mrb[48].mxu1  ;;  %v1804_v21 = vpop.f32.mrb[49].mxu0 }
 0x149   : > { %v2530_v61 = vadd.f32 %v693_v58, %v467_v1  ;;  %v1874_v27 = vpop.f32.mrb[49].mxu1  ;;  %v470_v62 = vpop.f32.mrb[50].mxu0 }
 0x14a   : > { %v696_v0 = vpop.f32.mrb[50].mxu1  ;;  %v1805_v3 = vpop.f32.mrb[51].mxu0 }
 0x14b   : > { %v2532_v26 = vadd.f32 %v696_v0, %v470_v62  ;;  %v1875_v39 = vpop.f32.mrb[51].mxu1 }
 0x14f   : > { %v475_v4 = vpop.f32.mrb[52].mxu0 }
 0x150   : > { %v701_v7 = vpop.f32.mrb[52].mxu1  ;;  %v1808_v8 = vpop.f32.mrb[53].mxu0 }
 0x151   : > { %v2534_v51 = vadd.f32 %v701_v7, %v475_v4  ;;  %v1878_v9 = vpop.f32.mrb[53].mxu1  ;;  %v478_v11 = vpop.f32.mrb[54].mxu0 }
 0x152   : > { %v704_v13 = vpop.f32.mrb[54].mxu1  ;;  %v1809_v34 = vpop.f32.mrb[55].mxu0 }
 0x153   : > { %v2536_v63 = vadd.f32 %v704_v13, %v478_v11  ;;  %v1879_v17 = vpop.f32.mrb[55].mxu1  ;;  %v2554_v34 = vld [vmem:[%s2668_s2] ss:$0 sm:$0xff] }
 0x157   : > { %v483_v18 = vpop.f32.mrb[56].mxu0 }
 0x158   : > { %v709_v22 = vpop.f32.mrb[56].mxu1  ;;  %v1812_v23 = vpop.f32.mrb[57].mxu0 }
 0x159   : > { %v2538_v24 = vadd.f32 %v709_v22, %v483_v18  ;;  %v1882_v41 = vpop.f32.mrb[57].mxu1  ;;  %v486_v29 = vpop.f32.mrb[58].mxu0 }
 0x15a   : > { %v712_v30 = vpop.f32.mrb[58].mxu1  ;;  %v1813_v32 = vpop.f32.mrb[59].mxu0 }
 0x15b   : > { %v2540_v36 = vadd.f32 %v712_v30, %v486_v29  ;;  %v1883_v38 = vpop.f32.mrb[59].mxu1 }
 0x15f   : > { %v491_v40 = vpop.f32.mrb[60].mxu0 }
 0x160   : > { %v717_v42 = vpop.f32.mrb[60].mxu1  ;;  %v1816_v43 = vpop.f32.mrb[61].mxu0 }
 0x161   : > { %v2542_v46 = vadd.f32 %v717_v42, %v491_v40  ;;  %v1886_v47 = vpop.f32.mrb[61].mxu1  ;;  %v494_v52 = vpop.f32.mrb[62].mxu0 }
 0x162   : > { %v720_v48 = vpop.f32.mrb[62].mxu1  ;;  %v1817_v53 = vpop.f32.mrb[63].mxu0 }
 0x163   : > { %v2544_v55 = vadd.f32 %v720_v48, %v494_v52  ;;  %v1887_v15 = vpop.f32.mrb[63].mxu1 }
 0x167   : > { %v499_v1 = vpop.f32.mrb[64].mxu0 }
 0x168   : > { %v725_v58 = vpop.f32.mrb[64].mxu1  ;;  %v1820_v21 = vpop.f32.mrb[65].mxu0 }
 0x169   : > { %v2546_v27 = vadd.f32 %v725_v58, %v499_v1  ;;  %v1890_v62 = vpop.f32.mrb[65].mxu1  ;;  %v502_v0 = vpop.f32.mrb[66].mxu0 }
 0x16a   : > { %v728_v3 = vpop.f32.mrb[66].mxu1  ;;  %v1821_v39 = vpop.f32.mrb[67].mxu0 }
 0x16b   : > { %v2548_v4 = vadd.f32 %v728_v3, %v502_v0  ;;  %v1891_v7 = vpop.f32.mrb[67].mxu1 }
 0x16f   : > { %v877_v8 = vpop.f32.mrb[68].mxu0 }
 0x170   : > { %v1012_v9 = vadd.f32 %v877_v8, %v2424_v20  ;;  %v1191_v11 = vpop.f32.mrb[68].mxu1  ;;  %v1896_v13 = vpop.f32.mrb[69].mxu0 }
 0x171   : > { %v1966_v17 = vpop.f32.mrb[69].mxu1  ;;  %v880_v18 = vpop.f32.mrb[70].mxu0 }
 0x172   : > { %v1326_v22 = vadd.f32 %v1191_v11, %v1012_v9  ;;  %v1013_v23 = vadd.f32 %v880_v18, %v2426_v28  ;;  %v1194_v41 = vpop.f32.mrb[70].mxu1  ;;  %v1897_v29 = vpop.f32.mrb[71].mxu0 }
 0x173   : > { %v1967_v30 = vpop.f32.mrb[71].mxu1 }
 0x174   : > { %v1367_v32 = vadd.f32 %v2554_v34, %v1326_v22  ;;  %v1327_v38 = vadd.f32 %v1194_v41, %v1013_v23 }
 0x176   : > { %vm1401_vm2 = vcmp.ge.f32.partialorder %v1367_v32, 0.0  ;;  %v1435_v20 = vmul.f32 0.01, %v1367_v32  ;;  %v1368_v40 = vadd.f32 %v2554_v34, %v1327_v38 }
 0x177   : > { %v885_v42 = vpop.f32.mrb[72].mxu0 }
 0x178   : > { %v1469_v43 = vsel %vm1401_vm2, %v1367_v32, %v1435_v20  ;;  %vm1402_vm3 = vcmp.ge.f32.partialorder %v1368_v40, 0.0  ;;  %v1436_v28 = vmul.f32 0.01, %v1368_v40  ;;  %v1014_v47 = vadd.f32 %v885_v42, %v2437_v37  ;;  %v1199_v52 = vpop.f32.mrb[72].mxu1  ;;  %v1900_v48 = vpop.f32.mrb[73].mxu0 }
 0x179   : > { %1503 = vst [vmem:[%s2562_s4] sm:$0xff] %v1469_v43  ;;  %v1970_v53 = vpop.f32.mrb[73].mxu1  ;;  %v888_v15 = vpop.f32.mrb[74].mxu0 }
 0x17a   : > { %v1470_v1 = vsel %vm1402_vm3, %v1368_v40, %v1436_v28  ;;  %v1328_v58 = vadd.f32 %v1199_v52, %v1014_v47  ;;  %v1015_v21 = vadd.f32 %v888_v15, %v2439_v44  ;;  %v1202_v62 = vpop.f32.mrb[74].mxu1  ;;  %v1901_v0 = vpop.f32.mrb[75].mxu0 }
 0x17b   : > { %1504 = vst [vmem:[%s2562_s4 + $0x8] sm:$0xff] %v1470_v1  ;;  %v1971_v3 = vpop.f32.mrb[75].mxu1 }
 0x17c   : > { %v1369_v39 = vadd.f32 %v2554_v34, %v1328_v58  ;;  %v1329_v7 = vadd.f32 %v1202_v62, %v1015_v21 }
 0x17e   : > { %vm1403_vm4 = vcmp.ge.f32.partialorder %v1369_v39, 0.0  ;;  %v1437_v8 = vmul.f32 0.01, %v1369_v39  ;;  %v1370_v37 = vadd.f32 %v2554_v34, %v1329_v7 }
 0x17f   : > { %v893_v9 = vpop.f32.mrb[76].mxu0 }
 0x180   : > { %v1471_v11 = vsel %vm1403_vm4, %v1369_v39, %v1437_v8  ;;  %vm1404_vm5 = vcmp.ge.f32.partialorder %v1370_v37, 0.0  ;;  %v1438_v13 = vmul.f32 0.01, %v1370_v37  ;;  %v1016_v17 = vadd.f32 %v893_v9, %v2450_v54  ;;  %v1207_v44 = vpop.f32.mrb[76].mxu1  ;;  %v1904_v18 = vpop.f32.mrb[77].mxu0 }
 0x181   : > { %1505 = vst [vmem:[%s2562_s4 + $0x10] sm:$0xff] %v1471_v11  ;;  %v1974_v22 = vpop.f32.mrb[77].mxu1  ;;  %v896_v23 = vpop.f32.mrb[78].mxu0 }
 0x182   : > { %v1472_v41 = vsel %vm1404_vm5, %v1370_v37, %v1438_v13  ;;  %v1330_v29 = vadd.f32 %v1207_v44, %v1016_v17  ;;  %v1017_v30 = vadd.f32 %v896_v23, %v2452_v59  ;;  %v1210_v32 = vpop.f32.mrb[78].mxu1  ;;  %v1905_v38 = vpop.f32.mrb[79].mxu0 }
 0x183   : > { %1506 = vst [vmem:[%s2562_s4 + $0x18] sm:$0xff] %v1472_v41  ;;  %v1975_v20 = vpop.f32.mrb[79].mxu1 }
 0x184   : > { %v1371_v40 = vadd.f32 %v2554_v34, %v1330_v29  ;;  %v1331_v42 = vadd.f32 %v1210_v32, %v1017_v30 }
 0x186   : > { %vm1405_vm6 = vcmp.ge.f32.partialorder %v1371_v40, 0.0  ;;  %v1439_v43 = vmul.f32 0.01, %v1371_v40  ;;  %v1372_v54 = vadd.f32 %v2554_v34, %v1331_v42 }
 0x187   : > { %v901_v28 = vpop.f32.mrb[80].mxu0 }
 0x188   : > { %v1473_v47 = vsel %vm1405_vm6, %v1371_v40, %v1439_v43  ;;  %vm1406_vm7 = vcmp.ge.f32.partialorder %v1372_v54, 0.0  ;;  %v1440_v52 = vmul.f32 0.01, %v1372_v54  ;;  %v1018_v48 = vadd.f32 %v901_v28, %v2463_v33  ;;  %v1215_v59 = vpop.f32.mrb[80].mxu1  ;;  %v1908_v53 = vpop.f32.mrb[81].mxu0 }
 0x189   : > { %1507 = vst [vmem:[%s2562_s4 + $0x20] sm:$0xff] %v1473_v47  ;;  %v1978_v15 = vpop.f32.mrb[81].mxu1  ;;  %v904_v1 = vpop.f32.mrb[82].mxu0 }
 0x18a   : > { %v1474_v58 = vsel %vm1406_vm7, %v1372_v54, %v1440_v52  ;;  %v1332_v21 = vadd.f32 %v1215_v59, %v1018_v48  ;;  %v1019_v62 = vadd.f32 %v904_v1, %v2465_v5  ;;  %v1218_v0 = vpop.f32.mrb[82].mxu1  ;;  %v1909_v3 = vpop.f32.mrb[83].mxu0 }
 0x18b   : > { %1508 = vst [vmem:[%s2562_s4 + $0x28] sm:$0xff] %v1474_v58  ;;  %v1979_v39 = vpop.f32.mrb[83].mxu1 }
 0x18c   : > { %v1373_v7 = vadd.f32 %v2554_v34, %v1332_v21  ;;  %v1333_v8 = vadd.f32 %v1218_v0, %v1019_v62 }
 0x18e   : > { %vm1407_vm8 = vcmp.ge.f32.partialorder %v1373_v7, 0.0  ;;  %v1441_v37 = vmul.f32 0.01, %v1373_v7  ;;  %v1374_v33 = vadd.f32 %v2554_v34, %v1333_v8 }
 0x18f   : > { %v909_v9 = vpop.f32.mrb[84].mxu0 }
 0x190   : > { %v1475_v11 = vsel %vm1407_vm8, %v1373_v7, %v1441_v37  ;;  %vm1408_vm9 = vcmp.ge.f32.partialorder %v1374_v33, 0.0  ;;  %v1442_v13 = vmul.f32 0.01, %v1374_v33  ;;  %v1020_v17 = vadd.f32 %v909_v9, %v2476_v57  ;;  %v1223_v5 = vpop.f32.mrb[84].mxu1  ;;  %v1912_v44 = vpop.f32.mrb[85].mxu0 }
 0x191   : > { %1509 = vst [vmem:[%s2562_s4 + $0x30] sm:$0xff] %v1475_v11  ;;  %v1982_v18 = vpop.f32.mrb[85].mxu1  ;;  %v912_v22 = vpop.f32.mrb[86].mxu0 }
 0x192   : > { %v1476_v23 = vsel %vm1408_vm9, %v1374_v33, %v1442_v13  ;;  %v1334_v41 = vadd.f32 %v1223_v5, %v1020_v17  ;;  %v1021_v29 = vadd.f32 %v912_v22, %v2478_v16  ;;  %v1226_v30 = vpop.f32.mrb[86].mxu1  ;;  %v1913_v32 = vpop.f32.mrb[87].mxu0 }
 0x193   : > { %1510 = vst [vmem:[%s2562_s4 + $0x38] sm:$0xff] %v1476_v23  ;;  %v1983_v38 = vpop.f32.mrb[87].mxu1 }
 0x194   : > { %v1375_v20 = vadd.f32 %v2554_v34, %v1334_v41  ;;  %v1335_v40 = vadd.f32 %v1226_v30, %v1021_v29 }
 0x196   : > { %vm1409_vm10 = vcmp.ge.f32.partialorder %v1375_v20, 0.0  ;;  %v1443_v42 = vmul.f32 0.01, %v1375_v20  ;;  %v1376_v57 = vadd.f32 %v2554_v34, %v1335_v40 }
 0x197   : > { %v917_v43 = vpop.f32.mrb[88].mxu0 }
 0x198   : > { %v1477_v54 = vsel %vm1409_vm10, %v1375_v20, %v1443_v42  ;;  %vm1410_vm11 = vcmp.ge.f32.partialorder %v1376_v57, 0.0  ;;  %v1444_v28 = vmul.f32 0.01, %v1376_v57  ;;  %v1022_v47 = vadd.f32 %v917_v43, %v2489_v25  ;;  %v1231_v16 = vpop.f32.mrb[88].mxu1  ;;  %v1916_v52 = vpop.f32.mrb[89].mxu0 }
 0x199   : > { %1511 = vst [vmem:[%s2562_s4 + $0x40] sm:$0xff] %v1477_v54  ;;  %v1986_v48 = vpop.f32.mrb[89].mxu1  ;;  %v920_v59 = vpop.f32.mrb[90].mxu0 }
 0x19a   : > { %v1478_v53 = vsel %vm1410_vm11, %v1376_v57, %v1444_v28  ;;  %v1336_v15 = vadd.f32 %v1231_v16, %v1022_v47  ;;  %v1023_v1 = vadd.f32 %v920_v59, %v2491_v35  ;;  %v1234_v58 = vpop.f32.mrb[90].mxu1  ;;  %v1917_v21 = vpop.f32.mrb[91].mxu0 }
 0x19b   : > { %1512 = vst [vmem:[%s2562_s4 + $0x48] sm:$0xff] %v1478_v53  ;;  %v1987_v62 = vpop.f32.mrb[91].mxu1 }
 0x19c   : > { %v1377_v0 = vadd.f32 %v2554_v34, %v1336_v15  ;;  %v1337_v3 = vadd.f32 %v1234_v58, %v1023_v1 }
 0x19e   : > { %vm1411_vm12 = vcmp.ge.f32.partialorder %v1377_v0, 0.0  ;;  %v1445_v39 = vmul.f32 0.01, %v1377_v0  ;;  %v1378_v25 = vadd.f32 %v2554_v34, %v1337_v3 }
 0x19f   : > { %v925_v7 = vpop.f32.mrb[92].mxu0 }
 0x1a0   : > { %v1479_v8 = vsel %vm1411_vm12, %v1377_v0, %v1445_v39  ;;  %vm1412_vm13 = vcmp.ge.f32.partialorder %v1378_v25, 0.0  ;;  %v1446_v37 = vmul.f32 0.01, %v1378_v25  ;;  %v1024_v33 = vadd.f32 %v925_v7, %v2504_v50  ;;  %v1239_v35 = vpop.f32.mrb[92].mxu1  ;;  %v1920_v9 = vpop.f32.mrb[93].mxu0 }
 0x1a1   : > { %1513 = vst [vmem:[%s2562_s4 + $0x50] sm:$0xff] %v1479_v8  ;;  %v1990_v11 = vpop.f32.mrb[93].mxu1  ;;  %v928_v13 = vpop.f32.mrb[94].mxu0 }
 0x1a2   : > { %v1480_v17 = vsel %vm1412_vm13, %v1378_v25, %v1446_v37  ;;  %v1338_v5 = vadd.f32 %v1239_v35, %v1024_v33  ;;  %v1025_v44 = vadd.f32 %v928_v13, %v2506_v19  ;;  %v1242_v18 = vpop.f32.mrb[94].mxu1  ;;  %v1921_v22 = vpop.f32.mrb[95].mxu0 }
 0x1a3   : > { %1514 = vst [vmem:[%s2562_s4 + $0x58] sm:$0xff] %v1480_v17  ;;  %v1991_v23 = vpop.f32.mrb[95].mxu1 }
 0x1a4   : > { %v1379_v41 = vadd.f32 %v2554_v34, %v1338_v5  ;;  %v1339_v29 = vadd.f32 %v1242_v18, %v1025_v44 }
 0x1a6   : > { %vm1413_vm14 = vcmp.ge.f32.partialorder %v1379_v41, 0.0  ;;  %v1447_v30 = vmul.f32 0.01, %v1379_v41  ;;  %v1380_v50 = vadd.f32 %v2554_v34, %v1339_v29 }
 0x1a7   : > { %v933_v32 = vpop.f32.mrb[96].mxu0 }
 0x1a8   : > { %v1481_v38 = vsel %vm1413_vm14, %v1379_v41, %v1447_v30  ;;  %vm1414_vm15 = vcmp.ge.f32.partialorder %v1380_v50, 0.0  ;;  %v1448_v20 = vmul.f32 0.01, %v1380_v50  ;;  %v1026_v40 = vadd.f32 %v933_v32, %v2510_v60  ;;  %v1247_v19 = vpop.f32.mrb[96].mxu1  ;;  %v1924_v42 = vpop.f32.mrb[97].mxu0 }
 0x1a9   : > { %1515 = vst [vmem:[%s2562_s4 + $0x60] sm:$0xff] %v1481_v38  ;;  %v1994_v57 = vpop.f32.mrb[97].mxu1  ;;  %v936_v43 = vpop.f32.mrb[98].mxu0 }
 0x1aa   : > { %v1482_v54 = vsel %vm1414_vm15, %v1380_v50, %v1448_v20  ;;  %v1340_v28 = vadd.f32 %v1247_v19, %v1026_v40  ;;  %v1027_v47 = vadd.f32 %v936_v43, %v2512_v2  ;;  %v1250_v16 = vpop.f32.mrb[98].mxu1  ;;  %v1925_v52 = vpop.f32.mrb[99].mxu0 }
 0x1ab   : > { %1516 = vst [vmem:[%s2562_s4 + $0x68] sm:$0xff] %v1482_v54  ;;  %v1995_v48 = vpop.f32.mrb[99].mxu1 }
 0x1ac   : > { %v1381_v59 = vadd.f32 %v2554_v34, %v1340_v28  ;;  %v1341_v53 = vadd.f32 %v1250_v16, %v1027_v47 }
 0x1ae   : > { %vm1415_vm0 = vcmp.ge.f32.partialorder %v1381_v59, 0.0  ;;  %v1449_v15 = vmul.f32 0.01, %v1381_v59  ;;  %v1382_v60 = vadd.f32 %v2554_v34, %v1341_v53 }
 0x1af   : > { %v941_v1 = vpop.f32.mrb[100].mxu0 }
 0x1b0   : > { %v1483_v58 = vsel %vm1415_vm0, %v1381_v59, %v1449_v15  ;;  %vm1416_vm1 = vcmp.ge.f32.partialorder %v1382_v60, 0.0  ;;  %v1450_v21 = vmul.f32 0.01, %v1382_v60  ;;  %v1028_v62 = vadd.f32 %v941_v1, %v2514_v45  ;;  %v1255_v2 = vpop.f32.mrb[100].mxu1  ;;  %v1928_v0 = vpop.f32.mrb[101].mxu0 }
 0x1b1   : > { %1517 = vst [vmem:[%s2562_s4 + $0x70] sm:$0xff] %v1483_v58  ;;  %v1998_v3 = vpop.f32.mrb[101].mxu1  ;;  %v944_v39 = vpop.f32.mrb[102].mxu0 }
 0x1b2   : > { %v1484_v25 = vsel %vm1416_vm1, %v1382_v60, %v1450_v21  ;;  %v1342_v7 = vadd.f32 %v1255_v2, %v1028_v62  ;;  %v1029_v8 = vadd.f32 %v944_v39, %v2516_v10  ;;  %v1258_v37 = vpop.f32.mrb[102].mxu1  ;;  %v1929_v33 = vpop.f32.mrb[103].mxu0 }
 0x1b3   : > { %1518 = vst [vmem:[%s2562_s4 + $0x78] sm:$0xff] %v1484_v25  ;;  %v1999_v35 = vpop.f32.mrb[103].mxu1 }
 0x1b4   : > { %v1383_v9 = vadd.f32 %v2554_v34, %v1342_v7  ;;  %v1343_v11 = vadd.f32 %v1258_v37, %v1029_v8 }
 0x1b6   : > { %vm1417_vm2 = vcmp.ge.f32.partialorder %v1383_v9, 0.0  ;;  %v1451_v13 = vmul.f32 0.01, %v1383_v9  ;;  %v1384_v45 = vadd.f32 %v2554_v34, %v1343_v11 }
 0x1b7   : > { %v949_v17 = vpop.f32.mrb[104].mxu0 }
 0x1b8   : > { %v1485_v5 = vsel %vm1417_vm2, %v1383_v9, %v1451_v13  ;;  %vm1418_vm3 = vcmp.ge.f32.partialorder %v1384_v45, 0.0  ;;  %v1452_v44 = vmul.f32 0.01, %v1384_v45  ;;  %v1030_v18 = vadd.f32 %v949_v17, %v2518_v14  ;;  %v1263_v10 = vpop.f32.mrb[104].mxu1  ;;  %v1932_v22 = vpop.f32.mrb[105].mxu0 }
 0x1b9   : > { %1519 = vst [vmem:[%s2562_s4 + $0x80] sm:$0xff] %v1485_v5  ;;  %v2002_v23 = vpop.f32.mrb[105].mxu1  ;;  %v952_v41 = vpop.f32.mrb[106].mxu0 }
 0x1ba   : > { %v1486_v29 = vsel %vm1418_vm3, %v1384_v45, %v1452_v44  ;;  %v1344_v30 = vadd.f32 %v1263_v10, %v1030_v18  ;;  %v1031_v50 = vadd.f32 %v952_v41, %v2520_v6  ;;  %v1266_v32 = vpop.f32.mrb[106].mxu1  ;;  %v1933_v38 = vpop.f32.mrb[107].mxu0 }
 0x1bb   : > { %1520 = vst [vmem:[%s2562_s4 + $0x88] sm:$0xff] %v1486_v29  ;;  %v2003_v20 = vpop.f32.mrb[107].mxu1 }
 0x1bc   : > { %v1385_v40 = vadd.f32 %v2554_v34, %v1344_v30  ;;  %v1345_v19 = vadd.f32 %v1266_v32, %v1031_v50 }
 0x1be   : > { %vm1419_vm4 = vcmp.ge.f32.partialorder %v1385_v40, 0.0  ;;  %v1453_v42 = vmul.f32 0.01, %v1385_v40  ;;  %v1386_v14 = vadd.f32 %v2554_v34, %v1345_v19 }
 0x1bf   : > { %v957_v57 = vpop.f32.mrb[108].mxu0 }
 0x1c0   : > { %v1487_v43 = vsel %vm1419_vm4, %v1385_v40, %v1453_v42  ;;  %vm1420_vm5 = vcmp.ge.f32.partialorder %v1386_v14, 0.0  ;;  %v1454_v54 = vmul.f32 0.01, %v1386_v14  ;;  %v1032_v28 = vadd.f32 %v957_v57, %v2522_v31  ;;  %v1271_v6 = vpop.f32.mrb[108].mxu1  ;;  %v1936_v47 = vpop.f32.mrb[109].mxu0 }
 0x1c1   : > { %1521 = vst [vmem:[%s2562_s4 + $0x90] sm:$0xff] %v1487_v43  ;;  %v2006_v16 = vpop.f32.mrb[109].mxu1  ;;  %v960_v52 = vpop.f32.mrb[110].mxu0 }
 0x1c2   : > { %v1488_v48 = vsel %vm1420_vm5, %v1386_v14, %v1454_v54  ;;  %v1346_v59 = vadd.f32 %v1271_v6, %v1032_v28  ;;  %v1033_v53 = vadd.f32 %v960_v52, %v2524_v12  ;;  %v1274_v15 = vpop.f32.mrb[110].mxu1  ;;  %v1937_v60 = vpop.f32.mrb[111].mxu0 }
 0x1c3   : > { %1522 = vst [vmem:[%s2562_s4 + $0x98] sm:$0xff] %v1488_v48  ;;  %v2007_v1 = vpop.f32.mrb[111].mxu1 }
 0x1c4   : > { %v1387_v58 = vadd.f32 %v2554_v34, %v1346_v59  ;;  %v1347_v21 = vadd.f32 %v1274_v15, %v1033_v53 }
 0x1c6   : > { %vm1421_vm6 = vcmp.ge.f32.partialorder %v1387_v58, 0.0  ;;  %v1455_v62 = vmul.f32 0.01, %v1387_v58  ;;  %v1388_v31 = vadd.f32 %v2554_v34, %v1347_v21 }
 0x1c7   : > { %v965_v2 = vpop.f32.mrb[112].mxu0 }
 0x1c8   : > { %v1489_v0 = vsel %vm1421_vm6, %v1387_v58, %v1455_v62  ;;  %vm1422_vm7 = vcmp.ge.f32.partialorder %v1388_v31, 0.0  ;;  %v1456_v3 = vmul.f32 0.01, %v1388_v31  ;;  %v1034_v39 = vadd.f32 %v965_v2, %v2526_v49  ;;  %v1279_v12 = vpop.f32.mrb[112].mxu1  ;;  %v1940_v25 = vpop.f32.mrb[113].mxu0 }
 0x1c9   : > { %1523 = vst [vmem:[%s2562_s4 + $0xa0] sm:$0xff] %v1489_v0  ;;  %v2010_v7 = vpop.f32.mrb[113].mxu1  ;;  %v968_v8 = vpop.f32.mrb[114].mxu0 }
 0x1ca   : > { %v1490_v37 = vsel %vm1422_vm7, %v1388_v31, %v1456_v3  ;;  %v1348_v33 = vadd.f32 %v1279_v12, %v1034_v39  ;;  %v1035_v35 = vadd.f32 %v968_v8, %v2528_v56  ;;  %v1282_v9 = vpop.f32.mrb[114].mxu1  ;;  %v1941_v11 = vpop.f32.mrb[115].mxu0 }
 0x1cb   : > { %1524 = vst [vmem:[%s2562_s4 + $0xa8] sm:$0xff] %v1490_v37  ;;  %v2011_v13 = vpop.f32.mrb[115].mxu1 }
 0x1cc   : > { %v1389_v45 = vadd.f32 %v2554_v34, %v1348_v33  ;;  %v1349_v17 = vadd.f32 %v1282_v9, %v1035_v35 }
 0x1ce   : > { %vm1423_vm8 = vcmp.ge.f32.partialorder %v1389_v45, 0.0  ;;  %v1457_v5 = vmul.f32 0.01, %v1389_v45  ;;  %v1390_v49 = vadd.f32 %v2554_v34, %v1349_v17 }
 0x1cf   : > { %v973_v44 = vpop.f32.mrb[116].mxu0 }
 0x1d0   : > { %v1491_v18 = vsel %vm1423_vm8, %v1389_v45, %v1457_v5  ;;  %vm1424_vm9 = vcmp.ge.f32.partialorder %v1390_v49, 0.0  ;;  %v1458_v10 = vmul.f32 0.01, %v1390_v49  ;;  %v1036_v22 = vadd.f32 %v973_v44, %v2530_v61  ;;  %v1287_v56 = vpop.f32.mrb[116].mxu1  ;;  %v1944_v23 = vpop.f32.mrb[117].mxu0 }
 0x1d1   : > { %1525 = vst [vmem:[%s2562_s4 + $0xb0] sm:$0xff] %v1491_v18  ;;  %v2014_v41 = vpop.f32.mrb[117].mxu1  ;;  %v976_v29 = vpop.f32.mrb[118].mxu0 }
 0x1d2   : > { %v1492_v30 = vsel %vm1424_vm9, %v1390_v49, %v1458_v10  ;;  %v1350_v50 = vadd.f32 %v1287_v56, %v1036_v22  ;;  %v1037_v32 = vadd.f32 %v976_v29, %v2532_v26  ;;  %v1290_v38 = vpop.f32.mrb[118].mxu1  ;;  %v1945_v20 = vpop.f32.mrb[119].mxu0 }
 0x1d3   : > { %1526 = vst [vmem:[%s2562_s4 + $0xb8] sm:$0xff] %v1492_v30  ;;  %v2015_v40 = vpop.f32.mrb[119].mxu1 }
 0x1d4   : > { %v1391_v19 = vadd.f32 %v2554_v34, %v1350_v50  ;;  %v1351_v42 = vadd.f32 %v1290_v38, %v1037_v32 }
 0x1d6   : > { %vm1425_vm10 = vcmp.ge.f32.partialorder %v1391_v19, 0.0  ;;  %v1459_v14 = vmul.f32 0.01, %v1391_v19  ;;  %v1392_v61 = vadd.f32 %v2554_v34, %v1351_v42 }
 0x1d7   : > { %v981_v57 = vpop.f32.mrb[120].mxu0 }
 0x1d8   : > { %v1493_v43 = vsel %vm1425_vm10, %v1391_v19, %v1459_v14  ;;  %vm1426_vm11 = vcmp.ge.f32.partialorder %v1392_v61, 0.0  ;;  %v1460_v54 = vmul.f32 0.01, %v1392_v61  ;;  %v1038_v28 = vadd.f32 %v981_v57, %v2534_v51  ;;  %v1295_v26 = vpop.f32.mrb[120].mxu1  ;;  %v1948_v6 = vpop.f32.mrb[121].mxu0 }
 0x1d9   : > { %1527 = vst [vmem:[%s2562_s4 + $0xc0] sm:$0xff] %v1493_v43  ;;  %v2018_v47 = vpop.f32.mrb[121].mxu1  ;;  %v984_v16 = vpop.f32.mrb[122].mxu0 }
 0x1da   : > { %v1494_v52 = vsel %vm1426_vm11, %v1392_v61, %v1460_v54  ;;  %v1352_v48 = vadd.f32 %v1295_v26, %v1038_v28  ;;  %v1039_v59 = vadd.f32 %v984_v16, %v2536_v63  ;;  %v1298_v53 = vpop.f32.mrb[122].mxu1  ;;  %v1949_v15 = vpop.f32.mrb[123].mxu0 }
 0x1db   : > { %1528 = vst [vmem:[%s2562_s4 + $0xc8] sm:$0xff] %v1494_v52  ;;  %v2019_v60 = vpop.f32.mrb[123].mxu1 }
 0x1dc   : > { %v1393_v1 = vadd.f32 %v2554_v34, %v1352_v48  ;;  %v1353_v58 = vadd.f32 %v1298_v53, %v1039_v59 }
 0x1de   : > { %vm1427_vm12 = vcmp.ge.f32.partialorder %v1393_v1, 0.0  ;;  %v1461_v21 = vmul.f32 0.01, %v1393_v1  ;;  %v1394_v51 = vadd.f32 %v2554_v34, %v1353_v58 }
 0x1df   : > { %v989_v62 = vpop.f32.mrb[124].mxu0 }
 0x1e0   : > { %v1495_v31 = vsel %vm1427_vm12, %v1393_v1, %v1461_v21  ;;  %vm1428_vm13 = vcmp.ge.f32.partialorder %v1394_v51, 0.0  ;;  %v1462_v2 = vmul.f32 0.01, %v1394_v51  ;;  %v1040_v0 = vadd.f32 %v989_v62, %v2538_v24  ;;  %v1303_v63 = vpop.f32.mrb[124].mxu1  ;;  %v1952_v3 = vpop.f32.mrb[125].mxu0 }
 0x1e1   : > { %1529 = vst [vmem:[%s2562_s4 + $0xd0] sm:$0xff] %v1495_v31  ;;  %v2022_v39 = vpop.f32.mrb[125].mxu1  ;;  %v992_v12 = vpop.f32.mrb[126].mxu0 }
 0x1e2   : > { %v1496_v25 = vsel %vm1428_vm13, %v1394_v51, %v1462_v2  ;;  %v1354_v7 = vadd.f32 %v1303_v63, %v1040_v0  ;;  %v1041_v8 = vadd.f32 %v992_v12, %v2540_v36  ;;  %v1306_v37 = vpop.f32.mrb[126].mxu1  ;;  %v1953_v33 = vpop.f32.mrb[127].mxu0 }
 0x1e3   : > { %1530 = vst [vmem:[%s2562_s4 + $0xd8] sm:$0xff] %v1496_v25  ;;  %v2023_v35 = vpop.f32.mrb[127].mxu1 }
 0x1e4   : > { %v1395_v9 = vadd.f32 %v2554_v34, %v1354_v7  ;;  %v1355_v11 = vadd.f32 %v1306_v37, %v1041_v8 }
 0x1e6   : > { %vm1429_vm14 = vcmp.ge.f32.partialorder %v1395_v9, 0.0  ;;  %v1463_v13 = vmul.f32 0.01, %v1395_v9  ;;  %v1396_v24 = vadd.f32 %v2554_v34, %v1355_v11 }
 0x1e7   : > { %v997_v45 = vpop.f32.mrb[128].mxu0 }
 0x1e8   : > { %v1497_v17 = vsel %vm1429_vm14, %v1395_v9, %v1463_v13  ;;  %vm1430_vm15 = vcmp.ge.f32.partialorder %v1396_v24, 0.0  ;;  %v1464_v5 = vmul.f32 0.01, %v1396_v24  ;;  %v1042_v49 = vadd.f32 %v997_v45, %v2542_v46  ;;  %v1311_v36 = vpop.f32.mrb[128].mxu1  ;;  %v1956_v44 = vpop.f32.mrb[129].mxu0 }
 0x1e9   : > { %1531 = vst [vmem:[%s2562_s4 + $0xe0] sm:$0xff] %v1497_v17  ;;  %v2026_v18 = vpop.f32.mrb[129].mxu1  ;;  %v1000_v10 = vpop.f32.mrb[130].mxu0 }
 0x1ea   : > { %v1498_v22 = vsel %vm1430_vm15, %v1396_v24, %v1464_v5  ;;  %v1356_v56 = vadd.f32 %v1311_v36, %v1042_v49  ;;  %v1043_v23 = vadd.f32 %v1000_v10, %v2544_v55  ;;  %v1314_v41 = vpop.f32.mrb[130].mxu1  ;;  %v1957_v29 = vpop.f32.mrb[131].mxu0 }
 0x1eb   : > { %1532 = vst [vmem:[%s2562_s4 + $0xe8] sm:$0xff] %v1498_v22  ;;  %v2027_v30 = vpop.f32.mrb[131].mxu1 }
 0x1ec   : > { %v1397_v50 = vadd.f32 %v2554_v34, %v1356_v56  ;;  %v1357_v32 = vadd.f32 %v1314_v41, %v1043_v23 }
 0x1ee   : > { %vm1431_vm0 = vcmp.ge.f32.partialorder %v1397_v50, 0.0  ;;  %v1465_v38 = vmul.f32 0.01, %v1397_v50  ;;  %v1398_v46 = vadd.f32 %v2554_v34, %v1357_v32 }
 0x1ef   : > { %v1005_v20 = vpop.f32.mrb[132].mxu0 }
 0x1f0   : > { %v1499_v40 = vsel %vm1431_vm0, %v1397_v50, %v1465_v38  ;;  %vm1432_vm1 = vcmp.ge.f32.partialorder %v1398_v46, 0.0  ;;  %v1466_v19 = vmul.f32 0.01, %v1398_v46  ;;  %v1044_v42 = vadd.f32 %v1005_v20, %v2546_v27  ;;  %v1319_v55 = vpop.f32.mrb[132].mxu1  ;;  %v1960_v14 = vpop.f32.mrb[133].mxu0 }
 0x1f1   : > { %1533 = vst [vmem:[%s2562_s4 + $0xf0] sm:$0xff] %v1499_v40  ;;  %v2030_v61 = vpop.f32.mrb[133].mxu1  ;;  %v1008_v57 = vpop.f32.mrb[134].mxu0 }
 0x1f2   : > { %v1500_v43 = vsel %vm1432_vm1, %v1398_v46, %v1466_v19  ;;  %v1358_v54 = vadd.f32 %v1319_v55, %v1044_v42  ;;  %v1045_v28 = vadd.f32 %v1008_v57, %v2548_v4  ;;  %v1322_v26 = vpop.f32.mrb[134].mxu1  ;;  %v1961_v6 = vpop.f32.mrb[135].mxu0 }
 0x1f3   : > { %1534 = vst [vmem:[%s2562_s4 + $0xf8] sm:$0xff] %v1500_v43  ;;  %v2031_v47 = vpop.f32.mrb[135].mxu1 }
 0x1f4   : > { %v1399_v16 = vadd.f32 %v2554_v34, %v1358_v54  ;;  %v1359_v52 = vadd.f32 %v1322_v26, %v1045_v28 }
 0x1f6   : > { %vm1433_vm2 = vcmp.ge.f32.partialorder %v1399_v16, 0.0  ;;  %v1467_v27 = vmul.f32 0.01, %v1399_v16  ;;  %v1400_v48 = vadd.f32 %v2554_v34, %v1359_v52 }
 0x1f8   : > { %v1501_v59 = vsel %vm1433_vm2, %v1399_v16, %v1467_v27  ;;  %vm1434_vm3 = vcmp.ge.f32.partialorder %v1400_v48, 0.0  ;;  %v1468_v53 = vmul.f32 0.01, %v1400_v48 }
 0x1f9   : > { %1535 = vst [vmem:[%s2562_s4 + $0x100] sm:$0xff] %v1501_v59 }
 0x1fa   : > { %v1502_v15 = vsel %vm1434_vm3, %v1400_v48, %v1468_v53 }
 0x1fb   : > { %1536 = vst [vmem:[%s2562_s4 + $0x108] sm:$0xff] %v1502_v15 }
 0x1fc PF: > { %s13_s12 = sadd.s32 1, %s2054_s12  }
 0x1fd   : > { %p10_p4 = scmp.ge.s32.totalorder %s13_s12, 4  }
 0x1ff   :  { %12 = sbr.rel (!%p10_p4) target bundleno = 1 (0x1), region = 65 }

// kernel: encoder_forward.5
= control target key start
LH: loop header
LB: loop body
LE: loop exit
PB: predicated region body
PF: predicated region fallthrough
CT: control target
= control target key end

     0   :  { %s3346_s12 = smov 0   ;;  %s4355_s0 = inlined_call_operand.vmem [shape: f32[2,88,512], index: 0, kind: input, shape index: {}]   ;;  %s4356_s1 = inlined_call_operand.vmem [shape: bf16[4,512,128], index: 1, kind: input, shape index: {}]   ;;  %s4357_s2 = inlined_call_operand.vmem [shape: f32[1,128], index: 2, kind: input, shape index: {}]   ;;  %s4358_s3 = inlined_call_operand.vmem [shape: f32[2,72,128], index: 3, kind: output, shape index: {}]  }
   0x1 LB: > { %s2478_s13 = sadd.s32 4294967295, %s3324_s12   ;;  %p2482_p0 = scmp.ge.s32.totalorder %s3324_s12, 1  ;;  %s3324_s12 = sphi %s3346_s12, %s13_s12  }
   0x2   : > { %p137_p1 = scmp.lt.s32.totalorder %s3324_s12, 3 }
   0x4   : > { %p138_p2 = pnand %p2482_p0, %p137_p1 }
   0x5   : > { %v3186_v0 = vld [vmem:[%s4356_s1 + $0x140] sm:$0xff] (!%p138_p2)   ;;  %v3190_v4 = vld [vmem:[%s4356_s1 + $0x148] sm:$0xff] (!%p138_p2)   ;;  %v3194_v8 = vld [vmem:[%s4356_s1 + $0x150] sm:$0xff] (!%p138_p2)   ;;  %p161_p3 = scmp.lt.s32.totalorder (!%p138_p2), %s2478_s13, 1  ;;  %vm373_vm0 = vsmask.f32 (!%p138_p2), 7424 }
   0x6   : > { %141 = sbr.rel (%p138_p2) target bundleno = 417 (0x1a1), region = 32  ;;  %v3187_v1 = vld [vmem:[%s4356_s1 + $0x1c0] sm:$0xff] (!%p138_p2)   ;;  %2808 = vmatprep.subr.bf16.mxu0 (!%p138_p2), %v3186_v0  ;;  %v3191_v5 = vld [vmem:[%s4356_s1 + $0x1c8] sm:$0xff] (!%p138_p2)   ;;  %v3195_v9 = vld [vmem:[%s4356_s1 + $0x1d0] sm:$0xff] (!%p138_p2)   ;;  %vm1969_vm1 = vcmask (!%p138_p2), 1046528  }
   0x7   : > { %v3188_v2 = vld [vmem:[%s4356_s1 + $0x100] sm:$0xff] (!%p138_p2)   ;;  %2854 = vmatprep.subr.bf16.mxu1 (!%p138_p2), %v3187_v1  ;;  %v3192_v6 = vld [vmem:[%s4356_s1 + $0x108] sm:$0xff] (!%p138_p2)   ;;  %v3196_v10 = vld [vmem:[%s4356_s1 + $0x110] sm:$0xff] (!%p138_p2)  }
   0x8   : > { %v3189_v3 = vld [vmem:[%s4356_s1 + $0x180] sm:$0xff] (!%p138_p2)   ;;  %2809 = vmatpush3.bf16.msra.mxu0 (!%p138_p2), %v3188_v2  ;;  %v3193_v7 = vld [vmem:[%s4356_s1 + $0x188] sm:$0xff] (!%p138_p2)   ;;  %v3197_v11 = vld [vmem:[%s4356_s1 + $0x190] sm:$0xff] (!%p138_p2)  }
   0x9   : > { %2855 = vmatpush3.bf16.msra.mxu1 (!%p138_p2), %v3189_v3  ;;  %2810 = vmatprep.subr.bf16.mxu0 (!%p138_p2), %v3190_v4  ;;  %v3198_v12 = vld [vmem:[%s4356_s1 + $0x158] sm:$0xff] (!%p138_p2)   ;;  %v3202_v16 = vld [vmem:[%s4356_s1 + $0x160] sm:$0xff] (!%p138_p2)   ;;  %v3206_v20 = vld [vmem:[%s4356_s1 + $0x168] sm:$0xff] (!%p138_p2)  }
   0xa   : > { %2856 = vmatprep.subr.bf16.mxu1 (!%p138_p2), %v3191_v5  ;;  %v3199_v13 = vld [vmem:[%s4356_s1 + $0x1d8] sm:$0xff] (!%p138_p2)   ;;  %v3203_v17 = vld [vmem:[%s4356_s1 + $0x1e0] sm:$0xff] (!%p138_p2)   ;;  %v3207_v21 = vld [vmem:[%s4356_s1 + $0x1e8] sm:$0xff] (!%p138_p2)  }
   0xb   : > { %v3200_v14 = vld [vmem:[%s4356_s1 + $0x118] sm:$0xff] (!%p138_p2)   ;;  %v3204_v18 = vld [vmem:[%s4356_s1 + $0x120] sm:$0xff] (!%p138_p2)   ;;  %v3208_v22 = vld [vmem:[%s4356_s1 + $0x128] sm:$0xff] (!%p138_p2)  }
   0xc   : > { %2811 = vmatpush3.bf16.msra.mxu0 (!%p138_p2), %v3192_v6  ;;  %v3201_v15 = vld [vmem:[%s4356_s1 + $0x198] sm:$0xff] (!%p138_p2)   ;;  %v3205_v19 = vld [vmem:[%s4356_s1 + $0x1a0] sm:$0xff] (!%p138_p2)   ;;  %v3209_v23 = vld [vmem:[%s4356_s1 + $0x1a8] sm:$0xff] (!%p138_p2)  }
   0xd   : > { %2857 = vmatpush3.bf16.msra.mxu1 %v3193_v7  ;;  %2812 = vmatprep.subr.bf16.mxu0 %v3194_v8  ;;  %s4360_s13 = smov (!%p161_p3, %s2478_s13), 1  ;;  %v3210_v24 = vld [vmem:[%s4356_s1 + $0x170] sm:$0xff]   ;;  %v3214_v28 = vld [vmem:[%s4356_s1 + $0x178] sm:$0xff]   ;;  %v3218_v5 = vld [vmem:[%s4356_s1 + $0x40] sm:$0xff]  }
   0xe   : > { %2858 = vmatprep.subr.bf16.mxu1 %v3195_v9  ;;  %v3211_v25 = vld [vmem:[%s4356_s1 + $0x1f0] sm:$0xff]   ;;  %s3176_s16 = smul.u32 352, %s4360_s13  ;;  %v3215_v29 = vld [vmem:[%s4356_s1 + $0x1f8] sm:$0xff]   ;;  %v3219_v6 = vld [vmem:[%s4356_s1 + $0xc0] sm:$0xff]  }
   0xf   : > { %v3212_v26 = vld [vmem:[%s4356_s1 + $0x130] sm:$0xff]   ;;  %v3216_v30 = vld [vmem:[%s4356_s1 + $0x138] sm:$0xff]   ;;  %s3177_s6 = smul.u32 72, %s4360_s13 }
  0x10   : > { %2813 = vmatpush3.bf16.msra.mxu0 %v3196_v10  ;;  %v3213_v27 = vld [vmem:[%s4356_s1 + $0x1b0] sm:$0xff]   ;;  %s3454_s27 = scalar_lea.vmem %s4355_s0, %s3176_s16  ;;  %v3217_v31 = vld [vmem:[%s4356_s1 + $0x1b8] sm:$0xff]  }
  0x11   : > { %2859 = vmatpush3.bf16.msra.mxu1 %v3197_v11  ;;  %2814 = vmatprep.subr.bf16.mxu0 %v3198_v12  ;;  %v3463_v32 = vld [vmem:[%s3454_s27 + $0x28] sm:$0xff]  ;;  %v3474_v37 = vld [vmem:[%s3454_s27 + $0x38] sm:$0xff]  ;;  %v3483_v42 = vld [vmem:[%s3454_s27 + $0x20] sm:$0xff]  ;;  %s4326_s9 = scalar_lea.vmem %s4358_s3, %s3177_s6 }
  0x12   : > { %2860 = vmatprep.subr.bf16.mxu1 %v3199_v13  ;;  %v181_v33 = vld [vmem:[%s3454_s27 + $0x48] sm:$0xff]  ;;  %v183_v38 = vld [vmem:[%s3454_s27 + $0x58] sm:$0xff]  ;;  %v3491_v46 = vld [vmem:[%s3454_s27 + $0x40] sm:$0xff] }
  0x13   : > { %v3467_v34 = vld [vmem:[%s3454_s27 + $0x68] sm:$0xff]  ;;  %v3479_v40 = vld [vmem:[%s3454_s27 + $0x78] sm:$0xff]  ;;  %v3494_v47 = vld [vmem:[%s3454_s27 + $0x60] sm:$0xff] }
  0x14   : > { %2815 = vmatpush3.bf16.msra.mxu0 %v3200_v14  ;;  %v3470_v35 = vpack.c.bf16 %v3467_v34, %v181_v33  ;;  %v293_v36 = vld [vmem:[%s3454_s27 + $0x8] sm:$0xfe]  ;;  %v295_v41 = vld [vmem:[%s3454_s27 + $0x18] sm:$0xfe]  ;;  %v3487_v44 = vpack.c.bf16 %v3479_v40, %v183_v38  ;;  %v292_v48 = vld [vmem:[%s3454_s27] sm:$0xfe]  ;;  %v3499_v51 = vpack.c.bf16 %v3494_v47, %v3491_v46 }
  0x15   : > { %2861 = vmatpush3.bf16.msra.mxu1 %v3201_v15  ;;  %2816 = vmatprep.subr.bf16.mxu0 %v3202_v16  ;;  %v301_v39 = vpack.c.bf16 %v3463_v32, %v293_v36  ;;  %v303_v45 = vpack.c.bf16 %v3474_v37, %v295_v41  ;;  %v300_v52 = vpack.c.bf16 %v3483_v42, %v292_v48  ;;  %v3503_v53 = vld [vmem:[%s3454_s27 + $0x30] sm:$0xff]  ;;  %v3220_v14 = vld [vmem:[%s4356_s1] sm:$0xff]   ;;  %v191_v38 = vld [vmem:[%s3454_s27 + $0x98] sm:$0xff] }
  0x16   : > { %2862 = vmatprep.subr.bf16.mxu1 %v3203_v17  ;;  %v394_v43 = vshll.u32 %v3470_v35, 16  ;;  %v3506_v54 = vld [vmem:[%s3454_s27 + $0x50] sm:$0xff]  ;;  %v418_v59 = vshll.u32 %v3487_v44, 16  ;;  %v382_v0 = vshll.u32 %v3499_v51, 16  ;;  %v422_v33 = vshrl.u32 %v3499_v51, 16  ;;  %v188_v41 = vld [vmem:[%s3454_s27 + $0x80] sm:$0xff] }
  0x17   : > { %v387_v49 = vshrl.u32 %v301_v39, 16  ;;  %v389_v50 = vshll.u32 %v301_v39, 16  ;;  %v3509_v55 = vld [vmem:[%s3454_s27 + $0x70] sm:$0xff]  ;;  %v411_v57 = vshrl.u32 %v303_v45, 16  ;;  %v413_v58 = vshll.u32 %v303_v45, 16  ;;  %v3560_v39 = vld [vmem:[%s3454_s27 + $0xb8] sm:$0xff] }
  0x18   : > { %2817 = vmatpush3.bf16.msra.mxu0 %v3204_v18  ;;  %v396_v56 = vrot.slane %v394_v43, 1  ;;  %v294_v60 = vld [vmem:[%s3454_s27 + $0x10] sm:$0xfe]  ;;  %v375_v62 = vshrl.u32 %v300_v52, 16  ;;  %v377_v63 = vshll.u32 %v300_v52, 16  ;;  %v420_v2 = vrot.slane %v418_v59, 1 }
  0x19   : > { %2863 = vmatpush3.bf16.msra.mxu1 %v3205_v19  ;;  %2818 = vmatprep.subr.bf16.mxu0 %v3206_v20  ;;  %v391_v61 = vrot.slane %v389_v50, 1  ;;  %v415_v1 = vrot.slane %v413_v58, 1  ;;  %v3516_v3 = vpack.c.bf16 %v3509_v55, %v3506_v54  ;;  %v302_v4 = vpack.c.bf16 %v3503_v53, %v294_v60  ;;  %v3221_v20 = vld [vmem:[%s4356_s1 + $0x80] sm:$0xff]   ;;  %v190_v52 = vld [vmem:[%s3454_s27 + $0x90] sm:$0xff] }
  0x1a   : > { %2864 = vmatprep.subr.bf16.mxu1 %v3207_v21  ;;  %v379_v8 = vrot.slane %v377_v63, 1  ;;  %v384_v9 = vrot.slane %v382_v0, 1  ;;  %v3222_v21 = vld [vmem:[%s4356_s1 + $0x48] sm:$0xff]   ;;  %v3571_v50 = vld [vmem:[%s3454_s27 + $0xa0] sm:$0xff]  ;;  %v3578_v58 = vpack.c.bf16 %v191_v38, %v3479_v40  ;;  %v3581_v59 = vpack.c.bf16 %v188_v41, %v3494_v47  ;;  %v3227_v0 = vld [vmem:[%s4356_s1 + $0xd0] sm:$0xff]  }
  0x1b   : > { %v392_v7 = vor.u32 %v391_v61, %v387_v49  ;;  %v416_v10 = vor.u32 %v415_v1, %v411_v57  ;;  %v399_v11 = vshrl.u32 %v302_v4, 16  ;;  %v401_v12 = vshll.u32 %v302_v4, 16  ;;  %v3575_v57 = vld [vmem:[%s3454_s27 + $0xb0] sm:$0xff] }
  0x1c   : > { %2819 = vmatpush3.bf16.msra.mxu0 %v3208_v22  ;;  %v406_v13 = vshll.u32 %v3516_v3, 16  ;;  %v380_v16 = vor.u32 %v379_v8, %v375_v62  ;;  %v438_v43 = vshrl.u32 %v3516_v3, 16  ;;  %v3568_v49 = vpack.c.bf16 %v3560_v39, %v191_v38  ;;  %v3226_v61 = vld [vmem:[%s4356_s1 + $0x50] sm:$0xff]  }
  0x1d   : > { %2865 = vmatpush3.bf16.msra.mxu1 %v3209_v23  ;;  %2820 = vmatprep.subr.bf16.mxu0 %v3210_v24  ;;  %v397_v15 = vsel %vm373_vm0, %v392_v7, %v396_v56  ;;  %v421_v17 = vsel %vm373_vm0, %v416_v10, %v420_v2  ;;  %v403_v18 = vrot.slane %v401_v12, 1  ;;  %v3223_v24 = vld [vmem:[%s4356_s1 + $0xc8] sm:$0xff]   ;;  %v3588_v60 = vpack.c.bf16 %v3575_v57, %v190_v52  ;;  %v3229_v7 = vld [vmem:[%s4356_s1 + $0x90] sm:$0xff]  }
  0x1e   : > { %2866 = vmatprep.subr.bf16.mxu1 %v3211_v25  ;;  %774 = vmatprep.mubr.bf16.mxu0 %v397_v15  ;;  %v408_v19 = vrot.slane %v406_v13, 1  ;;  %v385_v22 = vsel %vm373_vm0, %v380_v16, %v384_v9  ;;  %v430_v25 = vshrl.u32 %v3470_v35, 16  ;;  %v3594_v40 = vpack.c.bf16 %v190_v52, %v3509_v55  ;;  %v3228_v55 = vld [vmem:[%s4356_s1 + $0x10] sm:$0xff]   ;;  %v3611_v12 = vld [vmem:[%s3454_s27 + $0xe8] sm:$0xff]  ;;  %v199_v16 = vld [vmem:[%s3454_s27 + $0xd8] sm:$0xff] }
  0x1f   : > { %846 = vmatprep.mubr.bf16.mxu1 %v421_v17  ;;  %v404_v23 = vor.u32 %v403_v18, %v399_v11  ;;  %v450_v47 = vshll.u32 %v3568_v49, 16  ;;  %v424_v63 = vor.u32 %v422_v33, %v384_v9  ;;  %v197_v11 = vld [vmem:[%s3454_s27 + $0xc8] sm:$0xff]  ;;  %v3620_v17 = vld [vmem:[%s3454_s27 + $0xf8] sm:$0xff]  ;;  %v478_v18 = vshrl.u32 %v3568_v49, 16  ;;  %v3640_v33 = vld [vmem:[%s3454_s27 + $0xe0] sm:$0xff] }
  0x20   : > { %2821 = vmatpush3.bf16.msra.mxu0 %v3212_v26  ;;  %v3224_v26 = vld [vmem:[%s4356_s1 + $0x8] sm:$0xff]   ;;  %v432_v48 = vor.u32 %v430_v25, %v396_v56  ;;  %v3585_v56 = vpack.c.bf16 %v3571_v50, %v188_v41  ;;  %v198_v38 = vld [vmem:[%s3454_s27 + $0xd0] sm:$0xff] }
  0x21   : > { %2867 = vmatpush3.bf16.msra.mxu1 %v3213_v27  ;;  %2822 = vmatprep.subr.bf16.mxu0 %v3214_v28  ;;  %v409_v27 = vsel %vm373_vm0, %v404_v23, %v408_v19  ;;  %v3225_v28 = vld [vmem:[%s4356_s1 + $0x88] sm:$0xff]   ;;  %v3644_v41 = vld [vmem:[%s3454_s27 + $0xf0] sm:$0xff] }
  0x22   : > { %2868 = vmatprep.subr.bf16.mxu1 %v3215_v29  ;;  %v189_v29 = vld [vmem:[%s3454_s27 + $0x88] sm:$0xff]  ;;  %v426_v4 = vshll.u32 %v3585_v56, 16  ;;  %v454_v23 = vshrl.u32 %v3585_v56, 16 }
  0x23   : > { %v3565_v45 = vpack.c.bf16 %v189_v29, %v3467_v34 }
  0x24   : > { %2823 = vmatpush3.bf16.msra.mxu0 %v3216_v30  ;;  %v3551_v30 = vld [vmem:[%s3454_s27 + $0xa8] sm:$0xff]  ;;  %v428_v9 = vrot.slane %v426_v4, 1  ;;  %v3664_v4 = vpack.c.bf16 %v199_v16, %v3560_v39 }
  0x25   : > { %2869 = vmatpush3.bf16.msra.mxu1 %v3217_v31  ;;  %2900 = vmatprep.subr.bf16.mxu0 %v3218_v5  ;;  %v446_v31 = vshrl.u32 %v3487_v44, 16  ;;  %v3556_v36 = vpack.c.bf16 %v3551_v30, %v189_v29  ;;  %v440_v5 = vor.u32 %v438_v43, %v408_v19 }
  0x26   : > { %2946 = vmatprep.subr.bf16.mxu1 %v3219_v6  ;;  %v442_v6 = vshll.u32 %v3588_v60, 16  ;;  %v429_v19 = vsel %vm373_vm0, %v424_v63, %v428_v9 }
  0x27   : > { %775 = vmatmul.mubr.bf16.vlgmr.msra.gmra.mrb[0].mxu0 %v385_v22  ;;  %v434_v34 = vshll.u32 %v3556_v36, 16  ;;  %v448_v62 = vor.u32 %v446_v31, %v420_v2  ;;  %v452_v2 = vrot.slane %v450_v47, 1  ;;  %v462_v15 = vshrl.u32 %v3556_v36, 16  ;;  %v3230_v22 = vld [vmem:[%s4356_s1 + $0x58] sm:$0xff]  }
  0x28   : > { %2901 = vmatpush3.bf16.msra.mxu0 %v3220_v14  ;;  %847 = vmatmul.mubr.bf16.vlgmr.msra.gmra.mrb[0].mxu1 %v409_v27  ;;  %v444_v10 = vrot.slane %v442_v6, 1  ;;  %v3615_v14 = vpack.c.bf16 %v3611_v12, %v197_v11  ;;  %v196_v27 = vld [vmem:[%s3454_s27 + $0xc0] sm:$0xff]  ;;  %v3232_v47 = vld [vmem:[%s4356_s1 + $0x18] sm:$0xff]  }
  0x29   : > { %2902 = vmatprep.subr.bf16.mxu0 %v3222_v21  ;;  %2947 = vmatpush3.bf16.msra.mxu1 %v3221_v20  ;;  %v436_v1 = vrot.slane %v434_v34, 1  ;;  %v453_v13 = vsel %vm373_vm0, %v448_v62, %v452_v2  ;;  %v3626_v21 = vpack.c.bf16 %v3620_v17, %v199_v16  ;;  %v480_v29 = vor.u32 %v478_v18, %v452_v2  ;;  %v3237_v16 = vld [vmem:[%s4356_s1 + $0xa0] sm:$0xff]   ;;  %v3692_v18 = vld [vmem:[%s3454_s27 + $0x108] sm:$0xff] }
  0x2a   : > { %2948 = vmatprep.subr.bf16.mxu1 %v3223_v24  ;;  %854 = vmatprep.mubr.bf16.mxu1 %v453_v13  ;;  %v445_v20 = vsel %vm373_vm0, %v440_v5, %v444_v10  ;;  %v466_v25 = vshll.u32 %v3615_v14, 16  ;;  %v494_v43 = vshrl.u32 %v3615_v14, 16  ;;  %v3649_v34 = vpack.c.bf16 %v3640_v33, %v196_v27  ;;  %v3236_v13 = vld [vmem:[%s4356_s1 + $0x20] sm:$0xff]  }
  0x2b   : > { %v437_v8 = vsel %vm373_vm0, %v432_v48, %v436_v1  ;;  %v464_v24 = vor.u32 %v462_v15, %v436_v1  ;;  %v482_v31 = vshll.u32 %v3626_v21, 16  ;;  %v510_v48 = vshrl.u32 %v3626_v21, 16 }
  0x2c   : > { %2903 = vmatpush3.bf16.msra.mxu0 %v3224_v26  ;;  %782 = vmatprep.mubr.bf16.mxu0 %v437_v8  ;;  %v3231_v26 = vld [vmem:[%s4356_s1 + $0xd8] sm:$0xff]   ;;  %v468_v52 = vrot.slane %v466_v25, 1  ;;  %v3652_v62 = vpack.c.bf16 %v3644_v41, %v198_v38  ;;  %v3661_v1 = vpack.c.bf16 %v197_v11, %v3551_v30  ;;  %v3667_v5 = vpack.c.bf16 %v196_v27, %v3571_v50  ;;  %v3234_v30 = vld [vmem:[%s4356_s1 + $0x60] sm:$0xff]  }
  0x2d   : > { %2904 = vmatprep.subr.bf16.mxu0 %v3226_v61  ;;  %2949 = vmatpush3.bf16.msra.mxu1 %v3225_v28  ;;  %v470_v28 = vshrl.u32 %v3588_v60, 16  ;;  %v456_v61 = vor.u32 %v454_v23, %v428_v9  ;;  %v484_v63 = vrot.slane %v482_v31, 1  ;;  %v486_v39 = vshrl.u32 %v3649_v34, 16  ;;  %v3235_v11 = vld [vmem:[%s4356_s1 + $0xe0] sm:$0xff]   ;;  %v299_v25 = vld [vmem:[%s3454_s27 + $0x138] sm:$0x1] }
  0x2e   : > { %2950 = vmatprep.subr.bf16.mxu1 %v3227_v0  ;;  %v3233_v0 = vld [vmem:[%s4356_s1 + $0x98] sm:$0xff]   ;;  %v469_v6 = vsel %vm373_vm0, %v464_v24, %v468_v52  ;;  %v3678_v50 = vpack.c.bf16 %v198_v38, %v3575_v57  ;;  %v496_v23 = vor.u32 %v494_v43, %v468_v52  ;;  %v3707_v38 = vld [vmem:[%s3454_s27 + $0x110] sm:$0xff] }
  0x2f   : > { %783 = vmatmul.mubr.bf16.gmra.mrb[4].mxu0 %v429_v19  ;;  %v472_v2 = vor.u32 %v470_v28, %v444_v10  ;;  %v485_v8 = vsel %vm373_vm0, %v480_v29, %v484_v63  ;;  %v297_v19 = vld [vmem:[%s3454_s27 + $0x128] sm:$0x1]  ;;  %v3698_v24 = vld [vmem:[%s3454_s27 + $0x118] sm:$0xff]  ;;  %v512_v28 = vor.u32 %v510_v48, %v484_v63  ;;  %v296_v29 = vld [vmem:[%s3454_s27 + $0x120] sm:$0x1]  ;;  %v3721_v63 = vpack.c.bf16 %v3692_v18, %v3611_v12 }
  0x30   : > { %2905 = vmatpush3.bf16.msra.mxu0 %v3228_v55  ;;  %855 = vmatmul.mubr.bf16.gmra.mrb[4].mxu1 %v445_v20  ;;  %v458_v55 = vshll.u32 %v3649_v34, 16  ;;  %v502_v20 = vshrl.u32 %v3652_v62, 16  ;;  %v307_v27 = vpack.c.bf16 %v299_v25, %v3698_v24  ;;  %v3239_v48 = vld [vmem:[%s4356_s1 + $0xe8] sm:$0xff]   ;;  %v3736_v12 = vpack.c.bf16 %v3707_v38, %v3644_v41  ;;  %v3242_v41 = vld [vmem:[%s4356_s1 + $0x70] sm:$0xff]  }
  0x31   : > { %2951 = vmatpush3.bf16.msra.mxu1 %v3229_v7  ;;  %2906 = vmatprep.subr.bf16.mxu0 %v3230_v22  ;;  %v474_v7 = vshll.u32 %v3652_v62, 16  ;;  %v305_v22 = vpack.c.bf16 %v297_v19, %v3692_v18 }
  0x32   : > { %2952 = vmatprep.subr.bf16.mxu1 %v3231_v26  ;;  %790 = vmatprep.mubr.bf16.mxu0 %v469_v6  ;;  %v460_v9 = vrot.slane %v458_v55, 1  ;;  %v3702_v26 = vld [vmem:[%s3454_s27 + $0x100] sm:$0xff]  ;;  %v3238_v55 = vld [vmem:[%s4356_s1 + $0x68] sm:$0xff]   ;;  %v527_v25 = vshrl.u32 %v307_v27, 16 }
  0x33   : > { %862 = vmatprep.mubr.bf16.mxu1 %v485_v8  ;;  %v476_v10 = vrot.slane %v474_v7, 1  ;;  %v304_v6 = vpack.c.bf16 %v296_v29, %v3702_v26  ;;  %v3725_v7 = vpack.c.bf16 %v3698_v24, %v3620_v17  ;;  %v3729_v8 = vpack.c.bf16 %v3702_v26, %v3640_v33  ;;  %v3241_v17 = vld [vmem:[%s4356_s1 + $0xa8] sm:$0xff]  }
  0x34   : > { %2907 = vmatpush3.bf16.msra.mxu0 %v3232_v47  ;;  %v461_v15 = vsel %vm373_vm0, %v456_v61, %v460_v9  ;;  %v488_v31 = vor.u32 %v486_v39, %v460_v9  ;;  %v298_v61 = vld [vmem:[%s3454_s27 + $0x130] sm:$0x1]  ;;  %v1367_v47 = vshll.u32 %v3565_v45, 16 }
  0x35   : > { %2953 = vmatpush3.bf16.msra.mxu1 %v3233_v0  ;;  %2908 = vmatprep.subr.bf16.mxu0 %v3234_v30  ;;  %v477_v57 = vsel %vm373_vm0, %v472_v2, %v476_v10  ;;  %v498_v0 = vshll.u32 %v305_v22, 16  ;;  %v306_v43 = vpack.c.bf16 %v298_v61, %v3707_v38  ;;  %v504_v52 = vor.u32 %v502_v20, %v476_v10  ;;  %v3240_v10 = vld [vmem:[%s4356_s1 + $0x28] sm:$0xff]  }
  0x36   : > { %2954 = vmatprep.subr.bf16.mxu1 %v3235_v11  ;;  %v514_v2 = vshll.u32 %v307_v27, 16  ;;  %v490_v39 = vshll.u32 %v304_v6, 16  ;;  %v518_v61 = vshrl.u32 %v304_v6, 16  ;;  %v3246_v27 = vld [vmem:[%s4356_s1 + $0x78] sm:$0xff]  }
  0x37   : > { %791 = vmatmul.mubr.bf16.gmra.mrb[8].mxu0 %v461_v15  ;;  %v500_v30 = vrot.slane %v498_v0, 1  ;;  %v506_v9 = vshll.u32 %v306_v43, 16  ;;  %v524_v0 = vshrl.u32 %v306_v43, 16  ;;  %v3247_v6 = vld [vmem:[%s4356_s1 + $0xf8] sm:$0xff]  }
  0x38   : > { %2909 = vmatpush3.bf16.msra.mxu0 %v3236_v13  ;;  %863 = vmatmul.mubr.bf16.gmra.mrb[8].mxu1 %v477_v57  ;;  %v516_v11 = vrot.slane %v514_v2, 1  ;;  %v492_v13 = vrot.slane %v490_v39, 1  ;;  %v3248_v43 = vld [vmem:[%s4356_s1 + $0x38] sm:$0xff]   ;;  %v173_v39 = vld [vmem:[%s3454_s27 + $0x8] sm:$0xff] }
  0x39   : > { %2955 = vmatpush3.bf16.msra.mxu1 %v3237_v16  ;;  %2910 = vmatprep.subr.bf16.mxu0 %v3238_v55  ;;  %v501_v33 = vsel %vm373_vm0, %v496_v23, %v500_v30  ;;  %v508_v15 = vrot.slane %v506_v9, 1  ;;  %v521_v16 = vshrl.u32 %v305_v22, 16  ;;  %v3243_v23 = vld [vmem:[%s4356_s1 + $0xf0] sm:$0xff]   ;;  %v1355_v9 = vshll.u32 %v3581_v59, 16 }
  0x3a   : > { %2956 = vmatprep.subr.bf16.mxu1 %v3239_v48  ;;  %798 = vmatprep.mubr.bf16.mxu0 %v501_v33  ;;  %v517_v57 = vsel %vm373_vm0, %v512_v28, %v516_v11  ;;  %v493_v19 = vsel %vm373_vm0, %v488_v31, %v492_v13  ;;  %v3244_v28 = vld [vmem:[%s4356_s1 + $0x30] sm:$0xff]   ;;  %v529_v22 = vor.u32 %v527_v25, %v516_v11  ;;  %v3767_v48 = vrot.slane %v1367_v47, 1 }
  0x3b   : > { %870 = vmatprep.mubr.bf16.mxu1 %v517_v57  ;;  %v509_v20 = vsel %vm373_vm0, %v504_v52, %v508_v15  ;;  %v523_v29 = vor.u32 %v521_v16, %v500_v30  ;;  %v3245_v31 = vld [vmem:[%s4356_s1 + $0xb0] sm:$0xff]   ;;  %v1391_v52 = vshll.u32 %v3578_v58, 16  ;;  %v520_v55 = vor.u32 %v518_v61, %v492_v13  ;;  %v3249_v30 = vld [vmem:[%s4356_s1 + $0xb8] sm:$0xff]   ;;  %v172_v57 = vld [vmem:[%s3454_s27] sm:$0xff] }
  0x3c   : > { %2911 = vmatpush3.bf16.msra.mxu0 %v3240_v10  ;;  %v526_v2 = vor.u32 %v524_v0, %v508_v15  ;;  %v1403_v10 = vshrl.u32 %v3565_v45, 16  ;;  %v209_v11 = vpack.c.bf16 %v3463_v32, %v173_v39  ;;  %v1379_v33 = vshll.u32 %v3594_v40, 16  ;;  %v3250_v16 = vld [vmem:[%s4356_s1 + $0x240] sm:$0xff]  }
  0x3d   : > { %2957 = vmatpush3.bf16.msra.mxu1 %v3241_v17  ;;  %2912 = vmatprep.subr.bf16.mxu0 %v3242_v41  ;;  %v175_v17 = vld [vmem:[%s3454_s27 + $0x18] sm:$0xff]  ;;  %v1407_v13 = vshll.u32 %v3661_v1, 16  ;;  %v1419_v47 = vshrl.u32 %v3578_v58, 16  ;;  %v174_v41 = vld [vmem:[%s3454_s27 + $0x10] sm:$0xff]  ;;  %v3251_v32 = vld [vmem:[%s4356_s1 + $0x2c0] sm:$0xff]   ;;  %v1411_v39 = vshrl.u32 %v3594_v40, 16 }
  0x3e   : > { %2958 = vmatprep.subr.bf16.mxu1 %v3243_v23  ;;  %v211_v15 = vpack.c.bf16 %v3474_v37, %v175_v17  ;;  %v3792_v37 = vrot.slane %v1355_v9, 1  ;;  %v3256_v9 = vld [vmem:[%s4356_s1 + $0x208] sm:$0xff]  }
  0x3f   : > { %799 = vmatmul.mubr.bf16.gmra.mrb[12].mxu0 %v493_v19  ;;  %v3786_v19 = vrot.slane %v1391_v52, 1  ;;  %v1409_v23 = vrot.slane %v1407_v13, 1  ;;  %v3253_v52 = vld [vmem:[%s4356_s1 + $0x280] sm:$0xff]   ;;  %v3257_v17 = vld [vmem:[%s4356_s1 + $0x288] sm:$0xff]   ;;  %v1435_v13 = vshrl.u32 %v3661_v1, 16 }
  0x40   : > { %871 = vmatmul.mubr.bf16.gmra.mrb[12].mxu1 %v509_v20  ;;  %806 = vmatprep.mubr.bf16.mxu0 %v523_v29  ;;  %v1405_v20 = vor.u32 %v1403_v10, %v3767_v48  ;;  %v1423_v29 = vshll.u32 %v3664_v4, 16 }
  0x41   : > { %2913 = vmatpush3.bf16.msra.mxu0 %v3244_v28  ;;  %878 = vmatprep.mubr.bf16.mxu1 %v529_v22  ;;  %v1421_v25 = vor.u32 %v1419_v47, %v3786_v19  ;;  %v3796_v28 = vrot.slane %v1379_v33, 1  ;;  %v1395_v22 = vshrl.u32 %v3581_v59, 16  ;;  %v3258_v47 = vld [vmem:[%s4356_s1 + $0x250] sm:$0xff]  }
  0x42   : > { %2959 = vmatpush3.bf16.msra.mxu1 %v3245_v31  ;;  %2914 = vmatprep.subr.bf16.mxu0 %v3246_v27  ;;  %v3799_v61 = vsel %vm373_vm0, %v1405_v20, %v1409_v23  ;;  %v3252_v31 = vld [vmem:[%s4356_s1 + $0x200] sm:$0xff]   ;;  %v1425_v0 = vrot.slane %v1423_v29, 1  ;;  %v208_v27 = vpack.c.bf16 %v3483_v42, %v172_v57  ;;  %v3255_v42 = vld [vmem:[%s4356_s1 + $0x2c8] sm:$0xff]   ;;  %v3259_v57 = vld [vmem:[%s4356_s1 + $0x2d0] sm:$0xff]  }
  0x43   : > { %2960 = vmatprep.subr.bf16.mxu1 %v3247_v6  ;;  %v210_v6 = vpack.c.bf16 %v3503_v53, %v174_v41  ;;  %v1413_v10 = vor.u32 %v1411_v39, %v3796_v28  ;;  %v1437_v41 = vor.u32 %v1435_v13, %v1409_v23  ;;  %v3261_v29 = vld [vmem:[%s4356_s1 + $0x290] sm:$0xff]   ;;  %v3266_v39 = vld [vmem:[%s4356_s1 + $0x260] sm:$0xff]  }
  0x45   : > { %2915 = vmatpush3.bf16.msra.mxu0 %v3248_v43  ;;  %v3254_v43 = vld [vmem:[%s4356_s1 + $0x248] sm:$0xff]  }
  0x46   : > { %2961 = vmatpush3.bf16.msra.mxu1 %v3249_v30  ;;  %2992 = vmatprep.subr.bf16.mxu0 %v3250_v16  ;;  %v3816_v30 = vsel %vm373_vm0, %v1421_v25, %v1425_v0  ;;  %v1439_v16 = vshll.u32 %v3721_v63, 16  ;;  %v1451_v25 = vshrl.u32 %v3664_v4, 16 }
  0x47   : > { %807 = vmatmul.mubr.bf16.gmra.mrb[16].mxu0 %v520_v55  ;;  %3038 = vmatprep.subr.bf16.mxu1 %v3251_v32  ;;  %v1397_v55 = vor.u32 %v1395_v22, %v3792_v37  ;;  %v3260_v32 = vld [vmem:[%s4356_s1 + $0x210] sm:$0xff]   ;;  %v1455_v22 = vshll.u32 %v3725_v7, 16 }
  0x48   : > { %879 = vmatmul.mubr.bf16.gmra.mrb[16].mxu1 %v526_v2  ;;  %1110 = vmatprep.mubr.bf16.mxu0 %v209_v11  ;;  %v1399_v2 = vshll.u32 %v3667_v5, 16  ;;  %v1415_v11 = vshll.u32 %v3678_v50, 16  ;;  %v3853_v23 = vrot.slane %v1439_v16, 1  ;;  %v3274_v16 = vld [vmem:[%s4356_s1 + $0x270] sm:$0xff]  }
  0x49   : > { %1182 = vmatprep.mubr.bf16.mxu1 %v211_v15 }
  0x4a   : > { %v1401_v53 = vrot.slane %v1399_v2, 1  ;;  %v1417_v15 = vrot.slane %v1415_v11, 1  ;;  %v1447_v11 = vshll.u32 %v3736_v12, 16 }
  0x4c   : > { %v3831_v33 = vsel %vm373_vm0, %v1397_v55, %v1401_v53  ;;  %v3847_v20 = vsel %vm373_vm0, %v1413_v10, %v1417_v15  ;;  %v3870_v55 = vrot.slane %v1455_v22, 1  ;;  %v3907_v13 = vrot.slane %v1447_v11, 1  ;;  %v3279_v22 = vld [vmem:[%s4356_s1 + $0x2f8] sm:$0xff]  }
  0x4f   : > { %1111 = vmatmul.mubr.bf16.vlgmr.msra.gmra.mrb[20].mxu0 %v208_v27  ;;  %v3864_v27 = vsel %vm373_vm0, %v1437_v41, %v3853_v23  ;;  %v3273_v41 = vld [vmem:[%s4356_s1 + $0x2a8] sm:$0xff]  }
  0x50   : > { %1183 = vmatmul.mubr.bf16.vlgmr.msra.gmra.mrb[20].mxu1 %v210_v6  ;;  %2993 = vmatpush3.bf16.msra.mxu0 %v3252_v31  ;;  %v3263_v31 = vld [vmem:[%s4356_s1 + $0x2d8] sm:$0xff]   ;;  %v1427_v6 = vshrl.u32 %v3667_v5, 16 }
  0x51   : > { %3039 = vmatpush3.bf16.msra.mxu1 %v3253_v52  ;;  %2994 = vmatprep.subr.bf16.mxu0 %v3254_v43  ;;  %v3264_v52 = vld [vmem:[%s4356_s1 + $0x218] sm:$0xff]   ;;  %v1431_v43 = vshll.u32 %v3729_v8, 16 }
  0x52   : > { %3040 = vmatprep.subr.bf16.mxu1 %v3255_v42  ;;  %1118 = vmatprep.mubr.bf16.mxu0 %v3470_v35  ;;  %v3262_v35 = vld [vmem:[%s4356_s1 + $0x258] sm:$0xff]   ;;  %v1429_v2 = vor.u32 %v1427_v6, %v1401_v53 }
  0x53   : > { %1190 = vmatprep.mubr.bf16.mxu1 %v3487_v44  ;;  %v1453_v44 = vor.u32 %v1451_v25, %v1425_v0  ;;  %v3265_v0 = vld [vmem:[%s4356_s1 + $0x298] sm:$0xff]   ;;  %v3891_v53 = vrot.slane %v1431_v43, 1  ;;  %v225_v25 = vpack.c.bf16 %v3692_v18, %v3692_v18  ;;  %v1223_v18 = vld [vmem:[%s3454_s27 + $0x28] sm:$0xfe] }
  0x54   : > { %2995 = vmatpush3.bf16.msra.mxu0 %v3256_v9  ;;  %v3268_v9 = vld [vmem:[%s4356_s1 + $0x220] sm:$0xff]   ;;  %v1225_v6 = vld [vmem:[%s3454_s27 + $0x38] sm:$0xfe] }
  0x55   : > { %3041 = vmatpush3.bf16.msra.mxu1 %v3257_v17  ;;  %2996 = vmatprep.subr.bf16.mxu0 %v3258_v47  ;;  %v3883_v42 = vsel %vm373_vm0, %v1453_v44, %v3870_v55  ;;  %v3270_v17 = vld [vmem:[%s4356_s1 + $0x268] sm:$0xff]   ;;  %v1984_v44 = vrot.slane %v3661_v1, 1  ;;  %v3969_v43 = vld [vmem:[%s3454_s27 + $0x58] sm:$0xff]  ;;  %v3285_v1 = vld [vmem:[%s4356_s1 + $0x380] sm:$0xff]  }
  0x56   : > { %3042 = vmatprep.subr.bf16.mxu1 %v3259_v57  ;;  %v3271_v47 = vld [vmem:[%s4356_s1 + $0x2e8] sm:$0xff]  }
  0x57   : > { %1119 = vmatmul.mubr.bf16.gmra.mrb[24].mxu0 %v3499_v51  ;;  %v1443_v51 = vshrl.u32 %v3678_v50, 16 }
  0x58   : > { %1191 = vmatmul.mubr.bf16.gmra.mrb[24].mxu1 %v3516_v3  ;;  %2997 = vmatpush3.bf16.msra.mxu0 %v3260_v32  ;;  %v3267_v3 = vld [vmem:[%s4356_s1 + $0x2e0] sm:$0xff]   ;;  %v3276_v32 = vld [vmem:[%s4356_s1 + $0x230] sm:$0xff]  }
  0x59   : > { %3043 = vmatpush3.bf16.msra.mxu1 %v3261_v29  ;;  %1126 = vmatprep.mubr.bf16.mxu0 %v3556_v36  ;;  %v1445_v10 = vor.u32 %v1443_v51, %v1417_v15  ;;  %v3269_v36 = vld [vmem:[%s4356_s1 + $0x2a0] sm:$0xff]   ;;  %v3272_v15 = vld [vmem:[%s4356_s1 + $0x228] sm:$0xff]   ;;  %v227_v29 = vpack.c.bf16 %v3698_v24, %v3698_v24 }
  0x5a   : > { %1198 = vmatprep.mubr.bf16.mxu1 %v3568_v49  ;;  %2998 = vmatprep.subr.bf16.mxu0 %v3262_v35  ;;  %v3902_v49 = vsel %vm373_vm0, %v1429_v2, %v3891_v53  ;;  %v3278_v35 = vld [vmem:[%s4356_s1 + $0x278] sm:$0xff]  }
  0x5b   : > { %3044 = vmatprep.subr.bf16.mxu1 %v3263_v31  ;;  %v3917_v57 = vsel %vm373_vm0, %v1445_v10, %v3907_v13  ;;  %v1988_v31 = vrot.slane %v3664_v4, 1  ;;  %v1971_v10 = vrot.slane %v3581_v59, 1 }
  0x5c   : > { %2999 = vmatpush3.bf16.msra.mxu0 %v3264_v52  ;;  %v1222_v52 = vld [vmem:[%s3454_s27 + $0x20] sm:$0xfe] }
  0x5d   : > { %3045 = vmatpush3.bf16.msra.mxu1 %v3265_v0  ;;  %3000 = vmatprep.subr.bf16.mxu0 %v3266_v39  ;;  %v3965_v0 = vld [vmem:[%s3454_s27 + $0x48] sm:$0xff]  ;;  %v1265_v39 = vpack.c.bf16 %v3969_v43, %v1225_v6  ;;  %v1262_v51 = vpack.c.bf16 %v3491_v46, %v1222_v52  ;;  %v3280_v46 = vld [vmem:[%s4356_s1 + $0x238] sm:$0xff]  }
  0x5e   : > { %3046 = vmatprep.subr.bf16.mxu1 %v3267_v3  ;;  %v1263_v2 = vpack.c.bf16 %v3965_v0, %v1223_v18  ;;  %v1224_v3 = vld [vmem:[%s3454_s27 + $0x30] sm:$0xfe] }
  0x5f   : > { %1127 = vmatmul.mubr.bf16.gmra.mrb[28].mxu0 %v3585_v56  ;;  %v3275_v56 = vld [vmem:[%s4356_s1 + $0x2f0] sm:$0xff]  }
  0x60   : > { %1199 = vmatmul.mubr.bf16.gmra.mrb[28].mxu1 %v3588_v60  ;;  %3001 = vmatpush3.bf16.msra.mxu0 %v3268_v9  ;;  %v1974_v60 = vrot.slane %v3565_v45, 1  ;;  %v1264_v9 = vpack.c.bf16 %v3506_v54, %v1224_v3  ;;  %v3281_v54 = vld [vmem:[%s4356_s1 + $0x2b8] sm:$0xff]   ;;  %v1360_v11 = vshrl.u32 %v1263_v2, 16  ;;  %v1992_v3 = vrot.slane %v3721_v63, 1 }
  0x61   : > { %3047 = vmatpush3.bf16.msra.mxu1 %v3269_v36  ;;  %1134 = vmatprep.mubr.bf16.mxu0 %v3615_v14  ;;  %v3277_v14 = vld [vmem:[%s4356_s1 + $0x2b0] sm:$0xff]   ;;  %v1362_v36 = vshll.u32 %v1263_v2, 16  ;;  %v1977_v2 = vrot.slane %v3594_v40, 1 }
  0x62   : > { %1206 = vmatprep.mubr.bf16.mxu1 %v3626_v21  ;;  %3002 = vmatprep.subr.bf16.mxu0 %v3270_v17  ;;  %v1980_v21 = vrot.slane %v3578_v58, 1  ;;  %v3960_v24 = vsel %vm1969_vm1, %v1974_v60, %v1984_v44  ;;  %v1384_v17 = vshrl.u32 %v1265_v39, 16  ;;  %v1873_v58 = vld [vmem:[%s3454_s27 + $0x148] sm:$0x3] }
  0x63   : > { %3048 = vmatprep.subr.bf16.mxu1 %v3271_v47  ;;  %v1386_v47 = vshll.u32 %v1265_v39, 16 }
  0x64   : > { %3003 = vmatpush3.bf16.msra.mxu0 %v3272_v15  ;;  %v224_v15 = vpack.c.bf16 %v3702_v26, %v3702_v26 }
  0x65   : > { %3049 = vmatpush3.bf16.msra.mxu1 %v3273_v41  ;;  %3004 = vmatprep.subr.bf16.mxu0 %v3274_v16  ;;  %v1374_v41 = vshll.u32 %v1264_v9, 16  ;;  %v3282_v16 = vld [vmem:[%s4356_s1 + $0x340] sm:$0xff]  }
  0x66   : > { %3050 = vmatprep.subr.bf16.mxu1 %v3275_v56  ;;  %v3283_v56 = vld [vmem:[%s4356_s1 + $0x3c0] sm:$0xff]  }
  0x67   : > { %1135 = vmatmul.mubr.bf16.gmra.mrb[32].mxu0 %v3649_v34  ;;  %v3981_v34 = vsel %vm1969_vm1, %v1980_v21, %v1988_v31  ;;  %v1376_v18 = vrot.slane %v1374_v41, 1  ;;  %v3291_v41 = vld [vmem:[%s4356_s1 + $0x3d0] sm:$0xff]  }
  0x68   : > { %1207 = vmatmul.mubr.bf16.gmra.mrb[32].mxu1 %v3652_v62  ;;  %1142 = vmatprep.mubr.bf16.mxu0 %v225_v25  ;;  %v1982_v62 = vrot.slane %v3667_v5, 1  ;;  %v1350_v5 = vshll.u32 %v1262_v51, 16  ;;  %v1388_v25 = vrot.slane %v1386_v47, 1 }
  0x69   : > { %1214 = vmatprep.mubr.bf16.mxu1 %v227_v29  ;;  %3005 = vmatpush3.bf16.msra.mxu0 %v3276_v32  ;;  %v226_v32 = vpack.c.bf16 %v3707_v38, %v3707_v38  ;;  %v1348_v29 = vshrl.u32 %v1262_v51, 16  ;;  %v1986_v38 = vrot.slane %v3678_v50, 1  ;;  %v1996_v50 = vrot.slane %v3725_v7, 1 }
  0x6a   : > { %3051 = vmatpush3.bf16.msra.mxu1 %v3277_v14  ;;  %3006 = vmatprep.subr.bf16.mxu0 %v3278_v35  ;;  %v1364_v14 = vrot.slane %v1362_v36, 1  ;;  %v4003_v26 = vsel %vm1969_vm1, %v1971_v10, %v1982_v62  ;;  %v1352_v35 = vrot.slane %v1350_v5, 1  ;;  %v1389_v52 = vor.u32 %v1388_v25, %v1384_v17  ;;  %v3290_v5 = vld [vmem:[%s4356_s1 + $0x350] sm:$0xff]  }
  0x6b   : > { %3052 = vmatprep.subr.bf16.mxu1 %v3279_v22  ;;  %v1372_v22 = vshrl.u32 %v1264_v9, 16  ;;  %v4034_v36 = vsel %vm1969_vm1, %v1988_v31, %v1996_v50  ;;  %v1994_v17 = vrot.slane %v3736_v12, 1  ;;  %v3286_v31 = vld [vmem:[%s4356_s1 + $0x348] sm:$0xff]   ;;  %v1467_v25 = vshrl.u32 %v3721_v63, 16 }
  0x6c   : > { %v1365_v6 = vor.u32 %v1364_v14, %v1360_v11  ;;  %v1394_v51 = vsel %vm373_vm0, %v1389_v52, %v3786_v19  ;;  %v1353_v9 = vor.u32 %v1352_v35, %v1348_v29  ;;  %v1990_v19 = vrot.slane %v3729_v8, 1  ;;  %v3284_v11 = vld [vmem:[%s4356_s1 + $0x300] sm:$0xff]   ;;  %v1259_v14 = vld [vmem:[%s3454_s27 + $0x148] sm:$0x1]  ;;  %v4092_v29 = vld [vmem:[%s3454_s27 + $0x138] sm:$0xff] }
  0x6d   : > { %3007 = vmatpush3.bf16.msra.mxu0 %v3280_v46  ;;  %v1377_v46 = vor.u32 %v1376_v18, %v1372_v22  ;;  %v1261_v35 = vld [vmem:[%s3454_s27 + $0x158] sm:$0x1]  ;;  %v1483_v52 = vshrl.u32 %v3725_v7, 16 }
  0x6e   : > { %3053 = vmatpush3.bf16.msra.mxu1 %v3281_v54  ;;  %3084 = vmatprep.subr.bf16.mxu0 %v3282_v16  ;;  %v1370_v39 = vsel %vm373_vm0, %v1365_v6, %v3767_v48  ;;  %v4015_v54 = vsel %vm1969_vm1, %v1977_v2, %v1986_v38  ;;  %v4023_v48 = vsel %vm1969_vm1, %v1984_v44, %v1992_v3  ;;  %v3292_v16 = vld [vmem:[%s4356_s1 + $0x310] sm:$0xff]   ;;  %v3296_v22 = vld [vmem:[%s4356_s1 + $0x318] sm:$0xff]  }
  0x6f   : > { %3130 = vmatprep.subr.bf16.mxu1 %v3283_v56  ;;  %1143 = vmatmul.mubr.bf16.gmra.mrb[36].mxu0 %v224_v15  ;;  %v4043_v44 = vsel %vm1969_vm1, %v1982_v62, %v1990_v19  ;;  %v1358_v47 = vsel %vm373_vm0, %v1353_v9, %v3792_v37  ;;  %v1382_v4 = vsel %vm373_vm0, %v1377_v46, %v3796_v28  ;;  %v3287_v62 = vld [vmem:[%s4356_s1 + $0x3c8] sm:$0xff]   ;;  %v3293_v56 = vld [vmem:[%s4356_s1 + $0x390] sm:$0xff]  }
  0x70   : > { %1215 = vmatmul.mubr.bf16.gmra.mrb[36].mxu1 %v226_v32  ;;  %1747 = vmatprep.mubr.bf16.mxu0 %v1370_v39  ;;  %v4055_v15 = vsel %vm1969_vm1, %v1986_v38, %v1994_v17  ;;  %v3288_v37 = vld [vmem:[%s4356_s1 + $0x308] sm:$0xff]   ;;  %v3294_v32 = vld [vmem:[%s4356_s1 + $0x358] sm:$0xff]   ;;  %v4102_v6 = vpack.c.bf16 %v1261_v35, %v4092_v29  ;;  %v4106_v38 = vld [vmem:[%s3454_s27 + $0x120] sm:$0xff] }
  0x71   : > { %1819 = vmatprep.mubr.bf16.mxu1 %v1394_v51  ;;  %v3289_v28 = vld [vmem:[%s4356_s1 + $0x388] sm:$0xff]   ;;  %v1258_v39 = vld [vmem:[%s3454_s27 + $0x140] sm:$0x1]  ;;  %v4110_v51 = vld [vmem:[%s3454_s27 + $0x130] sm:$0xff] }
  0x72   : > { %v4115_v9 = vpack.c.bf16 %v1258_v39, %v4106_v38  ;;  %v1260_v46 = vld [vmem:[%s3454_s27 + $0x150] sm:$0x1]  ;;  %v3305_v35 = vld [vmem:[%s4356_s1 + $0x3a8] sm:$0xff]  }
  0x73   : > { %v3306_v39 = vld [vmem:[%s4356_s1 + $0x370] sm:$0xff]  }
  0x77   : > { %1748 = vmatmul.mubr.bf16.vlgmr.msra.gmra.mrb[40].mxu0 %v1358_v47 }
  0x78   : > { %1820 = vmatmul.mubr.bf16.vlgmr.msra.gmra.mrb[40].mxu1 %v1382_v4  ;;  %3085 = vmatpush3.bf16.msra.mxu0 %v3284_v11  ;;  %v3297_v11 = vld [vmem:[%s4356_s1 + $0x398] sm:$0xff]   ;;  %v3299_v4 = vld [vmem:[%s4356_s1 + $0x3e0] sm:$0xff]  }
  0x79   : > { %3131 = vmatpush3.bf16.msra.mxu1 %v3285_v1  ;;  %3086 = vmatprep.subr.bf16.mxu0 %v3286_v31  ;;  %v3298_v1 = vld [vmem:[%s4356_s1 + $0x360] sm:$0xff]   ;;  %v1469_v31 = vor.u32 %v1467_v25, %v3853_v23  ;;  %v3304_v25 = vld [vmem:[%s4356_s1 + $0x328] sm:$0xff]  }
  0x7a   : > { %3132 = vmatprep.subr.bf16.mxu1 %v3287_v62  ;;  %1755 = vmatprep.mubr.bf16.mxu0 %v3799_v61  ;;  %v3295_v61 = vld [vmem:[%s4356_s1 + $0x3d8] sm:$0xff]   ;;  %v1459_v62 = vshrl.u32 %v3729_v8, 16 }
  0x7b   : > { %1827 = vmatprep.mubr.bf16.mxu1 %v3816_v30  ;;  %v4087_v30 = vld [vmem:[%s3454_s27 + $0x128] sm:$0xff] }
  0x7c   : > { %3087 = vmatpush3.bf16.msra.mxu0 %v3288_v37  ;;  %v4099_v18 = vpack.c.bf16 %v1259_v14, %v4087_v30  ;;  %v3300_v37 = vld [vmem:[%s4356_s1 + $0x320] sm:$0xff]  }
  0x7d   : > { %3133 = vmatpush3.bf16.msra.mxu1 %v3289_v28  ;;  %3088 = vmatprep.subr.bf16.mxu0 %v3290_v5  ;;  %v1485_v5 = vor.u32 %v1483_v52, %v3870_v55  ;;  %v3303_v55 = vld [vmem:[%s4356_s1 + $0x3e8] sm:$0xff]  }
  0x7e   : > { %3134 = vmatprep.subr.bf16.mxu1 %v3291_v41  ;;  %v1471_v47 = vshll.u32 %v4099_v18, 16  ;;  %v3301_v41 = vld [vmem:[%s4356_s1 + $0x3a0] sm:$0xff]  }
  0x7f   : > { %1756 = vmatmul.mubr.bf16.gmra.mrb[44].mxu0 %v3831_v33  ;;  %v1487_v33 = vshll.u32 %v4102_v6, 16 }
  0x80   : > { %1828 = vmatmul.mubr.bf16.gmra.mrb[44].mxu1 %v3847_v20  ;;  %3089 = vmatpush3.bf16.msra.mxu0 %v3292_v16  ;;  %v4127_v20 = vpack.c.bf16 %v1260_v46, %v4110_v51  ;;  %v1473_v28 = vrot.slane %v1471_v47, 1  ;;  %v1475_v16 = vshrl.u32 %v3736_v12, 16 }
  0x81   : > { %3135 = vmatpush3.bf16.msra.mxu1 %v3293_v56  ;;  %1763 = vmatprep.mubr.bf16.mxu0 %v3864_v27  ;;  %v1489_v27 = vrot.slane %v1487_v33, 1  ;;  %v3302_v56 = vld [vmem:[%s4356_s1 + $0x368] sm:$0xff]  }
  0x82   : > { %1835 = vmatprep.mubr.bf16.mxu1 %v3883_v42  ;;  %3090 = vmatprep.subr.bf16.mxu0 %v3294_v32  ;;  %v1463_v42 = vshll.u32 %v4115_v9, 16  ;;  %v1479_v23 = vshll.u32 %v4127_v20, 16  ;;  %v1474_v32 = vsel %vm373_vm0, %v1469_v31, %v1473_v28  ;;  %v1477_v46 = vor.u32 %v1475_v16, %v3907_v13  ;;  %v1869_v33 = vld [vmem:[%s3454_s27 + $0x28] sm:$0xfc] }
  0x83   : > { %3136 = vmatprep.subr.bf16.mxu1 %v3295_v61  ;;  %v1490_v61 = vsel %vm373_vm0, %v1485_v5, %v1489_v27  ;;  %v1877_v31 = vpack.c.bf16 %v3965_v0, %v1869_v33  ;;  %v1491_v5 = vshrl.u32 %v4115_v9, 16  ;;  %v3312_v0 = vld [vmem:[%s4356_s1 + $0x338] sm:$0xff]   ;;  %v1870_v9 = vld [vmem:[%s3454_s27 + $0x30] sm:$0xfc] }
  0x84   : > { %3091 = vmatpush3.bf16.msra.mxu0 %v3296_v22  ;;  %v1465_v14 = vrot.slane %v1463_v42, 1  ;;  %v1461_v22 = vor.u32 %v1459_v62, %v3891_v53  ;;  %v1481_v52 = vrot.slane %v1479_v23, 1  ;;  %v3307_v53 = vld [vmem:[%s4356_s1 + $0x3f0] sm:$0xff]   ;;  %v1868_v23 = vld [vmem:[%s3454_s27 + $0x20] sm:$0xfc] }
  0x85   : > { %3137 = vmatpush3.bf16.msra.mxu1 %v3297_v11  ;;  %3092 = vmatprep.subr.bf16.mxu0 %v3298_v1  ;;  %v1494_v11 = vshrl.u32 %v4099_v18, 16  ;;  %v1500_v1 = vshrl.u32 %v4102_v6, 16  ;;  %v1871_v18 = vld [vmem:[%s3454_s27 + $0x38] sm:$0xfc]  ;;  %v3308_v6 = vld [vmem:[%s4356_s1 + $0x330] sm:$0xff]   ;;  %v1973_v42 = vrot.slane %v1877_v31, 1 }
  0x86   : > { %3138 = vmatprep.subr.bf16.mxu1 %v3299_v4  ;;  %v3309_v4 = vld [vmem:[%s4356_s1 + $0x3b0] sm:$0xff]   ;;  %v1879_v62 = vpack.c.bf16 %v3969_v43, %v1871_v18  ;;  %v3313_v43 = vld [vmem:[%s4356_s1 + $0x3b8] sm:$0xff]  }
  0x87   : > { %1764 = vmatmul.mubr.bf16.gmra.mrb[48].mxu0 %v3902_v49  ;;  %v1466_v49 = vsel %vm373_vm0, %v1461_v22, %v1465_v14  ;;  %v1496_v47 = vor.u32 %v1494_v11, %v1473_v28  ;;  %v1502_v13 = vor.u32 %v1500_v1, %v1489_v27  ;;  %v3311_v28 = vld [vmem:[%s4356_s1 + $0x3f8] sm:$0xff]   ;;  %v1497_v27 = vshrl.u32 %v4127_v20, 16 }
  0x88   : > { %1836 = vmatmul.mubr.bf16.gmra.mrb[48].mxu1 %v3917_v57  ;;  %3093 = vmatpush3.bf16.msra.mxu0 %v3300_v37  ;;  %v1482_v57 = vsel %vm373_vm0, %v1477_v46, %v1481_v52  ;;  %v3310_v37 = vld [vmem:[%s4356_s1 + $0x378] sm:$0xff]   ;;  %v1493_v20 = vor.u32 %v1491_v5, %v1465_v14 }
  0x89   : > { %3139 = vmatpush3.bf16.msra.mxu1 %v3301_v41  ;;  %1771 = vmatprep.mubr.bf16.mxu0 %v1474_v32  ;;  %v1979_v41 = vrot.slane %v1879_v62, 1  ;;  %v1499_v16 = vor.u32 %v1497_v27, %v1481_v52  ;;  %v3317_v32 = vld [vmem:[%s3454_s27 + $0x50] sm:$0xff] }
  0x8a   : > { %1843 = vmatprep.mubr.bf16.mxu1 %v1490_v61  ;;  %3094 = vmatprep.subr.bf16.mxu0 %v3302_v56  ;;  %v3316_v56 = vld [vmem:[%s3454_s27 + $0x40] sm:$0xff]  ;;  %v1878_v61 = vpack.c.bf16 %v3317_v32, %v1870_v9 }
  0x8b   : > { %3140 = vmatprep.subr.bf16.mxu1 %v3303_v55  ;;  %v1876_v55 = vpack.c.bf16 %v3316_v56, %v1868_v23 }
  0x8c   : > { %3095 = vmatpush3.bf16.msra.mxu0 %v3304_v25  ;;  %v1975_v25 = vsel %vm1969_vm1, %v1973_v42, %v1974_v60  ;;  %v1976_v22 = vrot.slane %v1878_v61, 1  ;;  %v1875_v60 = vld [vmem:[%s3454_s27 + $0x158] sm:$0x3] }
  0x8d   : > { %3141 = vmatpush3.bf16.msra.mxu1 %v3305_v35  ;;  %3096 = vmatprep.subr.bf16.mxu0 %v3306_v39  ;;  %v1981_v35 = vsel %vm1969_vm1, %v1979_v41, %v1980_v21  ;;  %v1970_v14 = vrot.slane %v1876_v55, 1  ;;  %v1881_v21 = vpack.c.bf16 %v1873_v58, %v4087_v30  ;;  %v1883_v59 = vpack.c.bf16 %v1875_v60, %v4092_v29 }
  0x8e   : > { %3142 = vmatprep.subr.bf16.mxu1 %v3307_v53  ;;  %v1978_v45 = vsel %vm1969_vm1, %v1976_v22, %v1977_v2  ;;  %v1872_v2 = vld [vmem:[%s3454_s27 + $0x140] sm:$0x3] }
  0x8f   : > { %1772 = vmatmul.mubr.bf16.gmra.mrb[52].mxu0 %v1466_v49  ;;  %v1972_v52 = vsel %vm1969_vm1, %v1970_v14, %v1971_v10  ;;  %v2000_v40 = vrot.slane %v1881_v21, 1  ;;  %v2004_v10 = vrot.slane %v1883_v59, 1 }
  0x90   : > { %1844 = vmatmul.mubr.bf16.gmra.mrb[52].mxu1 %v1482_v57  ;;  %1779 = vmatprep.mubr.bf16.mxu0 %v1496_v47 }
  0x91   : > { %1851 = vmatprep.mubr.bf16.mxu1 %v1502_v13  ;;  %3097 = vmatpush3.bf16.msra.mxu0 %v3308_v6  ;;  %v2001_v30 = vsel %vm1969_vm1, %v1992_v3, %v2000_v40 }
  0x92   : > { %3143 = vmatpush3.bf16.msra.mxu1 %v3309_v4  ;;  %3098 = vmatprep.subr.bf16.mxu0 %v3310_v37 }
  0x93   : > { %3144 = vmatprep.subr.bf16.mxu1 %v3311_v28 }
  0x95   : > { %3099 = vmatpush3.bf16.msra.mxu0 %v3312_v0 }
  0x96   : > { %3145 = vmatpush3.bf16.msra.mxu1 %v3313_v43 }
  0x97   : > { %1780 = vmatmul.mubr.bf16.gmra.mrb[56].mxu0 %v1493_v20 }
  0x98   : > { %1852 = vmatmul.mubr.bf16.gmra.mrb[56].mxu1 %v1499_v16  ;;  %2250 = vmatprep.mubr.bf16.mxu0 %v1975_v25 }
  0x99   : > { %2322 = vmatprep.mubr.bf16.mxu1 %v1981_v35 }
  0x9f   : > { %2251 = vmatmul.mubr.bf16.vlgmr.msra.gmra.mrb[60].mxu0 %v1972_v52 }
  0xa0   : > { %2323 = vmatmul.mubr.bf16.vlgmr.msra.gmra.mrb[60].mxu1 %v1978_v45  ;;  %2258 = vmatprep.mubr.bf16.mxu0 %v3960_v24  ;;  %v1874_v24 = vld [vmem:[%s3454_s27 + $0x150] sm:$0x3] }
  0xa1   : > { %2330 = vmatprep.mubr.bf16.mxu1 %v3981_v34  ;;  %v1880_v34 = vpack.c.bf16 %v1872_v2, %v4106_v38  ;;  %v1882_v39 = vpack.c.bf16 %v1874_v24, %v4110_v51 }
  0xa7   : > { %2259 = vmatmul.mubr.bf16.gmra.mrb[64].mxu0 %v4003_v26  ;;  %v2005_v26 = vsel %vm1969_vm1, %v1996_v50, %v2004_v10 }
  0xa8   : > { %2331 = vmatmul.mubr.bf16.gmra.mrb[64].mxu1 %v4015_v54  ;;  %2266 = vmatprep.mubr.bf16.mxu0 %v4023_v48  ;;  %v1998_v54 = vrot.slane %v1880_v34, 1  ;;  %v2002_v48 = vrot.slane %v1882_v39, 1 }
  0xa9   : > { %2338 = vmatprep.mubr.bf16.mxu1 %v4034_v36 }
  0xaa   : > { %v1999_v36 = vsel %vm1969_vm1, %v1990_v19, %v1998_v54  ;;  %v2003_v63 = vsel %vm1969_vm1, %v1994_v17, %v2002_v48 }
  0xaf   : > { %2267 = vmatmul.mubr.bf16.gmra.mrb[68].mxu0 %v4043_v44 }
  0xb0   : > { %2339 = vmatmul.mubr.bf16.gmra.mrb[68].mxu1 %v4055_v15  ;;  %2274 = vmatprep.mubr.bf16.mxu0 %v2001_v30 }
  0xb1   : > { %2346 = vmatprep.mubr.bf16.mxu1 %v2005_v26 }
  0xb7   : > { %2275 = vmatmul.mubr.bf16.gmra.mrb[72].mxu0 %v1999_v36 }
  0xb8   : > { %2347 = vmatmul.mubr.bf16.gmra.mrb[72].mxu1 %v2003_v63  ;;  %2282 = vmatprep.mubr.bf16.mxu0 %v2000_v40 }
  0xb9   : > { %2354 = vmatprep.mubr.bf16.mxu1 %v2004_v10 }
  0xbf   : > { %2283 = vmatmul.mubr.bf16.gmra.mrb[76].mxu0 %v1998_v54 }
  0xc0   : > { %2355 = vmatmul.mubr.bf16.gmra.mrb[76].mxu1 %v2002_v48 }
  0xfa   : > { %v2824_v7 = vpop.f32.mrb[0].mxu0 }
  0xfb   : > { %v2825_v3 = vpop.f32.mrb[1].mxu0  ;;  %v2870_v15 = vpop.f32.mrb[0].mxu1 }
  0xfc   : > { %v2826_v50 = vadd.f32 %v2825_v3, %v2824_v7  ;;  %v2827_v44 = vpop.f32.mrb[2].mxu0  ;;  %v2871_v38 = vpop.f32.mrb[1].mxu1 }
  0xfd   : > { %v2828_v29 = vpop.f32.mrb[3].mxu0  ;;  %v2872_v51 = vadd.f32 %v2871_v38, %v2870_v15  ;;  %v2873_v19 = vpop.f32.mrb[2].mxu1 }
  0xfe   : > { %v2829_v8 = vadd.f32 %v2828_v29, %v2827_v44  ;;  %v2874_v46 = vpop.f32.mrb[3].mxu1 }
  0xff   : > { %v4242_v12 = vadd.f32 %v2872_v51, %v2826_v50  ;;  %v2875_v17 = vadd.f32 %v2874_v46, %v2873_v19 }
 0x101   : > { %v4244_v11 = vadd.f32 %v2875_v17, %v2829_v8 }
 0x102   : > { %v2830_v1 = vpop.f32.mrb[4].mxu0 }
 0x103   : > { %v2876_v53 = vpop.f32.mrb[4].mxu1  ;;  %v2831_v49 = vpop.f32.mrb[5].mxu0 }
 0x104   : > { %v2877_v57 = vpop.f32.mrb[5].mxu1  ;;  %v2832_v47 = vadd.f32 %v2831_v49, %v2830_v1  ;;  %v2833_v33 = vpop.f32.mrb[6].mxu0 }
 0x105   : > { %v2878_v13 = vadd.f32 %v2877_v57, %v2876_v53  ;;  %v2879_v18 = vpop.f32.mrb[6].mxu1  ;;  %v2834_v6 = vpop.f32.mrb[7].mxu0 }
 0x106   : > { %v2880_v4 = vpop.f32.mrb[7].mxu1  ;;  %v2835_v62 = vadd.f32 %v2834_v6, %v2833_v33 }
 0x107   : > { %v4246_v31 = vadd.f32 %v2878_v13, %v2832_v47  ;;  %v2881_v37 = vadd.f32 %v2880_v4, %v2879_v18 }
 0x109   : > { %v4248_v28 = vadd.f32 %v2881_v37, %v2835_v62 }
 0x10a   : > { %v2836_v5 = vpop.f32.mrb[8].mxu0 }
 0x10b   : > { %v2882_v27 = vpop.f32.mrb[8].mxu1  ;;  %v2837_v0 = vpop.f32.mrb[9].mxu0 }
 0x10c   : > { %v2883_v43 = vpop.f32.mrb[9].mxu1  ;;  %v2838_v42 = vadd.f32 %v2837_v0, %v2836_v5  ;;  %v2839_v23 = vpop.f32.mrb[10].mxu0 }
 0x10d   : > { %v2884_v41 = vadd.f32 %v2883_v43, %v2882_v27  ;;  %v2885_v9 = vpop.f32.mrb[10].mxu1  ;;  %v2840_v20 = vpop.f32.mrb[11].mxu0 }
 0x10e   : > { %v2886_v16 = vpop.f32.mrb[11].mxu1  ;;  %v2841_v55 = vadd.f32 %v2840_v20, %v2839_v23 }
 0x10f   : > { %v4250_v56 = vadd.f32 %v2884_v41, %v2838_v42  ;;  %v2887_v32 = vadd.f32 %v2886_v16, %v2885_v9 }
 0x111   : > { %v4252_v61 = vadd.f32 %v2887_v32, %v2841_v55 }
 0x112   : > { %v2842_v25 = vpop.f32.mrb[12].mxu0 }
 0x113   : > { %v2888_v35 = vpop.f32.mrb[12].mxu1  ;;  %v2843_v14 = vpop.f32.mrb[13].mxu0 }
 0x114   : > { %v2889_v22 = vpop.f32.mrb[13].mxu1  ;;  %v2844_v52 = vadd.f32 %v2843_v14, %v2842_v25  ;;  %v2845_v58 = vpop.f32.mrb[14].mxu0 }
 0x115   : > { %v2890_v45 = vadd.f32 %v2889_v22, %v2888_v35  ;;  %v2891_v60 = vpop.f32.mrb[14].mxu1  ;;  %v2846_v21 = vpop.f32.mrb[15].mxu0 }
 0x116   : > { %v2892_v59 = vpop.f32.mrb[15].mxu1  ;;  %v2847_v10 = vadd.f32 %v2846_v21, %v2845_v58 }
 0x117   : > { %v4254_v40 = vadd.f32 %v2890_v45, %v2844_v52  ;;  %v2893_v2 = vadd.f32 %v2892_v59, %v2891_v60 }
 0x119   : > { %v4256_v24 = vadd.f32 %v2893_v2, %v2847_v10 }
 0x11a   : > { %v2848_v34 = vpop.f32.mrb[16].mxu0 }
 0x11b   : > { %v2894_v39 = vpop.f32.mrb[16].mxu1  ;;  %v2849_v30 = vpop.f32.mrb[17].mxu0 }
 0x11c   : > { %v2895_v26 = vpop.f32.mrb[17].mxu1  ;;  %v2850_v54 = vadd.f32 %v2849_v30, %v2848_v34  ;;  %v2851_v36 = vpop.f32.mrb[18].mxu0 }
 0x11d   : > { %v2896_v48 = vadd.f32 %v2895_v26, %v2894_v39  ;;  %v2897_v63 = vpop.f32.mrb[18].mxu1  ;;  %v2852_v7 = vpop.f32.mrb[19].mxu0 }
 0x11e   : > { %v2898_v3 = vpop.f32.mrb[19].mxu1 }
 0x11f   : > { %v4258_v50 = vadd.f32 %v2896_v48, %v2850_v54 }
 0x122   : > { %v2916_v44 = vpop.f32.mrb[20].mxu0 }
 0x123   : > { %v2962_v15 = vpop.f32.mrb[20].mxu1  ;;  %v2917_v29 = vpop.f32.mrb[21].mxu0 }
 0x124   : > { %v2963_v38 = vpop.f32.mrb[21].mxu1  ;;  %v2918_v8 = vadd.f32 %v2917_v29, %v2916_v44  ;;  %v2919_v19 = vpop.f32.mrb[22].mxu0 }
 0x125   : > { %v2964_v51 = vadd.f32 %v2963_v38, %v2962_v15  ;;  %v2965_v46 = vpop.f32.mrb[22].mxu1  ;;  %v2920_v17 = vpop.f32.mrb[23].mxu0 }
 0x126   : > { %v2966_v1 = vpop.f32.mrb[23].mxu1  ;;  %v1113_v53 = vadd.f32 %v2918_v8, %v4242_v12  ;;  %v2921_v49 = vadd.f32 %v2920_v17, %v2919_v19 }
 0x127   : > { %v2967_v57 = vadd.f32 %v2966_v1, %v2965_v46 }
 0x128   : > { %v4261_v47 = vadd.f32 %v2964_v51, %v1113_v53  ;;  %v1116_v13 = vadd.f32 %v2921_v49, %v4244_v11 }
 0x12a   : > { %v4264_v33 = vadd.f32 %v2967_v57, %v1116_v13  ;;  %v2922_v18 = vpop.f32.mrb[24].mxu0 }
 0x12b   : > { %v2968_v6 = vpop.f32.mrb[24].mxu1  ;;  %v2923_v4 = vpop.f32.mrb[25].mxu0 }
 0x12c   : > { %v2969_v62 = vpop.f32.mrb[25].mxu1  ;;  %v2924_v37 = vadd.f32 %v2923_v4, %v2922_v18  ;;  %v2925_v27 = vpop.f32.mrb[26].mxu0 }
 0x12d   : > { %v2970_v5 = vadd.f32 %v2969_v62, %v2968_v6  ;;  %v2971_v0 = vpop.f32.mrb[26].mxu1  ;;  %v2926_v43 = vpop.f32.mrb[27].mxu0 }
 0x12e   : > { %v2972_v42 = vpop.f32.mrb[27].mxu1  ;;  %v1121_v12 = vadd.f32 %v2924_v37, %v4246_v31  ;;  %v2927_v41 = vadd.f32 %v2926_v43, %v2925_v27 }
 0x12f   : > { %v2973_v23 = vadd.f32 %v2972_v42, %v2971_v0 }
 0x130   : > { %v4267_v9 = vadd.f32 %v2970_v5, %v1121_v12  ;;  %v1124_v11 = vadd.f32 %v2927_v41, %v4248_v28 }
 0x132   : > { %v4270_v20 = vadd.f32 %v2973_v23, %v1124_v11  ;;  %v2928_v16 = vpop.f32.mrb[28].mxu0 }
 0x133   : > { %v2974_v55 = vpop.f32.mrb[28].mxu1  ;;  %v2929_v32 = vpop.f32.mrb[29].mxu0 }
 0x134   : > { %v2975_v25 = vpop.f32.mrb[29].mxu1  ;;  %v2930_v35 = vadd.f32 %v2929_v32, %v2928_v16  ;;  %v2931_v22 = vpop.f32.mrb[30].mxu0 }
 0x135   : > { %v2976_v14 = vadd.f32 %v2975_v25, %v2974_v55  ;;  %v2977_v52 = vpop.f32.mrb[30].mxu1  ;;  %v2932_v45 = vpop.f32.mrb[31].mxu0 }
 0x136   : > { %v2978_v58 = vpop.f32.mrb[31].mxu1  ;;  %v1129_v31 = vadd.f32 %v2930_v35, %v4250_v56  ;;  %v2933_v60 = vadd.f32 %v2932_v45, %v2931_v22 }
 0x137   : > { %v2979_v21 = vadd.f32 %v2978_v58, %v2977_v52 }
 0x138   : > { %v4273_v59 = vadd.f32 %v2976_v14, %v1129_v31  ;;  %v1132_v28 = vadd.f32 %v2933_v60, %v4252_v61 }
 0x13a   : > { %v4276_v10 = vadd.f32 %v2979_v21, %v1132_v28  ;;  %v2934_v2 = vpop.f32.mrb[32].mxu0 }
 0x13b   : > { %v2980_v34 = vpop.f32.mrb[32].mxu1  ;;  %v2935_v39 = vpop.f32.mrb[33].mxu0 }
 0x13c   : > { %v2981_v30 = vpop.f32.mrb[33].mxu1  ;;  %v2936_v26 = vadd.f32 %v2935_v39, %v2934_v2  ;;  %v2937_v48 = vpop.f32.mrb[34].mxu0 }
 0x13d   : > { %v2982_v54 = vadd.f32 %v2981_v30, %v2980_v34  ;;  %v2983_v36 = vpop.f32.mrb[34].mxu1  ;;  %v2938_v63 = vpop.f32.mrb[35].mxu0 }
 0x13e   : > { %v2984_v7 = vpop.f32.mrb[35].mxu1  ;;  %v1137_v56 = vadd.f32 %v2936_v26, %v4254_v40  ;;  %v2939_v3 = vadd.f32 %v2938_v63, %v2937_v48 }
 0x13f   : > { %v2985_v44 = vadd.f32 %v2984_v7, %v2983_v36 }
 0x140   : > { %v4279_v15 = vadd.f32 %v2982_v54, %v1137_v56  ;;  %v1140_v61 = vadd.f32 %v2939_v3, %v4256_v24 }
 0x142   : > { %v4282_v29 = vadd.f32 %v2985_v44, %v1140_v61  ;;  %v2940_v38 = vpop.f32.mrb[36].mxu0 }
 0x143   : > { %v2986_v8 = vpop.f32.mrb[36].mxu1  ;;  %v2941_v51 = vpop.f32.mrb[37].mxu0 }
 0x144   : > { %v2987_v19 = vpop.f32.mrb[37].mxu1  ;;  %v2942_v46 = vadd.f32 %v2941_v51, %v2940_v38  ;;  %v2943_v1 = vpop.f32.mrb[38].mxu0 }
 0x145   : > { %v2988_v17 = vadd.f32 %v2987_v19, %v2986_v8  ;;  %v2989_v53 = vpop.f32.mrb[38].mxu1  ;;  %v2944_v49 = vpop.f32.mrb[39].mxu0 }
 0x146   : > { %v2990_v57 = vpop.f32.mrb[39].mxu1  ;;  %v1145_v40 = vadd.f32 %v2942_v46, %v4258_v50 }
 0x148   : > { %v4285_v13 = vadd.f32 %v2988_v17, %v1145_v40 }
 0x14a   : > { %v3008_v18 = vpop.f32.mrb[40].mxu0 }
 0x14b   : > { %v3054_v6 = vpop.f32.mrb[40].mxu1  ;;  %v3009_v4 = vpop.f32.mrb[41].mxu0 }
 0x14c   : > { %v3055_v24 = vpop.f32.mrb[41].mxu1  ;;  %v3010_v62 = vadd.f32 %v3009_v4, %v3008_v18  ;;  %v3011_v5 = vpop.f32.mrb[42].mxu0 }
 0x14d   : > { %v3056_v37 = vadd.f32 %v3055_v24, %v3054_v6  ;;  %v3057_v27 = vpop.f32.mrb[42].mxu1  ;;  %v3012_v0 = vpop.f32.mrb[43].mxu0 }
 0x14e   : > { %v3058_v43 = vpop.f32.mrb[43].mxu1  ;;  %v3013_v12 = vadd.f32 %v3012_v0, %v3011_v5 }
 0x14f   : > { %v1822_v42 = vadd.f32 %v3056_v37, %v3010_v62  ;;  %v3059_v41 = vadd.f32 %v3058_v43, %v3057_v27 }
 0x151   : > { %v4288_v23 = vadd.f32 %v1822_v42, %v4261_v47  ;;  %v1825_v11 = vadd.f32 %v3059_v41, %v3013_v12 }
 0x152   : > { %v3014_v16 = vpop.f32.mrb[44].mxu0 }
 0x153   : > { %v4291_v50 = vadd.f32 %v1825_v11, %v4264_v33  ;;  %v3060_v55 = vpop.f32.mrb[44].mxu1  ;;  %v3015_v32 = vpop.f32.mrb[45].mxu0 }
 0x154   : > { %v3061_v25 = vpop.f32.mrb[45].mxu1  ;;  %v3016_v35 = vadd.f32 %v3015_v32, %v3014_v16  ;;  %v3017_v22 = vpop.f32.mrb[46].mxu0 }
 0x155   : > { %v3062_v14 = vadd.f32 %v3061_v25, %v3060_v55  ;;  %v3063_v52 = vpop.f32.mrb[46].mxu1  ;;  %v3018_v45 = vpop.f32.mrb[47].mxu0 }
 0x156   : > { %v3064_v58 = vpop.f32.mrb[47].mxu1  ;;  %v3019_v60 = vadd.f32 %v3018_v45, %v3017_v22 }
 0x157   : > { %v1830_v31 = vadd.f32 %v3062_v14, %v3016_v35  ;;  %v3065_v21 = vadd.f32 %v3064_v58, %v3063_v52 }
 0x159   : > { %v4294_v47 = vadd.f32 %v1830_v31, %v4267_v9  ;;  %v1833_v28 = vadd.f32 %v3065_v21, %v3019_v60  ;;  %v4317_v21 = vld [vmem:[%s4357_s2] ss:$0 sm:$0xff] }
 0x15a   : > { %v3020_v2 = vpop.f32.mrb[48].mxu0 }
 0x15b   : > { %v4297_v33 = vadd.f32 %v1833_v28, %v4270_v20  ;;  %v3066_v34 = vpop.f32.mrb[48].mxu1  ;;  %v3021_v39 = vpop.f32.mrb[49].mxu0 }
 0x15c   : > { %v3067_v30 = vpop.f32.mrb[49].mxu1  ;;  %v3022_v26 = vadd.f32 %v3021_v39, %v3020_v2  ;;  %v3023_v48 = vpop.f32.mrb[50].mxu0 }
 0x15d   : > { %v3068_v54 = vadd.f32 %v3067_v30, %v3066_v34  ;;  %v3069_v36 = vpop.f32.mrb[50].mxu1  ;;  %v3024_v63 = vpop.f32.mrb[51].mxu0 }
 0x15e   : > { %v3070_v7 = vpop.f32.mrb[51].mxu1  ;;  %v3025_v3 = vadd.f32 %v3024_v63, %v3023_v48 }
 0x15f   : > { %v1838_v56 = vadd.f32 %v3068_v54, %v3022_v26  ;;  %v3071_v44 = vadd.f32 %v3070_v7, %v3069_v36 }
 0x161   : > { %v4300_v9 = vadd.f32 %v1838_v56, %v4273_v59  ;;  %v1841_v61 = vadd.f32 %v3071_v44, %v3025_v3 }
 0x162   : > { %v3026_v38 = vpop.f32.mrb[52].mxu0 }
 0x163   : > { %v4303_v20 = vadd.f32 %v1841_v61, %v4276_v10  ;;  %v3072_v8 = vpop.f32.mrb[52].mxu1  ;;  %v3027_v51 = vpop.f32.mrb[53].mxu0 }
 0x164   : > { %v3073_v19 = vpop.f32.mrb[53].mxu1  ;;  %v3028_v46 = vadd.f32 %v3027_v51, %v3026_v38  ;;  %v3029_v1 = vpop.f32.mrb[54].mxu0 }
 0x165   : > { %v3074_v17 = vadd.f32 %v3073_v19, %v3072_v8  ;;  %v3075_v53 = vpop.f32.mrb[54].mxu1  ;;  %v3030_v49 = vpop.f32.mrb[55].mxu0 }
 0x166   : > { %v3076_v57 = vpop.f32.mrb[55].mxu1  ;;  %v3031_v18 = vadd.f32 %v3030_v49, %v3029_v1 }
 0x167   : > { %v1846_v40 = vadd.f32 %v3074_v17, %v3028_v46  ;;  %v3077_v6 = vadd.f32 %v3076_v57, %v3075_v53 }
 0x169   : > { %v4306_v59 = vadd.f32 %v1846_v40, %v4279_v15  ;;  %v1849_v4 = vadd.f32 %v3077_v6, %v3031_v18 }
 0x16a   : > { %v3032_v24 = vpop.f32.mrb[56].mxu0 }
 0x16b   : > { %v4309_v10 = vadd.f32 %v1849_v4, %v4282_v29  ;;  %v3078_v62 = vpop.f32.mrb[56].mxu1  ;;  %v3033_v37 = vpop.f32.mrb[57].mxu0 }
 0x16c   : > { %v3079_v5 = vpop.f32.mrb[57].mxu1  ;;  %v3034_v27 = vadd.f32 %v3033_v37, %v3032_v24  ;;  %v3035_v43 = vpop.f32.mrb[58].mxu0 }
 0x16d   : > { %v3080_v0 = vadd.f32 %v3079_v5, %v3078_v62  ;;  %v3081_v42 = vpop.f32.mrb[58].mxu1  ;;  %v3036_v12 = vpop.f32.mrb[59].mxu0 }
 0x16e   : > { %v3082_v41 = vpop.f32.mrb[59].mxu1 }
 0x16f   : > { %v1854_v11 = vadd.f32 %v3080_v0, %v3034_v27 }
 0x171   : > { %v4312_v16 = vadd.f32 %v1854_v11, %v4285_v13 }
 0x172   : > { %v3100_v15 = vpop.f32.mrb[60].mxu0 }
 0x173   : > { %v3146_v55 = vpop.f32.mrb[60].mxu1  ;;  %v3101_v32 = vpop.f32.mrb[61].mxu0 }
 0x174   : > { %v3147_v29 = vpop.f32.mrb[61].mxu1  ;;  %v3102_v25 = vadd.f32 %v3101_v32, %v3100_v15  ;;  %v3103_v14 = vpop.f32.mrb[62].mxu0 }
 0x175   : > { %v3148_v35 = vadd.f32 %v3147_v29, %v3146_v55  ;;  %v3149_v22 = vpop.f32.mrb[62].mxu1  ;;  %v3104_v52 = vpop.f32.mrb[63].mxu0 }
 0x176   : > { %v3150_v45 = vpop.f32.mrb[63].mxu1  ;;  %v3105_v31 = vadd.f32 %v3104_v52, %v3103_v14 }
 0x177   : > { %v2325_v58 = vadd.f32 %v3148_v35, %v3102_v25  ;;  %v3151_v60 = vadd.f32 %v3150_v45, %v3149_v22 }
 0x179   : > { %v2362_v13 = vadd.f32 %v2325_v58, %v4288_v23  ;;  %v2328_v28 = vadd.f32 %v3151_v60, %v3105_v31 }
 0x17a   : > { %v3106_v39 = vpop.f32.mrb[64].mxu0 }
 0x17b   : > { %v2378_v2 = vadd.f32 %v4317_v21, %v2362_v13  ;;  %v2363_v34 = vadd.f32 %v2328_v28, %v4291_v50  ;;  %v3152_v30 = vpop.f32.mrb[64].mxu1  ;;  %v3107_v26 = vpop.f32.mrb[65].mxu0 }
 0x17c   : > { %v3153_v54 = vpop.f32.mrb[65].mxu1  ;;  %v3108_v36 = vadd.f32 %v3107_v26, %v3106_v39  ;;  %v3109_v63 = vpop.f32.mrb[66].mxu0 }
 0x17d   : > { %vm2387_vm2 = vcmp.ge.f32.partialorder %v2378_v2, 0.0  ;;  %v2396_v48 = vmul.f32 0.01, %v2378_v2  ;;  %v2379_v23 = vadd.f32 %v4317_v21, %v2363_v34  ;;  %v3155_v7 = vpop.f32.mrb[66].mxu1  ;;  %v3154_v56 = vadd.f32 %v3153_v54, %v3152_v30  ;;  %v3110_v50 = vpop.f32.mrb[67].mxu0 }
 0x17e   : > { %v3156_v3 = vpop.f32.mrb[67].mxu1  ;;  %v3111_v38 = vadd.f32 %v3110_v50, %v3109_v63 }
 0x17f   : > { %v2405_v44 = vsel %vm2387_vm2, %v2378_v2, %v2396_v48  ;;  %vm2388_vm3 = vcmp.ge.f32.partialorder %v2379_v23, 0.0  ;;  %v2397_v61 = vmul.f32 0.01, %v2379_v23  ;;  %v2333_v8 = vadd.f32 %v3154_v56, %v3108_v36 }
 0x180   : > { %2414 = vst [vmem:[%s4326_s9] sm:$0xff] %v2405_v44  ;;  %v3157_v51 = vadd.f32 %v3156_v3, %v3155_v7 }
 0x181   : > { %v2406_v19 = vsel %vm2388_vm3, %v2379_v23, %v2397_v61  ;;  %v2364_v46 = vadd.f32 %v2333_v8, %v4294_v47 }
 0x182   : > { %2415 = vst [vmem:[%s4326_s9 + $0x8] sm:$0xff] %v2406_v19  ;;  %v2336_v17 = vadd.f32 %v3157_v51, %v3111_v38  ;;  %v3112_v1 = vpop.f32.mrb[68].mxu0 }
 0x183   : > { %v3158_v53 = vpop.f32.mrb[68].mxu1  ;;  %v2380_v49 = vadd.f32 %v4317_v21, %v2364_v46  ;;  %v3113_v40 = vpop.f32.mrb[69].mxu0 }
 0x184   : > { %v2365_v57 = vadd.f32 %v2336_v17, %v4297_v33  ;;  %v3159_v18 = vpop.f32.mrb[69].mxu1  ;;  %v3114_v6 = vadd.f32 %v3113_v40, %v3112_v1  ;;  %v3115_v24 = vpop.f32.mrb[70].mxu0 }
 0x185   : > { %v3160_v4 = vadd.f32 %v3159_v18, %v3158_v53  ;;  %v3161_v62 = vpop.f32.mrb[70].mxu1  ;;  %vm2389_vm4 = vcmp.ge.f32.partialorder %v2380_v49, 0.0  ;;  %v2398_v37 = vmul.f32 0.01, %v2380_v49  ;;  %v3116_v47 = vpop.f32.mrb[71].mxu0 }
 0x186   : > { %v2381_v5 = vadd.f32 %v4317_v21, %v2365_v57  ;;  %v3162_v27 = vpop.f32.mrb[71].mxu1  ;;  %v3117_v43 = vadd.f32 %v3116_v47, %v3115_v24 }
 0x187   : > { %v2341_v0 = vadd.f32 %v3160_v4, %v3114_v6  ;;  %v3163_v42 = vadd.f32 %v3162_v27, %v3161_v62  ;;  %v2407_v12 = vsel %vm2389_vm4, %v2380_v49, %v2398_v37 }
 0x188   : > { %vm2390_vm5 = vcmp.ge.f32.partialorder %v2381_v5, 0.0  ;;  %v2399_v33 = vmul.f32 0.01, %v2381_v5  ;;  %2416 = vst [vmem:[%s4326_s9 + $0x10] sm:$0xff] %v2407_v12 }
 0x189   : > { %v2366_v41 = vadd.f32 %v2341_v0, %v4300_v9  ;;  %v2344_v11 = vadd.f32 %v3163_v42, %v3117_v43 }
 0x18a   : > { %v2408_v15 = vsel %vm2390_vm5, %v2381_v5, %v2399_v33  ;;  %v3118_v29 = vpop.f32.mrb[72].mxu0 }
 0x18b   : > { %2417 = vst [vmem:[%s4326_s9 + $0x18] sm:$0xff] %v2408_v15  ;;  %v2382_v55 = vadd.f32 %v4317_v21, %v2366_v41  ;;  %v2367_v32 = vadd.f32 %v2344_v11, %v4303_v20  ;;  %v3164_v25 = vpop.f32.mrb[72].mxu1  ;;  %v3119_v35 = vpop.f32.mrb[73].mxu0 }
 0x18c   : > { %v3165_v14 = vpop.f32.mrb[73].mxu1  ;;  %v3120_v45 = vadd.f32 %v3119_v35, %v3118_v29  ;;  %v3121_v58 = vpop.f32.mrb[74].mxu0 }
 0x18d   : > { %vm2391_vm6 = vcmp.ge.f32.partialorder %v2382_v55, 0.0  ;;  %v2400_v22 = vmul.f32 0.01, %v2382_v55  ;;  %v2383_v52 = vadd.f32 %v4317_v21, %v2367_v32  ;;  %v3167_v9 = vpop.f32.mrb[74].mxu1  ;;  %v3166_v31 = vadd.f32 %v3165_v14, %v3164_v25  ;;  %v3122_v60 = vpop.f32.mrb[75].mxu0 }
 0x18e   : > { %v3168_v13 = vpop.f32.mrb[75].mxu1  ;;  %v3123_v20 = vadd.f32 %v3122_v60, %v3121_v58 }
 0x18f   : > { %v2409_v28 = vsel %vm2391_vm6, %v2382_v55, %v2400_v22  ;;  %vm2392_vm7 = vcmp.ge.f32.partialorder %v2383_v52, 0.0  ;;  %v2401_v2 = vmul.f32 0.01, %v2383_v52  ;;  %v2349_v34 = vadd.f32 %v3166_v31, %v3120_v45 }
 0x190   : > { %2418 = vst [vmem:[%s4326_s9 + $0x20] sm:$0xff] %v2409_v28  ;;  %v3169_v39 = vadd.f32 %v3168_v13, %v3167_v9 }
 0x191   : > { %v2410_v30 = vsel %vm2392_vm7, %v2383_v52, %v2401_v2  ;;  %v2368_v26 = vadd.f32 %v2349_v34, %v4306_v59 }
 0x192   : > { %2419 = vst [vmem:[%s4326_s9 + $0x28] sm:$0xff] %v2410_v30  ;;  %v2352_v54 = vadd.f32 %v3169_v39, %v3123_v20  ;;  %v3124_v48 = vpop.f32.mrb[76].mxu0 }
 0x193   : > { %v3170_v23 = vpop.f32.mrb[76].mxu1  ;;  %v2384_v36 = vadd.f32 %v4317_v21, %v2368_v26  ;;  %v3125_v7 = vpop.f32.mrb[77].mxu0 }
 0x194   : > { %v2369_v63 = vadd.f32 %v2352_v54, %v4309_v10  ;;  %v3171_v56 = vpop.f32.mrb[77].mxu1  ;;  %v3126_v50 = vadd.f32 %v3125_v7, %v3124_v48  ;;  %v3127_v44 = vpop.f32.mrb[78].mxu0 }
 0x195   : > { %v3172_v3 = vadd.f32 %v3171_v56, %v3170_v23  ;;  %v3173_v61 = vpop.f32.mrb[78].mxu1  ;;  %vm2393_vm8 = vcmp.ge.f32.partialorder %v2384_v36, 0.0  ;;  %v2402_v38 = vmul.f32 0.01, %v2384_v36  ;;  %v3128_v8 = vpop.f32.mrb[79].mxu0 }
 0x196   : > { %v2385_v59 = vadd.f32 %v4317_v21, %v2369_v63  ;;  %v3174_v51 = vpop.f32.mrb[79].mxu1 }
 0x197   : > { %v2357_v19 = vadd.f32 %v3172_v3, %v3126_v50  ;;  %v2411_v46 = vsel %vm2393_vm8, %v2384_v36, %v2402_v38 }
 0x198   : > { %vm2394_vm9 = vcmp.ge.f32.partialorder %v2385_v59, 0.0  ;;  %v2403_v17 = vmul.f32 0.01, %v2385_v59  ;;  %2420 = vst [vmem:[%s4326_s9 + $0x30] sm:$0xff] %v2411_v46 }
 0x199   : > { %v2370_v10 = vadd.f32 %v2357_v19, %v4312_v16 }
 0x19a   : > { %v2412_v1 = vsel %vm2394_vm9, %v2385_v59, %v2403_v17 }
 0x19b   : > { %2421 = vst [vmem:[%s4326_s9 + $0x38] sm:$0xff] %v2412_v1  ;;  %v2386_v53 = vadd.f32 %v4317_v21, %v2370_v10 }
 0x19d   : > { %vm2395_vm10 = vcmp.ge.f32.partialorder %v2386_v53, 0.0  ;;  %v2404_v49 = vmul.f32 0.01, %v2386_v53 }
 0x19f   : > { %v2413_v57 = vsel %vm2395_vm10, %v2386_v53, %v2404_v49 }
 0x1a0   : > { %2422 = vst [vmem:[%s4326_s9 + $0x40] sm:$0xff] %v2413_v57 }
 0x1a1 PF: > { %s13_s12 = sadd.s32 1, %s3324_s12  }
 0x1a2   : > { %p10_p4 = scmp.ge.s32.totalorder %s13_s12, 4  }
 0x1a4   :  { %12 = sbr.rel (!%p10_p4) target bundleno = 1 (0x1), region = 65 }

// kernel: encoder_forward.6
= control target key start
LH: loop header
LB: loop body
LE: loop exit
PB: predicated region body
PF: predicated region fallthrough
CT: control target
= control target key end

     0   :  { %s3388_s12 = smov 0   ;;  %s4320_s0 = inlined_call_operand.vmem [shape: f32[2,32,512], index: 0, kind: input, shape index: {}]   ;;  %s4321_s1 = inlined_call_operand.vmem [shape: bf16[4,512,256], index: 1, kind: input, shape index: {}]   ;;  %s4322_s2 = inlined_call_operand.vmem [shape: f32[1,256], index: 2, kind: input, shape index: {}]   ;;  %s4323_s3 = inlined_call_operand.vmem [shape: f32[2,20,256], index: 3, kind: output, shape index: {}]  }
   0x1 LB: > { %s2478_s13 = sadd.s32 4294967295, %s3366_s12   ;;  %p2482_p0 = scmp.ge.s32.totalorder %s3366_s12, 1  ;;  %s3366_s12 = sphi %s3388_s12, %s13_s12  }
   0x2   : > { %p137_p1 = scmp.lt.s32.totalorder %s3366_s12, 3 }
   0x4   : > { %p138_p2 = pnand %p2482_p0, %p137_p1 }
   0x5   : > { %v2974_v0 = vld [vmem:[%s4321_s1 + $0x204] ss:$8 sps:$4 sm:$0xff] (!%p138_p2)   ;;  %v2978_v2 = vld [vmem:[%s4321_s1 + $0x200] ss:$8 sps:$4 sm:$0xff] (!%p138_p2)   ;;  %v2980_v4 = vld [vmem:[%s4321_s1 + $0x214] ss:$8 sps:$4 sm:$0xff] (!%p138_p2)  }
   0x6   : > { %141 = sbr.rel (%p138_p2) target bundleno = 495 (0x1ef), region = 32  ;;  %v2976_v1 = vld [vmem:[%s4321_s1 + $0x404] ss:$8 sps:$4 sm:$0xff] (!%p138_p2)   ;;  %725 = vmatprep.subr.bf16.mxu1 (!%p138_p2), %v2974_v0  ;;  %v2979_v3 = vld [vmem:[%s4321_s1 + $0x400] ss:$8 sps:$4 sm:$0xff] (!%p138_p2)   ;;  %p161_p3 = scmp.lt.s32.totalorder (!%p138_p2), %s2478_s13, 1 }
   0x7   : > { %1735 = vmatprep.subr.bf16.mxu0 (!%p138_p2), %v2976_v1  ;;  %726 = vmatpush1.bf16.msra.mxu1 (!%p138_p2), %v2978_v2  ;;  %v2982_v5 = vld [vmem:[%s4321_s1 + $0x414] ss:$8 sps:$4 sm:$0xff] (!%p138_p2)   ;;  %v2984_v6 = vld [vmem:[%s4321_s1 + $0x210] ss:$8 sps:$4 sm:$0xff] (!%p138_p2)   ;;  %v2986_v8 = vld [vmem:[%s4321_s1 + $0x224] ss:$8 sps:$4 sm:$0xff] (!%p138_p2)  }
   0x8   : > { %1736 = vmatpush1.bf16.msra.mxu0 (!%p138_p2), %v2979_v3  ;;  %727 = vmatprep.subr.bf16.mxu1 (!%p138_p2), %v2980_v4  ;;  %v2985_v7 = vld [vmem:[%s4321_s1 + $0x410] ss:$8 sps:$4 sm:$0xff] (!%p138_p2)   ;;  %v2988_v9 = vld [vmem:[%s4321_s1 + $0x424] ss:$8 sps:$4 sm:$0xff] (!%p138_p2)   ;;  %v2990_v10 = vld [vmem:[%s4321_s1 + $0x220] ss:$8 sps:$4 sm:$0xff] (!%p138_p2)  }
   0x9   : > { %1737 = vmatprep.subr.bf16.mxu0 (!%p138_p2), %v2982_v5  ;;  %v2991_v11 = vld [vmem:[%s4321_s1 + $0x420] ss:$8 sps:$4 sm:$0xff] (!%p138_p2)   ;;  %v2992_v12 = vld [vmem:[%s4321_s1 + $0x234] ss:$8 sps:$4 sm:$0xff] (!%p138_p2)   ;;  %v2996_v14 = vld [vmem:[%s4321_s1 + $0x230] ss:$8 sps:$4 sm:$0xff] (!%p138_p2)  }
   0xa   : > { %v2994_v13 = vld [vmem:[%s4321_s1 + $0x434] ss:$8 sps:$4 sm:$0xff] (!%p138_p2)   ;;  %v2997_v15 = vld [vmem:[%s4321_s1 + $0x430] ss:$8 sps:$4 sm:$0xff] (!%p138_p2)   ;;  %v2998_v16 = vld [vmem:[%s4321_s1 + $0x244] ss:$8 sps:$4 sm:$0xff] (!%p138_p2)  }
   0xb   : > { %728 = vmatpush1.bf16.msra.mxu1 (!%p138_p2), %v2984_v6  ;;  %v3000_v17 = vld [vmem:[%s4321_s1 + $0x444] ss:$8 sps:$4 sm:$0xff] (!%p138_p2)   ;;  %v3002_v18 = vld [vmem:[%s4321_s1 + $0x240] ss:$8 sps:$4 sm:$0xff] (!%p138_p2)   ;;  %v3004_v20 = vld [vmem:[%s4321_s1 + $0x254] ss:$8 sps:$4 sm:$0xff] (!%p138_p2)  }
   0xc   : > { %1738 = vmatpush1.bf16.msra.mxu0 (!%p138_p2), %v2985_v7  ;;  %729 = vmatprep.subr.bf16.mxu1 (!%p138_p2), %v2986_v8  ;;  %v3003_v19 = vld [vmem:[%s4321_s1 + $0x440] ss:$8 sps:$4 sm:$0xff] (!%p138_p2)   ;;  %v3006_v21 = vld [vmem:[%s4321_s1 + $0x454] ss:$8 sps:$4 sm:$0xff] (!%p138_p2)   ;;  %v3008_v22 = vld [vmem:[%s4321_s1 + $0x250] ss:$8 sps:$4 sm:$0xff] (!%p138_p2)  }
   0xd   : > { %1739 = vmatprep.subr.bf16.mxu0 %v2988_v9  ;;  %v3009_v23 = vld [vmem:[%s4321_s1 + $0x450] ss:$8 sps:$4 sm:$0xff]   ;;  %v3010_v24 = vld [vmem:[%s4321_s1 + $0x264] ss:$8 sps:$4 sm:$0xff]   ;;  %v3014_v26 = vld [vmem:[%s4321_s1 + $0x260] ss:$8 sps:$4 sm:$0xff]  }
   0xe   : > { %v3012_v25 = vld [vmem:[%s4321_s1 + $0x464] ss:$8 sps:$4 sm:$0xff]   ;;  %v3015_v27 = vld [vmem:[%s4321_s1 + $0x460] ss:$8 sps:$4 sm:$0xff]   ;;  %v3016_v28 = vld [vmem:[%s4321_s1 + $0x274] ss:$8 sps:$4 sm:$0xff]  }
   0xf   : > { %730 = vmatpush1.bf16.msra.mxu1 %v2990_v10  ;;  %v3018_v29 = vld [vmem:[%s4321_s1 + $0x474] ss:$8 sps:$4 sm:$0xff]   ;;  %v3020_v30 = vld [vmem:[%s4321_s1 + $0x270] ss:$8 sps:$4 sm:$0xff]   ;;  %v3022_v32 = vld [vmem:[%s4321_s1 + $0x284] ss:$8 sps:$4 sm:$0xff]  }
  0x10   : > { %1740 = vmatpush1.bf16.msra.mxu0 %v2991_v11  ;;  %731 = vmatprep.subr.bf16.mxu1 %v2992_v12  ;;  %v3021_v31 = vld [vmem:[%s4321_s1 + $0x470] ss:$8 sps:$4 sm:$0xff]   ;;  %v3024_v33 = vld [vmem:[%s4321_s1 + $0x484] ss:$8 sps:$4 sm:$0xff]   ;;  %v3026_v34 = vld [vmem:[%s4321_s1 + $0x280] ss:$8 sps:$4 sm:$0xff]  }
  0x11   : > { %1741 = vmatprep.subr.bf16.mxu0 %v2994_v13  ;;  %v3027_v35 = vld [vmem:[%s4321_s1 + $0x480] ss:$8 sps:$4 sm:$0xff]   ;;  %v3028_v36 = vld [vmem:[%s4321_s1 + $0x294] ss:$8 sps:$4 sm:$0xff]   ;;  %s4325_s13 = smov (!%p161_p3, %s2478_s13), 1  ;;  %vm1932_vm2 = vcmask 1044480  }
  0x12   : > { %v3030_v37 = vld [vmem:[%s4321_s1 + $0x494] ss:$8 sps:$4 sm:$0xff]   ;;  %v3032_v38 = vld [vmem:[%s4321_s1 + $0x290] ss:$8 sps:$4 sm:$0xff]   ;;  %v3034_v40 = vld [vmem:[%s4321_s1 + $0x2a4] ss:$8 sps:$4 sm:$0xff]  }
  0x13   : > { %732 = vmatpush1.bf16.msra.mxu1 %v2996_v14  ;;  %v3033_v39 = vld [vmem:[%s4321_s1 + $0x490] ss:$8 sps:$4 sm:$0xff]   ;;  %s2936_s21 = sshll.u32 %s4325_s13, 7  ;;  %v3036_v41 = vld [vmem:[%s4321_s1 + $0x4a4] ss:$8 sps:$4 sm:$0xff]   ;;  %s2965_s23 = smul.u32 48, %s4325_s13 }
  0x14   : > { %1742 = vmatpush1.bf16.msra.mxu0 %v2997_v15  ;;  %733 = vmatprep.subr.bf16.mxu1 %v2998_v16  ;;  %v3038_v42 = vld [vmem:[%s4321_s1 + $0x2a0] ss:$8 sps:$4 sm:$0xff]   ;;  %s3538_s30 = scalar_lea.vmem %s4320_s0, %s2936_s21  ;;  %v3040_v44 = vld [vmem:[%s4321_s1 + $0x2b4] ss:$8 sps:$4 sm:$0xff]   ;;  %vm336_vm0 = vsmask.f32 7424 }
  0x15   : > { %1743 = vmatprep.subr.bf16.mxu0 %v3000_v17  ;;  %v3039_v43 = vld [vmem:[%s4321_s1 + $0x4a0] ss:$8 sps:$4 sm:$0xff]   ;;  %v3042_v45 = vld [vmem:[%s4321_s1 + $0x4b4] ss:$8 sps:$4 sm:$0xff]   ;;  %v3044_v46 = vld [vmem:[%s4321_s1 + $0x2b0] ss:$8 sps:$4 sm:$0xff]   ;;  %s4307_s26 = scalar_lea.vmem %s4323_s3, %s2965_s23 }
  0x16   : > { %v3045_v47 = vld [vmem:[%s4321_s1 + $0x4b0] ss:$8 sps:$4 sm:$0xff]   ;;  %v3553_v48 = vld [vmem:[%s3538_s30 + $0x28] sm:$0xff]  ;;  %vm1338_vm1 = vsmask.f32 5376  ;;  %v175_v0 = vld [vmem:[%s3538_s30 + $0x20] sm:$0xff] }
  0x17   : > { %734 = vmatpush1.bf16.msra.mxu1 %v3002_v18  ;;  %v256_v49 = vld [vmem:[%s3538_s30 + $0x8] sm:$0xfe]  ;;  %v1262_v57 = vld [vmem:[%s3538_s30 + $0x68] sm:$0x1]  ;;  %v3052_v1 = vld [vmem:[%s4321_s1 + $0x2d4] ss:$8 sps:$4 sm:$0xff]  }
  0x18   : > { %1744 = vmatpush1.bf16.msra.mxu0 %v3003_v19  ;;  %735 = vmatprep.subr.bf16.mxu1 %v3004_v20  ;;  %v260_v50 = vld [vmem:[%s3538_s30 + $0x48] sm:$0x1f]  ;;  %v264_v53 = vpack.c.bf16 %v3553_v48, %v256_v49  ;;  %v1250_v55 = vld [vmem:[%s3538_s30 + $0x8] sm:$0xe0]  ;;  %v3054_v2 = vld [vmem:[%s4321_s1 + $0x4d4] ss:$8 sps:$4 sm:$0xff]  }
  0x19   : > { %1745 = vmatprep.subr.bf16.mxu0 %v3006_v21  ;;  %v3046_v51 = vld [vmem:[%s4321_s1 + $0x2c4] ss:$8 sps:$4 sm:$0xff]   ;;  %v3564_v54 = vpack.c.bf16 %v260_v50, %v260_v50  ;;  %v3050_v58 = vld [vmem:[%s4321_s1 + $0x2c0] ss:$8 sps:$4 sm:$0xff]   ;;  %v1266_v63 = vpack.c.bf16 %v3553_v48, %v1250_v55  ;;  %v3056_v20 = vld [vmem:[%s4321_s1 + $0x2d0] ss:$8 sps:$4 sm:$0xff]  }
  0x1a   : > { %v3048_v52 = vld [vmem:[%s4321_s1 + $0x4c4] ss:$8 sps:$4 sm:$0xff]   ;;  %v3051_v59 = vld [vmem:[%s4321_s1 + $0x4c0] ss:$8 sps:$4 sm:$0xff]   ;;  %v350_v60 = vshrl.u32 %v264_v53, 16  ;;  %v352_v61 = vshll.u32 %v264_v53, 16 }
  0x1b   : > { %736 = vmatpush1.bf16.msra.mxu1 %v3008_v22  ;;  %v3568_v56 = vld [vmem:[%s3538_s30 + $0x48] sm:$0xff]  ;;  %v357_v62 = vshll.u32 %v3564_v54, 16  ;;  %v255_v4 = vld [vmem:[%s3538_s30] sm:$0xfe]  ;;  %v1357_v7 = vshrl.u32 %v1266_v63, 16  ;;  %v1360_v8 = vshll.u32 %v1266_v63, 16 }
  0x1c   : > { %1746 = vmatpush1.bf16.msra.mxu0 %v3009_v23  ;;  %737 = vmatprep.subr.bf16.mxu1 %v3010_v24  ;;  %v1270_v3 = vpack.c.bf16 %v1262_v57, %v3568_v56  ;;  %v354_v5 = vrot.slane %v352_v61, 1  ;;  %v259_v9 = vld [vmem:[%s3538_s30 + $0x40] sm:$0x1f]  ;;  %v263_v12 = vpack.c.bf16 %v175_v0, %v255_v4  ;;  %v1249_v13 = vld [vmem:[%s3538_s30] sm:$0xe0] }
  0x1d   : > { %1747 = vmatprep.subr.bf16.mxu0 %v3012_v25  ;;  %v3588_v6 = vrot.slane %v357_v62, 1  ;;  %v1257_v14 = vld [vmem:[%s3538_s30 + $0x40] sm:$0xff]  ;;  %v1359_v16 = vrot.slane %v1357_v7, 2  ;;  %v1362_v17 = vrot.slane %v1360_v8, 3  ;;  %v1265_v19 = vpack.c.bf16 %v175_v0, %v1249_v13  ;;  %v3057_v25 = vld [vmem:[%s4321_s1 + $0x4d0] ss:$8 sps:$4 sm:$0xff]  }
  0x1e   : > { %v1365_v10 = vshrl.u32 %v1270_v3, 16  ;;  %v1368_v11 = vshll.u32 %v1270_v3, 16  ;;  %v355_v15 = vor.u32 %v354_v5, %v350_v60  ;;  %v1261_v18 = vld [vmem:[%s3538_s30 + $0x60] sm:$0x1]  ;;  %v3597_v23 = vpack.c.bf16 %v259_v9, %v259_v9  ;;  %v3068_v49 = vld [vmem:[%s4321_s1 + $0x2f0] ss:$8 sps:$4 sm:$0xff]  }
  0x1f   : > { %738 = vmatpush1.bf16.msra.mxu1 %v3014_v26  ;;  %v340_v24 = vshll.u32 %v263_v12, 16  ;;  %v3058_v26 = vld [vmem:[%s4321_s1 + $0x2e4] ss:$8 sps:$4 sm:$0xff]   ;;  %v3069_v50 = vld [vmem:[%s4321_s1 + $0x4f0] ss:$8 sps:$4 sm:$0xff]  }
  0x20   : > { %1748 = vmatpush1.bf16.msra.mxu0 %v3015_v27  ;;  %739 = vmatprep.subr.bf16.mxu1 %v3016_v28  ;;  %v1367_v21 = vrot.slane %v1365_v10, 2  ;;  %v1370_v22 = vrot.slane %v1368_v11, 3  ;;  %v360_v27 = vsel %vm336_vm0, %v355_v15, %v3588_v6  ;;  %v1363_v28 = vor.u32 %v1362_v17, %v1359_v16  ;;  %v3070_v60 = vld [vmem:[%s4321_s1 + $0x300] ss:$8 sps:$4 sm:$0xff]   ;;  %v3078_v0 = vld [vmem:[%s4321_s1 + $0x314] ss:$8 sps:$4 sm:$0xff]  }
  0x21   : > { %1749 = vmatprep.subr.bf16.mxu0 %v3018_v29  ;;  %v1269_v29 = vpack.c.bf16 %v1261_v18, %v1257_v14  ;;  %757 = vmatprep.mubr.bf16.mxu1 %v360_v27  ;;  %v3073_v61 = vld [vmem:[%s4321_s1 + $0x500] ss:$8 sps:$4 sm:$0xff]   ;;  %v385_v3 = vshrl.u32 %v3597_v23, 16  ;;  %v3079_v4 = vld [vmem:[%s4321_s1 + $0x510] ss:$8 sps:$4 sm:$0xff]  }
  0x22   : > { %v3084_v5 = vld [vmem:[%s4321_s1 + $0x324] ss:$8 sps:$4 sm:$0xff]   ;;  %v3082_v7 = vld [vmem:[%s4321_s1 + $0x320] ss:$8 sps:$4 sm:$0xff]   ;;  %v3090_v10 = vld [vmem:[%s4321_s1 + $0x334] ss:$8 sps:$4 sm:$0xff]  }
  0x23   : > { %740 = vmatpush1.bf16.msra.mxu1 %v3020_v30  ;;  %v3060_v30 = vld [vmem:[%s4321_s1 + $0x4e4] ss:$8 sps:$4 sm:$0xff]   ;;  %v3085_v9 = vld [vmem:[%s4321_s1 + $0x520] ss:$8 sps:$4 sm:$0xff]   ;;  %v3093_v11 = vld [vmem:[%s4321_s1 + $0x534] ss:$8 sps:$4 sm:$0xff]  }
  0x24   : > { %1750 = vmatpush1.bf16.msra.mxu0 %v3021_v31  ;;  %741 = vmatprep.subr.bf16.mxu1 %v3022_v32  ;;  %v1371_v31 = vor.u32 %v1370_v22, %v1367_v21  ;;  %v1340_v32 = vshrl.u32 %v1265_v19, 16  ;;  %v3091_v13 = vld [vmem:[%s4321_s1 + $0x530] ss:$8 sps:$4 sm:$0xff]   ;;  %v3096_v14 = vld [vmem:[%s4321_s1 + $0x344] ss:$8 sps:$4 sm:$0xff]  }
  0x25   : > { %1751 = vmatprep.subr.bf16.mxu0 %v3024_v33  ;;  %v1343_v33 = vshll.u32 %v1265_v19, 16  ;;  %v3099_v15 = vld [vmem:[%s4321_s1 + $0x544] ss:$8 sps:$4 sm:$0xff]   ;;  %v3094_v16 = vld [vmem:[%s4321_s1 + $0x340] ss:$8 sps:$4 sm:$0xff]  }
  0x26   : > { %v3097_v17 = vld [vmem:[%s4321_s1 + $0x540] ss:$8 sps:$4 sm:$0xff]   ;;  %v3102_v18 = vld [vmem:[%s4321_s1 + $0x354] ss:$8 sps:$4 sm:$0xff]   ;;  %v3103_v21 = vld [vmem:[%s4321_s1 + $0x550] ss:$8 sps:$4 sm:$0xff]  }
  0x27   : > { %742 = vmatpush1.bf16.msra.mxu1 %v3026_v34  ;;  %v3062_v34 = vld [vmem:[%s4321_s1 + $0x2e0] ss:$8 sps:$4 sm:$0xff]   ;;  %v3105_v19 = vld [vmem:[%s4321_s1 + $0x554] ss:$8 sps:$4 sm:$0xff]   ;;  %v3108_v22 = vld [vmem:[%s4321_s1 + $0x364] ss:$8 sps:$4 sm:$0xff]  }
  0x28   : > { %1752 = vmatpush1.bf16.msra.mxu0 %v3027_v35  ;;  %743 = vmatprep.subr.bf16.mxu1 %v3028_v36  ;;  %v3063_v35 = vld [vmem:[%s4321_s1 + $0x4e0] ss:$8 sps:$4 sm:$0xff]   ;;  %v1348_v36 = vshrl.u32 %v1269_v29, 16  ;;  %v3117_v27 = vld [vmem:[%s4321_s1 + $0x574] ss:$8 sps:$4 sm:$0xff]  }
  0x29   : > { %1753 = vmatprep.subr.bf16.mxu0 %v3030_v37  ;;  %v1351_v37 = vshll.u32 %v1269_v29, 16  ;;  %v3115_v29 = vld [vmem:[%s4321_s1 + $0x570] ss:$8 sps:$4 sm:$0xff]  }
  0x2b   : > { %744 = vmatpush1.bf16.msra.mxu1 %v3032_v38  ;;  %v1372_v38 = vsel %vm1338_vm1, %v1363_v28, %v1371_v31  ;;  %v3112_v28 = vld [vmem:[%s4321_s1 + $0x370] ss:$8 sps:$4 sm:$0xff]  }
  0x2c   : > { %1754 = vmatpush1.bf16.msra.mxu0 %v3033_v39  ;;  %745 = vmatprep.subr.bf16.mxu1 %v3034_v40  ;;  %v338_v39 = vshrl.u32 %v263_v12, 16  ;;  %v342_v40 = vrot.slane %v340_v24, 1  ;;  %v3088_v12 = vld [vmem:[%s4321_s1 + $0x330] ss:$8 sps:$4 sm:$0xff]   ;;  %v3106_v24 = vld [vmem:[%s4321_s1 + $0x360] ss:$8 sps:$4 sm:$0xff]  }
  0x2d   : > { %1755 = vmatprep.subr.bf16.mxu0 %v3036_v41  ;;  %v345_v41 = vshll.u32 %v3597_v23, 16  ;;  %1767 = vmatprep.mubr.bf16.mxu0 %v1372_v38  ;;  %v3111_v23 = vld [vmem:[%s4321_s1 + $0x564] ss:$8 sps:$4 sm:$0xff]   ;;  %v3747_v38 = vld [vmem:[%s3538_s30 + $0x58] sm:$0xff] }
  0x2f   : > { %746 = vmatpush1.bf16.msra.mxu1 %v3038_v42  ;;  %v3064_v42 = vld [vmem:[%s4321_s1 + $0x2f4] ss:$8 sps:$4 sm:$0xff]   ;;  %v347_v53 = vrot.slane %v345_v41, 1  ;;  %v3118_v41 = vld [vmem:[%s4321_s1 + $0x380] ss:$8 sps:$4 sm:$0xff]  }
  0x30   : > { %1756 = vmatpush1.bf16.msra.mxu0 %v3039_v43  ;;  %747 = vmatprep.subr.bf16.mxu1 %v3040_v44  ;;  %v1342_v43 = vrot.slane %v1340_v32, 2  ;;  %v1345_v44 = vrot.slane %v1343_v33, 3  ;;  %v258_v32 = vld [vmem:[%s3538_s30 + $0x18] sm:$0xfe] }
  0x31   : > { %1757 = vmatprep.subr.bf16.mxu0 %v3042_v45  ;;  %v1350_v45 = vrot.slane %v1348_v36, 2  ;;  %v387_v8 = vor.u32 %v385_v3, %v347_v53  ;;  %v262_v33 = vld [vmem:[%s3538_s30 + $0x58] sm:$0x1f]  ;;  %v3135_v3 = vld [vmem:[%s4321_s1 + $0x5a4] ss:$8 sps:$4 sm:$0xff]  }
  0x32   : > { %v1346_v55 = vor.u32 %v1345_v44, %v1342_v43 }
  0x33   : > { %748 = vmatpush1.bf16.msra.mxu1 %v3044_v46  ;;  %v1353_v46 = vrot.slane %v1351_v37, 3  ;;  %v3744_v37 = vpack.c.bf16 %v262_v33, %v262_v33 }
  0x34   : > { %1758 = vmatpush1.bf16.msra.mxu0 %v3045_v47  ;;  %749 = vmatprep.subr.bf16.mxu1 %v3046_v51  ;;  %v3066_v47 = vld [vmem:[%s4321_s1 + $0x4f4] ss:$8 sps:$4 sm:$0xff]   ;;  %v3072_v51 = vld [vmem:[%s4321_s1 + $0x304] ss:$8 sps:$4 sm:$0xff]  }
  0x35   : > { %1759 = vmatprep.subr.bf16.mxu0 %v3048_v52  ;;  %v343_v52 = vor.u32 %v342_v40, %v338_v39  ;;  %v1354_v57 = vor.u32 %v1353_v46, %v1350_v45  ;;  %v1264_v39 = vld [vmem:[%s3538_s30 + $0x78] sm:$0x1]  ;;  %v381_v46 = vshll.u32 %v3744_v37, 16 }
  0x36   : > { %v1272_v43 = vpack.c.bf16 %v1264_v39, %v3747_v38  ;;  %v3159_v39 = vld [vmem:[%s4321_s1 + $0x5e4] ss:$8 sps:$4 sm:$0xff]  }
  0x37   : > { %750 = vmatpush1.bf16.msra.mxu1 %v3050_v58  ;;  %v3075_v58 = vld [vmem:[%s4321_s1 + $0x504] ss:$8 sps:$4 sm:$0xff]   ;;  %v348_v62 = vsel %vm336_vm0, %v343_v52, %v347_v53  ;;  %v1355_v63 = vsel %vm1338_vm1, %v1346_v55, %v1354_v57  ;;  %v3129_v53 = vld [vmem:[%s4321_s1 + $0x594] ss:$8 sps:$4 sm:$0xff]  }
  0x38   : > { %1760 = vmatpush1.bf16.msra.mxu0 %v3051_v59  ;;  %751 = vmatprep.subr.bf16.mxu1 %v3052_v1  ;;  %v388_v59 = vshrl.u32 %v3564_v54, 16  ;;  %v3081_v54 = vld [vmem:[%s4321_s1 + $0x514] ss:$8 sps:$4 sm:$0xff]   ;;  %v1402_v52 = vshll.u32 %v1272_v43, 16 }
  0x39   : > { %1761 = vmatprep.subr.bf16.mxu0 %v3054_v2  ;;  %v3076_v2 = vld [vmem:[%s4321_s1 + $0x310] ss:$8 sps:$4 sm:$0xff]  }
  0x3a   : > { %v390_v1 = vor.u32 %v388_v59, %v3588_v6  ;;  %v3087_v6 = vld [vmem:[%s4321_s1 + $0x524] ss:$8 sps:$4 sm:$0xff]  }
  0x3b   : > { %752 = vmatpush1.bf16.msra.mxu1 %v3056_v20  ;;  %v3100_v20 = vld [vmem:[%s4321_s1 + $0x350] ss:$8 sps:$4 sm:$0xff]  }
  0x3c   : > { %1762 = vmatpush1.bf16.msra.mxu0 %v3057_v25  ;;  %753 = vmatprep.subr.bf16.mxu1 %v3058_v26  ;;  %v3109_v25 = vld [vmem:[%s4321_s1 + $0x560] ss:$8 sps:$4 sm:$0xff]   ;;  %v3114_v26 = vld [vmem:[%s4321_s1 + $0x374] ss:$8 sps:$4 sm:$0xff]  }
  0x3d   : > { %1763 = vmatprep.subr.bf16.mxu0 %v3060_v30  ;;  %v3120_v30 = vld [vmem:[%s4321_s1 + $0x384] ss:$8 sps:$4 sm:$0xff]  }
  0x3f   : > { %754 = vmatpush1.bf16.msra.mxu1 %v3062_v34  ;;  %v1252_v34 = vld [vmem:[%s3538_s30 + $0x18] sm:$0xe0] }
  0x40   : > { %1764 = vmatpush1.bf16.msra.mxu0 %v3063_v35  ;;  %755 = vmatprep.subr.bf16.mxu1 %v3064_v42  ;;  %v3123_v35 = vld [vmem:[%s4321_s1 + $0x584] ss:$8 sps:$4 sm:$0xff]   ;;  %v3121_v42 = vld [vmem:[%s4321_s1 + $0x580] ss:$8 sps:$4 sm:$0xff]  }
  0x41   : > { %1765 = vmatprep.subr.bf16.mxu0 %v3066_v47 }
  0x43   : > { %756 = vmatpush1.bf16.msra.mxu1 %v3068_v49  ;;  %v3126_v49 = vld [vmem:[%s4321_s1 + $0x394] ss:$8 sps:$4 sm:$0xff]  }
  0x44   : > { %1766 = vmatpush1.bf16.msra.mxu0 %v3069_v50  ;;  %776 = vmatprep.subr.bf16.mxu1 %v3072_v51  ;;  %v1399_v51 = vshrl.u32 %v1272_v43, 16 }
  0x45   : > { %1786 = vmatprep.subr.bf16.mxu0 %v3075_v58 }
  0x46   : > { %758 = vmatmul.mubr.bf16.vlgmr.msra.gmra.mrb[0].mxu1 %v348_v62  ;;  %v3124_v62 = vld [vmem:[%s4321_s1 + $0x390] ss:$8 sps:$4 sm:$0xff]  }
  0x47   : > { %1768 = vmatmul.mubr.bf16.vlgmr.msra.gmra.mrb[0].mxu0 %v1355_v63  ;;  %777 = vmatpush1.bf16.msra.mxu1 %v3070_v60  ;;  %v1401_v60 = vrot.slane %v1399_v51, 2  ;;  %v3165_v51 = vld [vmem:[%s4321_s1 + $0x5f4] ss:$8 sps:$4 sm:$0xff]  }
  0x48   : > { %1787 = vmatpush1.bf16.msra.mxu0 %v3073_v61  ;;  %778 = vmatprep.subr.bf16.mxu1 %v3078_v0  ;;  %v1404_v61 = vrot.slane %v1402_v52, 3  ;;  %v3127_v0 = vld [vmem:[%s4321_s1 + $0x590] ss:$8 sps:$4 sm:$0xff]  }
  0x49   : > { %1788 = vmatprep.subr.bf16.mxu0 %v3081_v54  ;;  %767 = vmatprep.mubr.bf16.mxu1 %v390_v1  ;;  %v3160_v52 = vld [vmem:[%s4321_s1 + $0x3f0] ss:$8 sps:$4 sm:$0xff]  }
  0x4a   : > { %1777 = vmatprep.mubr.bf16.mxu0 %v1371_v31  ;;  %v3735_v31 = vld [vmem:[%s3538_s30 + $0x38] sm:$0xff]  ;;  %v3773_v1 = vor.u32 %v1404_v61, %v1401_v60 }
  0x4b   : > { %779 = vmatpush1.bf16.msra.mxu1 %v3076_v2  ;;  %v266_v36 = vpack.c.bf16 %v3735_v31, %v258_v32  ;;  %v1268_v40 = vpack.c.bf16 %v3735_v31, %v1252_v34  ;;  %v3132_v2 = vld [vmem:[%s4321_s1 + $0x3a4] ss:$8 sps:$4 sm:$0xff]  }
  0x4c   : > { %1789 = vmatpush1.bf16.msra.mxu0 %v3079_v4  ;;  %780 = vmatprep.subr.bf16.mxu1 %v3084_v5 }
  0x4d   : > { %1790 = vmatprep.subr.bf16.mxu0 %v3087_v6  ;;  %v374_v44 = vshrl.u32 %v266_v36, 16  ;;  %v376_v45 = vshll.u32 %v266_v36, 16  ;;  %v1391_v47 = vshrl.u32 %v1268_v40, 16  ;;  %v1394_v50 = vshll.u32 %v1268_v40, 16  ;;  %v3130_v6 = vld [vmem:[%s4321_s1 + $0x3a0] ss:$8 sps:$4 sm:$0xff]  }
  0x4e   : > { %768 = vmatmul.mubr.bf16.gmra.mrb[4].mxu1 %v387_v8  ;;  %v3138_v8 = vld [vmem:[%s4321_s1 + $0x3b4] ss:$8 sps:$4 sm:$0xff]   ;;  %v3154_v40 = vld [vmem:[%s4321_s1 + $0x3e0] ss:$8 sps:$4 sm:$0xff]  }
  0x4f   : > { %1778 = vmatmul.mubr.bf16.gmra.mrb[4].mxu0 %v1354_v57  ;;  %781 = vmatpush1.bf16.msra.mxu1 %v3082_v7  ;;  %v378_v55 = vrot.slane %v376_v45, 1  ;;  %v3765_v57 = vrot.slane %v381_v46, 1  ;;  %v1393_v58 = vrot.slane %v1391_v47, 2  ;;  %v1396_v59 = vrot.slane %v1394_v50, 3  ;;  %v3133_v7 = vld [vmem:[%s4321_s1 + $0x5a0] ss:$8 sps:$4 sm:$0xff]  }
  0x50   : > { %1791 = vmatpush1.bf16.msra.mxu0 %v3085_v9  ;;  %782 = vmatprep.subr.bf16.mxu1 %v3090_v10  ;;  %v3141_v9 = vld [vmem:[%s4321_s1 + $0x5b4] ss:$8 sps:$4 sm:$0xff]   ;;  %v3136_v10 = vld [vmem:[%s4321_s1 + $0x3b0] ss:$8 sps:$4 sm:$0xff]  }
  0x51   : > { %1792 = vmatprep.subr.bf16.mxu0 %v3093_v11  ;;  %v379_v63 = vor.u32 %v378_v55, %v374_v44  ;;  %v1397_v54 = vor.u32 %v1396_v59, %v1393_v58  ;;  %v3139_v11 = vld [vmem:[%s4321_s1 + $0x5b0] ss:$8 sps:$4 sm:$0xff]   ;;  %v3168_v59 = vld [vmem:[%s4321_s1 + $0x4] ss:$8 sps:$4 sm:$0xff]  }
  0x53   : > { %783 = vmatpush1.bf16.msra.mxu1 %v3088_v12  ;;  %v384_v4 = vsel %vm336_vm0, %v379_v63, %v3765_v57  ;;  %v1406_v5 = vsel %vm1338_vm1, %v1397_v54, %v3773_v1  ;;  %v3804_v12 = vld [vmem:[%s3538_s30 + $0x30] sm:$0xff]  ;;  %v394_v63 = vshrl.u32 %v3744_v37, 16  ;;  %v3169_v54 = vld [vmem:[%s4321_s1 + $0x600] ss:$8 sps:$4 sm:$0xff]  }
  0x54   : > { %1793 = vmatpush1.bf16.msra.mxu0 %v3091_v13  ;;  %784 = vmatprep.subr.bf16.mxu1 %v3096_v14  ;;  %v3144_v13 = vld [vmem:[%s4321_s1 + $0x3c4] ss:$8 sps:$4 sm:$0xff]   ;;  %v3177_v37 = vld [vmem:[%s4321_s1 + $0x614] ss:$8 sps:$4 sm:$0xff]  }
  0x55   : > { %1794 = vmatprep.subr.bf16.mxu0 %v3099_v15  ;;  %808 = vmatprep.mubr.bf16.mxu1 %v384_v4  ;;  %v3147_v14 = vld [vmem:[%s4321_s1 + $0x5c4] ss:$8 sps:$4 sm:$0xff]   ;;  %v257_v15 = vld [vmem:[%s3538_s30 + $0x10] sm:$0xfe] }
  0x56   : > { %1818 = vmatprep.mubr.bf16.mxu0 %v1406_v5  ;;  %v3174_v4 = vld [vmem:[%s4321_s1 + $0x14] ss:$8 sps:$4 sm:$0xff]   ;;  %v396_v5 = vor.u32 %v394_v63, %v3765_v57  ;;  %v3183_v57 = vld [vmem:[%s4321_s1 + $0x624] ss:$8 sps:$4 sm:$0xff]   ;;  %v3235_v63 = vld [vmem:[%s4321_s1 + $0x6b0] ss:$8 sps:$4 sm:$0xff]  }
  0x57   : > { %785 = vmatpush1.bf16.msra.mxu1 %v3094_v16  ;;  %v3814_v16 = vld [vmem:[%s3538_s30 + $0x50] sm:$0xff] }
  0x58   : > { %1795 = vmatpush1.bf16.msra.mxu0 %v3097_v17  ;;  %786 = vmatprep.subr.bf16.mxu1 %v3102_v18  ;;  %v1251_v17 = vld [vmem:[%s3538_s30 + $0x10] sm:$0xe0]  ;;  %v1263_v18 = vld [vmem:[%s3538_s30 + $0x70] sm:$0x1] }
  0x59   : > { %1796 = vmatprep.subr.bf16.mxu0 %v3105_v19  ;;  %v3142_v19 = vld [vmem:[%s4321_s1 + $0x3c0] ss:$8 sps:$4 sm:$0xff]  }
  0x5b   : > { %787 = vmatpush1.bf16.msra.mxu1 %v3100_v20  ;;  %v3145_v20 = vld [vmem:[%s4321_s1 + $0x5c0] ss:$8 sps:$4 sm:$0xff]  }
  0x5c   : > { %1797 = vmatpush1.bf16.msra.mxu0 %v3103_v21  ;;  %788 = vmatprep.subr.bf16.mxu1 %v3108_v22  ;;  %v3150_v21 = vld [vmem:[%s4321_s1 + $0x3d4] ss:$8 sps:$4 sm:$0xff]   ;;  %v265_v22 = vpack.c.bf16 %v3804_v12, %v257_v15  ;;  %v3184_v15 = vld [vmem:[%s4321_s1 + $0x30] ss:$8 sps:$4 sm:$0xff]  }
  0x5d   : > { %1798 = vmatprep.subr.bf16.mxu0 %v3111_v23  ;;  %v261_v23 = vld [vmem:[%s3538_s30 + $0x50] sm:$0x1f] }
  0x5e   : > { %v364_v32 = vshll.u32 %v265_v22, 16  ;;  %v362_v43 = vshrl.u32 %v265_v22, 16  ;;  %v3190_v22 = vld [vmem:[%s4321_s1 + $0x40] ss:$8 sps:$4 sm:$0xff]  }
  0x5f   : > { %789 = vmatpush1.bf16.msra.mxu1 %v3106_v24  ;;  %v1267_v24 = vpack.c.bf16 %v3804_v12, %v1251_v17  ;;  %v3187_v17 = vld [vmem:[%s4321_s1 + $0x630] ss:$8 sps:$4 sm:$0xff]  }
  0x60   : > { %1799 = vmatpush1.bf16.msra.mxu0 %v3109_v25  ;;  %790 = vmatprep.subr.bf16.mxu1 %v3114_v26  ;;  %v1271_v25 = vpack.c.bf16 %v1263_v18, %v3814_v16  ;;  %v3153_v26 = vld [vmem:[%s4321_s1 + $0x5d4] ss:$8 sps:$4 sm:$0xff]   ;;  %v366_v44 = vrot.slane %v364_v32, 1  ;;  %v3192_v18 = vld [vmem:[%s4321_s1 + $0x44] ss:$8 sps:$4 sm:$0xff]  }
  0x61   : > { %1800 = vmatprep.subr.bf16.mxu0 %v3117_v27  ;;  %v3148_v27 = vld [vmem:[%s4321_s1 + $0x3d0] ss:$8 sps:$4 sm:$0xff]   ;;  %v1374_v33 = vshrl.u32 %v1267_v24, 16  ;;  %v1377_v34 = vshll.u32 %v1267_v24, 16  ;;  %v1848_v24 = vld [vmem:[%s3538_s30 + $0x68] sm:$0x3] }
  0x62   : > { %v1385_v36 = vshll.u32 %v1271_v25, 16  ;;  %v367_v55 = vor.u32 %v366_v44, %v362_v43  ;;  %v3211_v43 = vld [vmem:[%s4321_s1 + $0x670] ss:$8 sps:$4 sm:$0xff]   ;;  %v3216_v44 = vld [vmem:[%s4321_s1 + $0x84] ss:$8 sps:$4 sm:$0xff]  }
  0x63   : > { %791 = vmatpush1.bf16.msra.mxu1 %v3112_v28  ;;  %v3151_v28 = vld [vmem:[%s4321_s1 + $0x5d0] ss:$8 sps:$4 sm:$0xff]   ;;  %v1376_v46 = vrot.slane %v1374_v33, 2  ;;  %v1379_v47 = vrot.slane %v1377_v34, 3  ;;  %v3204_v34 = vld [vmem:[%s4321_s1 + $0x64] ss:$8 sps:$4 sm:$0xff]  }
  0x64   : > { %1801 = vmatpush1.bf16.msra.mxu0 %v3115_v29  ;;  %792 = vmatprep.subr.bf16.mxu1 %v3120_v30  ;;  %v3156_v29 = vld [vmem:[%s4321_s1 + $0x3e4] ss:$8 sps:$4 sm:$0xff]   ;;  %v3843_v30 = vpack.c.bf16 %v261_v23, %v261_v23  ;;  %v1387_v50 = vrot.slane %v1385_v36, 3  ;;  %v3202_v36 = vld [vmem:[%s4321_s1 + $0x60] ss:$8 sps:$4 sm:$0xff]  }
  0x65   : > { %1802 = vmatprep.subr.bf16.mxu0 %v3123_v35  ;;  %v1382_v35 = vshrl.u32 %v1271_v25, 16  ;;  %v1380_v60 = vor.u32 %v1379_v47, %v1376_v46  ;;  %v1844_v23 = vld [vmem:[%s3538_s30 + $0x8] sm:$0xc0]  ;;  %v3193_v25 = vld [vmem:[%s4321_s1 + $0x640] ss:$8 sps:$4 sm:$0xff]  }
  0x66   : > { %v369_v45 = vshll.u32 %v3843_v30, 16  ;;  %v3214_v46 = vld [vmem:[%s4321_s1 + $0x80] ss:$8 sps:$4 sm:$0xff]  }
  0x67   : > { %793 = vmatpush1.bf16.msra.mxu1 %v3118_v41  ;;  %v3157_v41 = vld [vmem:[%s4321_s1 + $0x5e0] ss:$8 sps:$4 sm:$0xff]  }
  0x68   : > { %1803 = vmatpush1.bf16.msra.mxu0 %v3121_v42  ;;  %794 = vmatprep.subr.bf16.mxu1 %v3126_v49  ;;  %v3162_v42 = vld [vmem:[%s4321_s1 + $0x3f4] ss:$8 sps:$4 sm:$0xff]   ;;  %v1384_v49 = vrot.slane %v1382_v35, 2  ;;  %v371_v58 = vrot.slane %v369_v45, 1  ;;  %v3207_v35 = vld [vmem:[%s4321_s1 + $0x664] ss:$8 sps:$4 sm:$0xff]  }
  0x69   : > { %1804 = vmatprep.subr.bf16.mxu0 %v3129_v53  ;;  %v3163_v53 = vld [vmem:[%s4321_s1 + $0x5f0] ss:$8 sps:$4 sm:$0xff]   ;;  %v3219_v45 = vld [vmem:[%s4321_s1 + $0x684] ss:$8 sps:$4 sm:$0xff]   ;;  %v3217_v47 = vld [vmem:[%s4321_s1 + $0x680] ss:$8 sps:$4 sm:$0xff]  }
  0x6a   : > { %v1388_v61 = vor.u32 %v1387_v50, %v1384_v49  ;;  %v3222_v49 = vld [vmem:[%s4321_s1 + $0x94] ss:$8 sps:$4 sm:$0xff]  }
  0x6b   : > { %795 = vmatpush1.bf16.msra.mxu1 %v3124_v62  ;;  %v3171_v62 = vld [vmem:[%s4321_s1 + $0x604] ss:$8 sps:$4 sm:$0xff]   ;;  %v3225_v50 = vld [vmem:[%s4321_s1 + $0x694] ss:$8 sps:$4 sm:$0xff]  }
  0x6c   : > { %1805 = vmatpush1.bf16.msra.mxu0 %v3127_v0  ;;  %796 = vmatprep.subr.bf16.mxu1 %v3132_v2  ;;  %v3166_v0 = vld [vmem:[%s4321_s1] ss:$8 sps:$4 sm:$0xff]   ;;  %v372_v2 = vsel %vm336_vm0, %v367_v55, %v371_v58  ;;  %v3231_v55 = vld [vmem:[%s4321_s1 + $0x6a4] ss:$8 sps:$4 sm:$0xff]  }
  0x6d   : > { %1806 = vmatprep.subr.bf16.mxu0 %v3135_v3  ;;  %v1389_v3 = vsel %vm1338_vm1, %v1380_v60, %v1388_v61  ;;  %v3234_v60 = vld [vmem:[%s4321_s1 + $0xb4] ss:$8 sps:$4 sm:$0xff]  }
  0x6f   : > { %797 = vmatpush1.bf16.msra.mxu1 %v3130_v6  ;;  %v3172_v6 = vld [vmem:[%s4321_s1 + $0x10] ss:$8 sps:$4 sm:$0xff]  }
  0x70   : > { %1807 = vmatpush1.bf16.msra.mxu0 %v3133_v7  ;;  %798 = vmatprep.subr.bf16.mxu1 %v3138_v8  ;;  %v3175_v7 = vld [vmem:[%s4321_s1 + $0x610] ss:$8 sps:$4 sm:$0xff]   ;;  %v391_v8 = vshrl.u32 %v3843_v30, 16 }
  0x71   : > { %1808 = vmatprep.subr.bf16.mxu0 %v3141_v9  ;;  %v3180_v9 = vld [vmem:[%s4321_s1 + $0x24] ss:$8 sps:$4 sm:$0xff]  }
  0x73   : > { %799 = vmatpush1.bf16.msra.mxu1 %v3136_v10  ;;  %v393_v10 = vor.u32 %v391_v8, %v371_v58  ;;  %v3226_v58 = vld [vmem:[%s4321_s1 + $0xa0] ss:$8 sps:$4 sm:$0xff]   ;;  %v3255_v8 = vld [vmem:[%s4321_s1 + $0x6e4] ss:$8 sps:$4 sm:$0xff]  }
  0x74   : > { %1809 = vmatpush1.bf16.msra.mxu0 %v3139_v11  ;;  %800 = vmatprep.subr.bf16.mxu1 %v3144_v13  ;;  %v3178_v11 = vld [vmem:[%s4321_s1 + $0x20] ss:$8 sps:$4 sm:$0xff]  }
  0x75   : > { %1810 = vmatprep.subr.bf16.mxu0 %v3147_v14  ;;  %v3181_v13 = vld [vmem:[%s4321_s1 + $0x620] ss:$8 sps:$4 sm:$0xff]   ;;  %v3186_v14 = vld [vmem:[%s4321_s1 + $0x34] ss:$8 sps:$4 sm:$0xff]  }
  0x77   : > { %801 = vmatpush1.bf16.msra.mxu1 %v3142_v19  ;;  %v3195_v19 = vld [vmem:[%s4321_s1 + $0x644] ss:$8 sps:$4 sm:$0xff]  }
  0x78   : > { %1811 = vmatpush1.bf16.msra.mxu0 %v3145_v20  ;;  %802 = vmatprep.subr.bf16.mxu1 %v3150_v21  ;;  %v172_v20 = vld [vmem:[%s3538_s30 + $0x8] sm:$0xff] }
  0x79   : > { %1812 = vmatprep.subr.bf16.mxu0 %v3153_v26  ;;  %v184_v21 = vpack.c.bf16 %v3553_v48, %v172_v20  ;;  %v1852_v26 = vpack.c.bf16 %v3553_v48, %v1844_v23  ;;  %v3196_v48 = vld [vmem:[%s4321_s1 + $0x50] ss:$8 sps:$4 sm:$0xff]  }
  0x7a   : > { %v3259_v20 = vld [vmem:[%s4321_s1 + $0x6f0] ss:$8 sps:$4 sm:$0xff]  }
  0x7b   : > { %803 = vmatpush1.bf16.msra.mxu1 %v3148_v27  ;;  %v1856_v27 = vpack.c.bf16 %v1848_v24, %v3568_v56  ;;  %v1936_v30 = vrot.slane %v1852_v26, 3  ;;  %v3199_v56 = vld [vmem:[%s4321_s1 + $0x650] ss:$8 sps:$4 sm:$0xff]   ;;  %v3264_v24 = vld [vmem:[%s4321_s1 + $0x104] ss:$8 sps:$4 sm:$0xff]  }
  0x7c   : > { %1813 = vmatpush1.bf16.msra.mxu0 %v3151_v28  ;;  %804 = vmatprep.subr.bf16.mxu1 %v3156_v29  ;;  %v3198_v28 = vld [vmem:[%s4321_s1 + $0x54] ss:$8 sps:$4 sm:$0xff]  }
  0x7d   : > { %1814 = vmatprep.subr.bf16.mxu0 %v3159_v39  ;;  %v3201_v29 = vld [vmem:[%s4321_s1 + $0x654] ss:$8 sps:$4 sm:$0xff]   ;;  %v3945_v32 = vrot.slane %v1856_v27, 3  ;;  %v3205_v39 = vld [vmem:[%s4321_s1 + $0x660] ss:$8 sps:$4 sm:$0xff]  }
  0x7e   : > { %v3262_v27 = vld [vmem:[%s4321_s1 + $0x100] ss:$8 sps:$4 sm:$0xff]  }
  0x7f   : > { %805 = vmatpush1.bf16.msra.mxu1 %v3154_v40  ;;  %v1938_v33 = vsel %vm1932_vm2, %v1936_v30, %v3945_v32  ;;  %v3210_v40 = vld [vmem:[%s4321_s1 + $0x74] ss:$8 sps:$4 sm:$0xff]  }
  0x80   : > { %1815 = vmatpush1.bf16.msra.mxu0 %v3157_v41  ;;  %806 = vmatprep.subr.bf16.mxu1 %v3162_v42  ;;  %v3213_v41 = vld [vmem:[%s4321_s1 + $0x674] ss:$8 sps:$4 sm:$0xff]   ;;  %v3208_v42 = vld [vmem:[%s4321_s1 + $0x70] ss:$8 sps:$4 sm:$0xff]  }
  0x81   : > { %1816 = vmatprep.subr.bf16.mxu0 %v3165_v51  ;;  %v3220_v51 = vld [vmem:[%s4321_s1 + $0x90] ss:$8 sps:$4 sm:$0xff]  }
  0x83   : > { %807 = vmatpush1.bf16.msra.mxu1 %v3160_v52  ;;  %v3223_v52 = vld [vmem:[%s4321_s1 + $0x690] ss:$8 sps:$4 sm:$0xff]  }
  0x84   : > { %1817 = vmatpush1.bf16.msra.mxu0 %v3163_v53  ;;  %1147 = vmatprep.subr.bf16.mxu1 %v3168_v59  ;;  %v3228_v53 = vld [vmem:[%s4321_s1 + $0xa4] ss:$8 sps:$4 sm:$0xff]   ;;  %v3229_v59 = vld [vmem:[%s4321_s1 + $0x6a0] ss:$8 sps:$4 sm:$0xff]  }
  0x85   : > { %2273 = vmatprep.subr.bf16.mxu0 %v3171_v62  ;;  %v3232_v62 = vld [vmem:[%s4321_s1 + $0xb0] ss:$8 sps:$4 sm:$0xff]  }
  0x86   : > { %809 = vmatmul.mubr.bf16.vlgmr.msra.gmra.mrb[0].mxu1 %v372_v2  ;;  %v3238_v2 = vld [vmem:[%s4321_s1 + $0xc0] ss:$8 sps:$4 sm:$0xff]  }
  0x87   : > { %1819 = vmatmul.mubr.bf16.vlgmr.msra.gmra.mrb[0].mxu0 %v1389_v3  ;;  %1148 = vmatpush1.bf16.msra.mxu1 %v3166_v0  ;;  %v3240_v0 = vld [vmem:[%s4321_s1 + $0xc4] ss:$8 sps:$4 sm:$0xff]   ;;  %v3241_v3 = vld [vmem:[%s4321_s1 + $0x6c0] ss:$8 sps:$4 sm:$0xff]  }
  0x88   : > { %2274 = vmatpush1.bf16.msra.mxu0 %v3169_v54  ;;  %1149 = vmatprep.subr.bf16.mxu1 %v3174_v4  ;;  %v3243_v54 = vld [vmem:[%s4321_s1 + $0x6c4] ss:$8 sps:$4 sm:$0xff]   ;;  %v3246_v4 = vld [vmem:[%s4321_s1 + $0xd4] ss:$8 sps:$4 sm:$0xff]  }
  0x89   : > { %2275 = vmatprep.subr.bf16.mxu0 %v3177_v37  ;;  %818 = vmatprep.mubr.bf16.mxu1 %v396_v5  ;;  %v3249_v37 = vld [vmem:[%s4321_s1 + $0x6d4] ss:$8 sps:$4 sm:$0xff]   ;;  %v3244_v5 = vld [vmem:[%s4321_s1 + $0xd0] ss:$8 sps:$4 sm:$0xff]  }
  0x8a   : > { %1828 = vmatprep.mubr.bf16.mxu0 %v3773_v1  ;;  %v3189_v1 = vld [vmem:[%s4321_s1 + $0x634] ss:$8 sps:$4 sm:$0xff]  }
  0x8b   : > { %1150 = vmatpush1.bf16.msra.mxu1 %v3172_v6  ;;  %v3247_v6 = vld [vmem:[%s4321_s1 + $0x6d0] ss:$8 sps:$4 sm:$0xff]  }
  0x8c   : > { %2276 = vmatpush1.bf16.msra.mxu0 %v3175_v7  ;;  %1151 = vmatprep.subr.bf16.mxu1 %v3180_v9  ;;  %v3252_v7 = vld [vmem:[%s4321_s1 + $0xe4] ss:$8 sps:$4 sm:$0xff]  }
  0x8d   : > { %2277 = vmatprep.subr.bf16.mxu0 %v3183_v57  ;;  %v1843_v9 = vld [vmem:[%s3538_s30] sm:$0xc0]  ;;  %v1847_v57 = vld [vmem:[%s3538_s30 + $0x60] sm:$0x3] }
  0x8e   : > { %819 = vmatmul.mubr.bf16.gmra.mrb[8].mxu1 %v393_v10  ;;  %v3250_v10 = vld [vmem:[%s4321_s1 + $0xe0] ss:$8 sps:$4 sm:$0xff]  }
  0x8f   : > { %1829 = vmatmul.mubr.bf16.gmra.mrb[8].mxu0 %v1388_v61  ;;  %1152 = vmatpush1.bf16.msra.mxu1 %v3178_v11  ;;  %v3237_v61 = vld [vmem:[%s4321_s1 + $0x6b4] ss:$8 sps:$4 sm:$0xff]   ;;  %v3253_v11 = vld [vmem:[%s4321_s1 + $0x6e0] ss:$8 sps:$4 sm:$0xff]  }
  0x90   : > { %2278 = vmatpush1.bf16.msra.mxu0 %v3181_v13  ;;  %1153 = vmatprep.subr.bf16.mxu1 %v3186_v14  ;;  %v3358_v13 = vld [vmem:[%s3538_s30 + $0x20] sm:$0xff] }
  0x91   : > { %2279 = vmatprep.subr.bf16.mxu0 %v3189_v1  ;;  %1179 = vmatprep.mubr.bf16.mxu1 %v184_v21  ;;  %v1851_v14 = vpack.c.bf16 %v3358_v13, %v1843_v9  ;;  %v3359_v1 = vld [vmem:[%s3538_s30 + $0x40] sm:$0xff] }
  0x92   : > { %2305 = vmatprep.mubr.bf16.mxu0 %v1938_v33  ;;  %v171_v21 = vld [vmem:[%s3538_s30] sm:$0xff]  ;;  %v3270_v33 = vld [vmem:[%s4321_s1 + $0x114] ss:$8 sps:$4 sm:$0xff]  }
  0x93   : > { %1154 = vmatpush1.bf16.msra.mxu1 %v3184_v15  ;;  %v1855_v15 = vpack.c.bf16 %v1847_v57, %v3359_v1  ;;  %v183_v26 = vpack.c.bf16 %v3358_v13, %v171_v21  ;;  %v3312_v9 = vld [vmem:[%s4321_s1 + $0x184] ss:$8 sps:$4 sm:$0xff]   ;;  %v3318_v13 = vld [vmem:[%s4321_s1 + $0x194] ss:$8 sps:$4 sm:$0xff]   ;;  %v3316_v1 = vld [vmem:[%s4321_s1 + $0x190] ss:$8 sps:$4 sm:$0xff]  }
  0x94   : > { %2280 = vmatpush1.bf16.msra.mxu0 %v3187_v17  ;;  %1155 = vmatprep.subr.bf16.mxu1 %v3192_v18  ;;  %v3258_v17 = vld [vmem:[%s4321_s1 + $0xf4] ss:$8 sps:$4 sm:$0xff]   ;;  %v3315_v57 = vld [vmem:[%s4321_s1 + $0x784] ss:$8 sps:$4 sm:$0xff]  }
  0x95   : > { %2281 = vmatprep.subr.bf16.mxu0 %v3195_v19  ;;  %v3261_v18 = vld [vmem:[%s4321_s1 + $0x6f4] ss:$8 sps:$4 sm:$0xff]   ;;  %v3256_v19 = vld [vmem:[%s4321_s1 + $0xf0] ss:$8 sps:$4 sm:$0xff]   ;;  %v1934_v23 = vrot.slane %v1855_v15, 3 }
  0x96   : > { %v3319_v15 = vld [vmem:[%s4321_s1 + $0x790] ss:$8 sps:$4 sm:$0xff]   ;;  %v3330_v21 = vld [vmem:[%s4321_s1 + $0x1b4] ss:$8 sps:$4 sm:$0xff]  }
  0x97   : > { %1156 = vmatpush1.bf16.msra.mxu1 %v3190_v22  ;;  %v1933_v22 = vrot.slane %v1851_v14, 3  ;;  %v3321_v14 = vld [vmem:[%s4321_s1 + $0x794] ss:$8 sps:$4 sm:$0xff]  }
  0x98   : > { %2282 = vmatpush1.bf16.msra.mxu0 %v3193_v25  ;;  %1157 = vmatprep.subr.bf16.mxu1 %v3198_v28  ;;  %v3267_v25 = vld [vmem:[%s4321_s1 + $0x704] ss:$8 sps:$4 sm:$0xff]   ;;  %v180_v28 = vld [vmem:[%s3538_s30 + $0x48] sm:$0xf] }
  0x99   : > { %2283 = vmatprep.subr.bf16.mxu0 %v3201_v29  ;;  %v3265_v29 = vld [vmem:[%s4321_s1 + $0x700] ss:$8 sps:$4 sm:$0xff]   ;;  %v1935_v30 = vsel %vm1932_vm2, %v1933_v22, %v1934_v23  ;;  %v3333_v22 = vld [vmem:[%s4321_s1 + $0x7b4] ss:$8 sps:$4 sm:$0xff]  }
  0x9b   : > { %1158 = vmatpush1.bf16.msra.mxu1 %v3196_v48  ;;  %v1846_v48 = vld [vmem:[%s3538_s30 + $0x18] sm:$0xc0] }
  0x9c   : > { %2284 = vmatpush1.bf16.msra.mxu0 %v3199_v56  ;;  %1159 = vmatprep.subr.bf16.mxu1 %v3204_v34  ;;  %v1850_v56 = vld [vmem:[%s3538_s30 + $0x78] sm:$0x3]  ;;  %v3273_v34 = vld [vmem:[%s4321_s1 + $0x714] ss:$8 sps:$4 sm:$0xff]  }
  0x9d   : > { %2285 = vmatprep.subr.bf16.mxu0 %v3207_v35  ;;  %v188_v35 = vpack.c.bf16 %v180_v28, %v180_v28  ;;  %v3337_v28 = vld [vmem:[%s4321_s1 + $0x7c0] ss:$8 sps:$4 sm:$0xff]  }
  0x9f   : > { %1160 = vmatpush1.bf16.msra.mxu1 %v3202_v36  ;;  %v1854_v36 = vpack.c.bf16 %v3735_v31, %v1846_v48  ;;  %v3340_v48 = vld [vmem:[%s4321_s1 + $0x1d0] ss:$8 sps:$4 sm:$0xff]  }
  0xa0   : > { %2286 = vmatpush1.bf16.msra.mxu0 %v3205_v39  ;;  %1161 = vmatprep.subr.bf16.mxu1 %v3210_v40  ;;  %v1858_v39 = vpack.c.bf16 %v1850_v56, %v3747_v38  ;;  %v3268_v40 = vld [vmem:[%s4321_s1 + $0x110] ss:$8 sps:$4 sm:$0xff]   ;;  %v3279_v38 = vld [vmem:[%s4321_s1 + $0x724] ss:$8 sps:$4 sm:$0xff]  }
  0xa1   : > { %2287 = vmatprep.subr.bf16.mxu0 %v3213_v41  ;;  %v3271_v41 = vld [vmem:[%s4321_s1 + $0x710] ss:$8 sps:$4 sm:$0xff]  }
  0xa2   : > { %v3343_v56 = vld [vmem:[%s4321_s1 + $0x7d0] ss:$8 sps:$4 sm:$0xff]  }
  0xa3   : > { %1162 = vmatpush1.bf16.msra.mxu1 %v3208_v42  ;;  %v179_v42 = vld [vmem:[%s3538_s30 + $0x40] sm:$0xf] }
  0xa4   : > { %2288 = vmatpush1.bf16.msra.mxu0 %v3211_v43  ;;  %1163 = vmatprep.subr.bf16.mxu1 %v3216_v44  ;;  %v3276_v43 = vld [vmem:[%s4321_s1 + $0x124] ss:$8 sps:$4 sm:$0xff]   ;;  %v187_v44 = vpack.c.bf16 %v179_v42, %v179_v42 }
  0xa5   : > { %2289 = vmatprep.subr.bf16.mxu0 %v3219_v45  ;;  %v174_v45 = vld [vmem:[%s3538_s30 + $0x18] sm:$0xff] }
  0xa7   : > { %1164 = vmatpush1.bf16.msra.mxu1 %v3214_v46  ;;  %v1942_v46 = vrot.slane %v1854_v36, 3  ;;  %v1849_v36 = vld [vmem:[%s3538_s30 + $0x70] sm:$0x3] }
  0xa8   : > { %2290 = vmatpush1.bf16.msra.mxu0 %v3217_v47  ;;  %1165 = vmatprep.subr.bf16.mxu1 %v3222_v49  ;;  %v4119_v47 = vrot.slane %v1858_v39, 3  ;;  %v3274_v49 = vld [vmem:[%s4321_s1 + $0x120] ss:$8 sps:$4 sm:$0xff]   ;;  %v1857_v42 = vpack.c.bf16 %v1849_v36, %v3814_v16  ;;  %v3355_v16 = vld [vmem:[%s4321_s1 + $0x7f0] ss:$8 sps:$4 sm:$0xff]  }
  0xa9   : > { %2291 = vmatprep.subr.bf16.mxu0 %v3225_v50  ;;  %v3277_v50 = vld [vmem:[%s4321_s1 + $0x720] ss:$8 sps:$4 sm:$0xff]  }
  0xaa   : > { %v3346_v39 = vld [vmem:[%s4321_s1 + $0x1e0] ss:$8 sps:$4 sm:$0xff]  }
  0xab   : > { %1166 = vmatpush1.bf16.msra.mxu1 %v3220_v51  ;;  %v3285_v51 = vld [vmem:[%s4321_s1 + $0x734] ss:$8 sps:$4 sm:$0xff]  }
  0xac   : > { %2292 = vmatpush1.bf16.msra.mxu0 %v3223_v52  ;;  %1167 = vmatprep.subr.bf16.mxu1 %v3228_v53  ;;  %v186_v52 = vpack.c.bf16 %v3735_v31, %v174_v45  ;;  %v1944_v53 = vsel %vm1932_vm2, %v1942_v46, %v4119_v47  ;;  %v3288_v31 = vld [vmem:[%s4321_s1 + $0x144] ss:$8 sps:$4 sm:$0xff]   ;;  %v173_v45 = vld [vmem:[%s3538_s30 + $0x10] sm:$0xff] }
  0xad   : > { %2293 = vmatprep.subr.bf16.mxu0 %v3231_v55  ;;  %v3280_v55 = vld [vmem:[%s4321_s1 + $0x130] ss:$8 sps:$4 sm:$0xff]  }
  0xaf   : > { %1168 = vmatpush1.bf16.msra.mxu1 %v3226_v58  ;;  %v3283_v58 = vld [vmem:[%s4321_s1 + $0x730] ss:$8 sps:$4 sm:$0xff]  }
  0xb0   : > { %2294 = vmatpush1.bf16.msra.mxu0 %v3229_v59  ;;  %1169 = vmatprep.subr.bf16.mxu1 %v3234_v60  ;;  %v3291_v59 = vld [vmem:[%s4321_s1 + $0x744] ss:$8 sps:$4 sm:$0xff]   ;;  %v3286_v60 = vld [vmem:[%s4321_s1 + $0x140] ss:$8 sps:$4 sm:$0xff]  }
  0xb1   : > { %2295 = vmatprep.subr.bf16.mxu0 %v3237_v61  ;;  %v3289_v61 = vld [vmem:[%s4321_s1 + $0x740] ss:$8 sps:$4 sm:$0xff]  }
  0xb3   : > { %1170 = vmatpush1.bf16.msra.mxu1 %v3232_v62  ;;  %v3294_v62 = vld [vmem:[%s4321_s1 + $0x154] ss:$8 sps:$4 sm:$0xff]  }
  0xb4   : > { %2296 = vmatpush1.bf16.msra.mxu0 %v3235_v63  ;;  %1171 = vmatprep.subr.bf16.mxu1 %v3240_v0  ;;  %v3297_v63 = vld [vmem:[%s4321_s1 + $0x754] ss:$8 sps:$4 sm:$0xff]   ;;  %v3292_v0 = vld [vmem:[%s4321_s1 + $0x150] ss:$8 sps:$4 sm:$0xff]  }
  0xb5   : > { %2297 = vmatprep.subr.bf16.mxu0 %v3243_v54  ;;  %v3295_v54 = vld [vmem:[%s4321_s1 + $0x750] ss:$8 sps:$4 sm:$0xff]  }
  0xb7   : > { %1172 = vmatpush1.bf16.msra.mxu1 %v3238_v2  ;;  %v3300_v2 = vld [vmem:[%s4321_s1 + $0x164] ss:$8 sps:$4 sm:$0xff]  }
  0xb8   : > { %2298 = vmatpush1.bf16.msra.mxu0 %v3241_v3  ;;  %1173 = vmatprep.subr.bf16.mxu1 %v3246_v4  ;;  %v3303_v3 = vld [vmem:[%s4321_s1 + $0x764] ss:$8 sps:$4 sm:$0xff]   ;;  %v3298_v4 = vld [vmem:[%s4321_s1 + $0x160] ss:$8 sps:$4 sm:$0xff]  }
  0xb9   : > { %2299 = vmatprep.subr.bf16.mxu0 %v3249_v37  ;;  %v3301_v37 = vld [vmem:[%s4321_s1 + $0x760] ss:$8 sps:$4 sm:$0xff]  }
  0xbb   : > { %1174 = vmatpush1.bf16.msra.mxu1 %v3244_v5  ;;  %v3306_v5 = vld [vmem:[%s4321_s1 + $0x174] ss:$8 sps:$4 sm:$0xff]  }
  0xbc   : > { %2300 = vmatpush1.bf16.msra.mxu0 %v3247_v6  ;;  %1175 = vmatprep.subr.bf16.mxu1 %v3252_v7  ;;  %v3309_v6 = vld [vmem:[%s4321_s1 + $0x774] ss:$8 sps:$4 sm:$0xff]   ;;  %v3304_v7 = vld [vmem:[%s4321_s1 + $0x170] ss:$8 sps:$4 sm:$0xff]  }
  0xbd   : > { %2301 = vmatprep.subr.bf16.mxu0 %v3255_v8  ;;  %v3307_v8 = vld [vmem:[%s4321_s1 + $0x770] ss:$8 sps:$4 sm:$0xff]  }
  0xbf   : > { %1176 = vmatpush1.bf16.msra.mxu1 %v3250_v10  ;;  %v3310_v10 = vld [vmem:[%s4321_s1 + $0x180] ss:$8 sps:$4 sm:$0xff]  }
  0xc0   : > { %2302 = vmatpush1.bf16.msra.mxu0 %v3253_v11  ;;  %1177 = vmatprep.subr.bf16.mxu1 %v3258_v17  ;;  %v3313_v11 = vld [vmem:[%s4321_s1 + $0x780] ss:$8 sps:$4 sm:$0xff]   ;;  %v3324_v17 = vld [vmem:[%s4321_s1 + $0x1a4] ss:$8 sps:$4 sm:$0xff]  }
  0xc1   : > { %2303 = vmatprep.subr.bf16.mxu0 %v3261_v18  ;;  %v3327_v18 = vld [vmem:[%s4321_s1 + $0x7a4] ss:$8 sps:$4 sm:$0xff]  }
  0xc3   : > { %1178 = vmatpush1.bf16.msra.mxu1 %v3256_v19  ;;  %v3322_v19 = vld [vmem:[%s4321_s1 + $0x1a0] ss:$8 sps:$4 sm:$0xff]  }
  0xc4   : > { %2304 = vmatpush1.bf16.msra.mxu0 %v3259_v20  ;;  %1198 = vmatprep.subr.bf16.mxu1 %v3264_v24  ;;  %v3325_v20 = vld [vmem:[%s4321_s1 + $0x7a0] ss:$8 sps:$4 sm:$0xff]   ;;  %v3331_v24 = vld [vmem:[%s4321_s1 + $0x7b0] ss:$8 sps:$4 sm:$0xff]  }
  0xc5   : > { %2324 = vmatprep.subr.bf16.mxu0 %v3267_v25  ;;  %v3336_v25 = vld [vmem:[%s4321_s1 + $0x1c4] ss:$8 sps:$4 sm:$0xff]  }
  0xc6   : > { %1180 = vmatmul.mubr.bf16.vlgmr.msra.gmra.mrb[0].mxu1 %v183_v26  ;;  %v3339_v26 = vld [vmem:[%s4321_s1 + $0x7c4] ss:$8 sps:$4 sm:$0xff]  }
  0xc7   : > { %2306 = vmatmul.mubr.bf16.vlgmr.msra.gmra.mrb[0].mxu0 %v1935_v30  ;;  %1199 = vmatpush1.bf16.msra.mxu1 %v3262_v27  ;;  %v3334_v27 = vld [vmem:[%s4321_s1 + $0x1c0] ss:$8 sps:$4 sm:$0xff]   ;;  %v3345_v30 = vld [vmem:[%s4321_s1 + $0x7d4] ss:$8 sps:$4 sm:$0xff]  }
  0xc8   : > { %2325 = vmatpush1.bf16.msra.mxu0 %v3265_v29  ;;  %1200 = vmatprep.subr.bf16.mxu1 %v3270_v33  ;;  %v3342_v29 = vld [vmem:[%s4321_s1 + $0x1d4] ss:$8 sps:$4 sm:$0xff]   ;;  %v3348_v33 = vld [vmem:[%s4321_s1 + $0x1e4] ss:$8 sps:$4 sm:$0xff]  }
  0xc9   : > { %2326 = vmatprep.subr.bf16.mxu0 %v3273_v34  ;;  %1189 = vmatprep.mubr.bf16.mxu1 %v188_v35  ;;  %v3351_v34 = vld [vmem:[%s4321_s1 + $0x7e4] ss:$8 sps:$4 sm:$0xff]   ;;  %v1845_v35 = vld [vmem:[%s3538_s30 + $0x10] sm:$0xc0] }
  0xca   : > { %2315 = vmatprep.mubr.bf16.mxu0 %v3945_v32  ;;  %v3282_v32 = vld [vmem:[%s4321_s1 + $0x134] ss:$8 sps:$4 sm:$0xff]  }
  0xcb   : > { %1201 = vmatpush1.bf16.msra.mxu1 %v3268_v40  ;;  %v3349_v40 = vld [vmem:[%s4321_s1 + $0x7e0] ss:$8 sps:$4 sm:$0xff]  }
  0xcc   : > { %2327 = vmatpush1.bf16.msra.mxu0 %v3271_v41  ;;  %1202 = vmatprep.subr.bf16.mxu1 %v3276_v43  ;;  %v1853_v41 = vpack.c.bf16 %v3804_v12, %v1845_v35  ;;  %v3354_v43 = vld [vmem:[%s4321_s1 + $0x1f4] ss:$8 sps:$4 sm:$0xff]  }
  0xcd   : > { %2328 = vmatprep.subr.bf16.mxu0 %v3279_v38  ;;  %v3357_v38 = vld [vmem:[%s4321_s1 + $0x7f4] ss:$8 sps:$4 sm:$0xff]  }
  0xce   : > { %1190 = vmatmul.mubr.bf16.gmra.mrb[12].mxu1 %v187_v44  ;;  %v3352_v44 = vld [vmem:[%s4321_s1 + $0x1f0] ss:$8 sps:$4 sm:$0xff]   ;;  %v1939_v46 = vrot.slane %v1853_v41, 3 }
  0xcf   : > { %2316 = vmatmul.mubr.bf16.gmra.mrb[12].mxu0 %v1934_v23  ;;  %1203 = vmatpush1.bf16.msra.mxu1 %v3274_v49  ;;  %v3328_v23 = vld [vmem:[%s4321_s1 + $0x1b0] ss:$8 sps:$4 sm:$0xff]   ;;  %v1940_v49 = vrot.slane %v1857_v42, 3 }
  0xd0   : > { %2329 = vmatpush1.bf16.msra.mxu0 %v3277_v50  ;;  %1204 = vmatprep.subr.bf16.mxu1 %v3282_v32  ;;  %v182_v50 = vld [vmem:[%s3538_s30 + $0x58] sm:$0xf]  ;;  %v185_v32 = vpack.c.bf16 %v3804_v12, %v173_v45 }
  0xd1   : > { %2330 = vmatprep.subr.bf16.mxu0 %v3285_v51  ;;  %1230 = vmatprep.mubr.bf16.mxu1 %v186_v52  ;;  %v1941_v51 = vsel %vm1932_vm2, %v1939_v46, %v1940_v49  ;;  %v190_v52 = vpack.c.bf16 %v182_v50, %v182_v50 }
  0xd2   : > { %2356 = vmatprep.mubr.bf16.mxu0 %v1944_v53  ;;  %v181_v53 = vld [vmem:[%s3538_s30 + $0x50] sm:$0xf] }
  0xd3   : > { %1205 = vmatpush1.bf16.msra.mxu1 %v3280_v55  ;;  %v189_v55 = vpack.c.bf16 %v181_v53, %v181_v53 }
  0xd4   : > { %2331 = vmatpush1.bf16.msra.mxu0 %v3283_v58  ;;  %1206 = vmatprep.subr.bf16.mxu1 %v3288_v31 }
  0xd5   : > { %2332 = vmatprep.subr.bf16.mxu0 %v3291_v59 }
  0xd7   : > { %1207 = vmatpush1.bf16.msra.mxu1 %v3286_v60 }
  0xd8   : > { %2333 = vmatpush1.bf16.msra.mxu0 %v3289_v61  ;;  %1208 = vmatprep.subr.bf16.mxu1 %v3294_v62 }
  0xd9   : > { %2334 = vmatprep.subr.bf16.mxu0 %v3297_v63 }
  0xdb   : > { %1209 = vmatpush1.bf16.msra.mxu1 %v3292_v0 }
  0xdc   : > { %2335 = vmatpush1.bf16.msra.mxu0 %v3295_v54  ;;  %1210 = vmatprep.subr.bf16.mxu1 %v3300_v2 }
  0xdd   : > { %2336 = vmatprep.subr.bf16.mxu0 %v3303_v3 }
  0xdf   : > { %1211 = vmatpush1.bf16.msra.mxu1 %v3298_v4 }
  0xe0   : > { %2337 = vmatpush1.bf16.msra.mxu0 %v3301_v37  ;;  %1212 = vmatprep.subr.bf16.mxu1 %v3306_v5 }
  0xe1   : > { %2338 = vmatprep.subr.bf16.mxu0 %v3309_v6 }
  0xe3   : > { %1213 = vmatpush1.bf16.msra.mxu1 %v3304_v7 }
  0xe4   : > { %2339 = vmatpush1.bf16.msra.mxu0 %v3307_v8  ;;  %1214 = vmatprep.subr.bf16.mxu1 %v3312_v9 }
  0xe5   : > { %2340 = vmatprep.subr.bf16.mxu0 %v3315_v57 }
  0xe7   : > { %1215 = vmatpush1.bf16.msra.mxu1 %v3310_v10 }
  0xe8   : > { %2341 = vmatpush1.bf16.msra.mxu0 %v3313_v11  ;;  %1216 = vmatprep.subr.bf16.mxu1 %v3318_v13 }
  0xe9   : > { %2342 = vmatprep.subr.bf16.mxu0 %v3321_v14 }
  0xeb   : > { %1217 = vmatpush1.bf16.msra.mxu1 %v3316_v1 }
  0xec   : > { %2343 = vmatpush1.bf16.msra.mxu0 %v3319_v15  ;;  %1218 = vmatprep.subr.bf16.mxu1 %v3324_v17 }
  0xed   : > { %2344 = vmatprep.subr.bf16.mxu0 %v3327_v18 }
  0xef   : > { %1219 = vmatpush1.bf16.msra.mxu1 %v3322_v19 }
  0xf0   : > { %2345 = vmatpush1.bf16.msra.mxu0 %v3325_v20  ;;  %1220 = vmatprep.subr.bf16.mxu1 %v3330_v21  ;;  %v2383_v20 = vlaneseq }
  0xf1   : > { %2346 = vmatprep.subr.bf16.mxu0 %v3333_v22 }
  0xf2   : > { %v2384_v21 = vshrl.u32 %v2383_v20, 7 }
  0xf3   : > { %1221 = vmatpush1.bf16.msra.mxu1 %v3328_v23  ;;  %v2381_v23 = vld [vmem:[%s4322_s2] sm:$0x3] }
  0xf4   : > { %2347 = vmatpush1.bf16.msra.mxu0 %v3331_v24  ;;  %1222 = vmatprep.subr.bf16.mxu1 %v3336_v25  ;;  %v2385_v22 = vsub.s32 0, %v2384_v21  ;;  %v2389_v24 = vsub.s32 1, %v2384_v21 }
  0xf5   : > { %2348 = vmatprep.subr.bf16.mxu0 %v3339_v26 }
  0xf6   : > { %v2386_v25 = vrot.slane %v2381_v23, %v2385_v22 }
  0xf7   : > { %1223 = vmatpush1.bf16.msra.mxu1 %v3334_v27 }
  0xf8   : > { %2349 = vmatpush1.bf16.msra.mxu0 %v3337_v28  ;;  %1224 = vmatprep.subr.bf16.mxu1 %v3342_v29  ;;  %v2390_v28 = vrot.slane %v2381_v23, %v2389_v24 }
  0xf9   : > { %2350 = vmatprep.subr.bf16.mxu0 %v3345_v30 }
  0xfb   : > { %1225 = vmatpush1.bf16.msra.mxu1 %v3340_v48 }
  0xfc   : > { %2351 = vmatpush1.bf16.msra.mxu0 %v3343_v56  ;;  %1226 = vmatprep.subr.bf16.mxu1 %v3348_v33 }
  0xfd   : > { %2352 = vmatprep.subr.bf16.mxu0 %v3351_v34 }
  0xff   : > { %1227 = vmatpush1.bf16.msra.mxu1 %v3346_v39 }
 0x100   : > { %2353 = vmatpush1.bf16.msra.mxu0 %v3349_v40  ;;  %1228 = vmatprep.subr.bf16.mxu1 %v3354_v43 }
 0x101   : > { %2354 = vmatprep.subr.bf16.mxu0 %v3357_v38 }
 0x103   : > { %1229 = vmatpush1.bf16.msra.mxu1 %v3352_v44 }
 0x104   : > { %2355 = vmatpush1.bf16.msra.mxu0 %v3355_v16 }
 0x106   : > { %1231 = vmatmul.mubr.bf16.vlgmr.msra.gmra.mrb[0].mxu1 %v185_v32 }
 0x107   : > { %2357 = vmatmul.mubr.bf16.vlgmr.msra.gmra.mrb[0].mxu0 %v1941_v51  ;;  %1240 = vmatprep.mubr.bf16.mxu1 %v190_v52 }
 0x108   : > { %2366 = vmatprep.mubr.bf16.mxu0 %v4119_v47 }
 0x10e   : > { %1241 = vmatmul.mubr.bf16.gmra.mrb[16].mxu1 %v189_v55 }
 0x10f   : > { %2367 = vmatmul.mubr.bf16.gmra.mrb[16].mxu0 %v1940_v49 }
 0x121   : > { %v769_v58 = vpop.f32.mrb[4].mxu1 }
 0x122   : > { %v1779_v31 = vpop.f32.mrb[4].mxu0  ;;  %v771_v59 = vpop.f32.mrb[5].mxu1 }
 0x123   : > { %v1781_v60 = vpop.f32.mrb[5].mxu0  ;;  %v773_v61 = vpop.f32.mrb[6].mxu1 }
 0x124   : > { %v1783_v12 = vpop.f32.mrb[6].mxu0  ;;  %v774_v62 = vpop.f32.mrb[7].mxu1 }
 0x125   : > { %v1784_v63 = vpop.f32.mrb[7].mxu0 }
 0x161   : > { %v820_v0 = vpop.f32.mrb[8].mxu1 }
 0x162   : > { %v1830_v54 = vpop.f32.mrb[8].mxu0  ;;  %v821_v2 = vadd.f32 %v820_v0, %v769_v58  ;;  %v822_v4 = vpop.f32.mrb[9].mxu1 }
 0x163   : > { %v4296_v3 = vadd.f32 %v1830_v54, %v1779_v31  ;;  %v1832_v37 = vpop.f32.mrb[9].mxu0  ;;  %v823_v47 = vadd.f32 %v822_v4, %v771_v59  ;;  %v824_v6 = vpop.f32.mrb[10].mxu1 }
 0x164   : > { %v4298_v5 = vadd.f32 %v1832_v37, %v1781_v60  ;;  %v1834_v7 = vpop.f32.mrb[10].mxu0  ;;  %v825_v8 = vpop.f32.mrb[11].mxu1 }
 0x165   : > { %v1835_v9 = vpop.f32.mrb[11].mxu0 }
 0x1a1   : > { %v1191_v57 = vpop.f32.mrb[12].mxu1 }
 0x1a2   : > { %v2317_v10 = vpop.f32.mrb[12].mxu0  ;;  %v1192_v11 = vadd.f32 %v1191_v57, %v821_v2  ;;  %v1193_v13 = vpop.f32.mrb[13].mxu1 }
 0x1a3   : > { %v2319_v14 = vpop.f32.mrb[13].mxu0  ;;  %v1194_v1 = vadd.f32 %v1193_v13, %v823_v47  ;;  %v1195_v15 = vpop.f32.mrb[14].mxu1 }
 0x1a4   : > { %v2321_v17 = vpop.f32.mrb[14].mxu0  ;;  %v1196_v18 = vpop.f32.mrb[15].mxu1 }
 0x1a5   : > { %v2322_v19 = vpop.f32.mrb[15].mxu0 }
 0x1d9   : > { %v1232_v26 = vpop.f32.mrb[0].mxu1 }
 0x1da   : > { %v2358_v27 = vpop.f32.mrb[0].mxu0  ;;  %v1234_v30 = vpop.f32.mrb[1].mxu1 }
 0x1db   : > { %v2937_v29 = vadd.f32 %v2358_v27, %v1232_v26  ;;  %v2360_v48 = vpop.f32.mrb[1].mxu0  ;;  %v1236_v33 = vpop.f32.mrb[2].mxu1 }
 0x1dc   : > { %v2938_v56 = vadd.f32 %v2360_v48, %v1234_v30  ;;  %v2362_v34 = vpop.f32.mrb[2].mxu0  ;;  %v1238_v39 = vpop.f32.mrb[3].mxu1 }
 0x1dd   : > { %v2393_v35 = vadd.f32 %v2937_v29, %v2386_v25  ;;  %v2939_v36 = vadd.f32 %v2362_v34, %v1236_v33  ;;  %v2364_v40 = vpop.f32.mrb[3].mxu0 }
 0x1de   : > { %v2394_v41 = vadd.f32 %v2938_v56, %v2390_v28  ;;  %v2940_v42 = vadd.f32 %v2364_v40, %v1238_v39 }
 0x1df   : > { %vm2399_vm3 = vcmp.ge.f32.partialorder %v2393_v35, 0.0  ;;  %v2405_v43 = vmul.f32 0.01, %v2393_v35  ;;  %v2395_v38 = vadd.f32 %v2939_v36, %v2386_v25 }
 0x1e0   : > { %vm2400_vm4 = vcmp.ge.f32.partialorder %v2394_v41, 0.0  ;;  %v2406_v44 = vmul.f32 0.01, %v2394_v41  ;;  %v2396_v16 = vadd.f32 %v2940_v42, %v2390_v28 }
 0x1e1   : > { %v2411_v45 = vsel %vm2399_vm3, %v2393_v35, %v2405_v43  ;;  %vm2401_vm5 = vcmp.ge.f32.partialorder %v2395_v38, 0.0  ;;  %v2407_v46 = vmul.f32 0.01, %v2395_v38  ;;  %v1242_v32 = vpop.f32.mrb[16].mxu1 }
 0x1e2   : > { %2417 = vst [vmem:[%s4307_s26] sm:$0xff] %v2411_v45  ;;  %v2412_v49 = vsel %vm2400_vm4, %v2394_v41, %v2406_v44  ;;  %vm2402_vm6 = vcmp.ge.f32.partialorder %v2396_v16, 0.0  ;;  %v2408_v50 = vmul.f32 0.01, %v2396_v16  ;;  %v2368_v51 = vpop.f32.mrb[16].mxu0  ;;  %v1243_v53 = vadd.f32 %v1242_v32, %v1192_v11  ;;  %v1244_v58 = vpop.f32.mrb[17].mxu1 }
 0x1e3   : > { %2418 = vst [vmem:[%s4307_s26 + $0x8] sm:$0xff] %v2412_v49  ;;  %v2413_v52 = vsel %vm2401_vm5, %v2395_v38, %v2407_v46  ;;  %v2369_v55 = vadd.f32 %v2368_v51, %v2317_v10  ;;  %v2370_v31 = vpop.f32.mrb[17].mxu0  ;;  %v1245_v60 = vadd.f32 %v1244_v58, %v1194_v1  ;;  %v1246_v12 = vpop.f32.mrb[18].mxu1 }
 0x1e4   : > { %2419 = vst [vmem:[%s4307_s26 + $0x10] sm:$0xff] %v2413_v52  ;;  %v2414_v59 = vsel %vm2402_vm6, %v2396_v16, %v2408_v50  ;;  %v2371_v61 = vadd.f32 %v2370_v31, %v2319_v14  ;;  %v2372_v62 = vpop.f32.mrb[18].mxu0  ;;  %v1841_v63 = vadd.f32 %v4296_v3, %v1243_v53  ;;  %v1247_v0 = vpop.f32.mrb[19].mxu1 }
 0x1e5   : > { %2420 = vst [vmem:[%s4307_s26 + $0x18] sm:$0xff] %v2414_v59  ;;  %v2373_v54 = vpop.f32.mrb[19].mxu0  ;;  %v1842_v2 = vadd.f32 %v4298_v5, %v1245_v60 }
 0x1e6   : > { %v2379_v4 = vadd.f32 %v2369_v55, %v1841_v63 }
 0x1e7   : > { %v2380_v37 = vadd.f32 %v2371_v61, %v1842_v2 }
 0x1e8   : > { %v2397_v47 = vadd.f32 %v2386_v25, %v2379_v4 }
 0x1e9   : > { %v2398_v6 = vadd.f32 %v2390_v28, %v2380_v37 }
 0x1ea   : > { %vm2403_vm7 = vcmp.ge.f32.partialorder %v2397_v47, 0.0  ;;  %v2409_v7 = vmul.f32 0.01, %v2397_v47 }
 0x1eb   : > { %vm2404_vm8 = vcmp.ge.f32.partialorder %v2398_v6, 0.0  ;;  %v2410_v8 = vmul.f32 0.01, %v2398_v6 }
 0x1ec   : > { %v2415_v9 = vsel %vm2403_vm7, %v2397_v47, %v2409_v7 }
 0x1ed   : > { %2421 = vst [vmem:[%s4307_s26 + $0x20] sm:$0xf] %v2415_v9  ;;  %v2416_v57 = vsel %vm2404_vm8, %v2398_v6, %v2410_v8 }
 0x1ee   : > { %2422 = vst [vmem:[%s4307_s26 + $0x28] sm:$0xf] %v2416_v57 }
 0x1ef PF: > { %s13_s12 = sadd.s32 1, %s3366_s12  }
 0x1f0   : > { %p10_p4 = scmp.ge.s32.totalorder %s13_s12, 4  }
 0x1f2   :  { %12 = sbr.rel (!%p10_p4) target bundleno = 1 (0x1), region = 65 }

// kernel: encoder_forward.7
= control target key start
LH: loop header
LB: loop body
LE: loop exit
PB: predicated region body
PF: predicated region fallthrough
CT: control target
= control target key end

     0   :  { %s17658_s1 = inlined_call_operand.vmem [shape: bf16[5120,512], index: 1, kind: input, shape index: {}]   ;;  %s17659_s0 = inlined_call_operand.vmem [shape: f32[8,5120], index: 0, kind: input, shape index: {}]   ;;  %s17660_s3 = inlined_call_operand.vmem [shape: f32[512,256], index: 3, kind: input, shape index: {}]   ;;  %s17661_s2 = inlined_call_operand.vmem [shape: f32[1,512], index: 2, kind: input, shape index: {}]   ;;  %s17662_s4 = inlined_call_operand.vmem [shape: f32[1,256], index: 4, kind: input, shape index: {}]   ;;  %s17663_s7 = inlined_call_operand.vmem [shape: f32[8,128], index: 7, kind: output, shape index: {1}]   ;;  %s17664_s8 = inlined_call_operand.vmem [shape: f32[8,128], index: 8, kind: output, shape index: {2}]   ;;  %s17665_s5 = inlined_call_operand.vmem [shape: f32[8,128], index: 5, kind: input, shape index: {}]   ;;  %s17666_s6 = inlined_call_operand.vmem [shape: f32[8,128], index: 6, kind: output, shape index: {0}]  }
   0x1   :  { %v11325_v0 = vld [vmem:[%s17658_s1 + $0x4] ss:$16 sps:$4 sm:$0xff]   ;;  %v11327_v1 = vld [vmem:[%s17658_s1 + $0xc] ss:$16 sps:$4 sm:$0xff]   ;;  %v11329_v2 = vld [vmem:[%s17658_s1] ss:$16 sps:$4 sm:$0xff]  }
   0x2   :  { %7808 = vmatprep.subr.bf16.mxu0 %v11325_v0  ;;  %v11330_v3 = vld [vmem:[%s17658_s1 + $0x8] ss:$16 sps:$4 sm:$0xff]   ;;  %8628 = vmatprep.subr.bf16.mxu1 %v11327_v1  ;;  %v11331_v4 = vld [vmem:[%s17658_s1 + $0x24] ss:$16 sps:$4 sm:$0xff]   ;;  %v11333_v5 = vld [vmem:[%s17658_s1 + $0x2c] ss:$16 sps:$4 sm:$0xff]  }
   0x3   :  { %7809 = vmatpush1.bf16.msra.mxu0 %v11329_v2  ;;  %8629 = vmatpush1.bf16.msra.mxu1 %v11330_v3  ;;  %v11335_v6 = vld [vmem:[%s17658_s1 + $0x20] ss:$16 sps:$4 sm:$0xff]   ;;  %v11336_v7 = vld [vmem:[%s17658_s1 + $0x28] ss:$16 sps:$4 sm:$0xff]   ;;  %v11337_v8 = vld [vmem:[%s17658_s1 + $0x44] ss:$16 sps:$4 sm:$0xff]  }
   0x4   :  { %7810 = vmatprep.subr.bf16.mxu0 %v11331_v4  ;;  %8630 = vmatprep.subr.bf16.mxu1 %v11333_v5  ;;  %v11339_v9 = vld [vmem:[%s17658_s1 + $0x4c] ss:$16 sps:$4 sm:$0xff]   ;;  %v11341_v10 = vld [vmem:[%s17658_s1 + $0x40] ss:$16 sps:$4 sm:$0xff]   ;;  %v11342_v11 = vld [vmem:[%s17658_s1 + $0x48] ss:$16 sps:$4 sm:$0xff]  }
   0x5   :  { %v11343_v12 = vld [vmem:[%s17658_s1 + $0x64] ss:$16 sps:$4 sm:$0xff]   ;;  %v11345_v13 = vld [vmem:[%s17658_s1 + $0x6c] ss:$16 sps:$4 sm:$0xff]   ;;  %v11347_v14 = vld [vmem:[%s17658_s1 + $0x60] ss:$16 sps:$4 sm:$0xff]  }
   0x6   :  { %v11348_v15 = vld [vmem:[%s17658_s1 + $0x68] ss:$16 sps:$4 sm:$0xff]   ;;  %v11349_v16 = vld [vmem:[%s17658_s1 + $0x84] ss:$16 sps:$4 sm:$0xff]   ;;  %v11351_v17 = vld [vmem:[%s17658_s1 + $0x8c] ss:$16 sps:$4 sm:$0xff]  }
   0x7   :  { %7811 = vmatpush1.bf16.msra.mxu0 %v11335_v6  ;;  %8631 = vmatpush1.bf16.msra.mxu1 %v11336_v7  ;;  %v11353_v18 = vld [vmem:[%s17658_s1 + $0x80] ss:$16 sps:$4 sm:$0xff]   ;;  %v11354_v19 = vld [vmem:[%s17658_s1 + $0x88] ss:$16 sps:$4 sm:$0xff]   ;;  %v11355_v20 = vld [vmem:[%s17658_s1 + $0xa4] ss:$16 sps:$4 sm:$0xff]  }
   0x8   :  { %7812 = vmatprep.subr.bf16.mxu0 %v11337_v8  ;;  %8632 = vmatprep.subr.bf16.mxu1 %v11339_v9  ;;  %v11357_v21 = vld [vmem:[%s17658_s1 + $0xac] ss:$16 sps:$4 sm:$0xff]   ;;  %v11359_v22 = vld [vmem:[%s17658_s1 + $0xa0] ss:$16 sps:$4 sm:$0xff]   ;;  %v11360_v23 = vld [vmem:[%s17658_s1 + $0xa8] ss:$16 sps:$4 sm:$0xff]  }
   0x9   :  { %v11361_v24 = vld [vmem:[%s17658_s1 + $0xc4] ss:$16 sps:$4 sm:$0xff]   ;;  %v11363_v25 = vld [vmem:[%s17658_s1 + $0xcc] ss:$16 sps:$4 sm:$0xff]   ;;  %v11365_v26 = vld [vmem:[%s17658_s1 + $0xc0] ss:$16 sps:$4 sm:$0xff]  }
   0xa   :  { %v11366_v27 = vld [vmem:[%s17658_s1 + $0xc8] ss:$16 sps:$4 sm:$0xff]   ;;  %v11367_v28 = vld [vmem:[%s17658_s1 + $0xe4] ss:$16 sps:$4 sm:$0xff]   ;;  %v11369_v29 = vld [vmem:[%s17658_s1 + $0xec] ss:$16 sps:$4 sm:$0xff]  }
   0xb   :  { %7813 = vmatpush1.bf16.msra.mxu0 %v11341_v10  ;;  %8633 = vmatpush1.bf16.msra.mxu1 %v11342_v11  ;;  %v11371_v30 = vld [vmem:[%s17658_s1 + $0xe0] ss:$16 sps:$4 sm:$0xff]   ;;  %v11372_v31 = vld [vmem:[%s17658_s1 + $0xe8] ss:$16 sps:$4 sm:$0xff]   ;;  %v11373_v32 = vld [vmem:[%s17658_s1 + $0x104] ss:$16 sps:$4 sm:$0xff]  }
   0xc   :  { %7814 = vmatprep.subr.bf16.mxu0 %v11343_v12  ;;  %8634 = vmatprep.subr.bf16.mxu1 %v11345_v13  ;;  %v11375_v33 = vld [vmem:[%s17658_s1 + $0x10c] ss:$16 sps:$4 sm:$0xff]   ;;  %v11377_v34 = vld [vmem:[%s17658_s1 + $0x100] ss:$16 sps:$4 sm:$0xff]   ;;  %v11378_v35 = vld [vmem:[%s17658_s1 + $0x108] ss:$16 sps:$4 sm:$0xff]  }
   0xd   :  { %v11379_v36 = vld [vmem:[%s17658_s1 + $0x124] ss:$16 sps:$4 sm:$0xff]   ;;  %v11381_v37 = vld [vmem:[%s17658_s1 + $0x12c] ss:$16 sps:$4 sm:$0xff]   ;;  %v11383_v38 = vld [vmem:[%s17658_s1 + $0x120] ss:$16 sps:$4 sm:$0xff]  }
   0xe   :  { %v11384_v39 = vld [vmem:[%s17658_s1 + $0x128] ss:$16 sps:$4 sm:$0xff]   ;;  %v11385_v40 = vld [vmem:[%s17658_s1 + $0x144] ss:$16 sps:$4 sm:$0xff]   ;;  %v11387_v41 = vld [vmem:[%s17658_s1 + $0x14c] ss:$16 sps:$4 sm:$0xff]  }
   0xf   :  { %7815 = vmatpush1.bf16.msra.mxu0 %v11347_v14  ;;  %8635 = vmatpush1.bf16.msra.mxu1 %v11348_v15  ;;  %v11389_v42 = vld [vmem:[%s17658_s1 + $0x140] ss:$16 sps:$4 sm:$0xff]   ;;  %v11390_v43 = vld [vmem:[%s17658_s1 + $0x148] ss:$16 sps:$4 sm:$0xff]   ;;  %v11391_v44 = vld [vmem:[%s17658_s1 + $0x164] ss:$16 sps:$4 sm:$0xff]  }
  0x10   :  { %7816 = vmatprep.subr.bf16.mxu0 %v11349_v16  ;;  %8636 = vmatprep.subr.bf16.mxu1 %v11351_v17  ;;  %v11393_v45 = vld [vmem:[%s17658_s1 + $0x16c] ss:$16 sps:$4 sm:$0xff]   ;;  %v11395_v47 = vld [vmem:[%s17658_s1 + $0x160] ss:$16 sps:$4 sm:$0xff]   ;;  %v11396_v49 = vld [vmem:[%s17658_s1 + $0x168] ss:$16 sps:$4 sm:$0xff]  }
  0x11   :  { %v27_v46 = vld [vmem:[%s17659_s0 + $0x8] sm:$0xff]  ;;  %v11397_v50 = vld [vmem:[%s17658_s1 + $0x184] ss:$16 sps:$4 sm:$0xff]   ;;  %v11401_v52 = vld [vmem:[%s17658_s1 + $0x180] ss:$16 sps:$4 sm:$0xff]  }
  0x12   :  { %v67_v48 = vpack.c.bf16 %v27_v46, %v27_v46  ;;  %v11399_v51 = vld [vmem:[%s17658_s1 + $0x18c] ss:$16 sps:$4 sm:$0xff]   ;;  %v11402_v53 = vld [vmem:[%s17658_s1 + $0x188] ss:$16 sps:$4 sm:$0xff]   ;;  %v11403_v54 = vld [vmem:[%s17658_s1 + $0x1a4] ss:$16 sps:$4 sm:$0xff]  }
  0x13   :  { %7817 = vmatpush1.bf16.msra.mxu0 %v11353_v18  ;;  %8637 = vmatpush1.bf16.msra.mxu1 %v11354_v19  ;;  %v11405_v55 = vld [vmem:[%s17658_s1 + $0x1ac] ss:$16 sps:$4 sm:$0xff]   ;;  %v11407_v56 = vld [vmem:[%s17658_s1 + $0x1a0] ss:$16 sps:$4 sm:$0xff]   ;;  %v11408_v57 = vld [vmem:[%s17658_s1 + $0x1a8] ss:$16 sps:$4 sm:$0xff]  }
  0x14   :  { %7818 = vmatprep.subr.bf16.mxu0 %v11355_v20  ;;  %8638 = vmatprep.subr.bf16.mxu1 %v11357_v21  ;;  %v11409_v58 = vld [vmem:[%s17658_s1 + $0x1c4] ss:$16 sps:$4 sm:$0xff]   ;;  %v11411_v59 = vld [vmem:[%s17658_s1 + $0x1cc] ss:$16 sps:$4 sm:$0xff]   ;;  %v11413_v60 = vld [vmem:[%s17658_s1 + $0x1c0] ss:$16 sps:$4 sm:$0xff]  }
  0x15   :  { %7840 = vmatprep.mubr.bf16.mxu0 %v67_v48  ;;  %8660 = vmatprep.mubr.bf16.mxu1 %v67_v48  ;;  %v11414_v61 = vld [vmem:[%s17658_s1 + $0x1c8] ss:$16 sps:$4 sm:$0xff]   ;;  %v11415_v62 = vld [vmem:[%s17658_s1 + $0x1e4] ss:$16 sps:$4 sm:$0xff]   ;;  %v11417_v63 = vld [vmem:[%s17658_s1 + $0x1ec] ss:$16 sps:$4 sm:$0xff]  }
  0x16   :  { %v11419_v0 = vld [vmem:[%s17658_s1 + $0x1e0] ss:$16 sps:$4 sm:$0xff]   ;;  %v11420_v1 = vld [vmem:[%s17658_s1 + $0x1e8] ss:$16 sps:$4 sm:$0xff]   ;;  %v11423_v3 = vld [vmem:[%s17658_s1 + $0x204] ss:$16 sps:$4 sm:$0xff]  }
  0x17   :  { %7819 = vmatpush1.bf16.msra.mxu0 %v11359_v22  ;;  %8639 = vmatpush1.bf16.msra.mxu1 %v11360_v23  ;;  %v26_v2 = vld [vmem:[%s17659_s0] sm:$0xff]  ;;  %v11426_v4 = vld [vmem:[%s17658_s1 + $0x20c] ss:$16 sps:$4 sm:$0xff]   ;;  %v11424_v7 = vld [vmem:[%s17658_s1 + $0x208] ss:$16 sps:$4 sm:$0xff]  }
  0x18   :  { %7820 = vmatprep.subr.bf16.mxu0 %v11361_v24  ;;  %8640 = vmatprep.subr.bf16.mxu1 %v11363_v25  ;;  %v66_v5 = vpack.c.bf16 %v26_v2, %v26_v2  ;;  %v11421_v6 = vld [vmem:[%s17658_s1 + $0x200] ss:$16 sps:$4 sm:$0xff]   ;;  %v11429_v8 = vld [vmem:[%s17658_s1 + $0x224] ss:$16 sps:$4 sm:$0xff]   ;;  %v11432_v9 = vld [vmem:[%s17658_s1 + $0x22c] ss:$16 sps:$4 sm:$0xff]  }
  0x19   :  { %v11427_v10 = vld [vmem:[%s17658_s1 + $0x220] ss:$16 sps:$4 sm:$0xff]   ;;  %v11430_v11 = vld [vmem:[%s17658_s1 + $0x228] ss:$16 sps:$4 sm:$0xff]   ;;  %v11435_v12 = vld [vmem:[%s17658_s1 + $0x244] ss:$16 sps:$4 sm:$0xff]  }
  0x1a   :  { %v11438_v13 = vld [vmem:[%s17658_s1 + $0x24c] ss:$16 sps:$4 sm:$0xff]   ;;  %v11433_v14 = vld [vmem:[%s17658_s1 + $0x240] ss:$16 sps:$4 sm:$0xff]   ;;  %v11436_v15 = vld [vmem:[%s17658_s1 + $0x248] ss:$16 sps:$4 sm:$0xff]  }
  0x1b   :  { %7821 = vmatpush1.bf16.msra.mxu0 %v11365_v26  ;;  %8641 = vmatpush1.bf16.msra.mxu1 %v11366_v27  ;;  %v11441_v16 = vld [vmem:[%s17658_s1 + $0x264] ss:$16 sps:$4 sm:$0xff]   ;;  %v11444_v17 = vld [vmem:[%s17658_s1 + $0x26c] ss:$16 sps:$4 sm:$0xff]   ;;  %v11439_v18 = vld [vmem:[%s17658_s1 + $0x260] ss:$16 sps:$4 sm:$0xff]  }
  0x1c   :  { %7822 = vmatprep.subr.bf16.mxu0 %v11367_v28  ;;  %8642 = vmatprep.subr.bf16.mxu1 %v11369_v29  ;;  %v11442_v19 = vld [vmem:[%s17658_s1 + $0x268] ss:$16 sps:$4 sm:$0xff]   ;;  %v11447_v20 = vld [vmem:[%s17658_s1 + $0x284] ss:$16 sps:$4 sm:$0xff]   ;;  %v11450_v21 = vld [vmem:[%s17658_s1 + $0x28c] ss:$16 sps:$4 sm:$0xff]  }
  0x1d   :  { %v11445_v22 = vld [vmem:[%s17658_s1 + $0x280] ss:$16 sps:$4 sm:$0xff]   ;;  %v11448_v23 = vld [vmem:[%s17658_s1 + $0x288] ss:$16 sps:$4 sm:$0xff]   ;;  %v11453_v24 = vld [vmem:[%s17658_s1 + $0x2a4] ss:$16 sps:$4 sm:$0xff]  }
  0x1e   :  { %v11456_v25 = vld [vmem:[%s17658_s1 + $0x2ac] ss:$16 sps:$4 sm:$0xff]   ;;  %v11451_v26 = vld [vmem:[%s17658_s1 + $0x2a0] ss:$16 sps:$4 sm:$0xff]   ;;  %v11454_v27 = vld [vmem:[%s17658_s1 + $0x2a8] ss:$16 sps:$4 sm:$0xff]  }
  0x1f   :  { %7823 = vmatpush1.bf16.msra.mxu0 %v11371_v30  ;;  %8643 = vmatpush1.bf16.msra.mxu1 %v11372_v31  ;;  %v11459_v28 = vld [vmem:[%s17658_s1 + $0x2c4] ss:$16 sps:$4 sm:$0xff]   ;;  %v11462_v29 = vld [vmem:[%s17658_s1 + $0x2cc] ss:$16 sps:$4 sm:$0xff]   ;;  %v11457_v31 = vld [vmem:[%s17658_s1 + $0x2c0] ss:$16 sps:$4 sm:$0xff]  }
  0x20   :  { %7824 = vmatprep.subr.bf16.mxu0 %v11373_v32  ;;  %8644 = vmatprep.subr.bf16.mxu1 %v11375_v33  ;;  %v29_v30 = vld [vmem:[%s17659_s0 + $0x18] sm:$0xff]  ;;  %v11483_v46 = vld [vmem:[%s17658_s1 + $0x344] ss:$16 sps:$4 sm:$0xff]   ;;  %v11481_v48 = vld [vmem:[%s17658_s1 + $0x340] ss:$16 sps:$4 sm:$0xff]  }
  0x21   :  { %v69_v32 = vpack.c.bf16 %v29_v30, %v29_v30  ;;  %v11460_v33 = vld [vmem:[%s17658_s1 + $0x2c8] ss:$16 sps:$4 sm:$0xff]   ;;  %v11513_v2 = vld [vmem:[%s17658_s1 + $0x3e4] ss:$16 sps:$4 sm:$0xff]  }
  0x22   :  { %v11549_v30 = vld [vmem:[%s17658_s1 + $0x4a4] ss:$16 sps:$4 sm:$0xff]  }
  0x23   :  { %7825 = vmatpush1.bf16.msra.mxu0 %v11377_v34  ;;  %8645 = vmatpush1.bf16.msra.mxu1 %v11378_v35  ;;  %v11465_v34 = vld [vmem:[%s17658_s1 + $0x2e4] ss:$16 sps:$4 sm:$0xff]   ;;  %v11468_v35 = vld [vmem:[%s17658_s1 + $0x2ec] ss:$16 sps:$4 sm:$0xff]  }
  0x24   :  { %7826 = vmatprep.subr.bf16.mxu0 %v11379_v36  ;;  %8646 = vmatprep.subr.bf16.mxu1 %v11381_v37  ;;  %v11463_v36 = vld [vmem:[%s17658_s1 + $0x2e0] ss:$16 sps:$4 sm:$0xff]   ;;  %v11466_v37 = vld [vmem:[%s17658_s1 + $0x2e8] ss:$16 sps:$4 sm:$0xff]  }
  0x27   :  { %7827 = vmatpush1.bf16.msra.mxu0 %v11383_v38  ;;  %8647 = vmatpush1.bf16.msra.mxu1 %v11384_v39  ;;  %v11471_v38 = vld [vmem:[%s17658_s1 + $0x304] ss:$16 sps:$4 sm:$0xff]   ;;  %v11474_v39 = vld [vmem:[%s17658_s1 + $0x30c] ss:$16 sps:$4 sm:$0xff]  }
  0x28   :  { %7828 = vmatprep.subr.bf16.mxu0 %v11385_v40  ;;  %8648 = vmatprep.subr.bf16.mxu1 %v11387_v41  ;;  %v11469_v40 = vld [vmem:[%s17658_s1 + $0x300] ss:$16 sps:$4 sm:$0xff]   ;;  %v11472_v41 = vld [vmem:[%s17658_s1 + $0x308] ss:$16 sps:$4 sm:$0xff]  }
  0x2b   :  { %7829 = vmatpush1.bf16.msra.mxu0 %v11389_v42  ;;  %8649 = vmatpush1.bf16.msra.mxu1 %v11390_v43  ;;  %v11477_v42 = vld [vmem:[%s17658_s1 + $0x324] ss:$16 sps:$4 sm:$0xff]   ;;  %v11480_v43 = vld [vmem:[%s17658_s1 + $0x32c] ss:$16 sps:$4 sm:$0xff]  }
  0x2c   :  { %7830 = vmatprep.subr.bf16.mxu0 %v11391_v44  ;;  %8650 = vmatprep.subr.bf16.mxu1 %v11393_v45  ;;  %v11475_v44 = vld [vmem:[%s17658_s1 + $0x320] ss:$16 sps:$4 sm:$0xff]   ;;  %v11478_v45 = vld [vmem:[%s17658_s1 + $0x328] ss:$16 sps:$4 sm:$0xff]  }
  0x2f   :  { %7831 = vmatpush1.bf16.msra.mxu0 %v11395_v47  ;;  %8651 = vmatpush1.bf16.msra.mxu1 %v11396_v49  ;;  %v11486_v47 = vld [vmem:[%s17658_s1 + $0x34c] ss:$16 sps:$4 sm:$0xff]   ;;  %v11484_v49 = vld [vmem:[%s17658_s1 + $0x348] ss:$16 sps:$4 sm:$0xff]  }
  0x30   :  { %7832 = vmatprep.subr.bf16.mxu0 %v11397_v50  ;;  %8652 = vmatprep.subr.bf16.mxu1 %v11399_v51  ;;  %v11489_v50 = vld [vmem:[%s17658_s1 + $0x364] ss:$16 sps:$4 sm:$0xff]   ;;  %v11492_v51 = vld [vmem:[%s17658_s1 + $0x36c] ss:$16 sps:$4 sm:$0xff]  }
  0x33   :  { %7833 = vmatpush1.bf16.msra.mxu0 %v11401_v52  ;;  %8653 = vmatpush1.bf16.msra.mxu1 %v11402_v53  ;;  %v11487_v52 = vld [vmem:[%s17658_s1 + $0x360] ss:$16 sps:$4 sm:$0xff]   ;;  %v11490_v53 = vld [vmem:[%s17658_s1 + $0x368] ss:$16 sps:$4 sm:$0xff]  }
  0x34   :  { %7834 = vmatprep.subr.bf16.mxu0 %v11403_v54  ;;  %8654 = vmatprep.subr.bf16.mxu1 %v11405_v55  ;;  %v11495_v54 = vld [vmem:[%s17658_s1 + $0x384] ss:$16 sps:$4 sm:$0xff]   ;;  %v11498_v55 = vld [vmem:[%s17658_s1 + $0x38c] ss:$16 sps:$4 sm:$0xff]  }
  0x37   :  { %7835 = vmatpush1.bf16.msra.mxu0 %v11407_v56  ;;  %8655 = vmatpush1.bf16.msra.mxu1 %v11408_v57  ;;  %v11493_v56 = vld [vmem:[%s17658_s1 + $0x380] ss:$16 sps:$4 sm:$0xff]   ;;  %v11496_v57 = vld [vmem:[%s17658_s1 + $0x388] ss:$16 sps:$4 sm:$0xff]  }
  0x38   :  { %7836 = vmatprep.subr.bf16.mxu0 %v11409_v58  ;;  %8656 = vmatprep.subr.bf16.mxu1 %v11411_v59  ;;  %v11501_v58 = vld [vmem:[%s17658_s1 + $0x3a4] ss:$16 sps:$4 sm:$0xff]   ;;  %v11504_v59 = vld [vmem:[%s17658_s1 + $0x3ac] ss:$16 sps:$4 sm:$0xff]  }
  0x3b   :  { %7837 = vmatpush1.bf16.msra.mxu0 %v11413_v60  ;;  %8657 = vmatpush1.bf16.msra.mxu1 %v11414_v61  ;;  %v11499_v60 = vld [vmem:[%s17658_s1 + $0x3a0] ss:$16 sps:$4 sm:$0xff]   ;;  %v11502_v61 = vld [vmem:[%s17658_s1 + $0x3a8] ss:$16 sps:$4 sm:$0xff]  }
  0x3c   :  { %7838 = vmatprep.subr.bf16.mxu0 %v11415_v62  ;;  %8658 = vmatprep.subr.bf16.mxu1 %v11417_v63  ;;  %v11507_v62 = vld [vmem:[%s17658_s1 + $0x3c4] ss:$16 sps:$4 sm:$0xff]   ;;  %v11510_v63 = vld [vmem:[%s17658_s1 + $0x3cc] ss:$16 sps:$4 sm:$0xff]  }
  0x3f   :  { %7839 = vmatpush1.bf16.msra.mxu0 %v11419_v0  ;;  %8659 = vmatpush1.bf16.msra.mxu1 %v11420_v1  ;;  %v11505_v0 = vld [vmem:[%s17658_s1 + $0x3c0] ss:$16 sps:$4 sm:$0xff]   ;;  %v11508_v1 = vld [vmem:[%s17658_s1 + $0x3c8] ss:$16 sps:$4 sm:$0xff]  }
  0x40   :  { %7849 = vmatprep.subr.bf16.mxu0 %v11423_v3  ;;  %8669 = vmatprep.subr.bf16.mxu1 %v11426_v4  ;;  %v11516_v3 = vld [vmem:[%s17658_s1 + $0x3ec] ss:$16 sps:$4 sm:$0xff]   ;;  %v11511_v4 = vld [vmem:[%s17658_s1 + $0x3e0] ss:$16 sps:$4 sm:$0xff]  }
  0x42   :  { %7841 = vmatmul.mubr.bf16.vlgmr.msra.gmra.mrb[0].mxu0 %v66_v5  ;;  %8661 = vmatmul.mubr.bf16.vlgmr.msra.gmra.mrb[0].mxu1 %v66_v5  ;;  %v11514_v5 = vld [vmem:[%s17658_s1 + $0x3e8] ss:$16 sps:$4 sm:$0xff]  }
  0x43   :  { %7850 = vmatpush1.bf16.msra.mxu0 %v11421_v6  ;;  %8670 = vmatpush1.bf16.msra.mxu1 %v11424_v7  ;;  %v11519_v6 = vld [vmem:[%s17658_s1 + $0x404] ss:$16 sps:$4 sm:$0xff]  }
  0x44   :  { %7851 = vmatprep.subr.bf16.mxu0 %v11429_v8  ;;  %8671 = vmatprep.subr.bf16.mxu1 %v11432_v9  ;;  %v28_v7 = vld [vmem:[%s17659_s0 + $0x10] sm:$0xff]  ;;  %v11522_v8 = vld [vmem:[%s17658_s1 + $0x40c] ss:$16 sps:$4 sm:$0xff]  }
  0x45   :  { %7881 = vmatprep.mubr.bf16.mxu0 %v69_v32  ;;  %8701 = vmatprep.mubr.bf16.mxu1 %v69_v32  ;;  %v11517_v9 = vld [vmem:[%s17658_s1 + $0x400] ss:$16 sps:$4 sm:$0xff]  }
  0x46   :  { %v11547_v32 = vld [vmem:[%s17658_s1 + $0x4a0] ss:$16 sps:$4 sm:$0xff]  }
  0x47   :  { %7852 = vmatpush1.bf16.msra.mxu0 %v11427_v10  ;;  %8672 = vmatpush1.bf16.msra.mxu1 %v11430_v11  ;;  %v11520_v10 = vld [vmem:[%s17658_s1 + $0x408] ss:$16 sps:$4 sm:$0xff]   ;;  %v68_v11 = vpack.c.bf16 %v28_v7, %v28_v7  ;;  %v11612_v7 = vld [vmem:[%s17658_s1 + $0x5ec] ss:$16 sps:$4 sm:$0xff]  }
  0x48   :  { %7853 = vmatprep.subr.bf16.mxu0 %v11435_v12  ;;  %8673 = vmatprep.subr.bf16.mxu1 %v11438_v13  ;;  %v11525_v12 = vld [vmem:[%s17658_s1 + $0x424] ss:$16 sps:$4 sm:$0xff]   ;;  %v11528_v13 = vld [vmem:[%s17658_s1 + $0x42c] ss:$16 sps:$4 sm:$0xff]  }
  0x4b   :  { %7854 = vmatpush1.bf16.msra.mxu0 %v11433_v14  ;;  %8674 = vmatpush1.bf16.msra.mxu1 %v11436_v15  ;;  %v31_v14 = vld [vmem:[%s17659_s0 + $0x28] sm:$0xff] }
  0x4c   :  { %7855 = vmatprep.subr.bf16.mxu0 %v11441_v16  ;;  %8675 = vmatprep.subr.bf16.mxu1 %v11444_v17  ;;  %v71_v15 = vpack.c.bf16 %v31_v14, %v31_v14  ;;  %v11523_v16 = vld [vmem:[%s17658_s1 + $0x420] ss:$16 sps:$4 sm:$0xff]   ;;  %v11526_v17 = vld [vmem:[%s17658_s1 + $0x428] ss:$16 sps:$4 sm:$0xff]  }
  0x4d   :  { %v11616_v14 = vld [vmem:[%s17658_s1 + $0x608] ss:$16 sps:$4 sm:$0xff]  }
  0x4f   :  { %7856 = vmatpush1.bf16.msra.mxu0 %v11439_v18  ;;  %8676 = vmatpush1.bf16.msra.mxu1 %v11442_v19  ;;  %v11531_v18 = vld [vmem:[%s17658_s1 + $0x444] ss:$16 sps:$4 sm:$0xff]   ;;  %v11534_v19 = vld [vmem:[%s17658_s1 + $0x44c] ss:$16 sps:$4 sm:$0xff]  }
  0x50   :  { %7857 = vmatprep.subr.bf16.mxu0 %v11447_v20  ;;  %8677 = vmatprep.subr.bf16.mxu1 %v11450_v21  ;;  %v11529_v20 = vld [vmem:[%s17658_s1 + $0x440] ss:$16 sps:$4 sm:$0xff]   ;;  %v11532_v21 = vld [vmem:[%s17658_s1 + $0x448] ss:$16 sps:$4 sm:$0xff]  }
  0x53   :  { %7858 = vmatpush1.bf16.msra.mxu0 %v11445_v22  ;;  %8678 = vmatpush1.bf16.msra.mxu1 %v11448_v23  ;;  %v11537_v22 = vld [vmem:[%s17658_s1 + $0x464] ss:$16 sps:$4 sm:$0xff]   ;;  %v11540_v23 = vld [vmem:[%s17658_s1 + $0x46c] ss:$16 sps:$4 sm:$0xff]  }
  0x54   :  { %7859 = vmatprep.subr.bf16.mxu0 %v11453_v24  ;;  %8679 = vmatprep.subr.bf16.mxu1 %v11456_v25  ;;  %v11535_v24 = vld [vmem:[%s17658_s1 + $0x460] ss:$16 sps:$4 sm:$0xff]   ;;  %v11538_v25 = vld [vmem:[%s17658_s1 + $0x468] ss:$16 sps:$4 sm:$0xff]  }
  0x57   :  { %7860 = vmatpush1.bf16.msra.mxu0 %v11451_v26  ;;  %8680 = vmatpush1.bf16.msra.mxu1 %v11454_v27  ;;  %v11543_v26 = vld [vmem:[%s17658_s1 + $0x484] ss:$16 sps:$4 sm:$0xff]   ;;  %v11546_v27 = vld [vmem:[%s17658_s1 + $0x48c] ss:$16 sps:$4 sm:$0xff]  }
  0x58   :  { %7861 = vmatprep.subr.bf16.mxu0 %v11459_v28  ;;  %8681 = vmatprep.subr.bf16.mxu1 %v11462_v29  ;;  %v11541_v28 = vld [vmem:[%s17658_s1 + $0x480] ss:$16 sps:$4 sm:$0xff]   ;;  %v11544_v29 = vld [vmem:[%s17658_s1 + $0x488] ss:$16 sps:$4 sm:$0xff]  }
  0x5b   :  { %7862 = vmatpush1.bf16.msra.mxu0 %v11457_v31  ;;  %8682 = vmatpush1.bf16.msra.mxu1 %v11460_v33  ;;  %v11552_v31 = vld [vmem:[%s17658_s1 + $0x4ac] ss:$16 sps:$4 sm:$0xff]   ;;  %v11550_v33 = vld [vmem:[%s17658_s1 + $0x4a8] ss:$16 sps:$4 sm:$0xff]  }
  0x5c   :  { %7863 = vmatprep.subr.bf16.mxu0 %v11465_v34  ;;  %8683 = vmatprep.subr.bf16.mxu1 %v11468_v35  ;;  %v11555_v34 = vld [vmem:[%s17658_s1 + $0x4c4] ss:$16 sps:$4 sm:$0xff]   ;;  %v11558_v35 = vld [vmem:[%s17658_s1 + $0x4cc] ss:$16 sps:$4 sm:$0xff]  }
  0x5f   :  { %7864 = vmatpush1.bf16.msra.mxu0 %v11463_v36  ;;  %8684 = vmatpush1.bf16.msra.mxu1 %v11466_v37  ;;  %v11553_v36 = vld [vmem:[%s17658_s1 + $0x4c0] ss:$16 sps:$4 sm:$0xff]   ;;  %v11556_v37 = vld [vmem:[%s17658_s1 + $0x4c8] ss:$16 sps:$4 sm:$0xff]  }
  0x60   :  { %7865 = vmatprep.subr.bf16.mxu0 %v11471_v38  ;;  %8685 = vmatprep.subr.bf16.mxu1 %v11474_v39  ;;  %v11561_v38 = vld [vmem:[%s17658_s1 + $0x4e4] ss:$16 sps:$4 sm:$0xff]   ;;  %v11564_v39 = vld [vmem:[%s17658_s1 + $0x4ec] ss:$16 sps:$4 sm:$0xff]  }
  0x63   :  { %7866 = vmatpush1.bf16.msra.mxu0 %v11469_v40  ;;  %8686 = vmatpush1.bf16.msra.mxu1 %v11472_v41  ;;  %v11559_v40 = vld [vmem:[%s17658_s1 + $0x4e0] ss:$16 sps:$4 sm:$0xff]   ;;  %v11562_v41 = vld [vmem:[%s17658_s1 + $0x4e8] ss:$16 sps:$4 sm:$0xff]  }
  0x64   :  { %7867 = vmatprep.subr.bf16.mxu0 %v11477_v42  ;;  %8687 = vmatprep.subr.bf16.mxu1 %v11480_v43  ;;  %v11567_v42 = vld [vmem:[%s17658_s1 + $0x504] ss:$16 sps:$4 sm:$0xff]   ;;  %v11570_v43 = vld [vmem:[%s17658_s1 + $0x50c] ss:$16 sps:$4 sm:$0xff]  }
  0x67   :  { %7868 = vmatpush1.bf16.msra.mxu0 %v11475_v44  ;;  %8688 = vmatpush1.bf16.msra.mxu1 %v11478_v45  ;;  %v11565_v44 = vld [vmem:[%s17658_s1 + $0x500] ss:$16 sps:$4 sm:$0xff]   ;;  %v11568_v45 = vld [vmem:[%s17658_s1 + $0x508] ss:$16 sps:$4 sm:$0xff]  }
  0x68   :  { %7869 = vmatprep.subr.bf16.mxu0 %v11483_v46  ;;  %8689 = vmatprep.subr.bf16.mxu1 %v11486_v47  ;;  %v11573_v46 = vld [vmem:[%s17658_s1 + $0x524] ss:$16 sps:$4 sm:$0xff]   ;;  %v11576_v47 = vld [vmem:[%s17658_s1 + $0x52c] ss:$16 sps:$4 sm:$0xff]  }
  0x6b   :  { %7870 = vmatpush1.bf16.msra.mxu0 %v11481_v48  ;;  %8690 = vmatpush1.bf16.msra.mxu1 %v11484_v49  ;;  %v11571_v48 = vld [vmem:[%s17658_s1 + $0x520] ss:$16 sps:$4 sm:$0xff]   ;;  %v11574_v49 = vld [vmem:[%s17658_s1 + $0x528] ss:$16 sps:$4 sm:$0xff]  }
  0x6c   :  { %7871 = vmatprep.subr.bf16.mxu0 %v11489_v50  ;;  %8691 = vmatprep.subr.bf16.mxu1 %v11492_v51  ;;  %v11579_v50 = vld [vmem:[%s17658_s1 + $0x544] ss:$16 sps:$4 sm:$0xff]   ;;  %v11582_v51 = vld [vmem:[%s17658_s1 + $0x54c] ss:$16 sps:$4 sm:$0xff]  }
  0x6f   :  { %7872 = vmatpush1.bf16.msra.mxu0 %v11487_v52  ;;  %8692 = vmatpush1.bf16.msra.mxu1 %v11490_v53  ;;  %v11577_v52 = vld [vmem:[%s17658_s1 + $0x540] ss:$16 sps:$4 sm:$0xff]   ;;  %v11580_v53 = vld [vmem:[%s17658_s1 + $0x548] ss:$16 sps:$4 sm:$0xff]  }
  0x70   :  { %7873 = vmatprep.subr.bf16.mxu0 %v11495_v54  ;;  %8693 = vmatprep.subr.bf16.mxu1 %v11498_v55  ;;  %v11585_v54 = vld [vmem:[%s17658_s1 + $0x564] ss:$16 sps:$4 sm:$0xff]   ;;  %v11588_v55 = vld [vmem:[%s17658_s1 + $0x56c] ss:$16 sps:$4 sm:$0xff]  }
  0x73   :  { %7874 = vmatpush1.bf16.msra.mxu0 %v11493_v56  ;;  %8694 = vmatpush1.bf16.msra.mxu1 %v11496_v57  ;;  %v11583_v56 = vld [vmem:[%s17658_s1 + $0x560] ss:$16 sps:$4 sm:$0xff]   ;;  %v11586_v57 = vld [vmem:[%s17658_s1 + $0x568] ss:$16 sps:$4 sm:$0xff]  }
  0x74   :  { %7875 = vmatprep.subr.bf16.mxu0 %v11501_v58  ;;  %8695 = vmatprep.subr.bf16.mxu1 %v11504_v59  ;;  %v11591_v58 = vld [vmem:[%s17658_s1 + $0x584] ss:$16 sps:$4 sm:$0xff]   ;;  %v11594_v59 = vld [vmem:[%s17658_s1 + $0x58c] ss:$16 sps:$4 sm:$0xff]  }
  0x77   :  { %7876 = vmatpush1.bf16.msra.mxu0 %v11499_v60  ;;  %8696 = vmatpush1.bf16.msra.mxu1 %v11502_v61  ;;  %v11589_v60 = vld [vmem:[%s17658_s1 + $0x580] ss:$16 sps:$4 sm:$0xff]   ;;  %v11592_v61 = vld [vmem:[%s17658_s1 + $0x588] ss:$16 sps:$4 sm:$0xff]  }
  0x78   :  { %7877 = vmatprep.subr.bf16.mxu0 %v11507_v62  ;;  %8697 = vmatprep.subr.bf16.mxu1 %v11510_v63  ;;  %v11597_v62 = vld [vmem:[%s17658_s1 + $0x5a4] ss:$16 sps:$4 sm:$0xff]   ;;  %v11600_v63 = vld [vmem:[%s17658_s1 + $0x5ac] ss:$16 sps:$4 sm:$0xff]  }
  0x7b   :  { %7878 = vmatpush1.bf16.msra.mxu0 %v11505_v0  ;;  %8698 = vmatpush1.bf16.msra.mxu1 %v11508_v1  ;;  %v11595_v0 = vld [vmem:[%s17658_s1 + $0x5a0] ss:$16 sps:$4 sm:$0xff]   ;;  %v11598_v1 = vld [vmem:[%s17658_s1 + $0x5a8] ss:$16 sps:$4 sm:$0xff]  }
  0x7c   :  { %7879 = vmatprep.subr.bf16.mxu0 %v11513_v2  ;;  %8699 = vmatprep.subr.bf16.mxu1 %v11516_v3  ;;  %v11603_v2 = vld [vmem:[%s17658_s1 + $0x5c4] ss:$16 sps:$4 sm:$0xff]   ;;  %v11606_v3 = vld [vmem:[%s17658_s1 + $0x5cc] ss:$16 sps:$4 sm:$0xff]  }
  0x7f   :  { %7880 = vmatpush1.bf16.msra.mxu0 %v11511_v4  ;;  %8700 = vmatpush1.bf16.msra.mxu1 %v11514_v5  ;;  %v11601_v4 = vld [vmem:[%s17658_s1 + $0x5c0] ss:$16 sps:$4 sm:$0xff]   ;;  %v11604_v5 = vld [vmem:[%s17658_s1 + $0x5c8] ss:$16 sps:$4 sm:$0xff]  }
  0x80   :  { %7890 = vmatprep.subr.bf16.mxu0 %v11519_v6  ;;  %8710 = vmatprep.subr.bf16.mxu1 %v11522_v8  ;;  %v11609_v6 = vld [vmem:[%s17658_s1 + $0x5e4] ss:$16 sps:$4 sm:$0xff]   ;;  %v11607_v8 = vld [vmem:[%s17658_s1 + $0x5e0] ss:$16 sps:$4 sm:$0xff]  }
  0x82   :  { %7882 = vmatmul.mubr.bf16.vlgmr.msra.gmra.mrb[0].mxu0 %v68_v11  ;;  %8702 = vmatmul.mubr.bf16.vlgmr.msra.gmra.mrb[0].mxu1 %v68_v11  ;;  %v30_v11 = vld [vmem:[%s17659_s0 + $0x20] sm:$0xff] }
  0x83   :  { %7891 = vmatpush1.bf16.msra.mxu0 %v11517_v9  ;;  %8711 = vmatpush1.bf16.msra.mxu1 %v11520_v10  ;;  %v11610_v9 = vld [vmem:[%s17658_s1 + $0x5e8] ss:$16 sps:$4 sm:$0xff]   ;;  %v11615_v10 = vld [vmem:[%s17658_s1 + $0x604] ss:$16 sps:$4 sm:$0xff]  }
  0x84   :  { %7892 = vmatprep.subr.bf16.mxu0 %v11525_v12  ;;  %8712 = vmatprep.subr.bf16.mxu1 %v11528_v13  ;;  %v11618_v12 = vld [vmem:[%s17658_s1 + $0x60c] ss:$16 sps:$4 sm:$0xff]   ;;  %v11613_v13 = vld [vmem:[%s17658_s1 + $0x600] ss:$16 sps:$4 sm:$0xff]  }
  0x85   :  { %7922 = vmatprep.mubr.bf16.mxu0 %v71_v15  ;;  %8742 = vmatprep.mubr.bf16.mxu1 %v71_v15  ;;  %v70_v15 = vpack.c.bf16 %v30_v11, %v30_v11  ;;  %v11708_v11 = vld [vmem:[%s17658_s1 + $0x7ec] ss:$16 sps:$4 sm:$0xff]  }
  0x87   :  { %7893 = vmatpush1.bf16.msra.mxu0 %v11523_v16  ;;  %8713 = vmatpush1.bf16.msra.mxu1 %v11526_v17  ;;  %v33_v16 = vld [vmem:[%s17659_s0 + $0x38] sm:$0xff]  ;;  %v11621_v17 = vld [vmem:[%s17658_s1 + $0x624] ss:$16 sps:$4 sm:$0xff]  }
  0x88   :  { %7894 = vmatprep.subr.bf16.mxu0 %v11531_v18  ;;  %8714 = vmatprep.subr.bf16.mxu1 %v11534_v19  ;;  %v11624_v18 = vld [vmem:[%s17658_s1 + $0x62c] ss:$16 sps:$4 sm:$0xff]   ;;  %v73_v19 = vpack.c.bf16 %v33_v16, %v33_v16 }
  0x89   :  { %v11714_v16 = vld [vmem:[%s17658_s1 + $0x80c] ss:$16 sps:$4 sm:$0xff]  }
  0x8b   :  { %7895 = vmatpush1.bf16.msra.mxu0 %v11529_v20  ;;  %8715 = vmatpush1.bf16.msra.mxu1 %v11532_v21  ;;  %v11619_v20 = vld [vmem:[%s17658_s1 + $0x620] ss:$16 sps:$4 sm:$0xff]   ;;  %v11622_v21 = vld [vmem:[%s17658_s1 + $0x628] ss:$16 sps:$4 sm:$0xff]  }
  0x8c   :  { %7896 = vmatprep.subr.bf16.mxu0 %v11537_v22  ;;  %8716 = vmatprep.subr.bf16.mxu1 %v11540_v23  ;;  %v11627_v22 = vld [vmem:[%s17658_s1 + $0x644] ss:$16 sps:$4 sm:$0xff]   ;;  %v11630_v23 = vld [vmem:[%s17658_s1 + $0x64c] ss:$16 sps:$4 sm:$0xff]  }
  0x8f   :  { %7897 = vmatpush1.bf16.msra.mxu0 %v11535_v24  ;;  %8717 = vmatpush1.bf16.msra.mxu1 %v11538_v25  ;;  %v11625_v24 = vld [vmem:[%s17658_s1 + $0x640] ss:$16 sps:$4 sm:$0xff]   ;;  %v11628_v25 = vld [vmem:[%s17658_s1 + $0x648] ss:$16 sps:$4 sm:$0xff]  }
  0x90   :  { %7898 = vmatprep.subr.bf16.mxu0 %v11543_v26  ;;  %8718 = vmatprep.subr.bf16.mxu1 %v11546_v27  ;;  %v11633_v26 = vld [vmem:[%s17658_s1 + $0x664] ss:$16 sps:$4 sm:$0xff]   ;;  %v11636_v27 = vld [vmem:[%s17658_s1 + $0x66c] ss:$16 sps:$4 sm:$0xff]  }
  0x93   :  { %7899 = vmatpush1.bf16.msra.mxu0 %v11541_v28  ;;  %8719 = vmatpush1.bf16.msra.mxu1 %v11544_v29  ;;  %v11631_v28 = vld [vmem:[%s17658_s1 + $0x660] ss:$16 sps:$4 sm:$0xff]   ;;  %v11634_v29 = vld [vmem:[%s17658_s1 + $0x668] ss:$16 sps:$4 sm:$0xff]  }
  0x94   :  { %7900 = vmatprep.subr.bf16.mxu0 %v11549_v30  ;;  %8720 = vmatprep.subr.bf16.mxu1 %v11552_v31  ;;  %v11639_v30 = vld [vmem:[%s17658_s1 + $0x684] ss:$16 sps:$4 sm:$0xff]   ;;  %v11642_v31 = vld [vmem:[%s17658_s1 + $0x68c] ss:$16 sps:$4 sm:$0xff]  }
  0x97   :  { %7901 = vmatpush1.bf16.msra.mxu0 %v11547_v32  ;;  %8721 = vmatpush1.bf16.msra.mxu1 %v11550_v33  ;;  %v11637_v32 = vld [vmem:[%s17658_s1 + $0x680] ss:$16 sps:$4 sm:$0xff]   ;;  %v11640_v33 = vld [vmem:[%s17658_s1 + $0x688] ss:$16 sps:$4 sm:$0xff]  }
  0x98   :  { %7902 = vmatprep.subr.bf16.mxu0 %v11555_v34  ;;  %8722 = vmatprep.subr.bf16.mxu1 %v11558_v35  ;;  %v11645_v34 = vld [vmem:[%s17658_s1 + $0x6a4] ss:$16 sps:$4 sm:$0xff]   ;;  %v11648_v35 = vld [vmem:[%s17658_s1 + $0x6ac] ss:$16 sps:$4 sm:$0xff]  }
  0x9b   :  { %7903 = vmatpush1.bf16.msra.mxu0 %v11553_v36  ;;  %8723 = vmatpush1.bf16.msra.mxu1 %v11556_v37  ;;  %v11643_v36 = vld [vmem:[%s17658_s1 + $0x6a0] ss:$16 sps:$4 sm:$0xff]   ;;  %v11646_v37 = vld [vmem:[%s17658_s1 + $0x6a8] ss:$16 sps:$4 sm:$0xff]  }
  0x9c   :  { %7904 = vmatprep.subr.bf16.mxu0 %v11561_v38  ;;  %8724 = vmatprep.subr.bf16.mxu1 %v11564_v39  ;;  %v11651_v38 = vld [vmem:[%s17658_s1 + $0x6c4] ss:$16 sps:$4 sm:$0xff]   ;;  %v11654_v39 = vld [vmem:[%s17658_s1 + $0x6cc] ss:$16 sps:$4 sm:$0xff]  }
  0x9f   :  { %7905 = vmatpush1.bf16.msra.mxu0 %v11559_v40  ;;  %8725 = vmatpush1.bf16.msra.mxu1 %v11562_v41  ;;  %v11649_v40 = vld [vmem:[%s17658_s1 + $0x6c0] ss:$16 sps:$4 sm:$0xff]   ;;  %v11652_v41 = vld [vmem:[%s17658_s1 + $0x6c8] ss:$16 sps:$4 sm:$0xff]  }
  0xa0   :  { %7906 = vmatprep.subr.bf16.mxu0 %v11567_v42  ;;  %8726 = vmatprep.subr.bf16.mxu1 %v11570_v43  ;;  %v11657_v42 = vld [vmem:[%s17658_s1 + $0x6e4] ss:$16 sps:$4 sm:$0xff]   ;;  %v11660_v43 = vld [vmem:[%s17658_s1 + $0x6ec] ss:$16 sps:$4 sm:$0xff]  }
  0xa3   :  { %7907 = vmatpush1.bf16.msra.mxu0 %v11565_v44  ;;  %8727 = vmatpush1.bf16.msra.mxu1 %v11568_v45  ;;  %v11655_v44 = vld [vmem:[%s17658_s1 + $0x6e0] ss:$16 sps:$4 sm:$0xff]   ;;  %v11658_v45 = vld [vmem:[%s17658_s1 + $0x6e8] ss:$16 sps:$4 sm:$0xff]  }
  0xa4   :  { %7908 = vmatprep.subr.bf16.mxu0 %v11573_v46  ;;  %8728 = vmatprep.subr.bf16.mxu1 %v11576_v47  ;;  %v11663_v46 = vld [vmem:[%s17658_s1 + $0x704] ss:$16 sps:$4 sm:$0xff]   ;;  %v11666_v47 = vld [vmem:[%s17658_s1 + $0x70c] ss:$16 sps:$4 sm:$0xff]  }
  0xa7   :  { %7909 = vmatpush1.bf16.msra.mxu0 %v11571_v48  ;;  %8729 = vmatpush1.bf16.msra.mxu1 %v11574_v49  ;;  %v11661_v48 = vld [vmem:[%s17658_s1 + $0x700] ss:$16 sps:$4 sm:$0xff]   ;;  %v11664_v49 = vld [vmem:[%s17658_s1 + $0x708] ss:$16 sps:$4 sm:$0xff]  }
  0xa8   :  { %7910 = vmatprep.subr.bf16.mxu0 %v11579_v50  ;;  %8730 = vmatprep.subr.bf16.mxu1 %v11582_v51  ;;  %v11669_v50 = vld [vmem:[%s17658_s1 + $0x724] ss:$16 sps:$4 sm:$0xff]   ;;  %v11672_v51 = vld [vmem:[%s17658_s1 + $0x72c] ss:$16 sps:$4 sm:$0xff]  }
  0xab   :  { %7911 = vmatpush1.bf16.msra.mxu0 %v11577_v52  ;;  %8731 = vmatpush1.bf16.msra.mxu1 %v11580_v53  ;;  %v11667_v52 = vld [vmem:[%s17658_s1 + $0x720] ss:$16 sps:$4 sm:$0xff]   ;;  %v11670_v53 = vld [vmem:[%s17658_s1 + $0x728] ss:$16 sps:$4 sm:$0xff]  }
  0xac   :  { %7912 = vmatprep.subr.bf16.mxu0 %v11585_v54  ;;  %8732 = vmatprep.subr.bf16.mxu1 %v11588_v55  ;;  %v11675_v54 = vld [vmem:[%s17658_s1 + $0x744] ss:$16 sps:$4 sm:$0xff]   ;;  %v11678_v55 = vld [vmem:[%s17658_s1 + $0x74c] ss:$16 sps:$4 sm:$0xff]  }
  0xaf   :  { %7913 = vmatpush1.bf16.msra.mxu0 %v11583_v56  ;;  %8733 = vmatpush1.bf16.msra.mxu1 %v11586_v57  ;;  %v11673_v56 = vld [vmem:[%s17658_s1 + $0x740] ss:$16 sps:$4 sm:$0xff]   ;;  %v11676_v57 = vld [vmem:[%s17658_s1 + $0x748] ss:$16 sps:$4 sm:$0xff]  }
  0xb0   :  { %7914 = vmatprep.subr.bf16.mxu0 %v11591_v58  ;;  %8734 = vmatprep.subr.bf16.mxu1 %v11594_v59  ;;  %v11681_v58 = vld [vmem:[%s17658_s1 + $0x764] ss:$16 sps:$4 sm:$0xff]   ;;  %v11684_v59 = vld [vmem:[%s17658_s1 + $0x76c] ss:$16 sps:$4 sm:$0xff]  }
  0xb3   :  { %7915 = vmatpush1.bf16.msra.mxu0 %v11589_v60  ;;  %8735 = vmatpush1.bf16.msra.mxu1 %v11592_v61  ;;  %v11679_v60 = vld [vmem:[%s17658_s1 + $0x760] ss:$16 sps:$4 sm:$0xff]   ;;  %v11682_v61 = vld [vmem:[%s17658_s1 + $0x768] ss:$16 sps:$4 sm:$0xff]  }
  0xb4   :  { %7916 = vmatprep.subr.bf16.mxu0 %v11597_v62  ;;  %8736 = vmatprep.subr.bf16.mxu1 %v11600_v63  ;;  %v11687_v62 = vld [vmem:[%s17658_s1 + $0x784] ss:$16 sps:$4 sm:$0xff]   ;;  %v11690_v63 = vld [vmem:[%s17658_s1 + $0x78c] ss:$16 sps:$4 sm:$0xff]  }
  0xb7   :  { %7917 = vmatpush1.bf16.msra.mxu0 %v11595_v0  ;;  %8737 = vmatpush1.bf16.msra.mxu1 %v11598_v1  ;;  %v11685_v0 = vld [vmem:[%s17658_s1 + $0x780] ss:$16 sps:$4 sm:$0xff]   ;;  %v11688_v1 = vld [vmem:[%s17658_s1 + $0x788] ss:$16 sps:$4 sm:$0xff]  }
  0xb8   :  { %7918 = vmatprep.subr.bf16.mxu0 %v11603_v2  ;;  %8738 = vmatprep.subr.bf16.mxu1 %v11606_v3  ;;  %v11693_v2 = vld [vmem:[%s17658_s1 + $0x7a4] ss:$16 sps:$4 sm:$0xff]   ;;  %v11696_v3 = vld [vmem:[%s17658_s1 + $0x7ac] ss:$16 sps:$4 sm:$0xff]  }
  0xbb   :  { %7919 = vmatpush1.bf16.msra.mxu0 %v11601_v4  ;;  %8739 = vmatpush1.bf16.msra.mxu1 %v11604_v5  ;;  %v11691_v4 = vld [vmem:[%s17658_s1 + $0x7a0] ss:$16 sps:$4 sm:$0xff]   ;;  %v11694_v5 = vld [vmem:[%s17658_s1 + $0x7a8] ss:$16 sps:$4 sm:$0xff]  }
  0xbc   :  { %7920 = vmatprep.subr.bf16.mxu0 %v11609_v6  ;;  %8740 = vmatprep.subr.bf16.mxu1 %v11612_v7  ;;  %v11699_v6 = vld [vmem:[%s17658_s1 + $0x7c4] ss:$16 sps:$4 sm:$0xff]   ;;  %v11702_v7 = vld [vmem:[%s17658_s1 + $0x7cc] ss:$16 sps:$4 sm:$0xff]  }
  0xbf   :  { %7921 = vmatpush1.bf16.msra.mxu0 %v11607_v8  ;;  %8741 = vmatpush1.bf16.msra.mxu1 %v11610_v9  ;;  %v11697_v8 = vld [vmem:[%s17658_s1 + $0x7c0] ss:$16 sps:$4 sm:$0xff]   ;;  %v11700_v9 = vld [vmem:[%s17658_s1 + $0x7c8] ss:$16 sps:$4 sm:$0xff]  }
  0xc0   :  { %7931 = vmatprep.subr.bf16.mxu0 %v11615_v10  ;;  %8751 = vmatprep.subr.bf16.mxu1 %v11618_v12  ;;  %v11705_v10 = vld [vmem:[%s17658_s1 + $0x7e4] ss:$16 sps:$4 sm:$0xff]   ;;  %v11703_v12 = vld [vmem:[%s17658_s1 + $0x7e0] ss:$16 sps:$4 sm:$0xff]  }
  0xc2   :  { %7923 = vmatmul.mubr.bf16.vlgmr.msra.gmra.mrb[0].mxu0 %v70_v15  ;;  %8743 = vmatmul.mubr.bf16.vlgmr.msra.gmra.mrb[0].mxu1 %v70_v15  ;;  %v11711_v15 = vld [vmem:[%s17658_s1 + $0x804] ss:$16 sps:$4 sm:$0xff]  }
  0xc3   :  { %7932 = vmatpush1.bf16.msra.mxu0 %v11613_v13  ;;  %8752 = vmatpush1.bf16.msra.mxu1 %v11616_v14  ;;  %v11706_v13 = vld [vmem:[%s17658_s1 + $0x7e8] ss:$16 sps:$4 sm:$0xff]   ;;  %v32_v14 = vld [vmem:[%s17659_s0 + $0x30] sm:$0xff] }
  0xc4   :  { %7933 = vmatprep.subr.bf16.mxu0 %v11621_v17  ;;  %8753 = vmatprep.subr.bf16.mxu1 %v11624_v18  ;;  %v72_v17 = vpack.c.bf16 %v32_v14, %v32_v14  ;;  %v35_v18 = vld [vmem:[%s17659_s0 + $0x48] sm:$0xff]  ;;  %v11801_v14 = vld [vmem:[%s17658_s1 + $0x9e4] ss:$16 sps:$4 sm:$0xff]  }
  0xc5   :  { %7963 = vmatprep.mubr.bf16.mxu0 %v73_v19  ;;  %8783 = vmatprep.mubr.bf16.mxu1 %v73_v19  ;;  %v11709_v19 = vld [vmem:[%s17658_s1 + $0x800] ss:$16 sps:$4 sm:$0xff]  }
  0xc7   :  { %7934 = vmatpush1.bf16.msra.mxu0 %v11619_v20  ;;  %8754 = vmatpush1.bf16.msra.mxu1 %v11622_v21  ;;  %v11712_v20 = vld [vmem:[%s17658_s1 + $0x808] ss:$16 sps:$4 sm:$0xff]   ;;  %v11717_v21 = vld [vmem:[%s17658_s1 + $0x824] ss:$16 sps:$4 sm:$0xff]  }
  0xc8   :  { %7935 = vmatprep.subr.bf16.mxu0 %v11627_v22  ;;  %8755 = vmatprep.subr.bf16.mxu1 %v11630_v23  ;;  %v11720_v22 = vld [vmem:[%s17658_s1 + $0x82c] ss:$16 sps:$4 sm:$0xff]   ;;  %v75_v23 = vpack.c.bf16 %v35_v18, %v35_v18  ;;  %v11807_v18 = vld [vmem:[%s17658_s1 + $0xa04] ss:$16 sps:$4 sm:$0xff]  }
  0xcb   :  { %7936 = vmatpush1.bf16.msra.mxu0 %v11625_v24  ;;  %8756 = vmatpush1.bf16.msra.mxu1 %v11628_v25  ;;  %v11715_v24 = vld [vmem:[%s17658_s1 + $0x820] ss:$16 sps:$4 sm:$0xff]   ;;  %v11718_v25 = vld [vmem:[%s17658_s1 + $0x828] ss:$16 sps:$4 sm:$0xff]  }
  0xcc   :  { %7937 = vmatprep.subr.bf16.mxu0 %v11633_v26  ;;  %8757 = vmatprep.subr.bf16.mxu1 %v11636_v27  ;;  %v11723_v26 = vld [vmem:[%s17658_s1 + $0x844] ss:$16 sps:$4 sm:$0xff]   ;;  %v11726_v27 = vld [vmem:[%s17658_s1 + $0x84c] ss:$16 sps:$4 sm:$0xff]  }
  0xcf   :  { %7938 = vmatpush1.bf16.msra.mxu0 %v11631_v28  ;;  %8758 = vmatpush1.bf16.msra.mxu1 %v11634_v29  ;;  %v11721_v28 = vld [vmem:[%s17658_s1 + $0x840] ss:$16 sps:$4 sm:$0xff]   ;;  %v11724_v29 = vld [vmem:[%s17658_s1 + $0x848] ss:$16 sps:$4 sm:$0xff]  }
  0xd0   :  { %7939 = vmatprep.subr.bf16.mxu0 %v11639_v30  ;;  %8759 = vmatprep.subr.bf16.mxu1 %v11642_v31  ;;  %v11729_v30 = vld [vmem:[%s17658_s1 + $0x864] ss:$16 sps:$4 sm:$0xff]   ;;  %v11732_v31 = vld [vmem:[%s17658_s1 + $0x86c] ss:$16 sps:$4 sm:$0xff]  }
  0xd3   :  { %7940 = vmatpush1.bf16.msra.mxu0 %v11637_v32  ;;  %8760 = vmatpush1.bf16.msra.mxu1 %v11640_v33  ;;  %v11727_v32 = vld [vmem:[%s17658_s1 + $0x860] ss:$16 sps:$4 sm:$0xff]   ;;  %v11730_v33 = vld [vmem:[%s17658_s1 + $0x868] ss:$16 sps:$4 sm:$0xff]  }
  0xd4   :  { %7941 = vmatprep.subr.bf16.mxu0 %v11645_v34  ;;  %8761 = vmatprep.subr.bf16.mxu1 %v11648_v35  ;;  %v11735_v34 = vld [vmem:[%s17658_s1 + $0x884] ss:$16 sps:$4 sm:$0xff]   ;;  %v11738_v35 = vld [vmem:[%s17658_s1 + $0x88c] ss:$16 sps:$4 sm:$0xff]  }
  0xd7   :  { %7942 = vmatpush1.bf16.msra.mxu0 %v11643_v36  ;;  %8762 = vmatpush1.bf16.msra.mxu1 %v11646_v37  ;;  %v11733_v36 = vld [vmem:[%s17658_s1 + $0x880] ss:$16 sps:$4 sm:$0xff]   ;;  %v11736_v37 = vld [vmem:[%s17658_s1 + $0x888] ss:$16 sps:$4 sm:$0xff]  }
  0xd8   :  { %7943 = vmatprep.subr.bf16.mxu0 %v11651_v38  ;;  %8763 = vmatprep.subr.bf16.mxu1 %v11654_v39  ;;  %v11741_v38 = vld [vmem:[%s17658_s1 + $0x8a4] ss:$16 sps:$4 sm:$0xff]   ;;  %v11744_v39 = vld [vmem:[%s17658_s1 + $0x8ac] ss:$16 sps:$4 sm:$0xff]  }
  0xdb   :  { %7944 = vmatpush1.bf16.msra.mxu0 %v11649_v40  ;;  %8764 = vmatpush1.bf16.msra.mxu1 %v11652_v41  ;;  %v11739_v40 = vld [vmem:[%s17658_s1 + $0x8a0] ss:$16 sps:$4 sm:$0xff]   ;;  %v11742_v41 = vld [vmem:[%s17658_s1 + $0x8a8] ss:$16 sps:$4 sm:$0xff]  }
  0xdc   :  { %7945 = vmatprep.subr.bf16.mxu0 %v11657_v42  ;;  %8765 = vmatprep.subr.bf16.mxu1 %v11660_v43  ;;  %v11747_v42 = vld [vmem:[%s17658_s1 + $0x8c4] ss:$16 sps:$4 sm:$0xff]   ;;  %v11750_v43 = vld [vmem:[%s17658_s1 + $0x8cc] ss:$16 sps:$4 sm:$0xff]  }
  0xdf   :  { %7946 = vmatpush1.bf16.msra.mxu0 %v11655_v44  ;;  %8766 = vmatpush1.bf16.msra.mxu1 %v11658_v45  ;;  %v11745_v44 = vld [vmem:[%s17658_s1 + $0x8c0] ss:$16 sps:$4 sm:$0xff]   ;;  %v11748_v45 = vld [vmem:[%s17658_s1 + $0x8c8] ss:$16 sps:$4 sm:$0xff]  }
  0xe0   :  { %7947 = vmatprep.subr.bf16.mxu0 %v11663_v46  ;;  %8767 = vmatprep.subr.bf16.mxu1 %v11666_v47  ;;  %v11753_v46 = vld [vmem:[%s17658_s1 + $0x8e4] ss:$16 sps:$4 sm:$0xff]   ;;  %v11756_v47 = vld [vmem:[%s17658_s1 + $0x8ec] ss:$16 sps:$4 sm:$0xff]  }
  0xe3   :  { %7948 = vmatpush1.bf16.msra.mxu0 %v11661_v48  ;;  %8768 = vmatpush1.bf16.msra.mxu1 %v11664_v49  ;;  %v11751_v48 = vld [vmem:[%s17658_s1 + $0x8e0] ss:$16 sps:$4 sm:$0xff]   ;;  %v11754_v49 = vld [vmem:[%s17658_s1 + $0x8e8] ss:$16 sps:$4 sm:$0xff]  }
  0xe4   :  { %7949 = vmatprep.subr.bf16.mxu0 %v11669_v50  ;;  %8769 = vmatprep.subr.bf16.mxu1 %v11672_v51  ;;  %v11759_v50 = vld [vmem:[%s17658_s1 + $0x904] ss:$16 sps:$4 sm:$0xff]   ;;  %v11762_v51 = vld [vmem:[%s17658_s1 + $0x90c] ss:$16 sps:$4 sm:$0xff]  }
  0xe7   :  { %7950 = vmatpush1.bf16.msra.mxu0 %v11667_v52  ;;  %8770 = vmatpush1.bf16.msra.mxu1 %v11670_v53  ;;  %v11757_v52 = vld [vmem:[%s17658_s1 + $0x900] ss:$16 sps:$4 sm:$0xff]   ;;  %v11760_v53 = vld [vmem:[%s17658_s1 + $0x908] ss:$16 sps:$4 sm:$0xff]  }
  0xe8   :  { %7951 = vmatprep.subr.bf16.mxu0 %v11675_v54  ;;  %8771 = vmatprep.subr.bf16.mxu1 %v11678_v55  ;;  %v11765_v54 = vld [vmem:[%s17658_s1 + $0x924] ss:$16 sps:$4 sm:$0xff]   ;;  %v11768_v55 = vld [vmem:[%s17658_s1 + $0x92c] ss:$16 sps:$4 sm:$0xff]  }
  0xeb   :  { %7952 = vmatpush1.bf16.msra.mxu0 %v11673_v56  ;;  %8772 = vmatpush1.bf16.msra.mxu1 %v11676_v57  ;;  %v11763_v56 = vld [vmem:[%s17658_s1 + $0x920] ss:$16 sps:$4 sm:$0xff]   ;;  %v11766_v57 = vld [vmem:[%s17658_s1 + $0x928] ss:$16 sps:$4 sm:$0xff]  }
  0xec   :  { %7953 = vmatprep.subr.bf16.mxu0 %v11681_v58  ;;  %8773 = vmatprep.subr.bf16.mxu1 %v11684_v59  ;;  %v11771_v58 = vld [vmem:[%s17658_s1 + $0x944] ss:$16 sps:$4 sm:$0xff]   ;;  %v11774_v59 = vld [vmem:[%s17658_s1 + $0x94c] ss:$16 sps:$4 sm:$0xff]  }
  0xef   :  { %7954 = vmatpush1.bf16.msra.mxu0 %v11679_v60  ;;  %8774 = vmatpush1.bf16.msra.mxu1 %v11682_v61  ;;  %v11769_v60 = vld [vmem:[%s17658_s1 + $0x940] ss:$16 sps:$4 sm:$0xff]   ;;  %v11772_v61 = vld [vmem:[%s17658_s1 + $0x948] ss:$16 sps:$4 sm:$0xff]  }
  0xf0   :  { %7955 = vmatprep.subr.bf16.mxu0 %v11687_v62  ;;  %8775 = vmatprep.subr.bf16.mxu1 %v11690_v63  ;;  %v11777_v62 = vld [vmem:[%s17658_s1 + $0x964] ss:$16 sps:$4 sm:$0xff]   ;;  %v11780_v63 = vld [vmem:[%s17658_s1 + $0x96c] ss:$16 sps:$4 sm:$0xff]  }
  0xf3   :  { %7956 = vmatpush1.bf16.msra.mxu0 %v11685_v0  ;;  %8776 = vmatpush1.bf16.msra.mxu1 %v11688_v1  ;;  %v11775_v0 = vld [vmem:[%s17658_s1 + $0x960] ss:$16 sps:$4 sm:$0xff]   ;;  %v11778_v1 = vld [vmem:[%s17658_s1 + $0x968] ss:$16 sps:$4 sm:$0xff]  }
  0xf4   :  { %7957 = vmatprep.subr.bf16.mxu0 %v11693_v2  ;;  %8777 = vmatprep.subr.bf16.mxu1 %v11696_v3  ;;  %v11783_v2 = vld [vmem:[%s17658_s1 + $0x984] ss:$16 sps:$4 sm:$0xff]   ;;  %v11786_v3 = vld [vmem:[%s17658_s1 + $0x98c] ss:$16 sps:$4 sm:$0xff]  }
  0xf7   :  { %7958 = vmatpush1.bf16.msra.mxu0 %v11691_v4  ;;  %8778 = vmatpush1.bf16.msra.mxu1 %v11694_v5  ;;  %v11781_v4 = vld [vmem:[%s17658_s1 + $0x980] ss:$16 sps:$4 sm:$0xff]   ;;  %v11784_v5 = vld [vmem:[%s17658_s1 + $0x988] ss:$16 sps:$4 sm:$0xff]  }
  0xf8   :  { %7959 = vmatprep.subr.bf16.mxu0 %v11699_v6  ;;  %8779 = vmatprep.subr.bf16.mxu1 %v11702_v7  ;;  %v11789_v6 = vld [vmem:[%s17658_s1 + $0x9a4] ss:$16 sps:$4 sm:$0xff]   ;;  %v11792_v7 = vld [vmem:[%s17658_s1 + $0x9ac] ss:$16 sps:$4 sm:$0xff]  }
  0xfb   :  { %7960 = vmatpush1.bf16.msra.mxu0 %v11697_v8  ;;  %8780 = vmatpush1.bf16.msra.mxu1 %v11700_v9  ;;  %v11787_v8 = vld [vmem:[%s17658_s1 + $0x9a0] ss:$16 sps:$4 sm:$0xff]   ;;  %v11790_v9 = vld [vmem:[%s17658_s1 + $0x9a8] ss:$16 sps:$4 sm:$0xff]  }
  0xfc   :  { %7961 = vmatprep.subr.bf16.mxu0 %v11705_v10  ;;  %8781 = vmatprep.subr.bf16.mxu1 %v11708_v11  ;;  %v11795_v10 = vld [vmem:[%s17658_s1 + $0x9c4] ss:$16 sps:$4 sm:$0xff]   ;;  %v11798_v11 = vld [vmem:[%s17658_s1 + $0x9cc] ss:$16 sps:$4 sm:$0xff]  }
  0xff   :  { %7962 = vmatpush1.bf16.msra.mxu0 %v11703_v12  ;;  %8782 = vmatpush1.bf16.msra.mxu1 %v11706_v13  ;;  %v11793_v12 = vld [vmem:[%s17658_s1 + $0x9c0] ss:$16 sps:$4 sm:$0xff]   ;;  %v11796_v13 = vld [vmem:[%s17658_s1 + $0x9c8] ss:$16 sps:$4 sm:$0xff]  }
 0x100   :  { %7972 = vmatprep.subr.bf16.mxu0 %v11711_v15  ;;  %8792 = vmatprep.subr.bf16.mxu1 %v11714_v16  ;;  %v11804_v15 = vld [vmem:[%s17658_s1 + $0x9ec] ss:$16 sps:$4 sm:$0xff]   ;;  %v11799_v16 = vld [vmem:[%s17658_s1 + $0x9e0] ss:$16 sps:$4 sm:$0xff]  }
 0x102   :  { %7964 = vmatmul.mubr.bf16.vlgmr.msra.gmra.mrb[0].mxu0 %v72_v17  ;;  %8784 = vmatmul.mubr.bf16.vlgmr.msra.gmra.mrb[0].mxu1 %v72_v17  ;;  %v11802_v17 = vld [vmem:[%s17658_s1 + $0x9e8] ss:$16 sps:$4 sm:$0xff]  }
 0x103   :  { %7973 = vmatpush1.bf16.msra.mxu0 %v11709_v19  ;;  %8793 = vmatpush1.bf16.msra.mxu1 %v11712_v20  ;;  %v34_v19 = vld [vmem:[%s17659_s0 + $0x40] sm:$0xff]  ;;  %v11810_v20 = vld [vmem:[%s17658_s1 + $0xa0c] ss:$16 sps:$4 sm:$0xff]  }
 0x104   :  { %7974 = vmatprep.subr.bf16.mxu0 %v11717_v21  ;;  %8794 = vmatprep.subr.bf16.mxu1 %v11720_v22  ;;  %v37_v21 = vld [vmem:[%s17659_s0 + $0x58] sm:$0xff]  ;;  %v74_v22 = vpack.c.bf16 %v34_v19, %v34_v19 }
 0x105   :  { %8004 = vmatprep.mubr.bf16.mxu0 %v75_v23  ;;  %8824 = vmatprep.mubr.bf16.mxu1 %v75_v23  ;;  %v11805_v23 = vld [vmem:[%s17658_s1 + $0xa00] ss:$16 sps:$4 sm:$0xff]   ;;  %v11900_v19 = vld [vmem:[%s17658_s1 + $0xbec] ss:$16 sps:$4 sm:$0xff]  }
 0x107   :  { %7975 = vmatpush1.bf16.msra.mxu0 %v11715_v24  ;;  %8795 = vmatpush1.bf16.msra.mxu1 %v11718_v25  ;;  %v11808_v24 = vld [vmem:[%s17658_s1 + $0xa08] ss:$16 sps:$4 sm:$0xff]   ;;  %v11813_v25 = vld [vmem:[%s17658_s1 + $0xa24] ss:$16 sps:$4 sm:$0xff]  }
 0x108   :  { %7976 = vmatprep.subr.bf16.mxu0 %v11723_v26  ;;  %8796 = vmatprep.subr.bf16.mxu1 %v11726_v27  ;;  %v11816_v26 = vld [vmem:[%s17658_s1 + $0xa2c] ss:$16 sps:$4 sm:$0xff]   ;;  %v77_v27 = vpack.c.bf16 %v37_v21, %v37_v21  ;;  %v11898_v21 = vld [vmem:[%s17658_s1 + $0xbe8] ss:$16 sps:$4 sm:$0xff]  }
 0x10b   :  { %7977 = vmatpush1.bf16.msra.mxu0 %v11721_v28  ;;  %8797 = vmatpush1.bf16.msra.mxu1 %v11724_v29  ;;  %v11811_v28 = vld [vmem:[%s17658_s1 + $0xa20] ss:$16 sps:$4 sm:$0xff]   ;;  %v11814_v29 = vld [vmem:[%s17658_s1 + $0xa28] ss:$16 sps:$4 sm:$0xff]  }
 0x10c   :  { %7978 = vmatprep.subr.bf16.mxu0 %v11729_v30  ;;  %8798 = vmatprep.subr.bf16.mxu1 %v11732_v31  ;;  %v11819_v30 = vld [vmem:[%s17658_s1 + $0xa44] ss:$16 sps:$4 sm:$0xff]   ;;  %v11822_v31 = vld [vmem:[%s17658_s1 + $0xa4c] ss:$16 sps:$4 sm:$0xff]  }
 0x10f   :  { %7979 = vmatpush1.bf16.msra.mxu0 %v11727_v32  ;;  %8799 = vmatpush1.bf16.msra.mxu1 %v11730_v33  ;;  %v11817_v32 = vld [vmem:[%s17658_s1 + $0xa40] ss:$16 sps:$4 sm:$0xff]   ;;  %v11820_v33 = vld [vmem:[%s17658_s1 + $0xa48] ss:$16 sps:$4 sm:$0xff]  }
 0x110   :  { %7980 = vmatprep.subr.bf16.mxu0 %v11735_v34  ;;  %8800 = vmatprep.subr.bf16.mxu1 %v11738_v35  ;;  %v11825_v34 = vld [vmem:[%s17658_s1 + $0xa64] ss:$16 sps:$4 sm:$0xff]   ;;  %v11828_v35 = vld [vmem:[%s17658_s1 + $0xa6c] ss:$16 sps:$4 sm:$0xff]  }
 0x113   :  { %7981 = vmatpush1.bf16.msra.mxu0 %v11733_v36  ;;  %8801 = vmatpush1.bf16.msra.mxu1 %v11736_v37  ;;  %v11823_v36 = vld [vmem:[%s17658_s1 + $0xa60] ss:$16 sps:$4 sm:$0xff]   ;;  %v11826_v37 = vld [vmem:[%s17658_s1 + $0xa68] ss:$16 sps:$4 sm:$0xff]  }
 0x114   :  { %7982 = vmatprep.subr.bf16.mxu0 %v11741_v38  ;;  %8802 = vmatprep.subr.bf16.mxu1 %v11744_v39  ;;  %v11831_v38 = vld [vmem:[%s17658_s1 + $0xa84] ss:$16 sps:$4 sm:$0xff]   ;;  %v11834_v39 = vld [vmem:[%s17658_s1 + $0xa8c] ss:$16 sps:$4 sm:$0xff]  }
 0x117   :  { %7983 = vmatpush1.bf16.msra.mxu0 %v11739_v40  ;;  %8803 = vmatpush1.bf16.msra.mxu1 %v11742_v41  ;;  %v11829_v40 = vld [vmem:[%s17658_s1 + $0xa80] ss:$16 sps:$4 sm:$0xff]   ;;  %v11832_v41 = vld [vmem:[%s17658_s1 + $0xa88] ss:$16 sps:$4 sm:$0xff]  }
 0x118   :  { %7984 = vmatprep.subr.bf16.mxu0 %v11747_v42  ;;  %8804 = vmatprep.subr.bf16.mxu1 %v11750_v43  ;;  %v11837_v42 = vld [vmem:[%s17658_s1 + $0xaa4] ss:$16 sps:$4 sm:$0xff]   ;;  %v11840_v43 = vld [vmem:[%s17658_s1 + $0xaac] ss:$16 sps:$4 sm:$0xff]  }
 0x11b   :  { %7985 = vmatpush1.bf16.msra.mxu0 %v11745_v44  ;;  %8805 = vmatpush1.bf16.msra.mxu1 %v11748_v45  ;;  %v11835_v44 = vld [vmem:[%s17658_s1 + $0xaa0] ss:$16 sps:$4 sm:$0xff]   ;;  %v11838_v45 = vld [vmem:[%s17658_s1 + $0xaa8] ss:$16 sps:$4 sm:$0xff]  }
 0x11c   :  { %7986 = vmatprep.subr.bf16.mxu0 %v11753_v46  ;;  %8806 = vmatprep.subr.bf16.mxu1 %v11756_v47  ;;  %v11843_v46 = vld [vmem:[%s17658_s1 + $0xac4] ss:$16 sps:$4 sm:$0xff]   ;;  %v11846_v47 = vld [vmem:[%s17658_s1 + $0xacc] ss:$16 sps:$4 sm:$0xff]  }
 0x11f   :  { %7987 = vmatpush1.bf16.msra.mxu0 %v11751_v48  ;;  %8807 = vmatpush1.bf16.msra.mxu1 %v11754_v49  ;;  %v11841_v48 = vld [vmem:[%s17658_s1 + $0xac0] ss:$16 sps:$4 sm:$0xff]   ;;  %v11844_v49 = vld [vmem:[%s17658_s1 + $0xac8] ss:$16 sps:$4 sm:$0xff]  }
 0x120   :  { %7988 = vmatprep.subr.bf16.mxu0 %v11759_v50  ;;  %8808 = vmatprep.subr.bf16.mxu1 %v11762_v51  ;;  %v11849_v50 = vld [vmem:[%s17658_s1 + $0xae4] ss:$16 sps:$4 sm:$0xff]   ;;  %v11852_v51 = vld [vmem:[%s17658_s1 + $0xaec] ss:$16 sps:$4 sm:$0xff]  }
 0x123   :  { %7989 = vmatpush1.bf16.msra.mxu0 %v11757_v52  ;;  %8809 = vmatpush1.bf16.msra.mxu1 %v11760_v53  ;;  %v11847_v52 = vld [vmem:[%s17658_s1 + $0xae0] ss:$16 sps:$4 sm:$0xff]   ;;  %v11850_v53 = vld [vmem:[%s17658_s1 + $0xae8] ss:$16 sps:$4 sm:$0xff]  }
 0x124   :  { %7990 = vmatprep.subr.bf16.mxu0 %v11765_v54  ;;  %8810 = vmatprep.subr.bf16.mxu1 %v11768_v55  ;;  %v11855_v54 = vld [vmem:[%s17658_s1 + $0xb04] ss:$16 sps:$4 sm:$0xff]   ;;  %v11858_v55 = vld [vmem:[%s17658_s1 + $0xb0c] ss:$16 sps:$4 sm:$0xff]  }
 0x127   :  { %7991 = vmatpush1.bf16.msra.mxu0 %v11763_v56  ;;  %8811 = vmatpush1.bf16.msra.mxu1 %v11766_v57  ;;  %v11853_v56 = vld [vmem:[%s17658_s1 + $0xb00] ss:$16 sps:$4 sm:$0xff]   ;;  %v11856_v57 = vld [vmem:[%s17658_s1 + $0xb08] ss:$16 sps:$4 sm:$0xff]  }
 0x128   :  { %7992 = vmatprep.subr.bf16.mxu0 %v11771_v58  ;;  %8812 = vmatprep.subr.bf16.mxu1 %v11774_v59  ;;  %v11861_v58 = vld [vmem:[%s17658_s1 + $0xb24] ss:$16 sps:$4 sm:$0xff]   ;;  %v11864_v59 = vld [vmem:[%s17658_s1 + $0xb2c] ss:$16 sps:$4 sm:$0xff]  }
 0x12b   :  { %7993 = vmatpush1.bf16.msra.mxu0 %v11769_v60  ;;  %8813 = vmatpush1.bf16.msra.mxu1 %v11772_v61  ;;  %v11859_v60 = vld [vmem:[%s17658_s1 + $0xb20] ss:$16 sps:$4 sm:$0xff]   ;;  %v11862_v61 = vld [vmem:[%s17658_s1 + $0xb28] ss:$16 sps:$4 sm:$0xff]  }
 0x12c   :  { %7994 = vmatprep.subr.bf16.mxu0 %v11777_v62  ;;  %8814 = vmatprep.subr.bf16.mxu1 %v11780_v63  ;;  %v11867_v62 = vld [vmem:[%s17658_s1 + $0xb44] ss:$16 sps:$4 sm:$0xff]   ;;  %v11870_v63 = vld [vmem:[%s17658_s1 + $0xb4c] ss:$16 sps:$4 sm:$0xff]  }
 0x12f   :  { %7995 = vmatpush1.bf16.msra.mxu0 %v11775_v0  ;;  %8815 = vmatpush1.bf16.msra.mxu1 %v11778_v1  ;;  %v11865_v0 = vld [vmem:[%s17658_s1 + $0xb40] ss:$16 sps:$4 sm:$0xff]   ;;  %v11868_v1 = vld [vmem:[%s17658_s1 + $0xb48] ss:$16 sps:$4 sm:$0xff]  }
 0x130   :  { %7996 = vmatprep.subr.bf16.mxu0 %v11783_v2  ;;  %8816 = vmatprep.subr.bf16.mxu1 %v11786_v3  ;;  %v11873_v2 = vld [vmem:[%s17658_s1 + $0xb64] ss:$16 sps:$4 sm:$0xff]   ;;  %v11876_v3 = vld [vmem:[%s17658_s1 + $0xb6c] ss:$16 sps:$4 sm:$0xff]  }
 0x133   :  { %7997 = vmatpush1.bf16.msra.mxu0 %v11781_v4  ;;  %8817 = vmatpush1.bf16.msra.mxu1 %v11784_v5  ;;  %v11871_v4 = vld [vmem:[%s17658_s1 + $0xb60] ss:$16 sps:$4 sm:$0xff]   ;;  %v11874_v5 = vld [vmem:[%s17658_s1 + $0xb68] ss:$16 sps:$4 sm:$0xff]  }
 0x134   :  { %7998 = vmatprep.subr.bf16.mxu0 %v11789_v6  ;;  %8818 = vmatprep.subr.bf16.mxu1 %v11792_v7  ;;  %v11879_v6 = vld [vmem:[%s17658_s1 + $0xb84] ss:$16 sps:$4 sm:$0xff]   ;;  %v11882_v7 = vld [vmem:[%s17658_s1 + $0xb8c] ss:$16 sps:$4 sm:$0xff]  }
 0x137   :  { %7999 = vmatpush1.bf16.msra.mxu0 %v11787_v8  ;;  %8819 = vmatpush1.bf16.msra.mxu1 %v11790_v9  ;;  %v11877_v8 = vld [vmem:[%s17658_s1 + $0xb80] ss:$16 sps:$4 sm:$0xff]   ;;  %v11880_v9 = vld [vmem:[%s17658_s1 + $0xb88] ss:$16 sps:$4 sm:$0xff]  }
 0x138   :  { %8000 = vmatprep.subr.bf16.mxu0 %v11795_v10  ;;  %8820 = vmatprep.subr.bf16.mxu1 %v11798_v11  ;;  %v11885_v10 = vld [vmem:[%s17658_s1 + $0xba4] ss:$16 sps:$4 sm:$0xff]   ;;  %v11888_v11 = vld [vmem:[%s17658_s1 + $0xbac] ss:$16 sps:$4 sm:$0xff]  }
 0x13b   :  { %8001 = vmatpush1.bf16.msra.mxu0 %v11793_v12  ;;  %8821 = vmatpush1.bf16.msra.mxu1 %v11796_v13  ;;  %v11883_v12 = vld [vmem:[%s17658_s1 + $0xba0] ss:$16 sps:$4 sm:$0xff]   ;;  %v11886_v13 = vld [vmem:[%s17658_s1 + $0xba8] ss:$16 sps:$4 sm:$0xff]  }
 0x13c   :  { %8002 = vmatprep.subr.bf16.mxu0 %v11801_v14  ;;  %8822 = vmatprep.subr.bf16.mxu1 %v11804_v15  ;;  %v11891_v14 = vld [vmem:[%s17658_s1 + $0xbc4] ss:$16 sps:$4 sm:$0xff]   ;;  %v11894_v15 = vld [vmem:[%s17658_s1 + $0xbcc] ss:$16 sps:$4 sm:$0xff]  }
 0x13f   :  { %8003 = vmatpush1.bf16.msra.mxu0 %v11799_v16  ;;  %8823 = vmatpush1.bf16.msra.mxu1 %v11802_v17  ;;  %v11889_v16 = vld [vmem:[%s17658_s1 + $0xbc0] ss:$16 sps:$4 sm:$0xff]   ;;  %v11892_v17 = vld [vmem:[%s17658_s1 + $0xbc8] ss:$16 sps:$4 sm:$0xff]  }
 0x140   :  { %8013 = vmatprep.subr.bf16.mxu0 %v11807_v18  ;;  %8833 = vmatprep.subr.bf16.mxu1 %v11810_v20  ;;  %v11897_v18 = vld [vmem:[%s17658_s1 + $0xbe4] ss:$16 sps:$4 sm:$0xff]   ;;  %v11895_v20 = vld [vmem:[%s17658_s1 + $0xbe0] ss:$16 sps:$4 sm:$0xff]  }
 0x142   :  { %8005 = vmatmul.mubr.bf16.vlgmr.msra.gmra.mrb[0].mxu0 %v74_v22  ;;  %8825 = vmatmul.mubr.bf16.vlgmr.msra.gmra.mrb[0].mxu1 %v74_v22  ;;  %v11903_v22 = vld [vmem:[%s17658_s1 + $0xc04] ss:$16 sps:$4 sm:$0xff]  }
 0x143   :  { %8014 = vmatpush1.bf16.msra.mxu0 %v11805_v23  ;;  %8834 = vmatpush1.bf16.msra.mxu1 %v11808_v24  ;;  %v36_v23 = vld [vmem:[%s17659_s0 + $0x50] sm:$0xff]  ;;  %v11906_v24 = vld [vmem:[%s17658_s1 + $0xc0c] ss:$16 sps:$4 sm:$0xff]  }
 0x144   :  { %8015 = vmatprep.subr.bf16.mxu0 %v11813_v25  ;;  %8835 = vmatprep.subr.bf16.mxu1 %v11816_v26  ;;  %v39_v25 = vld [vmem:[%s17659_s0 + $0x68] sm:$0xff]  ;;  %v76_v26 = vpack.c.bf16 %v36_v23, %v36_v23 }
 0x145   :  { %8045 = vmatprep.mubr.bf16.mxu0 %v77_v27  ;;  %8865 = vmatprep.mubr.bf16.mxu1 %v77_v27  ;;  %v11901_v27 = vld [vmem:[%s17658_s1 + $0xc00] ss:$16 sps:$4 sm:$0xff]   ;;  %v11996_v23 = vld [vmem:[%s17658_s1 + $0xdec] ss:$16 sps:$4 sm:$0xff]  }
 0x147   :  { %8016 = vmatpush1.bf16.msra.mxu0 %v11811_v28  ;;  %8836 = vmatpush1.bf16.msra.mxu1 %v11814_v29  ;;  %v11904_v28 = vld [vmem:[%s17658_s1 + $0xc08] ss:$16 sps:$4 sm:$0xff]   ;;  %v11909_v29 = vld [vmem:[%s17658_s1 + $0xc24] ss:$16 sps:$4 sm:$0xff]  }
 0x148   :  { %8017 = vmatprep.subr.bf16.mxu0 %v11819_v30  ;;  %8837 = vmatprep.subr.bf16.mxu1 %v11822_v31  ;;  %v11912_v30 = vld [vmem:[%s17658_s1 + $0xc2c] ss:$16 sps:$4 sm:$0xff]   ;;  %v79_v31 = vpack.c.bf16 %v39_v25, %v39_v25  ;;  %v11994_v25 = vld [vmem:[%s17658_s1 + $0xde8] ss:$16 sps:$4 sm:$0xff]  }
 0x14b   :  { %8018 = vmatpush1.bf16.msra.mxu0 %v11817_v32  ;;  %8838 = vmatpush1.bf16.msra.mxu1 %v11820_v33  ;;  %v11907_v32 = vld [vmem:[%s17658_s1 + $0xc20] ss:$16 sps:$4 sm:$0xff]   ;;  %v11910_v33 = vld [vmem:[%s17658_s1 + $0xc28] ss:$16 sps:$4 sm:$0xff]  }
 0x14c   :  { %8019 = vmatprep.subr.bf16.mxu0 %v11825_v34  ;;  %8839 = vmatprep.subr.bf16.mxu1 %v11828_v35  ;;  %v11915_v34 = vld [vmem:[%s17658_s1 + $0xc44] ss:$16 sps:$4 sm:$0xff]   ;;  %v11918_v35 = vld [vmem:[%s17658_s1 + $0xc4c] ss:$16 sps:$4 sm:$0xff]  }
 0x14f   :  { %8020 = vmatpush1.bf16.msra.mxu0 %v11823_v36  ;;  %8840 = vmatpush1.bf16.msra.mxu1 %v11826_v37  ;;  %v11913_v36 = vld [vmem:[%s17658_s1 + $0xc40] ss:$16 sps:$4 sm:$0xff]   ;;  %v11916_v37 = vld [vmem:[%s17658_s1 + $0xc48] ss:$16 sps:$4 sm:$0xff]  }
 0x150   :  { %8021 = vmatprep.subr.bf16.mxu0 %v11831_v38  ;;  %8841 = vmatprep.subr.bf16.mxu1 %v11834_v39  ;;  %v11921_v38 = vld [vmem:[%s17658_s1 + $0xc64] ss:$16 sps:$4 sm:$0xff]   ;;  %v11924_v39 = vld [vmem:[%s17658_s1 + $0xc6c] ss:$16 sps:$4 sm:$0xff]  }
 0x153   :  { %8022 = vmatpush1.bf16.msra.mxu0 %v11829_v40  ;;  %8842 = vmatpush1.bf16.msra.mxu1 %v11832_v41  ;;  %v11919_v40 = vld [vmem:[%s17658_s1 + $0xc60] ss:$16 sps:$4 sm:$0xff]   ;;  %v11922_v41 = vld [vmem:[%s17658_s1 + $0xc68] ss:$16 sps:$4 sm:$0xff]  }
 0x154   :  { %8023 = vmatprep.subr.bf16.mxu0 %v11837_v42  ;;  %8843 = vmatprep.subr.bf16.mxu1 %v11840_v43  ;;  %v11927_v42 = vld [vmem:[%s17658_s1 + $0xc84] ss:$16 sps:$4 sm:$0xff]   ;;  %v11930_v43 = vld [vmem:[%s17658_s1 + $0xc8c] ss:$16 sps:$4 sm:$0xff]  }
 0x157   :  { %8024 = vmatpush1.bf16.msra.mxu0 %v11835_v44  ;;  %8844 = vmatpush1.bf16.msra.mxu1 %v11838_v45  ;;  %v11925_v44 = vld [vmem:[%s17658_s1 + $0xc80] ss:$16 sps:$4 sm:$0xff]   ;;  %v11928_v45 = vld [vmem:[%s17658_s1 + $0xc88] ss:$16 sps:$4 sm:$0xff]  }
 0x158   :  { %8025 = vmatprep.subr.bf16.mxu0 %v11843_v46  ;;  %8845 = vmatprep.subr.bf16.mxu1 %v11846_v47  ;;  %v11933_v46 = vld [vmem:[%s17658_s1 + $0xca4] ss:$16 sps:$4 sm:$0xff]   ;;  %v11936_v47 = vld [vmem:[%s17658_s1 + $0xcac] ss:$16 sps:$4 sm:$0xff]  }
 0x15b   :  { %8026 = vmatpush1.bf16.msra.mxu0 %v11841_v48  ;;  %8846 = vmatpush1.bf16.msra.mxu1 %v11844_v49  ;;  %v11931_v48 = vld [vmem:[%s17658_s1 + $0xca0] ss:$16 sps:$4 sm:$0xff]   ;;  %v11934_v49 = vld [vmem:[%s17658_s1 + $0xca8] ss:$16 sps:$4 sm:$0xff]  }
 0x15c   :  { %8027 = vmatprep.subr.bf16.mxu0 %v11849_v50  ;;  %8847 = vmatprep.subr.bf16.mxu1 %v11852_v51  ;;  %v11939_v50 = vld [vmem:[%s17658_s1 + $0xcc4] ss:$16 sps:$4 sm:$0xff]   ;;  %v11942_v51 = vld [vmem:[%s17658_s1 + $0xccc] ss:$16 sps:$4 sm:$0xff]  }
 0x15f   :  { %8028 = vmatpush1.bf16.msra.mxu0 %v11847_v52  ;;  %8848 = vmatpush1.bf16.msra.mxu1 %v11850_v53  ;;  %v11937_v52 = vld [vmem:[%s17658_s1 + $0xcc0] ss:$16 sps:$4 sm:$0xff]   ;;  %v11940_v53 = vld [vmem:[%s17658_s1 + $0xcc8] ss:$16 sps:$4 sm:$0xff]  }
 0x160   :  { %8029 = vmatprep.subr.bf16.mxu0 %v11855_v54  ;;  %8849 = vmatprep.subr.bf16.mxu1 %v11858_v55  ;;  %v11945_v54 = vld [vmem:[%s17658_s1 + $0xce4] ss:$16 sps:$4 sm:$0xff]   ;;  %v11948_v55 = vld [vmem:[%s17658_s1 + $0xcec] ss:$16 sps:$4 sm:$0xff]  }
 0x163   :  { %8030 = vmatpush1.bf16.msra.mxu0 %v11853_v56  ;;  %8850 = vmatpush1.bf16.msra.mxu1 %v11856_v57  ;;  %v11943_v56 = vld [vmem:[%s17658_s1 + $0xce0] ss:$16 sps:$4 sm:$0xff]   ;;  %v11946_v57 = vld [vmem:[%s17658_s1 + $0xce8] ss:$16 sps:$4 sm:$0xff]  }
 0x164   :  { %8031 = vmatprep.subr.bf16.mxu0 %v11861_v58  ;;  %8851 = vmatprep.subr.bf16.mxu1 %v11864_v59  ;;  %v11951_v58 = vld [vmem:[%s17658_s1 + $0xd04] ss:$16 sps:$4 sm:$0xff]   ;;  %v11954_v59 = vld [vmem:[%s17658_s1 + $0xd0c] ss:$16 sps:$4 sm:$0xff]  }
 0x167   :  { %8032 = vmatpush1.bf16.msra.mxu0 %v11859_v60  ;;  %8852 = vmatpush1.bf16.msra.mxu1 %v11862_v61  ;;  %v11949_v60 = vld [vmem:[%s17658_s1 + $0xd00] ss:$16 sps:$4 sm:$0xff]   ;;  %v11952_v61 = vld [vmem:[%s17658_s1 + $0xd08] ss:$16 sps:$4 sm:$0xff]  }
 0x168   :  { %8033 = vmatprep.subr.bf16.mxu0 %v11867_v62  ;;  %8853 = vmatprep.subr.bf16.mxu1 %v11870_v63  ;;  %v11957_v62 = vld [vmem:[%s17658_s1 + $0xd24] ss:$16 sps:$4 sm:$0xff]   ;;  %v11960_v63 = vld [vmem:[%s17658_s1 + $0xd2c] ss:$16 sps:$4 sm:$0xff]  }
 0x16b   :  { %8034 = vmatpush1.bf16.msra.mxu0 %v11865_v0  ;;  %8854 = vmatpush1.bf16.msra.mxu1 %v11868_v1  ;;  %v11955_v0 = vld [vmem:[%s17658_s1 + $0xd20] ss:$16 sps:$4 sm:$0xff]   ;;  %v11958_v1 = vld [vmem:[%s17658_s1 + $0xd28] ss:$16 sps:$4 sm:$0xff]  }
 0x16c   :  { %8035 = vmatprep.subr.bf16.mxu0 %v11873_v2  ;;  %8855 = vmatprep.subr.bf16.mxu1 %v11876_v3  ;;  %v11963_v2 = vld [vmem:[%s17658_s1 + $0xd44] ss:$16 sps:$4 sm:$0xff]   ;;  %v11966_v3 = vld [vmem:[%s17658_s1 + $0xd4c] ss:$16 sps:$4 sm:$0xff]  }
 0x16f   :  { %8036 = vmatpush1.bf16.msra.mxu0 %v11871_v4  ;;  %8856 = vmatpush1.bf16.msra.mxu1 %v11874_v5  ;;  %v11961_v4 = vld [vmem:[%s17658_s1 + $0xd40] ss:$16 sps:$4 sm:$0xff]   ;;  %v11964_v5 = vld [vmem:[%s17658_s1 + $0xd48] ss:$16 sps:$4 sm:$0xff]  }
 0x170   :  { %8037 = vmatprep.subr.bf16.mxu0 %v11879_v6  ;;  %8857 = vmatprep.subr.bf16.mxu1 %v11882_v7  ;;  %v11969_v6 = vld [vmem:[%s17658_s1 + $0xd64] ss:$16 sps:$4 sm:$0xff]   ;;  %v11972_v7 = vld [vmem:[%s17658_s1 + $0xd6c] ss:$16 sps:$4 sm:$0xff]  }
 0x173   :  { %8038 = vmatpush1.bf16.msra.mxu0 %v11877_v8  ;;  %8858 = vmatpush1.bf16.msra.mxu1 %v11880_v9  ;;  %v11967_v8 = vld [vmem:[%s17658_s1 + $0xd60] ss:$16 sps:$4 sm:$0xff]   ;;  %v11970_v9 = vld [vmem:[%s17658_s1 + $0xd68] ss:$16 sps:$4 sm:$0xff]  }
 0x174   :  { %8039 = vmatprep.subr.bf16.mxu0 %v11885_v10  ;;  %8859 = vmatprep.subr.bf16.mxu1 %v11888_v11  ;;  %v11975_v10 = vld [vmem:[%s17658_s1 + $0xd84] ss:$16 sps:$4 sm:$0xff]   ;;  %v11978_v11 = vld [vmem:[%s17658_s1 + $0xd8c] ss:$16 sps:$4 sm:$0xff]  }
 0x177   :  { %8040 = vmatpush1.bf16.msra.mxu0 %v11883_v12  ;;  %8860 = vmatpush1.bf16.msra.mxu1 %v11886_v13  ;;  %v11973_v12 = vld [vmem:[%s17658_s1 + $0xd80] ss:$16 sps:$4 sm:$0xff]   ;;  %v11976_v13 = vld [vmem:[%s17658_s1 + $0xd88] ss:$16 sps:$4 sm:$0xff]  }
 0x178   :  { %8041 = vmatprep.subr.bf16.mxu0 %v11891_v14  ;;  %8861 = vmatprep.subr.bf16.mxu1 %v11894_v15  ;;  %v11981_v14 = vld [vmem:[%s17658_s1 + $0xda4] ss:$16 sps:$4 sm:$0xff]   ;;  %v11984_v15 = vld [vmem:[%s17658_s1 + $0xdac] ss:$16 sps:$4 sm:$0xff]  }
 0x17b   :  { %8042 = vmatpush1.bf16.msra.mxu0 %v11889_v16  ;;  %8862 = vmatpush1.bf16.msra.mxu1 %v11892_v17  ;;  %v11979_v16 = vld [vmem:[%s17658_s1 + $0xda0] ss:$16 sps:$4 sm:$0xff]   ;;  %v11982_v17 = vld [vmem:[%s17658_s1 + $0xda8] ss:$16 sps:$4 sm:$0xff]  }
 0x17c   :  { %8043 = vmatprep.subr.bf16.mxu0 %v11897_v18  ;;  %8863 = vmatprep.subr.bf16.mxu1 %v11900_v19  ;;  %v11987_v18 = vld [vmem:[%s17658_s1 + $0xdc4] ss:$16 sps:$4 sm:$0xff]   ;;  %v11990_v19 = vld [vmem:[%s17658_s1 + $0xdcc] ss:$16 sps:$4 sm:$0xff]  }
 0x17f   :  { %8044 = vmatpush1.bf16.msra.mxu0 %v11895_v20  ;;  %8864 = vmatpush1.bf16.msra.mxu1 %v11898_v21  ;;  %v11985_v20 = vld [vmem:[%s17658_s1 + $0xdc0] ss:$16 sps:$4 sm:$0xff]   ;;  %v11988_v21 = vld [vmem:[%s17658_s1 + $0xdc8] ss:$16 sps:$4 sm:$0xff]  }
 0x180   :  { %8054 = vmatprep.subr.bf16.mxu0 %v11903_v22  ;;  %8874 = vmatprep.subr.bf16.mxu1 %v11906_v24  ;;  %v11993_v22 = vld [vmem:[%s17658_s1 + $0xde4] ss:$16 sps:$4 sm:$0xff]   ;;  %v11991_v24 = vld [vmem:[%s17658_s1 + $0xde0] ss:$16 sps:$4 sm:$0xff]  }
 0x182   :  { %8046 = vmatmul.mubr.bf16.vlgmr.msra.gmra.mrb[0].mxu0 %v76_v26  ;;  %8866 = vmatmul.mubr.bf16.vlgmr.msra.gmra.mrb[0].mxu1 %v76_v26  ;;  %v11999_v26 = vld [vmem:[%s17658_s1 + $0xe04] ss:$16 sps:$4 sm:$0xff]  }
 0x183   :  { %8055 = vmatpush1.bf16.msra.mxu0 %v11901_v27  ;;  %8875 = vmatpush1.bf16.msra.mxu1 %v11904_v28  ;;  %v38_v27 = vld [vmem:[%s17659_s0 + $0x60] sm:$0xff]  ;;  %v12002_v28 = vld [vmem:[%s17658_s1 + $0xe0c] ss:$16 sps:$4 sm:$0xff]  }
 0x184   :  { %8056 = vmatprep.subr.bf16.mxu0 %v11909_v29  ;;  %8876 = vmatprep.subr.bf16.mxu1 %v11912_v30  ;;  %v41_v29 = vld [vmem:[%s17659_s0 + $0x78] sm:$0xff]  ;;  %v78_v30 = vpack.c.bf16 %v38_v27, %v38_v27 }
 0x185   :  { %8086 = vmatprep.mubr.bf16.mxu0 %v79_v31  ;;  %8906 = vmatprep.mubr.bf16.mxu1 %v79_v31  ;;  %v11997_v31 = vld [vmem:[%s17658_s1 + $0xe00] ss:$16 sps:$4 sm:$0xff]   ;;  %v12092_v27 = vld [vmem:[%s17658_s1 + $0xfec] ss:$16 sps:$4 sm:$0xff]  }
 0x187   :  { %8057 = vmatpush1.bf16.msra.mxu0 %v11907_v32  ;;  %8877 = vmatpush1.bf16.msra.mxu1 %v11910_v33  ;;  %v12000_v32 = vld [vmem:[%s17658_s1 + $0xe08] ss:$16 sps:$4 sm:$0xff]   ;;  %v12005_v33 = vld [vmem:[%s17658_s1 + $0xe24] ss:$16 sps:$4 sm:$0xff]  }
 0x188   :  { %8058 = vmatprep.subr.bf16.mxu0 %v11915_v34  ;;  %8878 = vmatprep.subr.bf16.mxu1 %v11918_v35  ;;  %v12008_v34 = vld [vmem:[%s17658_s1 + $0xe2c] ss:$16 sps:$4 sm:$0xff]   ;;  %v81_v35 = vpack.c.bf16 %v41_v29, %v41_v29  ;;  %v12090_v29 = vld [vmem:[%s17658_s1 + $0xfe8] ss:$16 sps:$4 sm:$0xff]  }
 0x18b   :  { %8059 = vmatpush1.bf16.msra.mxu0 %v11913_v36  ;;  %8879 = vmatpush1.bf16.msra.mxu1 %v11916_v37  ;;  %v12003_v36 = vld [vmem:[%s17658_s1 + $0xe20] ss:$16 sps:$4 sm:$0xff]   ;;  %v12006_v37 = vld [vmem:[%s17658_s1 + $0xe28] ss:$16 sps:$4 sm:$0xff]  }
 0x18c   :  { %8060 = vmatprep.subr.bf16.mxu0 %v11921_v38  ;;  %8880 = vmatprep.subr.bf16.mxu1 %v11924_v39  ;;  %v12011_v38 = vld [vmem:[%s17658_s1 + $0xe44] ss:$16 sps:$4 sm:$0xff]   ;;  %v12014_v39 = vld [vmem:[%s17658_s1 + $0xe4c] ss:$16 sps:$4 sm:$0xff]  }
 0x18f   :  { %8061 = vmatpush1.bf16.msra.mxu0 %v11919_v40  ;;  %8881 = vmatpush1.bf16.msra.mxu1 %v11922_v41  ;;  %v12009_v40 = vld [vmem:[%s17658_s1 + $0xe40] ss:$16 sps:$4 sm:$0xff]   ;;  %v12012_v41 = vld [vmem:[%s17658_s1 + $0xe48] ss:$16 sps:$4 sm:$0xff]  }
 0x190   :  { %8062 = vmatprep.subr.bf16.mxu0 %v11927_v42  ;;  %8882 = vmatprep.subr.bf16.mxu1 %v11930_v43  ;;  %v12017_v42 = vld [vmem:[%s17658_s1 + $0xe64] ss:$16 sps:$4 sm:$0xff]   ;;  %v12020_v43 = vld [vmem:[%s17658_s1 + $0xe6c] ss:$16 sps:$4 sm:$0xff]  }
 0x193   :  { %8063 = vmatpush1.bf16.msra.mxu0 %v11925_v44  ;;  %8883 = vmatpush1.bf16.msra.mxu1 %v11928_v45  ;;  %v12015_v44 = vld [vmem:[%s17658_s1 + $0xe60] ss:$16 sps:$4 sm:$0xff]   ;;  %v12018_v45 = vld [vmem:[%s17658_s1 + $0xe68] ss:$16 sps:$4 sm:$0xff]  }
 0x194   :  { %8064 = vmatprep.subr.bf16.mxu0 %v11933_v46  ;;  %8884 = vmatprep.subr.bf16.mxu1 %v11936_v47  ;;  %v12023_v46 = vld [vmem:[%s17658_s1 + $0xe84] ss:$16 sps:$4 sm:$0xff]   ;;  %v12026_v47 = vld [vmem:[%s17658_s1 + $0xe8c] ss:$16 sps:$4 sm:$0xff]  }
 0x197   :  { %8065 = vmatpush1.bf16.msra.mxu0 %v11931_v48  ;;  %8885 = vmatpush1.bf16.msra.mxu1 %v11934_v49  ;;  %v12021_v48 = vld [vmem:[%s17658_s1 + $0xe80] ss:$16 sps:$4 sm:$0xff]   ;;  %v12024_v49 = vld [vmem:[%s17658_s1 + $0xe88] ss:$16 sps:$4 sm:$0xff]  }
 0x198   :  { %8066 = vmatprep.subr.bf16.mxu0 %v11939_v50  ;;  %8886 = vmatprep.subr.bf16.mxu1 %v11942_v51  ;;  %v12029_v50 = vld [vmem:[%s17658_s1 + $0xea4] ss:$16 sps:$4 sm:$0xff]   ;;  %v12032_v51 = vld [vmem:[%s17658_s1 + $0xeac] ss:$16 sps:$4 sm:$0xff]  }
 0x19b   :  { %8067 = vmatpush1.bf16.msra.mxu0 %v11937_v52  ;;  %8887 = vmatpush1.bf16.msra.mxu1 %v11940_v53  ;;  %v12027_v52 = vld [vmem:[%s17658_s1 + $0xea0] ss:$16 sps:$4 sm:$0xff]   ;;  %v12030_v53 = vld [vmem:[%s17658_s1 + $0xea8] ss:$16 sps:$4 sm:$0xff]  }
 0x19c   :  { %8068 = vmatprep.subr.bf16.mxu0 %v11945_v54  ;;  %8888 = vmatprep.subr.bf16.mxu1 %v11948_v55  ;;  %v12035_v54 = vld [vmem:[%s17658_s1 + $0xec4] ss:$16 sps:$4 sm:$0xff]   ;;  %v12038_v55 = vld [vmem:[%s17658_s1 + $0xecc] ss:$16 sps:$4 sm:$0xff]  }
 0x19f   :  { %8069 = vmatpush1.bf16.msra.mxu0 %v11943_v56  ;;  %8889 = vmatpush1.bf16.msra.mxu1 %v11946_v57  ;;  %v12033_v56 = vld [vmem:[%s17658_s1 + $0xec0] ss:$16 sps:$4 sm:$0xff]   ;;  %v12036_v57 = vld [vmem:[%s17658_s1 + $0xec8] ss:$16 sps:$4 sm:$0xff]  }
 0x1a0   :  { %8070 = vmatprep.subr.bf16.mxu0 %v11951_v58  ;;  %8890 = vmatprep.subr.bf16.mxu1 %v11954_v59  ;;  %v12041_v58 = vld [vmem:[%s17658_s1 + $0xee4] ss:$16 sps:$4 sm:$0xff]   ;;  %v12044_v59 = vld [vmem:[%s17658_s1 + $0xeec] ss:$16 sps:$4 sm:$0xff]  }
 0x1a3   :  { %8071 = vmatpush1.bf16.msra.mxu0 %v11949_v60  ;;  %8891 = vmatpush1.bf16.msra.mxu1 %v11952_v61  ;;  %v12039_v60 = vld [vmem:[%s17658_s1 + $0xee0] ss:$16 sps:$4 sm:$0xff]   ;;  %v12042_v61 = vld [vmem:[%s17658_s1 + $0xee8] ss:$16 sps:$4 sm:$0xff]  }
 0x1a4   :  { %8072 = vmatprep.subr.bf16.mxu0 %v11957_v62  ;;  %8892 = vmatprep.subr.bf16.mxu1 %v11960_v63  ;;  %v12047_v62 = vld [vmem:[%s17658_s1 + $0xf04] ss:$16 sps:$4 sm:$0xff]   ;;  %v12050_v63 = vld [vmem:[%s17658_s1 + $0xf0c] ss:$16 sps:$4 sm:$0xff]  }
 0x1a7   :  { %8073 = vmatpush1.bf16.msra.mxu0 %v11955_v0  ;;  %8893 = vmatpush1.bf16.msra.mxu1 %v11958_v1  ;;  %v12045_v0 = vld [vmem:[%s17658_s1 + $0xf00] ss:$16 sps:$4 sm:$0xff]   ;;  %v12048_v1 = vld [vmem:[%s17658_s1 + $0xf08] ss:$16 sps:$4 sm:$0xff]  }
 0x1a8   :  { %8074 = vmatprep.subr.bf16.mxu0 %v11963_v2  ;;  %8894 = vmatprep.subr.bf16.mxu1 %v11966_v3  ;;  %v12053_v2 = vld [vmem:[%s17658_s1 + $0xf24] ss:$16 sps:$4 sm:$0xff]   ;;  %v12056_v3 = vld [vmem:[%s17658_s1 + $0xf2c] ss:$16 sps:$4 sm:$0xff]  }
 0x1ab   :  { %8075 = vmatpush1.bf16.msra.mxu0 %v11961_v4  ;;  %8895 = vmatpush1.bf16.msra.mxu1 %v11964_v5  ;;  %v12051_v4 = vld [vmem:[%s17658_s1 + $0xf20] ss:$16 sps:$4 sm:$0xff]   ;;  %v12054_v5 = vld [vmem:[%s17658_s1 + $0xf28] ss:$16 sps:$4 sm:$0xff]  }
 0x1ac   :  { %8076 = vmatprep.subr.bf16.mxu0 %v11969_v6  ;;  %8896 = vmatprep.subr.bf16.mxu1 %v11972_v7  ;;  %v12059_v6 = vld [vmem:[%s17658_s1 + $0xf44] ss:$16 sps:$4 sm:$0xff]   ;;  %v12062_v7 = vld [vmem:[%s17658_s1 + $0xf4c] ss:$16 sps:$4 sm:$0xff]  }
 0x1af   :  { %8077 = vmatpush1.bf16.msra.mxu0 %v11967_v8  ;;  %8897 = vmatpush1.bf16.msra.mxu1 %v11970_v9  ;;  %v12057_v8 = vld [vmem:[%s17658_s1 + $0xf40] ss:$16 sps:$4 sm:$0xff]   ;;  %v12060_v9 = vld [vmem:[%s17658_s1 + $0xf48] ss:$16 sps:$4 sm:$0xff]  }
 0x1b0   :  { %8078 = vmatprep.subr.bf16.mxu0 %v11975_v10  ;;  %8898 = vmatprep.subr.bf16.mxu1 %v11978_v11  ;;  %v12065_v10 = vld [vmem:[%s17658_s1 + $0xf64] ss:$16 sps:$4 sm:$0xff]   ;;  %v12068_v11 = vld [vmem:[%s17658_s1 + $0xf6c] ss:$16 sps:$4 sm:$0xff]  }
 0x1b3   :  { %8079 = vmatpush1.bf16.msra.mxu0 %v11973_v12  ;;  %8899 = vmatpush1.bf16.msra.mxu1 %v11976_v13  ;;  %v12063_v12 = vld [vmem:[%s17658_s1 + $0xf60] ss:$16 sps:$4 sm:$0xff]   ;;  %v12066_v13 = vld [vmem:[%s17658_s1 + $0xf68] ss:$16 sps:$4 sm:$0xff]  }
 0x1b4   :  { %8080 = vmatprep.subr.bf16.mxu0 %v11981_v14  ;;  %8900 = vmatprep.subr.bf16.mxu1 %v11984_v15  ;;  %v12071_v14 = vld [vmem:[%s17658_s1 + $0xf84] ss:$16 sps:$4 sm:$0xff]   ;;  %v12074_v15 = vld [vmem:[%s17658_s1 + $0xf8c] ss:$16 sps:$4 sm:$0xff]  }
 0x1b7   :  { %8081 = vmatpush1.bf16.msra.mxu0 %v11979_v16  ;;  %8901 = vmatpush1.bf16.msra.mxu1 %v11982_v17  ;;  %v12069_v16 = vld [vmem:[%s17658_s1 + $0xf80] ss:$16 sps:$4 sm:$0xff]   ;;  %v12072_v17 = vld [vmem:[%s17658_s1 + $0xf88] ss:$16 sps:$4 sm:$0xff]  }
 0x1b8   :  { %8082 = vmatprep.subr.bf16.mxu0 %v11987_v18  ;;  %8902 = vmatprep.subr.bf16.mxu1 %v11990_v19  ;;  %v12077_v18 = vld [vmem:[%s17658_s1 + $0xfa4] ss:$16 sps:$4 sm:$0xff]   ;;  %v12080_v19 = vld [vmem:[%s17658_s1 + $0xfac] ss:$16 sps:$4 sm:$0xff]  }
 0x1bb   :  { %8083 = vmatpush1.bf16.msra.mxu0 %v11985_v20  ;;  %8903 = vmatpush1.bf16.msra.mxu1 %v11988_v21  ;;  %v12075_v20 = vld [vmem:[%s17658_s1 + $0xfa0] ss:$16 sps:$4 sm:$0xff]   ;;  %v12078_v21 = vld [vmem:[%s17658_s1 + $0xfa8] ss:$16 sps:$4 sm:$0xff]  }
 0x1bc   :  { %8084 = vmatprep.subr.bf16.mxu0 %v11993_v22  ;;  %8904 = vmatprep.subr.bf16.mxu1 %v11996_v23  ;;  %v12083_v22 = vld [vmem:[%s17658_s1 + $0xfc4] ss:$16 sps:$4 sm:$0xff]   ;;  %v12086_v23 = vld [vmem:[%s17658_s1 + $0xfcc] ss:$16 sps:$4 sm:$0xff]  }
 0x1bf   :  { %8085 = vmatpush1.bf16.msra.mxu0 %v11991_v24  ;;  %8905 = vmatpush1.bf16.msra.mxu1 %v11994_v25  ;;  %v12081_v24 = vld [vmem:[%s17658_s1 + $0xfc0] ss:$16 sps:$4 sm:$0xff]   ;;  %v12084_v25 = vld [vmem:[%s17658_s1 + $0xfc8] ss:$16 sps:$4 sm:$0xff]  }
 0x1c0   :  { %8095 = vmatprep.subr.bf16.mxu0 %v11999_v26  ;;  %8915 = vmatprep.subr.bf16.mxu1 %v12002_v28  ;;  %v12089_v26 = vld [vmem:[%s17658_s1 + $0xfe4] ss:$16 sps:$4 sm:$0xff]   ;;  %v12087_v28 = vld [vmem:[%s17658_s1 + $0xfe0] ss:$16 sps:$4 sm:$0xff]  }
 0x1c2   :  { %8087 = vmatmul.mubr.bf16.vlgmr.msra.gmra.mrb[0].mxu0 %v78_v30  ;;  %8907 = vmatmul.mubr.bf16.vlgmr.msra.gmra.mrb[0].mxu1 %v78_v30  ;;  %v12095_v30 = vld [vmem:[%s17658_s1 + $0x1004] ss:$16 sps:$4 sm:$0xff]  }
 0x1c3   :  { %8096 = vmatpush1.bf16.msra.mxu0 %v11997_v31  ;;  %8916 = vmatpush1.bf16.msra.mxu1 %v12000_v32  ;;  %v40_v31 = vld [vmem:[%s17659_s0 + $0x70] sm:$0xff]  ;;  %v12098_v32 = vld [vmem:[%s17658_s1 + $0x100c] ss:$16 sps:$4 sm:$0xff]  }
 0x1c4   :  { %8097 = vmatprep.subr.bf16.mxu0 %v12005_v33  ;;  %8917 = vmatprep.subr.bf16.mxu1 %v12008_v34  ;;  %v43_v33 = vld [vmem:[%s17659_s0 + $0x88] sm:$0xff]  ;;  %v80_v34 = vpack.c.bf16 %v40_v31, %v40_v31 }
 0x1c5   :  { %8127 = vmatprep.mubr.bf16.mxu0 %v81_v35  ;;  %8947 = vmatprep.mubr.bf16.mxu1 %v81_v35  ;;  %v12093_v35 = vld [vmem:[%s17658_s1 + $0x1000] ss:$16 sps:$4 sm:$0xff]   ;;  %v12188_v31 = vld [vmem:[%s17658_s1 + $0x11ec] ss:$16 sps:$4 sm:$0xff]  }
 0x1c7   :  { %8098 = vmatpush1.bf16.msra.mxu0 %v12003_v36  ;;  %8918 = vmatpush1.bf16.msra.mxu1 %v12006_v37  ;;  %v12096_v36 = vld [vmem:[%s17658_s1 + $0x1008] ss:$16 sps:$4 sm:$0xff]   ;;  %v12101_v37 = vld [vmem:[%s17658_s1 + $0x1024] ss:$16 sps:$4 sm:$0xff]  }
 0x1c8   :  { %8099 = vmatprep.subr.bf16.mxu0 %v12011_v38  ;;  %8919 = vmatprep.subr.bf16.mxu1 %v12014_v39  ;;  %v12104_v38 = vld [vmem:[%s17658_s1 + $0x102c] ss:$16 sps:$4 sm:$0xff]   ;;  %v83_v39 = vpack.c.bf16 %v43_v33, %v43_v33  ;;  %v12186_v33 = vld [vmem:[%s17658_s1 + $0x11e8] ss:$16 sps:$4 sm:$0xff]  }
 0x1cb   :  { %8100 = vmatpush1.bf16.msra.mxu0 %v12009_v40  ;;  %8920 = vmatpush1.bf16.msra.mxu1 %v12012_v41  ;;  %v12099_v40 = vld [vmem:[%s17658_s1 + $0x1020] ss:$16 sps:$4 sm:$0xff]   ;;  %v12102_v41 = vld [vmem:[%s17658_s1 + $0x1028] ss:$16 sps:$4 sm:$0xff]  }
 0x1cc   :  { %8101 = vmatprep.subr.bf16.mxu0 %v12017_v42  ;;  %8921 = vmatprep.subr.bf16.mxu1 %v12020_v43  ;;  %v12107_v42 = vld [vmem:[%s17658_s1 + $0x1044] ss:$16 sps:$4 sm:$0xff]   ;;  %v12110_v43 = vld [vmem:[%s17658_s1 + $0x104c] ss:$16 sps:$4 sm:$0xff]  }
 0x1cf   :  { %8102 = vmatpush1.bf16.msra.mxu0 %v12015_v44  ;;  %8922 = vmatpush1.bf16.msra.mxu1 %v12018_v45  ;;  %v12105_v44 = vld [vmem:[%s17658_s1 + $0x1040] ss:$16 sps:$4 sm:$0xff]   ;;  %v12108_v45 = vld [vmem:[%s17658_s1 + $0x1048] ss:$16 sps:$4 sm:$0xff]  }
 0x1d0   :  { %8103 = vmatprep.subr.bf16.mxu0 %v12023_v46  ;;  %8923 = vmatprep.subr.bf16.mxu1 %v12026_v47  ;;  %v12113_v46 = vld [vmem:[%s17658_s1 + $0x1064] ss:$16 sps:$4 sm:$0xff]   ;;  %v12116_v47 = vld [vmem:[%s17658_s1 + $0x106c] ss:$16 sps:$4 sm:$0xff]  }
 0x1d3   :  { %8104 = vmatpush1.bf16.msra.mxu0 %v12021_v48  ;;  %8924 = vmatpush1.bf16.msra.mxu1 %v12024_v49  ;;  %v12111_v48 = vld [vmem:[%s17658_s1 + $0x1060] ss:$16 sps:$4 sm:$0xff]   ;;  %v12114_v49 = vld [vmem:[%s17658_s1 + $0x1068] ss:$16 sps:$4 sm:$0xff]  }
 0x1d4   :  { %8105 = vmatprep.subr.bf16.mxu0 %v12029_v50  ;;  %8925 = vmatprep.subr.bf16.mxu1 %v12032_v51  ;;  %v12119_v50 = vld [vmem:[%s17658_s1 + $0x1084] ss:$16 sps:$4 sm:$0xff]   ;;  %v12122_v51 = vld [vmem:[%s17658_s1 + $0x108c] ss:$16 sps:$4 sm:$0xff]  }
 0x1d7   :  { %8106 = vmatpush1.bf16.msra.mxu0 %v12027_v52  ;;  %8926 = vmatpush1.bf16.msra.mxu1 %v12030_v53  ;;  %v12117_v52 = vld [vmem:[%s17658_s1 + $0x1080] ss:$16 sps:$4 sm:$0xff]   ;;  %v12120_v53 = vld [vmem:[%s17658_s1 + $0x1088] ss:$16 sps:$4 sm:$0xff]  }
 0x1d8   :  { %8107 = vmatprep.subr.bf16.mxu0 %v12035_v54  ;;  %8927 = vmatprep.subr.bf16.mxu1 %v12038_v55  ;;  %v12125_v54 = vld [vmem:[%s17658_s1 + $0x10a4] ss:$16 sps:$4 sm:$0xff]   ;;  %v12128_v55 = vld [vmem:[%s17658_s1 + $0x10ac] ss:$16 sps:$4 sm:$0xff]  }
 0x1db   :  { %8108 = vmatpush1.bf16.msra.mxu0 %v12033_v56  ;;  %8928 = vmatpush1.bf16.msra.mxu1 %v12036_v57  ;;  %v12123_v56 = vld [vmem:[%s17658_s1 + $0x10a0] ss:$16 sps:$4 sm:$0xff]   ;;  %v12126_v57 = vld [vmem:[%s17658_s1 + $0x10a8] ss:$16 sps:$4 sm:$0xff]  }
 0x1dc   :  { %8109 = vmatprep.subr.bf16.mxu0 %v12041_v58  ;;  %8929 = vmatprep.subr.bf16.mxu1 %v12044_v59  ;;  %v12131_v58 = vld [vmem:[%s17658_s1 + $0x10c4] ss:$16 sps:$4 sm:$0xff]   ;;  %v12134_v59 = vld [vmem:[%s17658_s1 + $0x10cc] ss:$16 sps:$4 sm:$0xff]  }
 0x1df   :  { %8110 = vmatpush1.bf16.msra.mxu0 %v12039_v60  ;;  %8930 = vmatpush1.bf16.msra.mxu1 %v12042_v61  ;;  %v12129_v60 = vld [vmem:[%s17658_s1 + $0x10c0] ss:$16 sps:$4 sm:$0xff]   ;;  %v12132_v61 = vld [vmem:[%s17658_s1 + $0x10c8] ss:$16 sps:$4 sm:$0xff]  }
 0x1e0   :  { %8111 = vmatprep.subr.bf16.mxu0 %v12047_v62  ;;  %8931 = vmatprep.subr.bf16.mxu1 %v12050_v63  ;;  %v12137_v62 = vld [vmem:[%s17658_s1 + $0x10e4] ss:$16 sps:$4 sm:$0xff]   ;;  %v12140_v63 = vld [vmem:[%s17658_s1 + $0x10ec] ss:$16 sps:$4 sm:$0xff]  }
 0x1e3   :  { %8112 = vmatpush1.bf16.msra.mxu0 %v12045_v0  ;;  %8932 = vmatpush1.bf16.msra.mxu1 %v12048_v1  ;;  %v12135_v0 = vld [vmem:[%s17658_s1 + $0x10e0] ss:$16 sps:$4 sm:$0xff]   ;;  %v12138_v1 = vld [vmem:[%s17658_s1 + $0x10e8] ss:$16 sps:$4 sm:$0xff]  }
 0x1e4   :  { %8113 = vmatprep.subr.bf16.mxu0 %v12053_v2  ;;  %8933 = vmatprep.subr.bf16.mxu1 %v12056_v3  ;;  %v12143_v2 = vld [vmem:[%s17658_s1 + $0x1104] ss:$16 sps:$4 sm:$0xff]   ;;  %v12146_v3 = vld [vmem:[%s17658_s1 + $0x110c] ss:$16 sps:$4 sm:$0xff]  }
 0x1e7   :  { %8114 = vmatpush1.bf16.msra.mxu0 %v12051_v4  ;;  %8934 = vmatpush1.bf16.msra.mxu1 %v12054_v5  ;;  %v12141_v4 = vld [vmem:[%s17658_s1 + $0x1100] ss:$16 sps:$4 sm:$0xff]   ;;  %v12144_v5 = vld [vmem:[%s17658_s1 + $0x1108] ss:$16 sps:$4 sm:$0xff]  }
 0x1e8   :  { %8115 = vmatprep.subr.bf16.mxu0 %v12059_v6  ;;  %8935 = vmatprep.subr.bf16.mxu1 %v12062_v7  ;;  %v12149_v6 = vld [vmem:[%s17658_s1 + $0x1124] ss:$16 sps:$4 sm:$0xff]   ;;  %v12152_v7 = vld [vmem:[%s17658_s1 + $0x112c] ss:$16 sps:$4 sm:$0xff]  }
 0x1eb   :  { %8116 = vmatpush1.bf16.msra.mxu0 %v12057_v8  ;;  %8936 = vmatpush1.bf16.msra.mxu1 %v12060_v9  ;;  %v12147_v8 = vld [vmem:[%s17658_s1 + $0x1120] ss:$16 sps:$4 sm:$0xff]   ;;  %v12150_v9 = vld [vmem:[%s17658_s1 + $0x1128] ss:$16 sps:$4 sm:$0xff]  }
 0x1ec   :  { %8117 = vmatprep.subr.bf16.mxu0 %v12065_v10  ;;  %8937 = vmatprep.subr.bf16.mxu1 %v12068_v11  ;;  %v12155_v10 = vld [vmem:[%s17658_s1 + $0x1144] ss:$16 sps:$4 sm:$0xff]   ;;  %v12158_v11 = vld [vmem:[%s17658_s1 + $0x114c] ss:$16 sps:$4 sm:$0xff]  }
 0x1ef   :  { %8118 = vmatpush1.bf16.msra.mxu0 %v12063_v12  ;;  %8938 = vmatpush1.bf16.msra.mxu1 %v12066_v13  ;;  %v12153_v12 = vld [vmem:[%s17658_s1 + $0x1140] ss:$16 sps:$4 sm:$0xff]   ;;  %v12156_v13 = vld [vmem:[%s17658_s1 + $0x1148] ss:$16 sps:$4 sm:$0xff]  }
 0x1f0   :  { %8119 = vmatprep.subr.bf16.mxu0 %v12071_v14  ;;  %8939 = vmatprep.subr.bf16.mxu1 %v12074_v15  ;;  %v12161_v14 = vld [vmem:[%s17658_s1 + $0x1164] ss:$16 sps:$4 sm:$0xff]   ;;  %v12164_v15 = vld [vmem:[%s17658_s1 + $0x116c] ss:$16 sps:$4 sm:$0xff]  }
 0x1f3   :  { %8120 = vmatpush1.bf16.msra.mxu0 %v12069_v16  ;;  %8940 = vmatpush1.bf16.msra.mxu1 %v12072_v17  ;;  %v12159_v16 = vld [vmem:[%s17658_s1 + $0x1160] ss:$16 sps:$4 sm:$0xff]   ;;  %v12162_v17 = vld [vmem:[%s17658_s1 + $0x1168] ss:$16 sps:$4 sm:$0xff]  }
 0x1f4   :  { %8121 = vmatprep.subr.bf16.mxu0 %v12077_v18  ;;  %8941 = vmatprep.subr.bf16.mxu1 %v12080_v19  ;;  %v12167_v18 = vld [vmem:[%s17658_s1 + $0x1184] ss:$16 sps:$4 sm:$0xff]   ;;  %v12170_v19 = vld [vmem:[%s17658_s1 + $0x118c] ss:$16 sps:$4 sm:$0xff]  }
 0x1f7   :  { %8122 = vmatpush1.bf16.msra.mxu0 %v12075_v20  ;;  %8942 = vmatpush1.bf16.msra.mxu1 %v12078_v21  ;;  %v12165_v20 = vld [vmem:[%s17658_s1 + $0x1180] ss:$16 sps:$4 sm:$0xff]   ;;  %v12168_v21 = vld [vmem:[%s17658_s1 + $0x1188] ss:$16 sps:$4 sm:$0xff]  }
 0x1f8   :  { %8123 = vmatprep.subr.bf16.mxu0 %v12083_v22  ;;  %8943 = vmatprep.subr.bf16.mxu1 %v12086_v23  ;;  %v12173_v22 = vld [vmem:[%s17658_s1 + $0x11a4] ss:$16 sps:$4 sm:$0xff]   ;;  %v12176_v23 = vld [vmem:[%s17658_s1 + $0x11ac] ss:$16 sps:$4 sm:$0xff]  }
 0x1fb   :  { %8124 = vmatpush1.bf16.msra.mxu0 %v12081_v24  ;;  %8944 = vmatpush1.bf16.msra.mxu1 %v12084_v25  ;;  %v12171_v24 = vld [vmem:[%s17658_s1 + $0x11a0] ss:$16 sps:$4 sm:$0xff]   ;;  %v12174_v25 = vld [vmem:[%s17658_s1 + $0x11a8] ss:$16 sps:$4 sm:$0xff]  }
 0x1fc   :  { %8125 = vmatprep.subr.bf16.mxu0 %v12089_v26  ;;  %8945 = vmatprep.subr.bf16.mxu1 %v12092_v27  ;;  %v12179_v26 = vld [vmem:[%s17658_s1 + $0x11c4] ss:$16 sps:$4 sm:$0xff]   ;;  %v12182_v27 = vld [vmem:[%s17658_s1 + $0x11cc] ss:$16 sps:$4 sm:$0xff]  }
 0x1ff   :  { %8126 = vmatpush1.bf16.msra.mxu0 %v12087_v28  ;;  %8946 = vmatpush1.bf16.msra.mxu1 %v12090_v29  ;;  %v12177_v28 = vld [vmem:[%s17658_s1 + $0x11c0] ss:$16 sps:$4 sm:$0xff]   ;;  %v12180_v29 = vld [vmem:[%s17658_s1 + $0x11c8] ss:$16 sps:$4 sm:$0xff]  }
 0x200   :  { %8136 = vmatprep.subr.bf16.mxu0 %v12095_v30  ;;  %8956 = vmatprep.subr.bf16.mxu1 %v12098_v32  ;;  %v12185_v30 = vld [vmem:[%s17658_s1 + $0x11e4] ss:$16 sps:$4 sm:$0xff]   ;;  %v12183_v32 = vld [vmem:[%s17658_s1 + $0x11e0] ss:$16 sps:$4 sm:$0xff]  }
 0x202   :  { %8128 = vmatmul.mubr.bf16.vlgmr.msra.gmra.mrb[0].mxu0 %v80_v34  ;;  %8948 = vmatmul.mubr.bf16.vlgmr.msra.gmra.mrb[0].mxu1 %v80_v34  ;;  %v12191_v34 = vld [vmem:[%s17658_s1 + $0x1204] ss:$16 sps:$4 sm:$0xff]  }
 0x203   :  { %8137 = vmatpush1.bf16.msra.mxu0 %v12093_v35  ;;  %8957 = vmatpush1.bf16.msra.mxu1 %v12096_v36  ;;  %v42_v35 = vld [vmem:[%s17659_s0 + $0x80] sm:$0xff]  ;;  %v12194_v36 = vld [vmem:[%s17658_s1 + $0x120c] ss:$16 sps:$4 sm:$0xff]  }
 0x204   :  { %8138 = vmatprep.subr.bf16.mxu0 %v12101_v37  ;;  %8958 = vmatprep.subr.bf16.mxu1 %v12104_v38  ;;  %v45_v37 = vld [vmem:[%s17659_s0 + $0x98] sm:$0xff]  ;;  %v82_v38 = vpack.c.bf16 %v42_v35, %v42_v35 }
 0x205   :  { %8168 = vmatprep.mubr.bf16.mxu0 %v83_v39  ;;  %8988 = vmatprep.mubr.bf16.mxu1 %v83_v39  ;;  %v12189_v39 = vld [vmem:[%s17658_s1 + $0x1200] ss:$16 sps:$4 sm:$0xff]   ;;  %v12284_v35 = vld [vmem:[%s17658_s1 + $0x13ec] ss:$16 sps:$4 sm:$0xff]  }
 0x207   :  { %8139 = vmatpush1.bf16.msra.mxu0 %v12099_v40  ;;  %8959 = vmatpush1.bf16.msra.mxu1 %v12102_v41  ;;  %v12192_v40 = vld [vmem:[%s17658_s1 + $0x1208] ss:$16 sps:$4 sm:$0xff]   ;;  %v12197_v41 = vld [vmem:[%s17658_s1 + $0x1224] ss:$16 sps:$4 sm:$0xff]  }
 0x208   :  { %8140 = vmatprep.subr.bf16.mxu0 %v12107_v42  ;;  %8960 = vmatprep.subr.bf16.mxu1 %v12110_v43  ;;  %v12200_v42 = vld [vmem:[%s17658_s1 + $0x122c] ss:$16 sps:$4 sm:$0xff]   ;;  %v85_v43 = vpack.c.bf16 %v45_v37, %v45_v37  ;;  %v12282_v37 = vld [vmem:[%s17658_s1 + $0x13e8] ss:$16 sps:$4 sm:$0xff]  }
 0x20b   :  { %8141 = vmatpush1.bf16.msra.mxu0 %v12105_v44  ;;  %8961 = vmatpush1.bf16.msra.mxu1 %v12108_v45  ;;  %v12195_v44 = vld [vmem:[%s17658_s1 + $0x1220] ss:$16 sps:$4 sm:$0xff]   ;;  %v12198_v45 = vld [vmem:[%s17658_s1 + $0x1228] ss:$16 sps:$4 sm:$0xff]  }
 0x20c   :  { %8142 = vmatprep.subr.bf16.mxu0 %v12113_v46  ;;  %8962 = vmatprep.subr.bf16.mxu1 %v12116_v47  ;;  %v12203_v46 = vld [vmem:[%s17658_s1 + $0x1244] ss:$16 sps:$4 sm:$0xff]   ;;  %v12206_v47 = vld [vmem:[%s17658_s1 + $0x124c] ss:$16 sps:$4 sm:$0xff]  }
 0x20f   :  { %8143 = vmatpush1.bf16.msra.mxu0 %v12111_v48  ;;  %8963 = vmatpush1.bf16.msra.mxu1 %v12114_v49  ;;  %v12201_v48 = vld [vmem:[%s17658_s1 + $0x1240] ss:$16 sps:$4 sm:$0xff]   ;;  %v12204_v49 = vld [vmem:[%s17658_s1 + $0x1248] ss:$16 sps:$4 sm:$0xff]  }
 0x210   :  { %8144 = vmatprep.subr.bf16.mxu0 %v12119_v50  ;;  %8964 = vmatprep.subr.bf16.mxu1 %v12122_v51  ;;  %v12209_v50 = vld [vmem:[%s17658_s1 + $0x1264] ss:$16 sps:$4 sm:$0xff]   ;;  %v12212_v51 = vld [vmem:[%s17658_s1 + $0x126c] ss:$16 sps:$4 sm:$0xff]  }
 0x213   :  { %8145 = vmatpush1.bf16.msra.mxu0 %v12117_v52  ;;  %8965 = vmatpush1.bf16.msra.mxu1 %v12120_v53  ;;  %v12207_v52 = vld [vmem:[%s17658_s1 + $0x1260] ss:$16 sps:$4 sm:$0xff]   ;;  %v12210_v53 = vld [vmem:[%s17658_s1 + $0x1268] ss:$16 sps:$4 sm:$0xff]  }
 0x214   :  { %8146 = vmatprep.subr.bf16.mxu0 %v12125_v54  ;;  %8966 = vmatprep.subr.bf16.mxu1 %v12128_v55  ;;  %v12215_v54 = vld [vmem:[%s17658_s1 + $0x1284] ss:$16 sps:$4 sm:$0xff]   ;;  %v12218_v55 = vld [vmem:[%s17658_s1 + $0x128c] ss:$16 sps:$4 sm:$0xff]  }
 0x217   :  { %8147 = vmatpush1.bf16.msra.mxu0 %v12123_v56  ;;  %8967 = vmatpush1.bf16.msra.mxu1 %v12126_v57  ;;  %v12213_v56 = vld [vmem:[%s17658_s1 + $0x1280] ss:$16 sps:$4 sm:$0xff]   ;;  %v12216_v57 = vld [vmem:[%s17658_s1 + $0x1288] ss:$16 sps:$4 sm:$0xff]  }
 0x218   :  { %8148 = vmatprep.subr.bf16.mxu0 %v12131_v58  ;;  %8968 = vmatprep.subr.bf16.mxu1 %v12134_v59  ;;  %v12221_v58 = vld [vmem:[%s17658_s1 + $0x12a4] ss:$16 sps:$4 sm:$0xff]   ;;  %v12224_v59 = vld [vmem:[%s17658_s1 + $0x12ac] ss:$16 sps:$4 sm:$0xff]  }
 0x21b   :  { %8149 = vmatpush1.bf16.msra.mxu0 %v12129_v60  ;;  %8969 = vmatpush1.bf16.msra.mxu1 %v12132_v61  ;;  %v12219_v60 = vld [vmem:[%s17658_s1 + $0x12a0] ss:$16 sps:$4 sm:$0xff]   ;;  %v12222_v61 = vld [vmem:[%s17658_s1 + $0x12a8] ss:$16 sps:$4 sm:$0xff]  }
 0x21c   :  { %8150 = vmatprep.subr.bf16.mxu0 %v12137_v62  ;;  %8970 = vmatprep.subr.bf16.mxu1 %v12140_v63  ;;  %v12227_v62 = vld [vmem:[%s17658_s1 + $0x12c4] ss:$16 sps:$4 sm:$0xff]   ;;  %v12230_v63 = vld [vmem:[%s17658_s1 + $0x12cc] ss:$16 sps:$4 sm:$0xff]  }
 0x21f   :  { %8151 = vmatpush1.bf16.msra.mxu0 %v12135_v0  ;;  %8971 = vmatpush1.bf16.msra.mxu1 %v12138_v1  ;;  %v12225_v0 = vld [vmem:[%s17658_s1 + $0x12c0] ss:$16 sps:$4 sm:$0xff]   ;;  %v12228_v1 = vld [vmem:[%s17658_s1 + $0x12c8] ss:$16 sps:$4 sm:$0xff]  }
 0x220   :  { %8152 = vmatprep.subr.bf16.mxu0 %v12143_v2  ;;  %8972 = vmatprep.subr.bf16.mxu1 %v12146_v3  ;;  %v12233_v2 = vld [vmem:[%s17658_s1 + $0x12e4] ss:$16 sps:$4 sm:$0xff]   ;;  %v12236_v3 = vld [vmem:[%s17658_s1 + $0x12ec] ss:$16 sps:$4 sm:$0xff]  }
 0x223   :  { %8153 = vmatpush1.bf16.msra.mxu0 %v12141_v4  ;;  %8973 = vmatpush1.bf16.msra.mxu1 %v12144_v5  ;;  %v12231_v4 = vld [vmem:[%s17658_s1 + $0x12e0] ss:$16 sps:$4 sm:$0xff]   ;;  %v12234_v5 = vld [vmem:[%s17658_s1 + $0x12e8] ss:$16 sps:$4 sm:$0xff]  }
 0x224   :  { %8154 = vmatprep.subr.bf16.mxu0 %v12149_v6  ;;  %8974 = vmatprep.subr.bf16.mxu1 %v12152_v7  ;;  %v12239_v6 = vld [vmem:[%s17658_s1 + $0x1304] ss:$16 sps:$4 sm:$0xff]   ;;  %v12242_v7 = vld [vmem:[%s17658_s1 + $0x130c] ss:$16 sps:$4 sm:$0xff]  }
 0x227   :  { %8155 = vmatpush1.bf16.msra.mxu0 %v12147_v8  ;;  %8975 = vmatpush1.bf16.msra.mxu1 %v12150_v9  ;;  %v12237_v8 = vld [vmem:[%s17658_s1 + $0x1300] ss:$16 sps:$4 sm:$0xff]   ;;  %v12240_v9 = vld [vmem:[%s17658_s1 + $0x1308] ss:$16 sps:$4 sm:$0xff]  }
 0x228   :  { %8156 = vmatprep.subr.bf16.mxu0 %v12155_v10  ;;  %8976 = vmatprep.subr.bf16.mxu1 %v12158_v11  ;;  %v12245_v10 = vld [vmem:[%s17658_s1 + $0x1324] ss:$16 sps:$4 sm:$0xff]   ;;  %v12248_v11 = vld [vmem:[%s17658_s1 + $0x132c] ss:$16 sps:$4 sm:$0xff]  }
 0x22b   :  { %8157 = vmatpush1.bf16.msra.mxu0 %v12153_v12  ;;  %8977 = vmatpush1.bf16.msra.mxu1 %v12156_v13  ;;  %v12243_v12 = vld [vmem:[%s17658_s1 + $0x1320] ss:$16 sps:$4 sm:$0xff]   ;;  %v12246_v13 = vld [vmem:[%s17658_s1 + $0x1328] ss:$16 sps:$4 sm:$0xff]  }
 0x22c   :  { %8158 = vmatprep.subr.bf16.mxu0 %v12161_v14  ;;  %8978 = vmatprep.subr.bf16.mxu1 %v12164_v15  ;;  %v12251_v14 = vld [vmem:[%s17658_s1 + $0x1344] ss:$16 sps:$4 sm:$0xff]   ;;  %v12254_v15 = vld [vmem:[%s17658_s1 + $0x134c] ss:$16 sps:$4 sm:$0xff]  }
 0x22f   :  { %8159 = vmatpush1.bf16.msra.mxu0 %v12159_v16  ;;  %8979 = vmatpush1.bf16.msra.mxu1 %v12162_v17  ;;  %v12249_v16 = vld [vmem:[%s17658_s1 + $0x1340] ss:$16 sps:$4 sm:$0xff]   ;;  %v12252_v17 = vld [vmem:[%s17658_s1 + $0x1348] ss:$16 sps:$4 sm:$0xff]  }
 0x230   :  { %8160 = vmatprep.subr.bf16.mxu0 %v12167_v18  ;;  %8980 = vmatprep.subr.bf16.mxu1 %v12170_v19  ;;  %v12257_v18 = vld [vmem:[%s17658_s1 + $0x1364] ss:$16 sps:$4 sm:$0xff]   ;;  %v12260_v19 = vld [vmem:[%s17658_s1 + $0x136c] ss:$16 sps:$4 sm:$0xff]  }
 0x233   :  { %8161 = vmatpush1.bf16.msra.mxu0 %v12165_v20  ;;  %8981 = vmatpush1.bf16.msra.mxu1 %v12168_v21  ;;  %v12255_v20 = vld [vmem:[%s17658_s1 + $0x1360] ss:$16 sps:$4 sm:$0xff]   ;;  %v12258_v21 = vld [vmem:[%s17658_s1 + $0x1368] ss:$16 sps:$4 sm:$0xff]  }
 0x234   :  { %8162 = vmatprep.subr.bf16.mxu0 %v12173_v22  ;;  %8982 = vmatprep.subr.bf16.mxu1 %v12176_v23  ;;  %v12263_v22 = vld [vmem:[%s17658_s1 + $0x1384] ss:$16 sps:$4 sm:$0xff]   ;;  %v12266_v23 = vld [vmem:[%s17658_s1 + $0x138c] ss:$16 sps:$4 sm:$0xff]  }
 0x237   :  { %8163 = vmatpush1.bf16.msra.mxu0 %v12171_v24  ;;  %8983 = vmatpush1.bf16.msra.mxu1 %v12174_v25  ;;  %v12261_v24 = vld [vmem:[%s17658_s1 + $0x1380] ss:$16 sps:$4 sm:$0xff]   ;;  %v12264_v25 = vld [vmem:[%s17658_s1 + $0x1388] ss:$16 sps:$4 sm:$0xff]  }
 0x238   :  { %8164 = vmatprep.subr.bf16.mxu0 %v12179_v26  ;;  %8984 = vmatprep.subr.bf16.mxu1 %v12182_v27  ;;  %v12269_v26 = vld [vmem:[%s17658_s1 + $0x13a4] ss:$16 sps:$4 sm:$0xff]   ;;  %v12272_v27 = vld [vmem:[%s17658_s1 + $0x13ac] ss:$16 sps:$4 sm:$0xff]  }
 0x23b   :  { %8165 = vmatpush1.bf16.msra.mxu0 %v12177_v28  ;;  %8985 = vmatpush1.bf16.msra.mxu1 %v12180_v29  ;;  %v12267_v28 = vld [vmem:[%s17658_s1 + $0x13a0] ss:$16 sps:$4 sm:$0xff]   ;;  %v12270_v29 = vld [vmem:[%s17658_s1 + $0x13a8] ss:$16 sps:$4 sm:$0xff]  }
 0x23c   :  { %8166 = vmatprep.subr.bf16.mxu0 %v12185_v30  ;;  %8986 = vmatprep.subr.bf16.mxu1 %v12188_v31  ;;  %v12275_v30 = vld [vmem:[%s17658_s1 + $0x13c4] ss:$16 sps:$4 sm:$0xff]   ;;  %v12278_v31 = vld [vmem:[%s17658_s1 + $0x13cc] ss:$16 sps:$4 sm:$0xff]  }
 0x23f   :  { %8167 = vmatpush1.bf16.msra.mxu0 %v12183_v32  ;;  %8987 = vmatpush1.bf16.msra.mxu1 %v12186_v33  ;;  %v12273_v32 = vld [vmem:[%s17658_s1 + $0x13c0] ss:$16 sps:$4 sm:$0xff]   ;;  %v12276_v33 = vld [vmem:[%s17658_s1 + $0x13c8] ss:$16 sps:$4 sm:$0xff]  }
 0x240   :  { %8177 = vmatprep.subr.bf16.mxu0 %v12191_v34  ;;  %8997 = vmatprep.subr.bf16.mxu1 %v12194_v36  ;;  %v12281_v34 = vld [vmem:[%s17658_s1 + $0x13e4] ss:$16 sps:$4 sm:$0xff]   ;;  %v12279_v36 = vld [vmem:[%s17658_s1 + $0x13e0] ss:$16 sps:$4 sm:$0xff]  }
 0x242   :  { %8169 = vmatmul.mubr.bf16.vlgmr.msra.gmra.mrb[0].mxu0 %v82_v38  ;;  %8989 = vmatmul.mubr.bf16.vlgmr.msra.gmra.mrb[0].mxu1 %v82_v38  ;;  %v12287_v38 = vld [vmem:[%s17658_s1 + $0x1404] ss:$16 sps:$4 sm:$0xff]  }
 0x243   :  { %8178 = vmatpush1.bf16.msra.mxu0 %v12189_v39  ;;  %8998 = vmatpush1.bf16.msra.mxu1 %v12192_v40  ;;  %v44_v39 = vld [vmem:[%s17659_s0 + $0x90] sm:$0xff]  ;;  %v12290_v40 = vld [vmem:[%s17658_s1 + $0x140c] ss:$16 sps:$4 sm:$0xff]  }
 0x244   :  { %8179 = vmatprep.subr.bf16.mxu0 %v12197_v41  ;;  %8999 = vmatprep.subr.bf16.mxu1 %v12200_v42  ;;  %v47_v41 = vld [vmem:[%s17659_s0 + $0xa8] sm:$0xff]  ;;  %v84_v42 = vpack.c.bf16 %v44_v39, %v44_v39 }
 0x245   :  { %8209 = vmatprep.mubr.bf16.mxu0 %v85_v43  ;;  %9029 = vmatprep.mubr.bf16.mxu1 %v85_v43  ;;  %v12285_v43 = vld [vmem:[%s17658_s1 + $0x1400] ss:$16 sps:$4 sm:$0xff]   ;;  %v12380_v39 = vld [vmem:[%s17658_s1 + $0x15ec] ss:$16 sps:$4 sm:$0xff]  }
 0x247   :  { %8180 = vmatpush1.bf16.msra.mxu0 %v12195_v44  ;;  %9000 = vmatpush1.bf16.msra.mxu1 %v12198_v45  ;;  %v12288_v44 = vld [vmem:[%s17658_s1 + $0x1408] ss:$16 sps:$4 sm:$0xff]   ;;  %v12293_v45 = vld [vmem:[%s17658_s1 + $0x1424] ss:$16 sps:$4 sm:$0xff]  }
 0x248   :  { %8181 = vmatprep.subr.bf16.mxu0 %v12203_v46  ;;  %9001 = vmatprep.subr.bf16.mxu1 %v12206_v47  ;;  %v12296_v46 = vld [vmem:[%s17658_s1 + $0x142c] ss:$16 sps:$4 sm:$0xff]   ;;  %v87_v47 = vpack.c.bf16 %v47_v41, %v47_v41  ;;  %v12378_v41 = vld [vmem:[%s17658_s1 + $0x15e8] ss:$16 sps:$4 sm:$0xff]  }
 0x24b   :  { %8182 = vmatpush1.bf16.msra.mxu0 %v12201_v48  ;;  %9002 = vmatpush1.bf16.msra.mxu1 %v12204_v49  ;;  %v12291_v48 = vld [vmem:[%s17658_s1 + $0x1420] ss:$16 sps:$4 sm:$0xff]   ;;  %v12294_v49 = vld [vmem:[%s17658_s1 + $0x1428] ss:$16 sps:$4 sm:$0xff]  }
 0x24c   :  { %8183 = vmatprep.subr.bf16.mxu0 %v12209_v50  ;;  %9003 = vmatprep.subr.bf16.mxu1 %v12212_v51  ;;  %v12299_v50 = vld [vmem:[%s17658_s1 + $0x1444] ss:$16 sps:$4 sm:$0xff]   ;;  %v12302_v51 = vld [vmem:[%s17658_s1 + $0x144c] ss:$16 sps:$4 sm:$0xff]  }
 0x24f   :  { %8184 = vmatpush1.bf16.msra.mxu0 %v12207_v52  ;;  %9004 = vmatpush1.bf16.msra.mxu1 %v12210_v53  ;;  %v12297_v52 = vld [vmem:[%s17658_s1 + $0x1440] ss:$16 sps:$4 sm:$0xff]   ;;  %v12300_v53 = vld [vmem:[%s17658_s1 + $0x1448] ss:$16 sps:$4 sm:$0xff]  }
 0x250   :  { %8185 = vmatprep.subr.bf16.mxu0 %v12215_v54  ;;  %9005 = vmatprep.subr.bf16.mxu1 %v12218_v55  ;;  %v12305_v54 = vld [vmem:[%s17658_s1 + $0x1464] ss:$16 sps:$4 sm:$0xff]   ;;  %v12308_v55 = vld [vmem:[%s17658_s1 + $0x146c] ss:$16 sps:$4 sm:$0xff]  }
 0x253   :  { %8186 = vmatpush1.bf16.msra.mxu0 %v12213_v56  ;;  %9006 = vmatpush1.bf16.msra.mxu1 %v12216_v57  ;;  %v12303_v56 = vld [vmem:[%s17658_s1 + $0x1460] ss:$16 sps:$4 sm:$0xff]   ;;  %v12306_v57 = vld [vmem:[%s17658_s1 + $0x1468] ss:$16 sps:$4 sm:$0xff]  }
 0x254   :  { %8187 = vmatprep.subr.bf16.mxu0 %v12221_v58  ;;  %9007 = vmatprep.subr.bf16.mxu1 %v12224_v59  ;;  %v12311_v58 = vld [vmem:[%s17658_s1 + $0x1484] ss:$16 sps:$4 sm:$0xff]   ;;  %v12314_v59 = vld [vmem:[%s17658_s1 + $0x148c] ss:$16 sps:$4 sm:$0xff]  }
 0x257   :  { %8188 = vmatpush1.bf16.msra.mxu0 %v12219_v60  ;;  %9008 = vmatpush1.bf16.msra.mxu1 %v12222_v61  ;;  %v12309_v60 = vld [vmem:[%s17658_s1 + $0x1480] ss:$16 sps:$4 sm:$0xff]   ;;  %v12312_v61 = vld [vmem:[%s17658_s1 + $0x1488] ss:$16 sps:$4 sm:$0xff]  }
 0x258   :  { %8189 = vmatprep.subr.bf16.mxu0 %v12227_v62  ;;  %9009 = vmatprep.subr.bf16.mxu1 %v12230_v63  ;;  %v12317_v62 = vld [vmem:[%s17658_s1 + $0x14a4] ss:$16 sps:$4 sm:$0xff]   ;;  %v12320_v63 = vld [vmem:[%s17658_s1 + $0x14ac] ss:$16 sps:$4 sm:$0xff]  }
 0x25b   :  { %8190 = vmatpush1.bf16.msra.mxu0 %v12225_v0  ;;  %9010 = vmatpush1.bf16.msra.mxu1 %v12228_v1  ;;  %v12315_v0 = vld [vmem:[%s17658_s1 + $0x14a0] ss:$16 sps:$4 sm:$0xff]   ;;  %v12318_v1 = vld [vmem:[%s17658_s1 + $0x14a8] ss:$16 sps:$4 sm:$0xff]  }
 0x25c   :  { %8191 = vmatprep.subr.bf16.mxu0 %v12233_v2  ;;  %9011 = vmatprep.subr.bf16.mxu1 %v12236_v3  ;;  %v12323_v2 = vld [vmem:[%s17658_s1 + $0x14c4] ss:$16 sps:$4 sm:$0xff]   ;;  %v12326_v3 = vld [vmem:[%s17658_s1 + $0x14cc] ss:$16 sps:$4 sm:$0xff]  }
 0x25f   :  { %8192 = vmatpush1.bf16.msra.mxu0 %v12231_v4  ;;  %9012 = vmatpush1.bf16.msra.mxu1 %v12234_v5  ;;  %v12321_v4 = vld [vmem:[%s17658_s1 + $0x14c0] ss:$16 sps:$4 sm:$0xff]   ;;  %v12324_v5 = vld [vmem:[%s17658_s1 + $0x14c8] ss:$16 sps:$4 sm:$0xff]  }
 0x260   :  { %8193 = vmatprep.subr.bf16.mxu0 %v12239_v6  ;;  %9013 = vmatprep.subr.bf16.mxu1 %v12242_v7  ;;  %v12329_v6 = vld [vmem:[%s17658_s1 + $0x14e4] ss:$16 sps:$4 sm:$0xff]   ;;  %v12332_v7 = vld [vmem:[%s17658_s1 + $0x14ec] ss:$16 sps:$4 sm:$0xff]  }
 0x263   :  { %8194 = vmatpush1.bf16.msra.mxu0 %v12237_v8  ;;  %9014 = vmatpush1.bf16.msra.mxu1 %v12240_v9  ;;  %v12327_v8 = vld [vmem:[%s17658_s1 + $0x14e0] ss:$16 sps:$4 sm:$0xff]   ;;  %v12330_v9 = vld [vmem:[%s17658_s1 + $0x14e8] ss:$16 sps:$4 sm:$0xff]  }
 0x264   :  { %8195 = vmatprep.subr.bf16.mxu0 %v12245_v10  ;;  %9015 = vmatprep.subr.bf16.mxu1 %v12248_v11  ;;  %v12335_v10 = vld [vmem:[%s17658_s1 + $0x1504] ss:$16 sps:$4 sm:$0xff]   ;;  %v12338_v11 = vld [vmem:[%s17658_s1 + $0x150c] ss:$16 sps:$4 sm:$0xff]  }
 0x267   :  { %8196 = vmatpush1.bf16.msra.mxu0 %v12243_v12  ;;  %9016 = vmatpush1.bf16.msra.mxu1 %v12246_v13  ;;  %v12333_v12 = vld [vmem:[%s17658_s1 + $0x1500] ss:$16 sps:$4 sm:$0xff]   ;;  %v12336_v13 = vld [vmem:[%s17658_s1 + $0x1508] ss:$16 sps:$4 sm:$0xff]  }
 0x268   :  { %8197 = vmatprep.subr.bf16.mxu0 %v12251_v14  ;;  %9017 = vmatprep.subr.bf16.mxu1 %v12254_v15  ;;  %v12341_v14 = vld [vmem:[%s17658_s1 + $0x1524] ss:$16 sps:$4 sm:$0xff]   ;;  %v12344_v15 = vld [vmem:[%s17658_s1 + $0x152c] ss:$16 sps:$4 sm:$0xff]  }
 0x26b   :  { %8198 = vmatpush1.bf16.msra.mxu0 %v12249_v16  ;;  %9018 = vmatpush1.bf16.msra.mxu1 %v12252_v17  ;;  %v12339_v16 = vld [vmem:[%s17658_s1 + $0x1520] ss:$16 sps:$4 sm:$0xff]   ;;  %v12342_v17 = vld [vmem:[%s17658_s1 + $0x1528] ss:$16 sps:$4 sm:$0xff]  }
 0x26c   :  { %8199 = vmatprep.subr.bf16.mxu0 %v12257_v18  ;;  %9019 = vmatprep.subr.bf16.mxu1 %v12260_v19  ;;  %v12347_v18 = vld [vmem:[%s17658_s1 + $0x1544] ss:$16 sps:$4 sm:$0xff]   ;;  %v12350_v19 = vld [vmem:[%s17658_s1 + $0x154c] ss:$16 sps:$4 sm:$0xff]  }
 0x26f   :  { %8200 = vmatpush1.bf16.msra.mxu0 %v12255_v20  ;;  %9020 = vmatpush1.bf16.msra.mxu1 %v12258_v21  ;;  %v12345_v20 = vld [vmem:[%s17658_s1 + $0x1540] ss:$16 sps:$4 sm:$0xff]   ;;  %v12348_v21 = vld [vmem:[%s17658_s1 + $0x1548] ss:$16 sps:$4 sm:$0xff]  }
 0x270   :  { %8201 = vmatprep.subr.bf16.mxu0 %v12263_v22  ;;  %9021 = vmatprep.subr.bf16.mxu1 %v12266_v23  ;;  %v12353_v22 = vld [vmem:[%s17658_s1 + $0x1564] ss:$16 sps:$4 sm:$0xff]   ;;  %v12356_v23 = vld [vmem:[%s17658_s1 + $0x156c] ss:$16 sps:$4 sm:$0xff]  }
 0x273   :  { %8202 = vmatpush1.bf16.msra.mxu0 %v12261_v24  ;;  %9022 = vmatpush1.bf16.msra.mxu1 %v12264_v25  ;;  %v12351_v24 = vld [vmem:[%s17658_s1 + $0x1560] ss:$16 sps:$4 sm:$0xff]   ;;  %v12354_v25 = vld [vmem:[%s17658_s1 + $0x1568] ss:$16 sps:$4 sm:$0xff]  }
 0x274   :  { %8203 = vmatprep.subr.bf16.mxu0 %v12269_v26  ;;  %9023 = vmatprep.subr.bf16.mxu1 %v12272_v27  ;;  %v12359_v26 = vld [vmem:[%s17658_s1 + $0x1584] ss:$16 sps:$4 sm:$0xff]   ;;  %v12362_v27 = vld [vmem:[%s17658_s1 + $0x158c] ss:$16 sps:$4 sm:$0xff]  }
 0x277   :  { %8204 = vmatpush1.bf16.msra.mxu0 %v12267_v28  ;;  %9024 = vmatpush1.bf16.msra.mxu1 %v12270_v29  ;;  %v12357_v28 = vld [vmem:[%s17658_s1 + $0x1580] ss:$16 sps:$4 sm:$0xff]   ;;  %v12360_v29 = vld [vmem:[%s17658_s1 + $0x1588] ss:$16 sps:$4 sm:$0xff]  }
 0x278   :  { %8205 = vmatprep.subr.bf16.mxu0 %v12275_v30  ;;  %9025 = vmatprep.subr.bf16.mxu1 %v12278_v31  ;;  %v12365_v30 = vld [vmem:[%s17658_s1 + $0x15a4] ss:$16 sps:$4 sm:$0xff]   ;;  %v12368_v31 = vld [vmem:[%s17658_s1 + $0x15ac] ss:$16 sps:$4 sm:$0xff]  }
 0x27b   :  { %8206 = vmatpush1.bf16.msra.mxu0 %v12273_v32  ;;  %9026 = vmatpush1.bf16.msra.mxu1 %v12276_v33  ;;  %v12363_v32 = vld [vmem:[%s17658_s1 + $0x15a0] ss:$16 sps:$4 sm:$0xff]   ;;  %v12366_v33 = vld [vmem:[%s17658_s1 + $0x15a8] ss:$16 sps:$4 sm:$0xff]  }
 0x27c   :  { %8207 = vmatprep.subr.bf16.mxu0 %v12281_v34  ;;  %9027 = vmatprep.subr.bf16.mxu1 %v12284_v35  ;;  %v12371_v34 = vld [vmem:[%s17658_s1 + $0x15c4] ss:$16 sps:$4 sm:$0xff]   ;;  %v12374_v35 = vld [vmem:[%s17658_s1 + $0x15cc] ss:$16 sps:$4 sm:$0xff]  }
 0x27f   :  { %8208 = vmatpush1.bf16.msra.mxu0 %v12279_v36  ;;  %9028 = vmatpush1.bf16.msra.mxu1 %v12282_v37  ;;  %v12369_v36 = vld [vmem:[%s17658_s1 + $0x15c0] ss:$16 sps:$4 sm:$0xff]   ;;  %v12372_v37 = vld [vmem:[%s17658_s1 + $0x15c8] ss:$16 sps:$4 sm:$0xff]  }
 0x280   :  { %8218 = vmatprep.subr.bf16.mxu0 %v12287_v38  ;;  %9038 = vmatprep.subr.bf16.mxu1 %v12290_v40  ;;  %v12377_v38 = vld [vmem:[%s17658_s1 + $0x15e4] ss:$16 sps:$4 sm:$0xff]   ;;  %v12375_v40 = vld [vmem:[%s17658_s1 + $0x15e0] ss:$16 sps:$4 sm:$0xff]  }
 0x282   :  { %8210 = vmatmul.mubr.bf16.vlgmr.msra.gmra.mrb[0].mxu0 %v84_v42  ;;  %9030 = vmatmul.mubr.bf16.vlgmr.msra.gmra.mrb[0].mxu1 %v84_v42  ;;  %v12383_v42 = vld [vmem:[%s17658_s1 + $0x1604] ss:$16 sps:$4 sm:$0xff]  }
 0x283   :  { %8219 = vmatpush1.bf16.msra.mxu0 %v12285_v43  ;;  %9039 = vmatpush1.bf16.msra.mxu1 %v12288_v44  ;;  %v46_v43 = vld [vmem:[%s17659_s0 + $0xa0] sm:$0xff]  ;;  %v12386_v44 = vld [vmem:[%s17658_s1 + $0x160c] ss:$16 sps:$4 sm:$0xff]  }
 0x284   :  { %8220 = vmatprep.subr.bf16.mxu0 %v12293_v45  ;;  %9040 = vmatprep.subr.bf16.mxu1 %v12296_v46  ;;  %v49_v45 = vld [vmem:[%s17659_s0 + $0xb8] sm:$0xff]  ;;  %v86_v46 = vpack.c.bf16 %v46_v43, %v46_v43 }
 0x285   :  { %8250 = vmatprep.mubr.bf16.mxu0 %v87_v47  ;;  %9070 = vmatprep.mubr.bf16.mxu1 %v87_v47  ;;  %v12381_v47 = vld [vmem:[%s17658_s1 + $0x1600] ss:$16 sps:$4 sm:$0xff]   ;;  %v12476_v43 = vld [vmem:[%s17658_s1 + $0x17ec] ss:$16 sps:$4 sm:$0xff]  }
 0x287   :  { %8221 = vmatpush1.bf16.msra.mxu0 %v12291_v48  ;;  %9041 = vmatpush1.bf16.msra.mxu1 %v12294_v49  ;;  %v12384_v48 = vld [vmem:[%s17658_s1 + $0x1608] ss:$16 sps:$4 sm:$0xff]   ;;  %v12389_v49 = vld [vmem:[%s17658_s1 + $0x1624] ss:$16 sps:$4 sm:$0xff]  }
 0x288   :  { %8222 = vmatprep.subr.bf16.mxu0 %v12299_v50  ;;  %9042 = vmatprep.subr.bf16.mxu1 %v12302_v51  ;;  %v12392_v50 = vld [vmem:[%s17658_s1 + $0x162c] ss:$16 sps:$4 sm:$0xff]   ;;  %v89_v51 = vpack.c.bf16 %v49_v45, %v49_v45  ;;  %v12474_v45 = vld [vmem:[%s17658_s1 + $0x17e8] ss:$16 sps:$4 sm:$0xff]  }
 0x28b   :  { %8223 = vmatpush1.bf16.msra.mxu0 %v12297_v52  ;;  %9043 = vmatpush1.bf16.msra.mxu1 %v12300_v53  ;;  %v12387_v52 = vld [vmem:[%s17658_s1 + $0x1620] ss:$16 sps:$4 sm:$0xff]   ;;  %v12390_v53 = vld [vmem:[%s17658_s1 + $0x1628] ss:$16 sps:$4 sm:$0xff]  }
 0x28c   :  { %8224 = vmatprep.subr.bf16.mxu0 %v12305_v54  ;;  %9044 = vmatprep.subr.bf16.mxu1 %v12308_v55  ;;  %v12395_v54 = vld [vmem:[%s17658_s1 + $0x1644] ss:$16 sps:$4 sm:$0xff]   ;;  %v12398_v55 = vld [vmem:[%s17658_s1 + $0x164c] ss:$16 sps:$4 sm:$0xff]  }
 0x28f   :  { %8225 = vmatpush1.bf16.msra.mxu0 %v12303_v56  ;;  %9045 = vmatpush1.bf16.msra.mxu1 %v12306_v57  ;;  %v12393_v56 = vld [vmem:[%s17658_s1 + $0x1640] ss:$16 sps:$4 sm:$0xff]   ;;  %v12396_v57 = vld [vmem:[%s17658_s1 + $0x1648] ss:$16 sps:$4 sm:$0xff]  }
 0x290   :  { %8226 = vmatprep.subr.bf16.mxu0 %v12311_v58  ;;  %9046 = vmatprep.subr.bf16.mxu1 %v12314_v59  ;;  %v12401_v58 = vld [vmem:[%s17658_s1 + $0x1664] ss:$16 sps:$4 sm:$0xff]   ;;  %v12404_v59 = vld [vmem:[%s17658_s1 + $0x166c] ss:$16 sps:$4 sm:$0xff]  }
 0x293   :  { %8227 = vmatpush1.bf16.msra.mxu0 %v12309_v60  ;;  %9047 = vmatpush1.bf16.msra.mxu1 %v12312_v61  ;;  %v12399_v60 = vld [vmem:[%s17658_s1 + $0x1660] ss:$16 sps:$4 sm:$0xff]   ;;  %v12402_v61 = vld [vmem:[%s17658_s1 + $0x1668] ss:$16 sps:$4 sm:$0xff]  }
 0x294   :  { %8228 = vmatprep.subr.bf16.mxu0 %v12317_v62  ;;  %9048 = vmatprep.subr.bf16.mxu1 %v12320_v63  ;;  %v12407_v62 = vld [vmem:[%s17658_s1 + $0x1684] ss:$16 sps:$4 sm:$0xff]   ;;  %v12410_v63 = vld [vmem:[%s17658_s1 + $0x168c] ss:$16 sps:$4 sm:$0xff]  }
 0x297   :  { %8229 = vmatpush1.bf16.msra.mxu0 %v12315_v0  ;;  %9049 = vmatpush1.bf16.msra.mxu1 %v12318_v1  ;;  %v12405_v0 = vld [vmem:[%s17658_s1 + $0x1680] ss:$16 sps:$4 sm:$0xff]   ;;  %v12408_v1 = vld [vmem:[%s17658_s1 + $0x1688] ss:$16 sps:$4 sm:$0xff]  }
 0x298   :  { %8230 = vmatprep.subr.bf16.mxu0 %v12323_v2  ;;  %9050 = vmatprep.subr.bf16.mxu1 %v12326_v3  ;;  %v12413_v2 = vld [vmem:[%s17658_s1 + $0x16a4] ss:$16 sps:$4 sm:$0xff]   ;;  %v12416_v3 = vld [vmem:[%s17658_s1 + $0x16ac] ss:$16 sps:$4 sm:$0xff]  }
 0x29b   :  { %8231 = vmatpush1.bf16.msra.mxu0 %v12321_v4  ;;  %9051 = vmatpush1.bf16.msra.mxu1 %v12324_v5  ;;  %v12411_v4 = vld [vmem:[%s17658_s1 + $0x16a0] ss:$16 sps:$4 sm:$0xff]   ;;  %v12414_v5 = vld [vmem:[%s17658_s1 + $0x16a8] ss:$16 sps:$4 sm:$0xff]  }
 0x29c   :  { %8232 = vmatprep.subr.bf16.mxu0 %v12329_v6  ;;  %9052 = vmatprep.subr.bf16.mxu1 %v12332_v7  ;;  %v12419_v6 = vld [vmem:[%s17658_s1 + $0x16c4] ss:$16 sps:$4 sm:$0xff]   ;;  %v12422_v7 = vld [vmem:[%s17658_s1 + $0x16cc] ss:$16 sps:$4 sm:$0xff]  }
 0x29f   :  { %8233 = vmatpush1.bf16.msra.mxu0 %v12327_v8  ;;  %9053 = vmatpush1.bf16.msra.mxu1 %v12330_v9  ;;  %v12417_v8 = vld [vmem:[%s17658_s1 + $0x16c0] ss:$16 sps:$4 sm:$0xff]   ;;  %v12420_v9 = vld [vmem:[%s17658_s1 + $0x16c8] ss:$16 sps:$4 sm:$0xff]  }
 0x2a0   :  { %8234 = vmatprep.subr.bf16.mxu0 %v12335_v10  ;;  %9054 = vmatprep.subr.bf16.mxu1 %v12338_v11  ;;  %v12425_v10 = vld [vmem:[%s17658_s1 + $0x16e4] ss:$16 sps:$4 sm:$0xff]   ;;  %v12428_v11 = vld [vmem:[%s17658_s1 + $0x16ec] ss:$16 sps:$4 sm:$0xff]  }
 0x2a3   :  { %8235 = vmatpush1.bf16.msra.mxu0 %v12333_v12  ;;  %9055 = vmatpush1.bf16.msra.mxu1 %v12336_v13  ;;  %v12423_v12 = vld [vmem:[%s17658_s1 + $0x16e0] ss:$16 sps:$4 sm:$0xff]   ;;  %v12426_v13 = vld [vmem:[%s17658_s1 + $0x16e8] ss:$16 sps:$4 sm:$0xff]  }
 0x2a4   :  { %8236 = vmatprep.subr.bf16.mxu0 %v12341_v14  ;;  %9056 = vmatprep.subr.bf16.mxu1 %v12344_v15  ;;  %v12431_v14 = vld [vmem:[%s17658_s1 + $0x1704] ss:$16 sps:$4 sm:$0xff]   ;;  %v12434_v15 = vld [vmem:[%s17658_s1 + $0x170c] ss:$16 sps:$4 sm:$0xff]  }
 0x2a7   :  { %8237 = vmatpush1.bf16.msra.mxu0 %v12339_v16  ;;  %9057 = vmatpush1.bf16.msra.mxu1 %v12342_v17  ;;  %v12429_v16 = vld [vmem:[%s17658_s1 + $0x1700] ss:$16 sps:$4 sm:$0xff]   ;;  %v12432_v17 = vld [vmem:[%s17658_s1 + $0x1708] ss:$16 sps:$4 sm:$0xff]  }
 0x2a8   :  { %8238 = vmatprep.subr.bf16.mxu0 %v12347_v18  ;;  %9058 = vmatprep.subr.bf16.mxu1 %v12350_v19  ;;  %v12437_v18 = vld [vmem:[%s17658_s1 + $0x1724] ss:$16 sps:$4 sm:$0xff]   ;;  %v12440_v19 = vld [vmem:[%s17658_s1 + $0x172c] ss:$16 sps:$4 sm:$0xff]  }
 0x2ab   :  { %8239 = vmatpush1.bf16.msra.mxu0 %v12345_v20  ;;  %9059 = vmatpush1.bf16.msra.mxu1 %v12348_v21  ;;  %v12435_v20 = vld [vmem:[%s17658_s1 + $0x1720] ss:$16 sps:$4 sm:$0xff]   ;;  %v12438_v21 = vld [vmem:[%s17658_s1 + $0x1728] ss:$16 sps:$4 sm:$0xff]  }
 0x2ac   :  { %8240 = vmatprep.subr.bf16.mxu0 %v12353_v22  ;;  %9060 = vmatprep.subr.bf16.mxu1 %v12356_v23  ;;  %v12443_v22 = vld [vmem:[%s17658_s1 + $0x1744] ss:$16 sps:$4 sm:$0xff]   ;;  %v12446_v23 = vld [vmem:[%s17658_s1 + $0x174c] ss:$16 sps:$4 sm:$0xff]  }
 0x2af   :  { %8241 = vmatpush1.bf16.msra.mxu0 %v12351_v24  ;;  %9061 = vmatpush1.bf16.msra.mxu1 %v12354_v25  ;;  %v12441_v24 = vld [vmem:[%s17658_s1 + $0x1740] ss:$16 sps:$4 sm:$0xff]   ;;  %v12444_v25 = vld [vmem:[%s17658_s1 + $0x1748] ss:$16 sps:$4 sm:$0xff]  }
 0x2b0   :  { %8242 = vmatprep.subr.bf16.mxu0 %v12359_v26  ;;  %9062 = vmatprep.subr.bf16.mxu1 %v12362_v27  ;;  %v12449_v26 = vld [vmem:[%s17658_s1 + $0x1764] ss:$16 sps:$4 sm:$0xff]   ;;  %v12452_v27 = vld [vmem:[%s17658_s1 + $0x176c] ss:$16 sps:$4 sm:$0xff]  }
 0x2b3   :  { %8243 = vmatpush1.bf16.msra.mxu0 %v12357_v28  ;;  %9063 = vmatpush1.bf16.msra.mxu1 %v12360_v29  ;;  %v12447_v28 = vld [vmem:[%s17658_s1 + $0x1760] ss:$16 sps:$4 sm:$0xff]   ;;  %v12450_v29 = vld [vmem:[%s17658_s1 + $0x1768] ss:$16 sps:$4 sm:$0xff]  }
 0x2b4   :  { %8244 = vmatprep.subr.bf16.mxu0 %v12365_v30  ;;  %9064 = vmatprep.subr.bf16.mxu1 %v12368_v31  ;;  %v12455_v30 = vld [vmem:[%s17658_s1 + $0x1784] ss:$16 sps:$4 sm:$0xff]   ;;  %v12458_v31 = vld [vmem:[%s17658_s1 + $0x178c] ss:$16 sps:$4 sm:$0xff]  }
 0x2b7   :  { %8245 = vmatpush1.bf16.msra.mxu0 %v12363_v32  ;;  %9065 = vmatpush1.bf16.msra.mxu1 %v12366_v33  ;;  %v12453_v32 = vld [vmem:[%s17658_s1 + $0x1780] ss:$16 sps:$4 sm:$0xff]   ;;  %v12456_v33 = vld [vmem:[%s17658_s1 + $0x1788] ss:$16 sps:$4 sm:$0xff]  }
 0x2b8   :  { %8246 = vmatprep.subr.bf16.mxu0 %v12371_v34  ;;  %9066 = vmatprep.subr.bf16.mxu1 %v12374_v35  ;;  %v12461_v34 = vld [vmem:[%s17658_s1 + $0x17a4] ss:$16 sps:$4 sm:$0xff]   ;;  %v12464_v35 = vld [vmem:[%s17658_s1 + $0x17ac] ss:$16 sps:$4 sm:$0xff]  }
 0x2bb   :  { %8247 = vmatpush1.bf16.msra.mxu0 %v12369_v36  ;;  %9067 = vmatpush1.bf16.msra.mxu1 %v12372_v37  ;;  %v12459_v36 = vld [vmem:[%s17658_s1 + $0x17a0] ss:$16 sps:$4 sm:$0xff]   ;;  %v12462_v37 = vld [vmem:[%s17658_s1 + $0x17a8] ss:$16 sps:$4 sm:$0xff]  }
 0x2bc   :  { %8248 = vmatprep.subr.bf16.mxu0 %v12377_v38  ;;  %9068 = vmatprep.subr.bf16.mxu1 %v12380_v39  ;;  %v12467_v38 = vld [vmem:[%s17658_s1 + $0x17c4] ss:$16 sps:$4 sm:$0xff]   ;;  %v12470_v39 = vld [vmem:[%s17658_s1 + $0x17cc] ss:$16 sps:$4 sm:$0xff]  }
 0x2bf   :  { %8249 = vmatpush1.bf16.msra.mxu0 %v12375_v40  ;;  %9069 = vmatpush1.bf16.msra.mxu1 %v12378_v41  ;;  %v12465_v40 = vld [vmem:[%s17658_s1 + $0x17c0] ss:$16 sps:$4 sm:$0xff]   ;;  %v12468_v41 = vld [vmem:[%s17658_s1 + $0x17c8] ss:$16 sps:$4 sm:$0xff]  }
 0x2c0   :  { %8259 = vmatprep.subr.bf16.mxu0 %v12383_v42  ;;  %9079 = vmatprep.subr.bf16.mxu1 %v12386_v44  ;;  %v12473_v42 = vld [vmem:[%s17658_s1 + $0x17e4] ss:$16 sps:$4 sm:$0xff]   ;;  %v12471_v44 = vld [vmem:[%s17658_s1 + $0x17e0] ss:$16 sps:$4 sm:$0xff]  }
 0x2c2   :  { %8251 = vmatmul.mubr.bf16.vlgmr.msra.gmra.mrb[0].mxu0 %v86_v46  ;;  %9071 = vmatmul.mubr.bf16.vlgmr.msra.gmra.mrb[0].mxu1 %v86_v46  ;;  %v48_v46 = vld [vmem:[%s17659_s0 + $0xb0] sm:$0xff] }
 0x2c3   :  { %8260 = vmatpush1.bf16.msra.mxu0 %v12381_v47  ;;  %9080 = vmatpush1.bf16.msra.mxu1 %v12384_v48  ;;  %v12479_v47 = vld [vmem:[%s17658_s1 + $0x1804] ss:$16 sps:$4 sm:$0xff]   ;;  %v12482_v48 = vld [vmem:[%s17658_s1 + $0x180c] ss:$16 sps:$4 sm:$0xff]  }
 0x2c4   :  { %8261 = vmatprep.subr.bf16.mxu0 %v12389_v49  ;;  %9081 = vmatprep.subr.bf16.mxu1 %v12392_v50  ;;  %v88_v49 = vpack.c.bf16 %v48_v46, %v48_v46  ;;  %v51_v50 = vld [vmem:[%s17659_s0 + $0xc8] sm:$0xff]  ;;  %v12569_v46 = vld [vmem:[%s17658_s1 + $0x19e4] ss:$16 sps:$4 sm:$0xff]  }
 0x2c5   :  { %8291 = vmatprep.mubr.bf16.mxu0 %v89_v51  ;;  %9111 = vmatprep.mubr.bf16.mxu1 %v89_v51  ;;  %v12477_v51 = vld [vmem:[%s17658_s1 + $0x1800] ss:$16 sps:$4 sm:$0xff]  }
 0x2c7   :  { %8262 = vmatpush1.bf16.msra.mxu0 %v12387_v52  ;;  %9082 = vmatpush1.bf16.msra.mxu1 %v12390_v53  ;;  %v12480_v52 = vld [vmem:[%s17658_s1 + $0x1808] ss:$16 sps:$4 sm:$0xff]   ;;  %v12485_v53 = vld [vmem:[%s17658_s1 + $0x1824] ss:$16 sps:$4 sm:$0xff]  }
 0x2c8   :  { %8263 = vmatprep.subr.bf16.mxu0 %v12395_v54  ;;  %9083 = vmatprep.subr.bf16.mxu1 %v12398_v55  ;;  %v12488_v54 = vld [vmem:[%s17658_s1 + $0x182c] ss:$16 sps:$4 sm:$0xff]   ;;  %v91_v55 = vpack.c.bf16 %v51_v50, %v51_v50  ;;  %v50_v50 = vld [vmem:[%s17659_s0 + $0xc0] sm:$0xff] }
 0x2cb   :  { %8264 = vmatpush1.bf16.msra.mxu0 %v12393_v56  ;;  %9084 = vmatpush1.bf16.msra.mxu1 %v12396_v57  ;;  %v12483_v56 = vld [vmem:[%s17658_s1 + $0x1820] ss:$16 sps:$4 sm:$0xff]   ;;  %v12486_v57 = vld [vmem:[%s17658_s1 + $0x1828] ss:$16 sps:$4 sm:$0xff]  }
 0x2cc   :  { %8265 = vmatprep.subr.bf16.mxu0 %v12401_v58  ;;  %9085 = vmatprep.subr.bf16.mxu1 %v12404_v59  ;;  %v12491_v58 = vld [vmem:[%s17658_s1 + $0x1844] ss:$16 sps:$4 sm:$0xff]   ;;  %v12494_v59 = vld [vmem:[%s17658_s1 + $0x184c] ss:$16 sps:$4 sm:$0xff]  }
 0x2cf   :  { %8266 = vmatpush1.bf16.msra.mxu0 %v12399_v60  ;;  %9086 = vmatpush1.bf16.msra.mxu1 %v12402_v61  ;;  %v12489_v60 = vld [vmem:[%s17658_s1 + $0x1840] ss:$16 sps:$4 sm:$0xff]   ;;  %v12492_v61 = vld [vmem:[%s17658_s1 + $0x1848] ss:$16 sps:$4 sm:$0xff]  }
 0x2d0   :  { %8267 = vmatprep.subr.bf16.mxu0 %v12407_v62  ;;  %9087 = vmatprep.subr.bf16.mxu1 %v12410_v63  ;;  %v12497_v62 = vld [vmem:[%s17658_s1 + $0x1864] ss:$16 sps:$4 sm:$0xff]   ;;  %v12500_v63 = vld [vmem:[%s17658_s1 + $0x186c] ss:$16 sps:$4 sm:$0xff]  }
 0x2d3   :  { %8268 = vmatpush1.bf16.msra.mxu0 %v12405_v0  ;;  %9088 = vmatpush1.bf16.msra.mxu1 %v12408_v1  ;;  %v12495_v0 = vld [vmem:[%s17658_s1 + $0x1860] ss:$16 sps:$4 sm:$0xff]   ;;  %v12498_v1 = vld [vmem:[%s17658_s1 + $0x1868] ss:$16 sps:$4 sm:$0xff]  }
 0x2d4   :  { %8269 = vmatprep.subr.bf16.mxu0 %v12413_v2  ;;  %9089 = vmatprep.subr.bf16.mxu1 %v12416_v3  ;;  %v12503_v2 = vld [vmem:[%s17658_s1 + $0x1884] ss:$16 sps:$4 sm:$0xff]   ;;  %v12506_v3 = vld [vmem:[%s17658_s1 + $0x188c] ss:$16 sps:$4 sm:$0xff]  }
 0x2d7   :  { %8270 = vmatpush1.bf16.msra.mxu0 %v12411_v4  ;;  %9090 = vmatpush1.bf16.msra.mxu1 %v12414_v5  ;;  %v12501_v4 = vld [vmem:[%s17658_s1 + $0x1880] ss:$16 sps:$4 sm:$0xff]   ;;  %v12504_v5 = vld [vmem:[%s17658_s1 + $0x1888] ss:$16 sps:$4 sm:$0xff]  }
 0x2d8   :  { %8271 = vmatprep.subr.bf16.mxu0 %v12419_v6  ;;  %9091 = vmatprep.subr.bf16.mxu1 %v12422_v7  ;;  %v12509_v6 = vld [vmem:[%s17658_s1 + $0x18a4] ss:$16 sps:$4 sm:$0xff]   ;;  %v12512_v7 = vld [vmem:[%s17658_s1 + $0x18ac] ss:$16 sps:$4 sm:$0xff]  }
 0x2db   :  { %8272 = vmatpush1.bf16.msra.mxu0 %v12417_v8  ;;  %9092 = vmatpush1.bf16.msra.mxu1 %v12420_v9  ;;  %v12507_v8 = vld [vmem:[%s17658_s1 + $0x18a0] ss:$16 sps:$4 sm:$0xff]   ;;  %v12510_v9 = vld [vmem:[%s17658_s1 + $0x18a8] ss:$16 sps:$4 sm:$0xff]  }
 0x2dc   :  { %8273 = vmatprep.subr.bf16.mxu0 %v12425_v10  ;;  %9093 = vmatprep.subr.bf16.mxu1 %v12428_v11  ;;  %v12515_v10 = vld [vmem:[%s17658_s1 + $0x18c4] ss:$16 sps:$4 sm:$0xff]   ;;  %v12518_v11 = vld [vmem:[%s17658_s1 + $0x18cc] ss:$16 sps:$4 sm:$0xff]  }
 0x2df   :  { %8274 = vmatpush1.bf16.msra.mxu0 %v12423_v12  ;;  %9094 = vmatpush1.bf16.msra.mxu1 %v12426_v13  ;;  %v12513_v12 = vld [vmem:[%s17658_s1 + $0x18c0] ss:$16 sps:$4 sm:$0xff]   ;;  %v12516_v13 = vld [vmem:[%s17658_s1 + $0x18c8] ss:$16 sps:$4 sm:$0xff]  }
 0x2e0   :  { %8275 = vmatprep.subr.bf16.mxu0 %v12431_v14  ;;  %9095 = vmatprep.subr.bf16.mxu1 %v12434_v15  ;;  %v12521_v14 = vld [vmem:[%s17658_s1 + $0x18e4] ss:$16 sps:$4 sm:$0xff]   ;;  %v12524_v15 = vld [vmem:[%s17658_s1 + $0x18ec] ss:$16 sps:$4 sm:$0xff]  }
 0x2e3   :  { %8276 = vmatpush1.bf16.msra.mxu0 %v12429_v16  ;;  %9096 = vmatpush1.bf16.msra.mxu1 %v12432_v17  ;;  %v12519_v16 = vld [vmem:[%s17658_s1 + $0x18e0] ss:$16 sps:$4 sm:$0xff]   ;;  %v12522_v17 = vld [vmem:[%s17658_s1 + $0x18e8] ss:$16 sps:$4 sm:$0xff]  }
 0x2e4   :  { %8277 = vmatprep.subr.bf16.mxu0 %v12437_v18  ;;  %9097 = vmatprep.subr.bf16.mxu1 %v12440_v19  ;;  %v12527_v18 = vld [vmem:[%s17658_s1 + $0x1904] ss:$16 sps:$4 sm:$0xff]   ;;  %v12530_v19 = vld [vmem:[%s17658_s1 + $0x190c] ss:$16 sps:$4 sm:$0xff]  }
 0x2e7   :  { %8278 = vmatpush1.bf16.msra.mxu0 %v12435_v20  ;;  %9098 = vmatpush1.bf16.msra.mxu1 %v12438_v21  ;;  %v12525_v20 = vld [vmem:[%s17658_s1 + $0x1900] ss:$16 sps:$4 sm:$0xff]   ;;  %v12528_v21 = vld [vmem:[%s17658_s1 + $0x1908] ss:$16 sps:$4 sm:$0xff]  }
 0x2e8   :  { %8279 = vmatprep.subr.bf16.mxu0 %v12443_v22  ;;  %9099 = vmatprep.subr.bf16.mxu1 %v12446_v23  ;;  %v12533_v22 = vld [vmem:[%s17658_s1 + $0x1924] ss:$16 sps:$4 sm:$0xff]   ;;  %v12536_v23 = vld [vmem:[%s17658_s1 + $0x192c] ss:$16 sps:$4 sm:$0xff]  }
 0x2eb   :  { %8280 = vmatpush1.bf16.msra.mxu0 %v12441_v24  ;;  %9100 = vmatpush1.bf16.msra.mxu1 %v12444_v25  ;;  %v12531_v24 = vld [vmem:[%s17658_s1 + $0x1920] ss:$16 sps:$4 sm:$0xff]   ;;  %v12534_v25 = vld [vmem:[%s17658_s1 + $0x1928] ss:$16 sps:$4 sm:$0xff]  }
 0x2ec   :  { %8281 = vmatprep.subr.bf16.mxu0 %v12449_v26  ;;  %9101 = vmatprep.subr.bf16.mxu1 %v12452_v27  ;;  %v12539_v26 = vld [vmem:[%s17658_s1 + $0x1944] ss:$16 sps:$4 sm:$0xff]   ;;  %v12542_v27 = vld [vmem:[%s17658_s1 + $0x194c] ss:$16 sps:$4 sm:$0xff]  }
 0x2ef   :  { %8282 = vmatpush1.bf16.msra.mxu0 %v12447_v28  ;;  %9102 = vmatpush1.bf16.msra.mxu1 %v12450_v29  ;;  %v12537_v28 = vld [vmem:[%s17658_s1 + $0x1940] ss:$16 sps:$4 sm:$0xff]   ;;  %v12540_v29 = vld [vmem:[%s17658_s1 + $0x1948] ss:$16 sps:$4 sm:$0xff]  }
 0x2f0   :  { %8283 = vmatprep.subr.bf16.mxu0 %v12455_v30  ;;  %9103 = vmatprep.subr.bf16.mxu1 %v12458_v31  ;;  %v12545_v30 = vld [vmem:[%s17658_s1 + $0x1964] ss:$16 sps:$4 sm:$0xff]   ;;  %v12548_v31 = vld [vmem:[%s17658_s1 + $0x196c] ss:$16 sps:$4 sm:$0xff]  }
 0x2f3   :  { %8284 = vmatpush1.bf16.msra.mxu0 %v12453_v32  ;;  %9104 = vmatpush1.bf16.msra.mxu1 %v12456_v33  ;;  %v12543_v32 = vld [vmem:[%s17658_s1 + $0x1960] ss:$16 sps:$4 sm:$0xff]   ;;  %v12546_v33 = vld [vmem:[%s17658_s1 + $0x1968] ss:$16 sps:$4 sm:$0xff]  }
 0x2f4   :  { %8285 = vmatprep.subr.bf16.mxu0 %v12461_v34  ;;  %9105 = vmatprep.subr.bf16.mxu1 %v12464_v35  ;;  %v12551_v34 = vld [vmem:[%s17658_s1 + $0x1984] ss:$16 sps:$4 sm:$0xff]   ;;  %v12554_v35 = vld [vmem:[%s17658_s1 + $0x198c] ss:$16 sps:$4 sm:$0xff]  }
 0x2f7   :  { %8286 = vmatpush1.bf16.msra.mxu0 %v12459_v36  ;;  %9106 = vmatpush1.bf16.msra.mxu1 %v12462_v37  ;;  %v12549_v36 = vld [vmem:[%s17658_s1 + $0x1980] ss:$16 sps:$4 sm:$0xff]   ;;  %v12552_v37 = vld [vmem:[%s17658_s1 + $0x1988] ss:$16 sps:$4 sm:$0xff]  }
 0x2f8   :  { %8287 = vmatprep.subr.bf16.mxu0 %v12467_v38  ;;  %9107 = vmatprep.subr.bf16.mxu1 %v12470_v39  ;;  %v12557_v38 = vld [vmem:[%s17658_s1 + $0x19a4] ss:$16 sps:$4 sm:$0xff]   ;;  %v12560_v39 = vld [vmem:[%s17658_s1 + $0x19ac] ss:$16 sps:$4 sm:$0xff]  }
 0x2fb   :  { %8288 = vmatpush1.bf16.msra.mxu0 %v12465_v40  ;;  %9108 = vmatpush1.bf16.msra.mxu1 %v12468_v41  ;;  %v12555_v40 = vld [vmem:[%s17658_s1 + $0x19a0] ss:$16 sps:$4 sm:$0xff]   ;;  %v12558_v41 = vld [vmem:[%s17658_s1 + $0x19a8] ss:$16 sps:$4 sm:$0xff]  }
 0x2fc   :  { %8289 = vmatprep.subr.bf16.mxu0 %v12473_v42  ;;  %9109 = vmatprep.subr.bf16.mxu1 %v12476_v43  ;;  %v12563_v42 = vld [vmem:[%s17658_s1 + $0x19c4] ss:$16 sps:$4 sm:$0xff]   ;;  %v12566_v43 = vld [vmem:[%s17658_s1 + $0x19cc] ss:$16 sps:$4 sm:$0xff]  }
 0x2ff   :  { %8290 = vmatpush1.bf16.msra.mxu0 %v12471_v44  ;;  %9110 = vmatpush1.bf16.msra.mxu1 %v12474_v45  ;;  %v12561_v44 = vld [vmem:[%s17658_s1 + $0x19c0] ss:$16 sps:$4 sm:$0xff]   ;;  %v12564_v45 = vld [vmem:[%s17658_s1 + $0x19c8] ss:$16 sps:$4 sm:$0xff]  }
 0x300   :  { %8300 = vmatprep.subr.bf16.mxu0 %v12479_v47  ;;  %9120 = vmatprep.subr.bf16.mxu1 %v12482_v48  ;;  %v12572_v47 = vld [vmem:[%s17658_s1 + $0x19ec] ss:$16 sps:$4 sm:$0xff]   ;;  %v12567_v48 = vld [vmem:[%s17658_s1 + $0x19e0] ss:$16 sps:$4 sm:$0xff]  }
 0x302   :  { %8292 = vmatmul.mubr.bf16.vlgmr.msra.gmra.mrb[0].mxu0 %v88_v49  ;;  %9112 = vmatmul.mubr.bf16.vlgmr.msra.gmra.mrb[0].mxu1 %v88_v49  ;;  %v12570_v49 = vld [vmem:[%s17658_s1 + $0x19e8] ss:$16 sps:$4 sm:$0xff]  }
 0x303   :  { %8301 = vmatpush1.bf16.msra.mxu0 %v12477_v51  ;;  %9121 = vmatpush1.bf16.msra.mxu1 %v12480_v52  ;;  %v12575_v51 = vld [vmem:[%s17658_s1 + $0x1a04] ss:$16 sps:$4 sm:$0xff]   ;;  %v12578_v52 = vld [vmem:[%s17658_s1 + $0x1a0c] ss:$16 sps:$4 sm:$0xff]  }
 0x304   :  { %8302 = vmatprep.subr.bf16.mxu0 %v12485_v53  ;;  %9122 = vmatprep.subr.bf16.mxu1 %v12488_v54  ;;  %v90_v53 = vpack.c.bf16 %v50_v50, %v50_v50  ;;  %v53_v54 = vld [vmem:[%s17659_s0 + $0xd8] sm:$0xff]  ;;  %v12665_v50 = vld [vmem:[%s17658_s1 + $0x1be4] ss:$16 sps:$4 sm:$0xff]  }
 0x305   :  { %8332 = vmatprep.mubr.bf16.mxu0 %v91_v55  ;;  %9152 = vmatprep.mubr.bf16.mxu1 %v91_v55  ;;  %v12573_v55 = vld [vmem:[%s17658_s1 + $0x1a00] ss:$16 sps:$4 sm:$0xff]  }
 0x307   :  { %8303 = vmatpush1.bf16.msra.mxu0 %v12483_v56  ;;  %9123 = vmatpush1.bf16.msra.mxu1 %v12486_v57  ;;  %v12576_v56 = vld [vmem:[%s17658_s1 + $0x1a08] ss:$16 sps:$4 sm:$0xff]   ;;  %v12581_v57 = vld [vmem:[%s17658_s1 + $0x1a24] ss:$16 sps:$4 sm:$0xff]  }
 0x308   :  { %8304 = vmatprep.subr.bf16.mxu0 %v12491_v58  ;;  %9124 = vmatprep.subr.bf16.mxu1 %v12494_v59  ;;  %v12584_v58 = vld [vmem:[%s17658_s1 + $0x1a2c] ss:$16 sps:$4 sm:$0xff]   ;;  %v93_v59 = vpack.c.bf16 %v53_v54, %v53_v54  ;;  %v52_v54 = vld [vmem:[%s17659_s0 + $0xd0] sm:$0xff] }
 0x30b   :  { %8305 = vmatpush1.bf16.msra.mxu0 %v12489_v60  ;;  %9125 = vmatpush1.bf16.msra.mxu1 %v12492_v61  ;;  %v12579_v60 = vld [vmem:[%s17658_s1 + $0x1a20] ss:$16 sps:$4 sm:$0xff]   ;;  %v12582_v61 = vld [vmem:[%s17658_s1 + $0x1a28] ss:$16 sps:$4 sm:$0xff]  }
 0x30c   :  { %8306 = vmatprep.subr.bf16.mxu0 %v12497_v62  ;;  %9126 = vmatprep.subr.bf16.mxu1 %v12500_v63  ;;  %v12587_v62 = vld [vmem:[%s17658_s1 + $0x1a44] ss:$16 sps:$4 sm:$0xff]   ;;  %v12590_v63 = vld [vmem:[%s17658_s1 + $0x1a4c] ss:$16 sps:$4 sm:$0xff]  }
 0x30f   :  { %8307 = vmatpush1.bf16.msra.mxu0 %v12495_v0  ;;  %9127 = vmatpush1.bf16.msra.mxu1 %v12498_v1  ;;  %v12585_v0 = vld [vmem:[%s17658_s1 + $0x1a40] ss:$16 sps:$4 sm:$0xff]   ;;  %v12588_v1 = vld [vmem:[%s17658_s1 + $0x1a48] ss:$16 sps:$4 sm:$0xff]  }
 0x310   :  { %8308 = vmatprep.subr.bf16.mxu0 %v12503_v2  ;;  %9128 = vmatprep.subr.bf16.mxu1 %v12506_v3  ;;  %v12593_v2 = vld [vmem:[%s17658_s1 + $0x1a64] ss:$16 sps:$4 sm:$0xff]   ;;  %v12596_v3 = vld [vmem:[%s17658_s1 + $0x1a6c] ss:$16 sps:$4 sm:$0xff]  }
 0x313   :  { %8309 = vmatpush1.bf16.msra.mxu0 %v12501_v4  ;;  %9129 = vmatpush1.bf16.msra.mxu1 %v12504_v5  ;;  %v12591_v4 = vld [vmem:[%s17658_s1 + $0x1a60] ss:$16 sps:$4 sm:$0xff]   ;;  %v12594_v5 = vld [vmem:[%s17658_s1 + $0x1a68] ss:$16 sps:$4 sm:$0xff]  }
 0x314   :  { %8310 = vmatprep.subr.bf16.mxu0 %v12509_v6  ;;  %9130 = vmatprep.subr.bf16.mxu1 %v12512_v7  ;;  %v12599_v6 = vld [vmem:[%s17658_s1 + $0x1a84] ss:$16 sps:$4 sm:$0xff]   ;;  %v12602_v7 = vld [vmem:[%s17658_s1 + $0x1a8c] ss:$16 sps:$4 sm:$0xff]  }
 0x317   :  { %8311 = vmatpush1.bf16.msra.mxu0 %v12507_v8  ;;  %9131 = vmatpush1.bf16.msra.mxu1 %v12510_v9  ;;  %v12597_v8 = vld [vmem:[%s17658_s1 + $0x1a80] ss:$16 sps:$4 sm:$0xff]   ;;  %v12600_v9 = vld [vmem:[%s17658_s1 + $0x1a88] ss:$16 sps:$4 sm:$0xff]  }
 0x318   :  { %8312 = vmatprep.subr.bf16.mxu0 %v12515_v10  ;;  %9132 = vmatprep.subr.bf16.mxu1 %v12518_v11  ;;  %v12605_v10 = vld [vmem:[%s17658_s1 + $0x1aa4] ss:$16 sps:$4 sm:$0xff]   ;;  %v12608_v11 = vld [vmem:[%s17658_s1 + $0x1aac] ss:$16 sps:$4 sm:$0xff]  }
 0x31b   :  { %8313 = vmatpush1.bf16.msra.mxu0 %v12513_v12  ;;  %9133 = vmatpush1.bf16.msra.mxu1 %v12516_v13  ;;  %v12603_v12 = vld [vmem:[%s17658_s1 + $0x1aa0] ss:$16 sps:$4 sm:$0xff]   ;;  %v12606_v13 = vld [vmem:[%s17658_s1 + $0x1aa8] ss:$16 sps:$4 sm:$0xff]  }
 0x31c   :  { %8314 = vmatprep.subr.bf16.mxu0 %v12521_v14  ;;  %9134 = vmatprep.subr.bf16.mxu1 %v12524_v15  ;;  %v12611_v14 = vld [vmem:[%s17658_s1 + $0x1ac4] ss:$16 sps:$4 sm:$0xff]   ;;  %v12614_v15 = vld [vmem:[%s17658_s1 + $0x1acc] ss:$16 sps:$4 sm:$0xff]  }
 0x31f   :  { %8315 = vmatpush1.bf16.msra.mxu0 %v12519_v16  ;;  %9135 = vmatpush1.bf16.msra.mxu1 %v12522_v17  ;;  %v12609_v16 = vld [vmem:[%s17658_s1 + $0x1ac0] ss:$16 sps:$4 sm:$0xff]   ;;  %v12612_v17 = vld [vmem:[%s17658_s1 + $0x1ac8] ss:$16 sps:$4 sm:$0xff]  }
 0x320   :  { %8316 = vmatprep.subr.bf16.mxu0 %v12527_v18  ;;  %9136 = vmatprep.subr.bf16.mxu1 %v12530_v19  ;;  %v12617_v18 = vld [vmem:[%s17658_s1 + $0x1ae4] ss:$16 sps:$4 sm:$0xff]   ;;  %v12620_v19 = vld [vmem:[%s17658_s1 + $0x1aec] ss:$16 sps:$4 sm:$0xff]  }
 0x323   :  { %8317 = vmatpush1.bf16.msra.mxu0 %v12525_v20  ;;  %9137 = vmatpush1.bf16.msra.mxu1 %v12528_v21  ;;  %v12615_v20 = vld [vmem:[%s17658_s1 + $0x1ae0] ss:$16 sps:$4 sm:$0xff]   ;;  %v12618_v21 = vld [vmem:[%s17658_s1 + $0x1ae8] ss:$16 sps:$4 sm:$0xff]  }
 0x324   :  { %8318 = vmatprep.subr.bf16.mxu0 %v12533_v22  ;;  %9138 = vmatprep.subr.bf16.mxu1 %v12536_v23  ;;  %v12623_v22 = vld [vmem:[%s17658_s1 + $0x1b04] ss:$16 sps:$4 sm:$0xff]   ;;  %v12626_v23 = vld [vmem:[%s17658_s1 + $0x1b0c] ss:$16 sps:$4 sm:$0xff]  }
 0x327   :  { %8319 = vmatpush1.bf16.msra.mxu0 %v12531_v24  ;;  %9139 = vmatpush1.bf16.msra.mxu1 %v12534_v25  ;;  %v12621_v24 = vld [vmem:[%s17658_s1 + $0x1b00] ss:$16 sps:$4 sm:$0xff]   ;;  %v12624_v25 = vld [vmem:[%s17658_s1 + $0x1b08] ss:$16 sps:$4 sm:$0xff]  }
 0x328   :  { %8320 = vmatprep.subr.bf16.mxu0 %v12539_v26  ;;  %9140 = vmatprep.subr.bf16.mxu1 %v12542_v27  ;;  %v12629_v26 = vld [vmem:[%s17658_s1 + $0x1b24] ss:$16 sps:$4 sm:$0xff]   ;;  %v12632_v27 = vld [vmem:[%s17658_s1 + $0x1b2c] ss:$16 sps:$4 sm:$0xff]  }
 0x32b   :  { %8321 = vmatpush1.bf16.msra.mxu0 %v12537_v28  ;;  %9141 = vmatpush1.bf16.msra.mxu1 %v12540_v29  ;;  %v12627_v28 = vld [vmem:[%s17658_s1 + $0x1b20] ss:$16 sps:$4 sm:$0xff]   ;;  %v12630_v29 = vld [vmem:[%s17658_s1 + $0x1b28] ss:$16 sps:$4 sm:$0xff]  }
 0x32c   :  { %8322 = vmatprep.subr.bf16.mxu0 %v12545_v30  ;;  %9142 = vmatprep.subr.bf16.mxu1 %v12548_v31  ;;  %v12635_v30 = vld [vmem:[%s17658_s1 + $0x1b44] ss:$16 sps:$4 sm:$0xff]   ;;  %v12638_v31 = vld [vmem:[%s17658_s1 + $0x1b4c] ss:$16 sps:$4 sm:$0xff]  }
 0x32f   :  { %8323 = vmatpush1.bf16.msra.mxu0 %v12543_v32  ;;  %9143 = vmatpush1.bf16.msra.mxu1 %v12546_v33  ;;  %v12633_v32 = vld [vmem:[%s17658_s1 + $0x1b40] ss:$16 sps:$4 sm:$0xff]   ;;  %v12636_v33 = vld [vmem:[%s17658_s1 + $0x1b48] ss:$16 sps:$4 sm:$0xff]  }
 0x330   :  { %8324 = vmatprep.subr.bf16.mxu0 %v12551_v34  ;;  %9144 = vmatprep.subr.bf16.mxu1 %v12554_v35  ;;  %v12641_v34 = vld [vmem:[%s17658_s1 + $0x1b64] ss:$16 sps:$4 sm:$0xff]   ;;  %v12644_v35 = vld [vmem:[%s17658_s1 + $0x1b6c] ss:$16 sps:$4 sm:$0xff]  }
 0x333   :  { %8325 = vmatpush1.bf16.msra.mxu0 %v12549_v36  ;;  %9145 = vmatpush1.bf16.msra.mxu1 %v12552_v37  ;;  %v12639_v36 = vld [vmem:[%s17658_s1 + $0x1b60] ss:$16 sps:$4 sm:$0xff]   ;;  %v12642_v37 = vld [vmem:[%s17658_s1 + $0x1b68] ss:$16 sps:$4 sm:$0xff]  }
 0x334   :  { %8326 = vmatprep.subr.bf16.mxu0 %v12557_v38  ;;  %9146 = vmatprep.subr.bf16.mxu1 %v12560_v39  ;;  %v12647_v38 = vld [vmem:[%s17658_s1 + $0x1b84] ss:$16 sps:$4 sm:$0xff]   ;;  %v12650_v39 = vld [vmem:[%s17658_s1 + $0x1b8c] ss:$16 sps:$4 sm:$0xff]  }
 0x337   :  { %8327 = vmatpush1.bf16.msra.mxu0 %v12555_v40  ;;  %9147 = vmatpush1.bf16.msra.mxu1 %v12558_v41  ;;  %v12645_v40 = vld [vmem:[%s17658_s1 + $0x1b80] ss:$16 sps:$4 sm:$0xff]   ;;  %v12648_v41 = vld [vmem:[%s17658_s1 + $0x1b88] ss:$16 sps:$4 sm:$0xff]  }
 0x338   :  { %8328 = vmatprep.subr.bf16.mxu0 %v12563_v42  ;;  %9148 = vmatprep.subr.bf16.mxu1 %v12566_v43  ;;  %v12653_v42 = vld [vmem:[%s17658_s1 + $0x1ba4] ss:$16 sps:$4 sm:$0xff]   ;;  %v12656_v43 = vld [vmem:[%s17658_s1 + $0x1bac] ss:$16 sps:$4 sm:$0xff]  }
 0x33b   :  { %8329 = vmatpush1.bf16.msra.mxu0 %v12561_v44  ;;  %9149 = vmatpush1.bf16.msra.mxu1 %v12564_v45  ;;  %v12651_v44 = vld [vmem:[%s17658_s1 + $0x1ba0] ss:$16 sps:$4 sm:$0xff]   ;;  %v12654_v45 = vld [vmem:[%s17658_s1 + $0x1ba8] ss:$16 sps:$4 sm:$0xff]  }
 0x33c   :  { %8330 = vmatprep.subr.bf16.mxu0 %v12569_v46  ;;  %9150 = vmatprep.subr.bf16.mxu1 %v12572_v47  ;;  %v12659_v46 = vld [vmem:[%s17658_s1 + $0x1bc4] ss:$16 sps:$4 sm:$0xff]   ;;  %v12662_v47 = vld [vmem:[%s17658_s1 + $0x1bcc] ss:$16 sps:$4 sm:$0xff]  }
 0x33f   :  { %8331 = vmatpush1.bf16.msra.mxu0 %v12567_v48  ;;  %9151 = vmatpush1.bf16.msra.mxu1 %v12570_v49  ;;  %v12657_v48 = vld [vmem:[%s17658_s1 + $0x1bc0] ss:$16 sps:$4 sm:$0xff]   ;;  %v12660_v49 = vld [vmem:[%s17658_s1 + $0x1bc8] ss:$16 sps:$4 sm:$0xff]  }
 0x340   :  { %8341 = vmatprep.subr.bf16.mxu0 %v12575_v51  ;;  %9161 = vmatprep.subr.bf16.mxu1 %v12578_v52  ;;  %v12668_v51 = vld [vmem:[%s17658_s1 + $0x1bec] ss:$16 sps:$4 sm:$0xff]   ;;  %v12663_v52 = vld [vmem:[%s17658_s1 + $0x1be0] ss:$16 sps:$4 sm:$0xff]  }
 0x342   :  { %8333 = vmatmul.mubr.bf16.vlgmr.msra.gmra.mrb[0].mxu0 %v90_v53  ;;  %9153 = vmatmul.mubr.bf16.vlgmr.msra.gmra.mrb[0].mxu1 %v90_v53  ;;  %v12666_v53 = vld [vmem:[%s17658_s1 + $0x1be8] ss:$16 sps:$4 sm:$0xff]  }
 0x343   :  { %8342 = vmatpush1.bf16.msra.mxu0 %v12573_v55  ;;  %9162 = vmatpush1.bf16.msra.mxu1 %v12576_v56  ;;  %v12671_v55 = vld [vmem:[%s17658_s1 + $0x1c04] ss:$16 sps:$4 sm:$0xff]   ;;  %v12674_v56 = vld [vmem:[%s17658_s1 + $0x1c0c] ss:$16 sps:$4 sm:$0xff]  }
 0x344   :  { %8343 = vmatprep.subr.bf16.mxu0 %v12581_v57  ;;  %9163 = vmatprep.subr.bf16.mxu1 %v12584_v58  ;;  %v92_v57 = vpack.c.bf16 %v52_v54, %v52_v54  ;;  %v55_v58 = vld [vmem:[%s17659_s0 + $0xe8] sm:$0xff]  ;;  %v12761_v54 = vld [vmem:[%s17658_s1 + $0x1de4] ss:$16 sps:$4 sm:$0xff]  }
 0x345   :  { %8373 = vmatprep.mubr.bf16.mxu0 %v93_v59  ;;  %9193 = vmatprep.mubr.bf16.mxu1 %v93_v59  ;;  %v12669_v59 = vld [vmem:[%s17658_s1 + $0x1c00] ss:$16 sps:$4 sm:$0xff]  }
 0x347   :  { %8344 = vmatpush1.bf16.msra.mxu0 %v12579_v60  ;;  %9164 = vmatpush1.bf16.msra.mxu1 %v12582_v61  ;;  %v12672_v60 = vld [vmem:[%s17658_s1 + $0x1c08] ss:$16 sps:$4 sm:$0xff]   ;;  %v12677_v61 = vld [vmem:[%s17658_s1 + $0x1c24] ss:$16 sps:$4 sm:$0xff]  }
 0x348   :  { %8345 = vmatprep.subr.bf16.mxu0 %v12587_v62  ;;  %9165 = vmatprep.subr.bf16.mxu1 %v12590_v63  ;;  %v12680_v62 = vld [vmem:[%s17658_s1 + $0x1c2c] ss:$16 sps:$4 sm:$0xff]   ;;  %v95_v63 = vpack.c.bf16 %v55_v58, %v55_v58  ;;  %v54_v58 = vld [vmem:[%s17659_s0 + $0xe0] sm:$0xff] }
 0x34b   :  { %8346 = vmatpush1.bf16.msra.mxu0 %v12585_v0  ;;  %9166 = vmatpush1.bf16.msra.mxu1 %v12588_v1  ;;  %v12675_v0 = vld [vmem:[%s17658_s1 + $0x1c20] ss:$16 sps:$4 sm:$0xff]   ;;  %v12678_v1 = vld [vmem:[%s17658_s1 + $0x1c28] ss:$16 sps:$4 sm:$0xff]  }
 0x34c   :  { %8347 = vmatprep.subr.bf16.mxu0 %v12593_v2  ;;  %9167 = vmatprep.subr.bf16.mxu1 %v12596_v3  ;;  %v12683_v2 = vld [vmem:[%s17658_s1 + $0x1c44] ss:$16 sps:$4 sm:$0xff]   ;;  %v12686_v3 = vld [vmem:[%s17658_s1 + $0x1c4c] ss:$16 sps:$4 sm:$0xff]  }
 0x34f   :  { %8348 = vmatpush1.bf16.msra.mxu0 %v12591_v4  ;;  %9168 = vmatpush1.bf16.msra.mxu1 %v12594_v5  ;;  %v12681_v4 = vld [vmem:[%s17658_s1 + $0x1c40] ss:$16 sps:$4 sm:$0xff]   ;;  %v12684_v5 = vld [vmem:[%s17658_s1 + $0x1c48] ss:$16 sps:$4 sm:$0xff]  }
 0x350   :  { %8349 = vmatprep.subr.bf16.mxu0 %v12599_v6  ;;  %9169 = vmatprep.subr.bf16.mxu1 %v12602_v7  ;;  %v12689_v6 = vld [vmem:[%s17658_s1 + $0x1c64] ss:$16 sps:$4 sm:$0xff]   ;;  %v12692_v7 = vld [vmem:[%s17658_s1 + $0x1c6c] ss:$16 sps:$4 sm:$0xff]  }
 0x353   :  { %8350 = vmatpush1.bf16.msra.mxu0 %v12597_v8  ;;  %9170 = vmatpush1.bf16.msra.mxu1 %v12600_v9  ;;  %v12687_v8 = vld [vmem:[%s17658_s1 + $0x1c60] ss:$16 sps:$4 sm:$0xff]   ;;  %v12690_v9 = vld [vmem:[%s17658_s1 + $0x1c68] ss:$16 sps:$4 sm:$0xff]  }
 0x354   :  { %8351 = vmatprep.subr.bf16.mxu0 %v12605_v10  ;;  %9171 = vmatprep.subr.bf16.mxu1 %v12608_v11  ;;  %v12695_v10 = vld [vmem:[%s17658_s1 + $0x1c84] ss:$16 sps:$4 sm:$0xff]   ;;  %v12698_v11 = vld [vmem:[%s17658_s1 + $0x1c8c] ss:$16 sps:$4 sm:$0xff]  }
 0x357   :  { %8352 = vmatpush1.bf16.msra.mxu0 %v12603_v12  ;;  %9172 = vmatpush1.bf16.msra.mxu1 %v12606_v13  ;;  %v12693_v12 = vld [vmem:[%s17658_s1 + $0x1c80] ss:$16 sps:$4 sm:$0xff]   ;;  %v12696_v13 = vld [vmem:[%s17658_s1 + $0x1c88] ss:$16 sps:$4 sm:$0xff]  }
 0x358   :  { %8353 = vmatprep.subr.bf16.mxu0 %v12611_v14  ;;  %9173 = vmatprep.subr.bf16.mxu1 %v12614_v15  ;;  %v12701_v14 = vld [vmem:[%s17658_s1 + $0x1ca4] ss:$16 sps:$4 sm:$0xff]   ;;  %v12704_v15 = vld [vmem:[%s17658_s1 + $0x1cac] ss:$16 sps:$4 sm:$0xff]  }
 0x35b   :  { %8354 = vmatpush1.bf16.msra.mxu0 %v12609_v16  ;;  %9174 = vmatpush1.bf16.msra.mxu1 %v12612_v17  ;;  %v12699_v16 = vld [vmem:[%s17658_s1 + $0x1ca0] ss:$16 sps:$4 sm:$0xff]   ;;  %v12702_v17 = vld [vmem:[%s17658_s1 + $0x1ca8] ss:$16 sps:$4 sm:$0xff]  }
 0x35c   :  { %8355 = vmatprep.subr.bf16.mxu0 %v12617_v18  ;;  %9175 = vmatprep.subr.bf16.mxu1 %v12620_v19  ;;  %v12707_v18 = vld [vmem:[%s17658_s1 + $0x1cc4] ss:$16 sps:$4 sm:$0xff]   ;;  %v12710_v19 = vld [vmem:[%s17658_s1 + $0x1ccc] ss:$16 sps:$4 sm:$0xff]  }
 0x35f   :  { %8356 = vmatpush1.bf16.msra.mxu0 %v12615_v20  ;;  %9176 = vmatpush1.bf16.msra.mxu1 %v12618_v21  ;;  %v12705_v20 = vld [vmem:[%s17658_s1 + $0x1cc0] ss:$16 sps:$4 sm:$0xff]   ;;  %v12708_v21 = vld [vmem:[%s17658_s1 + $0x1cc8] ss:$16 sps:$4 sm:$0xff]  }
 0x360   :  { %8357 = vmatprep.subr.bf16.mxu0 %v12623_v22  ;;  %9177 = vmatprep.subr.bf16.mxu1 %v12626_v23  ;;  %v12713_v22 = vld [vmem:[%s17658_s1 + $0x1ce4] ss:$16 sps:$4 sm:$0xff]   ;;  %v12716_v23 = vld [vmem:[%s17658_s1 + $0x1cec] ss:$16 sps:$4 sm:$0xff]  }
 0x363   :  { %8358 = vmatpush1.bf16.msra.mxu0 %v12621_v24  ;;  %9178 = vmatpush1.bf16.msra.mxu1 %v12624_v25  ;;  %v12711_v24 = vld [vmem:[%s17658_s1 + $0x1ce0] ss:$16 sps:$4 sm:$0xff]   ;;  %v12714_v25 = vld [vmem:[%s17658_s1 + $0x1ce8] ss:$16 sps:$4 sm:$0xff]  }
 0x364   :  { %8359 = vmatprep.subr.bf16.mxu0 %v12629_v26  ;;  %9179 = vmatprep.subr.bf16.mxu1 %v12632_v27  ;;  %v12719_v26 = vld [vmem:[%s17658_s1 + $0x1d04] ss:$16 sps:$4 sm:$0xff]   ;;  %v12722_v27 = vld [vmem:[%s17658_s1 + $0x1d0c] ss:$16 sps:$4 sm:$0xff]  }
 0x367   :  { %8360 = vmatpush1.bf16.msra.mxu0 %v12627_v28  ;;  %9180 = vmatpush1.bf16.msra.mxu1 %v12630_v29  ;;  %v12717_v28 = vld [vmem:[%s17658_s1 + $0x1d00] ss:$16 sps:$4 sm:$0xff]   ;;  %v12720_v29 = vld [vmem:[%s17658_s1 + $0x1d08] ss:$16 sps:$4 sm:$0xff]  }
 0x368   :  { %8361 = vmatprep.subr.bf16.mxu0 %v12635_v30  ;;  %9181 = vmatprep.subr.bf16.mxu1 %v12638_v31  ;;  %v12725_v30 = vld [vmem:[%s17658_s1 + $0x1d24] ss:$16 sps:$4 sm:$0xff]   ;;  %v12728_v31 = vld [vmem:[%s17658_s1 + $0x1d2c] ss:$16 sps:$4 sm:$0xff]  }
 0x36b   :  { %8362 = vmatpush1.bf16.msra.mxu0 %v12633_v32  ;;  %9182 = vmatpush1.bf16.msra.mxu1 %v12636_v33  ;;  %v12723_v32 = vld [vmem:[%s17658_s1 + $0x1d20] ss:$16 sps:$4 sm:$0xff]   ;;  %v12726_v33 = vld [vmem:[%s17658_s1 + $0x1d28] ss:$16 sps:$4 sm:$0xff]  }
 0x36c   :  { %8363 = vmatprep.subr.bf16.mxu0 %v12641_v34  ;;  %9183 = vmatprep.subr.bf16.mxu1 %v12644_v35  ;;  %v12731_v34 = vld [vmem:[%s17658_s1 + $0x1d44] ss:$16 sps:$4 sm:$0xff]   ;;  %v12734_v35 = vld [vmem:[%s17658_s1 + $0x1d4c] ss:$16 sps:$4 sm:$0xff]  }
 0x36f   :  { %8364 = vmatpush1.bf16.msra.mxu0 %v12639_v36  ;;  %9184 = vmatpush1.bf16.msra.mxu1 %v12642_v37  ;;  %v12729_v36 = vld [vmem:[%s17658_s1 + $0x1d40] ss:$16 sps:$4 sm:$0xff]   ;;  %v12732_v37 = vld [vmem:[%s17658_s1 + $0x1d48] ss:$16 sps:$4 sm:$0xff]  }
 0x370   :  { %8365 = vmatprep.subr.bf16.mxu0 %v12647_v38  ;;  %9185 = vmatprep.subr.bf16.mxu1 %v12650_v39  ;;  %v12737_v38 = vld [vmem:[%s17658_s1 + $0x1d64] ss:$16 sps:$4 sm:$0xff]   ;;  %v12740_v39 = vld [vmem:[%s17658_s1 + $0x1d6c] ss:$16 sps:$4 sm:$0xff]  }
 0x373   :  { %8366 = vmatpush1.bf16.msra.mxu0 %v12645_v40  ;;  %9186 = vmatpush1.bf16.msra.mxu1 %v12648_v41  ;;  %v12735_v40 = vld [vmem:[%s17658_s1 + $0x1d60] ss:$16 sps:$4 sm:$0xff]   ;;  %v12738_v41 = vld [vmem:[%s17658_s1 + $0x1d68] ss:$16 sps:$4 sm:$0xff]  }
 0x374   :  { %8367 = vmatprep.subr.bf16.mxu0 %v12653_v42  ;;  %9187 = vmatprep.subr.bf16.mxu1 %v12656_v43  ;;  %v12743_v42 = vld [vmem:[%s17658_s1 + $0x1d84] ss:$16 sps:$4 sm:$0xff]   ;;  %v12746_v43 = vld [vmem:[%s17658_s1 + $0x1d8c] ss:$16 sps:$4 sm:$0xff]  }
 0x377   :  { %8368 = vmatpush1.bf16.msra.mxu0 %v12651_v44  ;;  %9188 = vmatpush1.bf16.msra.mxu1 %v12654_v45  ;;  %v12741_v44 = vld [vmem:[%s17658_s1 + $0x1d80] ss:$16 sps:$4 sm:$0xff]   ;;  %v12744_v45 = vld [vmem:[%s17658_s1 + $0x1d88] ss:$16 sps:$4 sm:$0xff]  }
 0x378   :  { %8369 = vmatprep.subr.bf16.mxu0 %v12659_v46  ;;  %9189 = vmatprep.subr.bf16.mxu1 %v12662_v47  ;;  %v12749_v46 = vld [vmem:[%s17658_s1 + $0x1da4] ss:$16 sps:$4 sm:$0xff]   ;;  %v12752_v47 = vld [vmem:[%s17658_s1 + $0x1dac] ss:$16 sps:$4 sm:$0xff]  }
 0x37b   :  { %8370 = vmatpush1.bf16.msra.mxu0 %v12657_v48  ;;  %9190 = vmatpush1.bf16.msra.mxu1 %v12660_v49  ;;  %v12747_v48 = vld [vmem:[%s17658_s1 + $0x1da0] ss:$16 sps:$4 sm:$0xff]   ;;  %v12750_v49 = vld [vmem:[%s17658_s1 + $0x1da8] ss:$16 sps:$4 sm:$0xff]  }
 0x37c   :  { %8371 = vmatprep.subr.bf16.mxu0 %v12665_v50  ;;  %9191 = vmatprep.subr.bf16.mxu1 %v12668_v51  ;;  %v12755_v50 = vld [vmem:[%s17658_s1 + $0x1dc4] ss:$16 sps:$4 sm:$0xff]   ;;  %v12758_v51 = vld [vmem:[%s17658_s1 + $0x1dcc] ss:$16 sps:$4 sm:$0xff]  }
 0x37f   :  { %8372 = vmatpush1.bf16.msra.mxu0 %v12663_v52  ;;  %9192 = vmatpush1.bf16.msra.mxu1 %v12666_v53  ;;  %v12753_v52 = vld [vmem:[%s17658_s1 + $0x1dc0] ss:$16 sps:$4 sm:$0xff]   ;;  %v12756_v53 = vld [vmem:[%s17658_s1 + $0x1dc8] ss:$16 sps:$4 sm:$0xff]  }
 0x380   :  { %8382 = vmatprep.subr.bf16.mxu0 %v12671_v55  ;;  %9202 = vmatprep.subr.bf16.mxu1 %v12674_v56  ;;  %v12764_v55 = vld [vmem:[%s17658_s1 + $0x1dec] ss:$16 sps:$4 sm:$0xff]   ;;  %v12759_v56 = vld [vmem:[%s17658_s1 + $0x1de0] ss:$16 sps:$4 sm:$0xff]  }
 0x382   :  { %8374 = vmatmul.mubr.bf16.vlgmr.msra.gmra.mrb[0].mxu0 %v92_v57  ;;  %9194 = vmatmul.mubr.bf16.vlgmr.msra.gmra.mrb[0].mxu1 %v92_v57  ;;  %v12762_v57 = vld [vmem:[%s17658_s1 + $0x1de8] ss:$16 sps:$4 sm:$0xff]  }
 0x383   :  { %8383 = vmatpush1.bf16.msra.mxu0 %v12669_v59  ;;  %9203 = vmatpush1.bf16.msra.mxu1 %v12672_v60  ;;  %v12767_v59 = vld [vmem:[%s17658_s1 + $0x1e04] ss:$16 sps:$4 sm:$0xff]   ;;  %v12770_v60 = vld [vmem:[%s17658_s1 + $0x1e0c] ss:$16 sps:$4 sm:$0xff]  }
 0x384   :  { %8384 = vmatprep.subr.bf16.mxu0 %v12677_v61  ;;  %9204 = vmatprep.subr.bf16.mxu1 %v12680_v62  ;;  %v94_v61 = vpack.c.bf16 %v54_v58, %v54_v58  ;;  %v57_v62 = vld [vmem:[%s17659_s0 + $0xf8] sm:$0xff]  ;;  %v12857_v58 = vld [vmem:[%s17658_s1 + $0x1fe4] ss:$16 sps:$4 sm:$0xff]  }
 0x385   :  { %8414 = vmatprep.mubr.bf16.mxu0 %v95_v63  ;;  %9234 = vmatprep.mubr.bf16.mxu1 %v95_v63  ;;  %v12765_v63 = vld [vmem:[%s17658_s1 + $0x1e00] ss:$16 sps:$4 sm:$0xff]  }
 0x387   :  { %8385 = vmatpush1.bf16.msra.mxu0 %v12675_v0  ;;  %9205 = vmatpush1.bf16.msra.mxu1 %v12678_v1  ;;  %v12768_v0 = vld [vmem:[%s17658_s1 + $0x1e08] ss:$16 sps:$4 sm:$0xff]   ;;  %v12773_v1 = vld [vmem:[%s17658_s1 + $0x1e24] ss:$16 sps:$4 sm:$0xff]  }
 0x388   :  { %8386 = vmatprep.subr.bf16.mxu0 %v12683_v2  ;;  %9206 = vmatprep.subr.bf16.mxu1 %v12686_v3  ;;  %v12776_v2 = vld [vmem:[%s17658_s1 + $0x1e2c] ss:$16 sps:$4 sm:$0xff]   ;;  %v97_v3 = vpack.c.bf16 %v57_v62, %v57_v62  ;;  %v56_v62 = vld [vmem:[%s17659_s0 + $0xf0] sm:$0xff] }
 0x38b   :  { %8387 = vmatpush1.bf16.msra.mxu0 %v12681_v4  ;;  %9207 = vmatpush1.bf16.msra.mxu1 %v12684_v5  ;;  %v12771_v4 = vld [vmem:[%s17658_s1 + $0x1e20] ss:$16 sps:$4 sm:$0xff]   ;;  %v12774_v5 = vld [vmem:[%s17658_s1 + $0x1e28] ss:$16 sps:$4 sm:$0xff]  }
 0x38c   :  { %8388 = vmatprep.subr.bf16.mxu0 %v12689_v6  ;;  %9208 = vmatprep.subr.bf16.mxu1 %v12692_v7  ;;  %v12779_v6 = vld [vmem:[%s17658_s1 + $0x1e44] ss:$16 sps:$4 sm:$0xff]   ;;  %v12782_v7 = vld [vmem:[%s17658_s1 + $0x1e4c] ss:$16 sps:$4 sm:$0xff]  }
 0x38f   :  { %8389 = vmatpush1.bf16.msra.mxu0 %v12687_v8  ;;  %9209 = vmatpush1.bf16.msra.mxu1 %v12690_v9  ;;  %v12777_v8 = vld [vmem:[%s17658_s1 + $0x1e40] ss:$16 sps:$4 sm:$0xff]   ;;  %v12780_v9 = vld [vmem:[%s17658_s1 + $0x1e48] ss:$16 sps:$4 sm:$0xff]  }
 0x390   :  { %8390 = vmatprep.subr.bf16.mxu0 %v12695_v10  ;;  %9210 = vmatprep.subr.bf16.mxu1 %v12698_v11  ;;  %v12785_v10 = vld [vmem:[%s17658_s1 + $0x1e64] ss:$16 sps:$4 sm:$0xff]   ;;  %v12788_v11 = vld [vmem:[%s17658_s1 + $0x1e6c] ss:$16 sps:$4 sm:$0xff]  }
 0x393   :  { %8391 = vmatpush1.bf16.msra.mxu0 %v12693_v12  ;;  %9211 = vmatpush1.bf16.msra.mxu1 %v12696_v13  ;;  %v12783_v12 = vld [vmem:[%s17658_s1 + $0x1e60] ss:$16 sps:$4 sm:$0xff]   ;;  %v12786_v13 = vld [vmem:[%s17658_s1 + $0x1e68] ss:$16 sps:$4 sm:$0xff]  }
 0x394   :  { %8392 = vmatprep.subr.bf16.mxu0 %v12701_v14  ;;  %9212 = vmatprep.subr.bf16.mxu1 %v12704_v15  ;;  %v12791_v14 = vld [vmem:[%s17658_s1 + $0x1e84] ss:$16 sps:$4 sm:$0xff]   ;;  %v12794_v15 = vld [vmem:[%s17658_s1 + $0x1e8c] ss:$16 sps:$4 sm:$0xff]  }
 0x397   :  { %8393 = vmatpush1.bf16.msra.mxu0 %v12699_v16  ;;  %9213 = vmatpush1.bf16.msra.mxu1 %v12702_v17  ;;  %v12789_v16 = vld [vmem:[%s17658_s1 + $0x1e80] ss:$16 sps:$4 sm:$0xff]   ;;  %v12792_v17 = vld [vmem:[%s17658_s1 + $0x1e88] ss:$16 sps:$4 sm:$0xff]  }
 0x398   :  { %8394 = vmatprep.subr.bf16.mxu0 %v12707_v18  ;;  %9214 = vmatprep.subr.bf16.mxu1 %v12710_v19  ;;  %v12797_v18 = vld [vmem:[%s17658_s1 + $0x1ea4] ss:$16 sps:$4 sm:$0xff]   ;;  %v12800_v19 = vld [vmem:[%s17658_s1 + $0x1eac] ss:$16 sps:$4 sm:$0xff]  }
 0x39b   :  { %8395 = vmatpush1.bf16.msra.mxu0 %v12705_v20  ;;  %9215 = vmatpush1.bf16.msra.mxu1 %v12708_v21  ;;  %v12795_v20 = vld [vmem:[%s17658_s1 + $0x1ea0] ss:$16 sps:$4 sm:$0xff]   ;;  %v12798_v21 = vld [vmem:[%s17658_s1 + $0x1ea8] ss:$16 sps:$4 sm:$0xff]  }
 0x39c   :  { %8396 = vmatprep.subr.bf16.mxu0 %v12713_v22  ;;  %9216 = vmatprep.subr.bf16.mxu1 %v12716_v23  ;;  %v12803_v22 = vld [vmem:[%s17658_s1 + $0x1ec4] ss:$16 sps:$4 sm:$0xff]   ;;  %v12806_v23 = vld [vmem:[%s17658_s1 + $0x1ecc] ss:$16 sps:$4 sm:$0xff]  }
 0x39f   :  { %8397 = vmatpush1.bf16.msra.mxu0 %v12711_v24  ;;  %9217 = vmatpush1.bf16.msra.mxu1 %v12714_v25  ;;  %v12801_v24 = vld [vmem:[%s17658_s1 + $0x1ec0] ss:$16 sps:$4 sm:$0xff]   ;;  %v12804_v25 = vld [vmem:[%s17658_s1 + $0x1ec8] ss:$16 sps:$4 sm:$0xff]  }
 0x3a0   :  { %8398 = vmatprep.subr.bf16.mxu0 %v12719_v26  ;;  %9218 = vmatprep.subr.bf16.mxu1 %v12722_v27  ;;  %v12809_v26 = vld [vmem:[%s17658_s1 + $0x1ee4] ss:$16 sps:$4 sm:$0xff]   ;;  %v12812_v27 = vld [vmem:[%s17658_s1 + $0x1eec] ss:$16 sps:$4 sm:$0xff]  }
 0x3a3   :  { %8399 = vmatpush1.bf16.msra.mxu0 %v12717_v28  ;;  %9219 = vmatpush1.bf16.msra.mxu1 %v12720_v29  ;;  %v12807_v28 = vld [vmem:[%s17658_s1 + $0x1ee0] ss:$16 sps:$4 sm:$0xff]   ;;  %v12810_v29 = vld [vmem:[%s17658_s1 + $0x1ee8] ss:$16 sps:$4 sm:$0xff]  }
 0x3a4   :  { %8400 = vmatprep.subr.bf16.mxu0 %v12725_v30  ;;  %9220 = vmatprep.subr.bf16.mxu1 %v12728_v31  ;;  %v12815_v30 = vld [vmem:[%s17658_s1 + $0x1f04] ss:$16 sps:$4 sm:$0xff]   ;;  %v12818_v31 = vld [vmem:[%s17658_s1 + $0x1f0c] ss:$16 sps:$4 sm:$0xff]  }
 0x3a7   :  { %8401 = vmatpush1.bf16.msra.mxu0 %v12723_v32  ;;  %9221 = vmatpush1.bf16.msra.mxu1 %v12726_v33  ;;  %v12813_v32 = vld [vmem:[%s17658_s1 + $0x1f00] ss:$16 sps:$4 sm:$0xff]   ;;  %v12816_v33 = vld [vmem:[%s17658_s1 + $0x1f08] ss:$16 sps:$4 sm:$0xff]  }
 0x3a8   :  { %8402 = vmatprep.subr.bf16.mxu0 %v12731_v34  ;;  %9222 = vmatprep.subr.bf16.mxu1 %v12734_v35  ;;  %v12821_v34 = vld [vmem:[%s17658_s1 + $0x1f24] ss:$16 sps:$4 sm:$0xff]   ;;  %v12824_v35 = vld [vmem:[%s17658_s1 + $0x1f2c] ss:$16 sps:$4 sm:$0xff]  }
 0x3ab   :  { %8403 = vmatpush1.bf16.msra.mxu0 %v12729_v36  ;;  %9223 = vmatpush1.bf16.msra.mxu1 %v12732_v37  ;;  %v12819_v36 = vld [vmem:[%s17658_s1 + $0x1f20] ss:$16 sps:$4 sm:$0xff]   ;;  %v12822_v37 = vld [vmem:[%s17658_s1 + $0x1f28] ss:$16 sps:$4 sm:$0xff]  }
 0x3ac   :  { %8404 = vmatprep.subr.bf16.mxu0 %v12737_v38  ;;  %9224 = vmatprep.subr.bf16.mxu1 %v12740_v39  ;;  %v12827_v38 = vld [vmem:[%s17658_s1 + $0x1f44] ss:$16 sps:$4 sm:$0xff]   ;;  %v12830_v39 = vld [vmem:[%s17658_s1 + $0x1f4c] ss:$16 sps:$4 sm:$0xff]  }
 0x3af   :  { %8405 = vmatpush1.bf16.msra.mxu0 %v12735_v40  ;;  %9225 = vmatpush1.bf16.msra.mxu1 %v12738_v41  ;;  %v12825_v40 = vld [vmem:[%s17658_s1 + $0x1f40] ss:$16 sps:$4 sm:$0xff]   ;;  %v12828_v41 = vld [vmem:[%s17658_s1 + $0x1f48] ss:$16 sps:$4 sm:$0xff]  }
 0x3b0   :  { %8406 = vmatprep.subr.bf16.mxu0 %v12743_v42  ;;  %9226 = vmatprep.subr.bf16.mxu1 %v12746_v43  ;;  %v12833_v42 = vld [vmem:[%s17658_s1 + $0x1f64] ss:$16 sps:$4 sm:$0xff]   ;;  %v12836_v43 = vld [vmem:[%s17658_s1 + $0x1f6c] ss:$16 sps:$4 sm:$0xff]  }
 0x3b3   :  { %8407 = vmatpush1.bf16.msra.mxu0 %v12741_v44  ;;  %9227 = vmatpush1.bf16.msra.mxu1 %v12744_v45  ;;  %v12831_v44 = vld [vmem:[%s17658_s1 + $0x1f60] ss:$16 sps:$4 sm:$0xff]   ;;  %v12834_v45 = vld [vmem:[%s17658_s1 + $0x1f68] ss:$16 sps:$4 sm:$0xff]  }
 0x3b4   :  { %8408 = vmatprep.subr.bf16.mxu0 %v12749_v46  ;;  %9228 = vmatprep.subr.bf16.mxu1 %v12752_v47  ;;  %v12839_v46 = vld [vmem:[%s17658_s1 + $0x1f84] ss:$16 sps:$4 sm:$0xff]   ;;  %v12842_v47 = vld [vmem:[%s17658_s1 + $0x1f8c] ss:$16 sps:$4 sm:$0xff]  }
 0x3b7   :  { %8409 = vmatpush1.bf16.msra.mxu0 %v12747_v48  ;;  %9229 = vmatpush1.bf16.msra.mxu1 %v12750_v49  ;;  %v12837_v48 = vld [vmem:[%s17658_s1 + $0x1f80] ss:$16 sps:$4 sm:$0xff]   ;;  %v12840_v49 = vld [vmem:[%s17658_s1 + $0x1f88] ss:$16 sps:$4 sm:$0xff]  }
 0x3b8   :  { %8410 = vmatprep.subr.bf16.mxu0 %v12755_v50  ;;  %9230 = vmatprep.subr.bf16.mxu1 %v12758_v51  ;;  %v12845_v50 = vld [vmem:[%s17658_s1 + $0x1fa4] ss:$16 sps:$4 sm:$0xff]   ;;  %v12848_v51 = vld [vmem:[%s17658_s1 + $0x1fac] ss:$16 sps:$4 sm:$0xff]  }
 0x3bb   :  { %8411 = vmatpush1.bf16.msra.mxu0 %v12753_v52  ;;  %9231 = vmatpush1.bf16.msra.mxu1 %v12756_v53  ;;  %v12843_v52 = vld [vmem:[%s17658_s1 + $0x1fa0] ss:$16 sps:$4 sm:$0xff]   ;;  %v12846_v53 = vld [vmem:[%s17658_s1 + $0x1fa8] ss:$16 sps:$4 sm:$0xff]  }
 0x3bc   :  { %8412 = vmatprep.subr.bf16.mxu0 %v12761_v54  ;;  %9232 = vmatprep.subr.bf16.mxu1 %v12764_v55  ;;  %v12851_v54 = vld [vmem:[%s17658_s1 + $0x1fc4] ss:$16 sps:$4 sm:$0xff]   ;;  %v12854_v55 = vld [vmem:[%s17658_s1 + $0x1fcc] ss:$16 sps:$4 sm:$0xff]  }
 0x3bf   :  { %8413 = vmatpush1.bf16.msra.mxu0 %v12759_v56  ;;  %9233 = vmatpush1.bf16.msra.mxu1 %v12762_v57  ;;  %v12849_v56 = vld [vmem:[%s17658_s1 + $0x1fc0] ss:$16 sps:$4 sm:$0xff]   ;;  %v12852_v57 = vld [vmem:[%s17658_s1 + $0x1fc8] ss:$16 sps:$4 sm:$0xff]  }
 0x3c0   :  { %8423 = vmatprep.subr.bf16.mxu0 %v12767_v59  ;;  %9243 = vmatprep.subr.bf16.mxu1 %v12770_v60  ;;  %v12860_v59 = vld [vmem:[%s17658_s1 + $0x1fec] ss:$16 sps:$4 sm:$0xff]   ;;  %v12855_v60 = vld [vmem:[%s17658_s1 + $0x1fe0] ss:$16 sps:$4 sm:$0xff]  }
 0x3c2   :  { %8415 = vmatmul.mubr.bf16.vlgmr.msra.gmra.mrb[0].mxu0 %v94_v61  ;;  %9235 = vmatmul.mubr.bf16.vlgmr.msra.gmra.mrb[0].mxu1 %v94_v61  ;;  %v12858_v61 = vld [vmem:[%s17658_s1 + $0x1fe8] ss:$16 sps:$4 sm:$0xff]  }
 0x3c3   :  { %8424 = vmatpush1.bf16.msra.mxu0 %v12765_v63  ;;  %9244 = vmatpush1.bf16.msra.mxu1 %v12768_v0  ;;  %v12863_v63 = vld [vmem:[%s17658_s1 + $0x2004] ss:$16 sps:$4 sm:$0xff]   ;;  %v12866_v0 = vld [vmem:[%s17658_s1 + $0x200c] ss:$16 sps:$4 sm:$0xff]  }
 0x3c4   :  { %8425 = vmatprep.subr.bf16.mxu0 %v12773_v1  ;;  %9245 = vmatprep.subr.bf16.mxu1 %v12776_v2  ;;  %v96_v1 = vpack.c.bf16 %v56_v62, %v56_v62  ;;  %v59_v2 = vld [vmem:[%s17659_s0 + $0x108] sm:$0xff]  ;;  %v12953_v62 = vld [vmem:[%s17658_s1 + $0x21e4] ss:$16 sps:$4 sm:$0xff]  }
 0x3c5   :  { %8455 = vmatprep.mubr.bf16.mxu0 %v97_v3  ;;  %9275 = vmatprep.mubr.bf16.mxu1 %v97_v3  ;;  %v12861_v3 = vld [vmem:[%s17658_s1 + $0x2000] ss:$16 sps:$4 sm:$0xff]  }
 0x3c7   :  { %8426 = vmatpush1.bf16.msra.mxu0 %v12771_v4  ;;  %9246 = vmatpush1.bf16.msra.mxu1 %v12774_v5  ;;  %v12864_v4 = vld [vmem:[%s17658_s1 + $0x2008] ss:$16 sps:$4 sm:$0xff]   ;;  %v12869_v5 = vld [vmem:[%s17658_s1 + $0x2024] ss:$16 sps:$4 sm:$0xff]  }
 0x3c8   :  { %8427 = vmatprep.subr.bf16.mxu0 %v12779_v6  ;;  %9247 = vmatprep.subr.bf16.mxu1 %v12782_v7  ;;  %v12872_v6 = vld [vmem:[%s17658_s1 + $0x202c] ss:$16 sps:$4 sm:$0xff]   ;;  %v99_v7 = vpack.c.bf16 %v59_v2, %v59_v2  ;;  %v58_v2 = vld [vmem:[%s17659_s0 + $0x100] sm:$0xff] }
 0x3cb   :  { %8428 = vmatpush1.bf16.msra.mxu0 %v12777_v8  ;;  %9248 = vmatpush1.bf16.msra.mxu1 %v12780_v9  ;;  %v12867_v8 = vld [vmem:[%s17658_s1 + $0x2020] ss:$16 sps:$4 sm:$0xff]   ;;  %v12870_v9 = vld [vmem:[%s17658_s1 + $0x2028] ss:$16 sps:$4 sm:$0xff]  }
 0x3cc   :  { %8429 = vmatprep.subr.bf16.mxu0 %v12785_v10  ;;  %9249 = vmatprep.subr.bf16.mxu1 %v12788_v11  ;;  %v12875_v10 = vld [vmem:[%s17658_s1 + $0x2044] ss:$16 sps:$4 sm:$0xff]   ;;  %v12878_v11 = vld [vmem:[%s17658_s1 + $0x204c] ss:$16 sps:$4 sm:$0xff]  }
 0x3cf   :  { %8430 = vmatpush1.bf16.msra.mxu0 %v12783_v12  ;;  %9250 = vmatpush1.bf16.msra.mxu1 %v12786_v13  ;;  %v12873_v12 = vld [vmem:[%s17658_s1 + $0x2040] ss:$16 sps:$4 sm:$0xff]   ;;  %v12876_v13 = vld [vmem:[%s17658_s1 + $0x2048] ss:$16 sps:$4 sm:$0xff]  }
 0x3d0   :  { %8431 = vmatprep.subr.bf16.mxu0 %v12791_v14  ;;  %9251 = vmatprep.subr.bf16.mxu1 %v12794_v15  ;;  %v12881_v14 = vld [vmem:[%s17658_s1 + $0x2064] ss:$16 sps:$4 sm:$0xff]   ;;  %v12884_v15 = vld [vmem:[%s17658_s1 + $0x206c] ss:$16 sps:$4 sm:$0xff]  }
 0x3d3   :  { %8432 = vmatpush1.bf16.msra.mxu0 %v12789_v16  ;;  %9252 = vmatpush1.bf16.msra.mxu1 %v12792_v17  ;;  %v12879_v16 = vld [vmem:[%s17658_s1 + $0x2060] ss:$16 sps:$4 sm:$0xff]   ;;  %v12882_v17 = vld [vmem:[%s17658_s1 + $0x2068] ss:$16 sps:$4 sm:$0xff]  }
 0x3d4   :  { %8433 = vmatprep.subr.bf16.mxu0 %v12797_v18  ;;  %9253 = vmatprep.subr.bf16.mxu1 %v12800_v19  ;;  %v12887_v18 = vld [vmem:[%s17658_s1 + $0x2084] ss:$16 sps:$4 sm:$0xff]   ;;  %v12890_v19 = vld [vmem:[%s17658_s1 + $0x208c] ss:$16 sps:$4 sm:$0xff]  }
 0x3d7   :  { %8434 = vmatpush1.bf16.msra.mxu0 %v12795_v20  ;;  %9254 = vmatpush1.bf16.msra.mxu1 %v12798_v21  ;;  %v12885_v20 = vld [vmem:[%s17658_s1 + $0x2080] ss:$16 sps:$4 sm:$0xff]   ;;  %v12888_v21 = vld [vmem:[%s17658_s1 + $0x2088] ss:$16 sps:$4 sm:$0xff]  }
 0x3d8   :  { %8435 = vmatprep.subr.bf16.mxu0 %v12803_v22  ;;  %9255 = vmatprep.subr.bf16.mxu1 %v12806_v23  ;;  %v12893_v22 = vld [vmem:[%s17658_s1 + $0x20a4] ss:$16 sps:$4 sm:$0xff]   ;;  %v12896_v23 = vld [vmem:[%s17658_s1 + $0x20ac] ss:$16 sps:$4 sm:$0xff]  }
 0x3db   :  { %8436 = vmatpush1.bf16.msra.mxu0 %v12801_v24  ;;  %9256 = vmatpush1.bf16.msra.mxu1 %v12804_v25  ;;  %v12891_v24 = vld [vmem:[%s17658_s1 + $0x20a0] ss:$16 sps:$4 sm:$0xff]   ;;  %v12894_v25 = vld [vmem:[%s17658_s1 + $0x20a8] ss:$16 sps:$4 sm:$0xff]  }
 0x3dc   :  { %8437 = vmatprep.subr.bf16.mxu0 %v12809_v26  ;;  %9257 = vmatprep.subr.bf16.mxu1 %v12812_v27  ;;  %v12899_v26 = vld [vmem:[%s17658_s1 + $0x20c4] ss:$16 sps:$4 sm:$0xff]   ;;  %v12902_v27 = vld [vmem:[%s17658_s1 + $0x20cc] ss:$16 sps:$4 sm:$0xff]  }
 0x3df   :  { %8438 = vmatpush1.bf16.msra.mxu0 %v12807_v28  ;;  %9258 = vmatpush1.bf16.msra.mxu1 %v12810_v29  ;;  %v12897_v28 = vld [vmem:[%s17658_s1 + $0x20c0] ss:$16 sps:$4 sm:$0xff]   ;;  %v12900_v29 = vld [vmem:[%s17658_s1 + $0x20c8] ss:$16 sps:$4 sm:$0xff]  }
 0x3e0   :  { %8439 = vmatprep.subr.bf16.mxu0 %v12815_v30  ;;  %9259 = vmatprep.subr.bf16.mxu1 %v12818_v31  ;;  %v12905_v30 = vld [vmem:[%s17658_s1 + $0x20e4] ss:$16 sps:$4 sm:$0xff]   ;;  %v12908_v31 = vld [vmem:[%s17658_s1 + $0x20ec] ss:$16 sps:$4 sm:$0xff]  }
 0x3e3   :  { %8440 = vmatpush1.bf16.msra.mxu0 %v12813_v32  ;;  %9260 = vmatpush1.bf16.msra.mxu1 %v12816_v33  ;;  %v12903_v32 = vld [vmem:[%s17658_s1 + $0x20e0] ss:$16 sps:$4 sm:$0xff]   ;;  %v12906_v33 = vld [vmem:[%s17658_s1 + $0x20e8] ss:$16 sps:$4 sm:$0xff]  }
 0x3e4   :  { %8441 = vmatprep.subr.bf16.mxu0 %v12821_v34  ;;  %9261 = vmatprep.subr.bf16.mxu1 %v12824_v35  ;;  %v12911_v34 = vld [vmem:[%s17658_s1 + $0x2104] ss:$16 sps:$4 sm:$0xff]   ;;  %v12914_v35 = vld [vmem:[%s17658_s1 + $0x210c] ss:$16 sps:$4 sm:$0xff]  }
 0x3e7   :  { %8442 = vmatpush1.bf16.msra.mxu0 %v12819_v36  ;;  %9262 = vmatpush1.bf16.msra.mxu1 %v12822_v37  ;;  %v12909_v36 = vld [vmem:[%s17658_s1 + $0x2100] ss:$16 sps:$4 sm:$0xff]   ;;  %v12912_v37 = vld [vmem:[%s17658_s1 + $0x2108] ss:$16 sps:$4 sm:$0xff]  }
 0x3e8   :  { %8443 = vmatprep.subr.bf16.mxu0 %v12827_v38  ;;  %9263 = vmatprep.subr.bf16.mxu1 %v12830_v39  ;;  %v12917_v38 = vld [vmem:[%s17658_s1 + $0x2124] ss:$16 sps:$4 sm:$0xff]   ;;  %v12920_v39 = vld [vmem:[%s17658_s1 + $0x212c] ss:$16 sps:$4 sm:$0xff]  }
 0x3eb   :  { %8444 = vmatpush1.bf16.msra.mxu0 %v12825_v40  ;;  %9264 = vmatpush1.bf16.msra.mxu1 %v12828_v41  ;;  %v12915_v40 = vld [vmem:[%s17658_s1 + $0x2120] ss:$16 sps:$4 sm:$0xff]   ;;  %v12918_v41 = vld [vmem:[%s17658_s1 + $0x2128] ss:$16 sps:$4 sm:$0xff]  }
 0x3ec   :  { %8445 = vmatprep.subr.bf16.mxu0 %v12833_v42  ;;  %9265 = vmatprep.subr.bf16.mxu1 %v12836_v43  ;;  %v12923_v42 = vld [vmem:[%s17658_s1 + $0x2144] ss:$16 sps:$4 sm:$0xff]   ;;  %v12926_v43 = vld [vmem:[%s17658_s1 + $0x214c] ss:$16 sps:$4 sm:$0xff]  }
 0x3ef   :  { %8446 = vmatpush1.bf16.msra.mxu0 %v12831_v44  ;;  %9266 = vmatpush1.bf16.msra.mxu1 %v12834_v45  ;;  %v12921_v44 = vld [vmem:[%s17658_s1 + $0x2140] ss:$16 sps:$4 sm:$0xff]   ;;  %v12924_v45 = vld [vmem:[%s17658_s1 + $0x2148] ss:$16 sps:$4 sm:$0xff]  }
 0x3f0   :  { %8447 = vmatprep.subr.bf16.mxu0 %v12839_v46  ;;  %9267 = vmatprep.subr.bf16.mxu1 %v12842_v47  ;;  %v12929_v46 = vld [vmem:[%s17658_s1 + $0x2164] ss:$16 sps:$4 sm:$0xff]   ;;  %v12932_v47 = vld [vmem:[%s17658_s1 + $0x216c] ss:$16 sps:$4 sm:$0xff]  }
 0x3f3   :  { %8448 = vmatpush1.bf16.msra.mxu0 %v12837_v48  ;;  %9268 = vmatpush1.bf16.msra.mxu1 %v12840_v49  ;;  %v12927_v48 = vld [vmem:[%s17658_s1 + $0x2160] ss:$16 sps:$4 sm:$0xff]   ;;  %v12930_v49 = vld [vmem:[%s17658_s1 + $0x2168] ss:$16 sps:$4 sm:$0xff]  }
 0x3f4   :  { %8449 = vmatprep.subr.bf16.mxu0 %v12845_v50  ;;  %9269 = vmatprep.subr.bf16.mxu1 %v12848_v51  ;;  %v12935_v50 = vld [vmem:[%s17658_s1 + $0x2184] ss:$16 sps:$4 sm:$0xff]   ;;  %v12938_v51 = vld [vmem:[%s17658_s1 + $0x218c] ss:$16 sps:$4 sm:$0xff]  }
 0x3f7   :  { %8450 = vmatpush1.bf16.msra.mxu0 %v12843_v52  ;;  %9270 = vmatpush1.bf16.msra.mxu1 %v12846_v53  ;;  %v12933_v52 = vld [vmem:[%s17658_s1 + $0x2180] ss:$16 sps:$4 sm:$0xff]   ;;  %v12936_v53 = vld [vmem:[%s17658_s1 + $0x2188] ss:$16 sps:$4 sm:$0xff]  }
 0x3f8   :  { %8451 = vmatprep.subr.bf16.mxu0 %v12851_v54  ;;  %9271 = vmatprep.subr.bf16.mxu1 %v12854_v55  ;;  %v12941_v54 = vld [vmem:[%s17658_s1 + $0x21a4] ss:$16 sps:$4 sm:$0xff]   ;;  %v12944_v55 = vld [vmem:[%s17658_s1 + $0x21ac] ss:$16 sps:$4 sm:$0xff]  }
 0x3fb   :  { %8452 = vmatpush1.bf16.msra.mxu0 %v12849_v56  ;;  %9272 = vmatpush1.bf16.msra.mxu1 %v12852_v57  ;;  %v12939_v56 = vld [vmem:[%s17658_s1 + $0x21a0] ss:$16 sps:$4 sm:$0xff]   ;;  %v12942_v57 = vld [vmem:[%s17658_s1 + $0x21a8] ss:$16 sps:$4 sm:$0xff]  }
 0x3fc   :  { %8453 = vmatprep.subr.bf16.mxu0 %v12857_v58  ;;  %9273 = vmatprep.subr.bf16.mxu1 %v12860_v59  ;;  %v12947_v58 = vld [vmem:[%s17658_s1 + $0x21c4] ss:$16 sps:$4 sm:$0xff]   ;;  %v12950_v59 = vld [vmem:[%s17658_s1 + $0x21cc] ss:$16 sps:$4 sm:$0xff]  }
 0x3ff   :  { %8454 = vmatpush1.bf16.msra.mxu0 %v12855_v60  ;;  %9274 = vmatpush1.bf16.msra.mxu1 %v12858_v61  ;;  %v12945_v60 = vld [vmem:[%s17658_s1 + $0x21c0] ss:$16 sps:$4 sm:$0xff]   ;;  %v12948_v61 = vld [vmem:[%s17658_s1 + $0x21c8] ss:$16 sps:$4 sm:$0xff]  }
 0x400   :  { %8464 = vmatprep.subr.bf16.mxu0 %v12863_v63  ;;  %9284 = vmatprep.subr.bf16.mxu1 %v12866_v0  ;;  %v12956_v63 = vld [vmem:[%s17658_s1 + $0x21ec] ss:$16 sps:$4 sm:$0xff]   ;;  %v12951_v0 = vld [vmem:[%s17658_s1 + $0x21e0] ss:$16 sps:$4 sm:$0xff]  }
 0x402   :  { %8456 = vmatmul.mubr.bf16.vlgmr.msra.gmra.mrb[0].mxu0 %v96_v1  ;;  %9276 = vmatmul.mubr.bf16.vlgmr.msra.gmra.mrb[0].mxu1 %v96_v1  ;;  %v12954_v1 = vld [vmem:[%s17658_s1 + $0x21e8] ss:$16 sps:$4 sm:$0xff]  }
 0x403   :  { %8465 = vmatpush1.bf16.msra.mxu0 %v12861_v3  ;;  %9285 = vmatpush1.bf16.msra.mxu1 %v12864_v4  ;;  %v12959_v3 = vld [vmem:[%s17658_s1 + $0x2204] ss:$16 sps:$4 sm:$0xff]   ;;  %v12962_v4 = vld [vmem:[%s17658_s1 + $0x220c] ss:$16 sps:$4 sm:$0xff]  }
 0x404   :  { %8466 = vmatprep.subr.bf16.mxu0 %v12869_v5  ;;  %9286 = vmatprep.subr.bf16.mxu1 %v12872_v6  ;;  %v98_v5 = vpack.c.bf16 %v58_v2, %v58_v2  ;;  %v61_v6 = vld [vmem:[%s17659_s0 + $0x118] sm:$0xff]  ;;  %v13049_v2 = vld [vmem:[%s17658_s1 + $0x23e4] ss:$16 sps:$4 sm:$0xff]  }
 0x405   :  { %8496 = vmatprep.mubr.bf16.mxu0 %v99_v7  ;;  %9316 = vmatprep.mubr.bf16.mxu1 %v99_v7  ;;  %v12957_v7 = vld [vmem:[%s17658_s1 + $0x2200] ss:$16 sps:$4 sm:$0xff]  }
 0x407   :  { %8467 = vmatpush1.bf16.msra.mxu0 %v12867_v8  ;;  %9287 = vmatpush1.bf16.msra.mxu1 %v12870_v9  ;;  %v12960_v8 = vld [vmem:[%s17658_s1 + $0x2208] ss:$16 sps:$4 sm:$0xff]   ;;  %v12965_v9 = vld [vmem:[%s17658_s1 + $0x2224] ss:$16 sps:$4 sm:$0xff]  }
 0x408   :  { %8468 = vmatprep.subr.bf16.mxu0 %v12875_v10  ;;  %9288 = vmatprep.subr.bf16.mxu1 %v12878_v11  ;;  %v12968_v10 = vld [vmem:[%s17658_s1 + $0x222c] ss:$16 sps:$4 sm:$0xff]   ;;  %v101_v11 = vpack.c.bf16 %v61_v6, %v61_v6  ;;  %v60_v6 = vld [vmem:[%s17659_s0 + $0x110] sm:$0xff] }
 0x40b   :  { %8469 = vmatpush1.bf16.msra.mxu0 %v12873_v12  ;;  %9289 = vmatpush1.bf16.msra.mxu1 %v12876_v13  ;;  %v12963_v12 = vld [vmem:[%s17658_s1 + $0x2220] ss:$16 sps:$4 sm:$0xff]   ;;  %v12966_v13 = vld [vmem:[%s17658_s1 + $0x2228] ss:$16 sps:$4 sm:$0xff]  }
 0x40c   :  { %8470 = vmatprep.subr.bf16.mxu0 %v12881_v14  ;;  %9290 = vmatprep.subr.bf16.mxu1 %v12884_v15  ;;  %v12971_v14 = vld [vmem:[%s17658_s1 + $0x2244] ss:$16 sps:$4 sm:$0xff]   ;;  %v12974_v15 = vld [vmem:[%s17658_s1 + $0x224c] ss:$16 sps:$4 sm:$0xff]  }
 0x40f   :  { %8471 = vmatpush1.bf16.msra.mxu0 %v12879_v16  ;;  %9291 = vmatpush1.bf16.msra.mxu1 %v12882_v17  ;;  %v12969_v16 = vld [vmem:[%s17658_s1 + $0x2240] ss:$16 sps:$4 sm:$0xff]   ;;  %v12972_v17 = vld [vmem:[%s17658_s1 + $0x2248] ss:$16 sps:$4 sm:$0xff]  }
 0x410   :  { %8472 = vmatprep.subr.bf16.mxu0 %v12887_v18  ;;  %9292 = vmatprep.subr.bf16.mxu1 %v12890_v19  ;;  %v12977_v18 = vld [vmem:[%s17658_s1 + $0x2264] ss:$16 sps:$4 sm:$0xff]   ;;  %v12980_v19 = vld [vmem:[%s17658_s1 + $0x226c] ss:$16 sps:$4 sm:$0xff]  }
 0x413   :  { %8473 = vmatpush1.bf16.msra.mxu0 %v12885_v20  ;;  %9293 = vmatpush1.bf16.msra.mxu1 %v12888_v21  ;;  %v12975_v20 = vld [vmem:[%s17658_s1 + $0x2260] ss:$16 sps:$4 sm:$0xff]   ;;  %v12978_v21 = vld [vmem:[%s17658_s1 + $0x2268] ss:$16 sps:$4 sm:$0xff]  }
 0x414   :  { %8474 = vmatprep.subr.bf16.mxu0 %v12893_v22  ;;  %9294 = vmatprep.subr.bf16.mxu1 %v12896_v23  ;;  %v12983_v22 = vld [vmem:[%s17658_s1 + $0x2284] ss:$16 sps:$4 sm:$0xff]   ;;  %v12986_v23 = vld [vmem:[%s17658_s1 + $0x228c] ss:$16 sps:$4 sm:$0xff]  }
 0x417   :  { %8475 = vmatpush1.bf16.msra.mxu0 %v12891_v24  ;;  %9295 = vmatpush1.bf16.msra.mxu1 %v12894_v25  ;;  %v12981_v24 = vld [vmem:[%s17658_s1 + $0x2280] ss:$16 sps:$4 sm:$0xff]   ;;  %v12984_v25 = vld [vmem:[%s17658_s1 + $0x2288] ss:$16 sps:$4 sm:$0xff]  }
 0x418   :  { %8476 = vmatprep.subr.bf16.mxu0 %v12899_v26  ;;  %9296 = vmatprep.subr.bf16.mxu1 %v12902_v27  ;;  %v12989_v26 = vld [vmem:[%s17658_s1 + $0x22a4] ss:$16 sps:$4 sm:$0xff]   ;;  %v12992_v27 = vld [vmem:[%s17658_s1 + $0x22ac] ss:$16 sps:$4 sm:$0xff]  }
 0x41b   :  { %8477 = vmatpush1.bf16.msra.mxu0 %v12897_v28  ;;  %9297 = vmatpush1.bf16.msra.mxu1 %v12900_v29  ;;  %v12987_v28 = vld [vmem:[%s17658_s1 + $0x22a0] ss:$16 sps:$4 sm:$0xff]   ;;  %v12990_v29 = vld [vmem:[%s17658_s1 + $0x22a8] ss:$16 sps:$4 sm:$0xff]  }
 0x41c   :  { %8478 = vmatprep.subr.bf16.mxu0 %v12905_v30  ;;  %9298 = vmatprep.subr.bf16.mxu1 %v12908_v31  ;;  %v12995_v30 = vld [vmem:[%s17658_s1 + $0x22c4] ss:$16 sps:$4 sm:$0xff]   ;;  %v12998_v31 = vld [vmem:[%s17658_s1 + $0x22cc] ss:$16 sps:$4 sm:$0xff]  }
 0x41f   :  { %8479 = vmatpush1.bf16.msra.mxu0 %v12903_v32  ;;  %9299 = vmatpush1.bf16.msra.mxu1 %v12906_v33  ;;  %v12993_v32 = vld [vmem:[%s17658_s1 + $0x22c0] ss:$16 sps:$4 sm:$0xff]   ;;  %v12996_v33 = vld [vmem:[%s17658_s1 + $0x22c8] ss:$16 sps:$4 sm:$0xff]  }
 0x420   :  { %8480 = vmatprep.subr.bf16.mxu0 %v12911_v34  ;;  %9300 = vmatprep.subr.bf16.mxu1 %v12914_v35  ;;  %v13001_v34 = vld [vmem:[%s17658_s1 + $0x22e4] ss:$16 sps:$4 sm:$0xff]   ;;  %v13004_v35 = vld [vmem:[%s17658_s1 + $0x22ec] ss:$16 sps:$4 sm:$0xff]  }
 0x423   :  { %8481 = vmatpush1.bf16.msra.mxu0 %v12909_v36  ;;  %9301 = vmatpush1.bf16.msra.mxu1 %v12912_v37  ;;  %v12999_v36 = vld [vmem:[%s17658_s1 + $0x22e0] ss:$16 sps:$4 sm:$0xff]   ;;  %v13002_v37 = vld [vmem:[%s17658_s1 + $0x22e8] ss:$16 sps:$4 sm:$0xff]  }
 0x424   :  { %8482 = vmatprep.subr.bf16.mxu0 %v12917_v38  ;;  %9302 = vmatprep.subr.bf16.mxu1 %v12920_v39  ;;  %v13007_v38 = vld [vmem:[%s17658_s1 + $0x2304] ss:$16 sps:$4 sm:$0xff]   ;;  %v13010_v39 = vld [vmem:[%s17658_s1 + $0x230c] ss:$16 sps:$4 sm:$0xff]  }
 0x427   :  { %8483 = vmatpush1.bf16.msra.mxu0 %v12915_v40  ;;  %9303 = vmatpush1.bf16.msra.mxu1 %v12918_v41  ;;  %v13005_v40 = vld [vmem:[%s17658_s1 + $0x2300] ss:$16 sps:$4 sm:$0xff]   ;;  %v13008_v41 = vld [vmem:[%s17658_s1 + $0x2308] ss:$16 sps:$4 sm:$0xff]  }
 0x428   :  { %8484 = vmatprep.subr.bf16.mxu0 %v12923_v42  ;;  %9304 = vmatprep.subr.bf16.mxu1 %v12926_v43  ;;  %v13013_v42 = vld [vmem:[%s17658_s1 + $0x2324] ss:$16 sps:$4 sm:$0xff]   ;;  %v13016_v43 = vld [vmem:[%s17658_s1 + $0x232c] ss:$16 sps:$4 sm:$0xff]  }
 0x42b   :  { %8485 = vmatpush1.bf16.msra.mxu0 %v12921_v44  ;;  %9305 = vmatpush1.bf16.msra.mxu1 %v12924_v45  ;;  %v13011_v44 = vld [vmem:[%s17658_s1 + $0x2320] ss:$16 sps:$4 sm:$0xff]   ;;  %v13014_v45 = vld [vmem:[%s17658_s1 + $0x2328] ss:$16 sps:$4 sm:$0xff]  }
 0x42c   :  { %8486 = vmatprep.subr.bf16.mxu0 %v12929_v46  ;;  %9306 = vmatprep.subr.bf16.mxu1 %v12932_v47  ;;  %v13019_v46 = vld [vmem:[%s17658_s1 + $0x2344] ss:$16 sps:$4 sm:$0xff]   ;;  %v13022_v47 = vld [vmem:[%s17658_s1 + $0x234c] ss:$16 sps:$4 sm:$0xff]  }
 0x42f   :  { %8487 = vmatpush1.bf16.msra.mxu0 %v12927_v48  ;;  %9307 = vmatpush1.bf16.msra.mxu1 %v12930_v49  ;;  %v13017_v48 = vld [vmem:[%s17658_s1 + $0x2340] ss:$16 sps:$4 sm:$0xff]   ;;  %v13020_v49 = vld [vmem:[%s17658_s1 + $0x2348] ss:$16 sps:$4 sm:$0xff]  }
 0x430   :  { %8488 = vmatprep.subr.bf16.mxu0 %v12935_v50  ;;  %9308 = vmatprep.subr.bf16.mxu1 %v12938_v51  ;;  %v13025_v50 = vld [vmem:[%s17658_s1 + $0x2364] ss:$16 sps:$4 sm:$0xff]   ;;  %v13028_v51 = vld [vmem:[%s17658_s1 + $0x236c] ss:$16 sps:$4 sm:$0xff]  }
 0x433   :  { %8489 = vmatpush1.bf16.msra.mxu0 %v12933_v52  ;;  %9309 = vmatpush1.bf16.msra.mxu1 %v12936_v53  ;;  %v13023_v52 = vld [vmem:[%s17658_s1 + $0x2360] ss:$16 sps:$4 sm:$0xff]   ;;  %v13026_v53 = vld [vmem:[%s17658_s1 + $0x2368] ss:$16 sps:$4 sm:$0xff]  }
 0x434   :  { %8490 = vmatprep.subr.bf16.mxu0 %v12941_v54  ;;  %9310 = vmatprep.subr.bf16.mxu1 %v12944_v55  ;;  %v13031_v54 = vld [vmem:[%s17658_s1 + $0x2384] ss:$16 sps:$4 sm:$0xff]   ;;  %v13034_v55 = vld [vmem:[%s17658_s1 + $0x238c] ss:$16 sps:$4 sm:$0xff]  }
 0x437   :  { %8491 = vmatpush1.bf16.msra.mxu0 %v12939_v56  ;;  %9311 = vmatpush1.bf16.msra.mxu1 %v12942_v57  ;;  %v13029_v56 = vld [vmem:[%s17658_s1 + $0x2380] ss:$16 sps:$4 sm:$0xff]   ;;  %v13032_v57 = vld [vmem:[%s17658_s1 + $0x2388] ss:$16 sps:$4 sm:$0xff]  }
 0x438   :  { %8492 = vmatprep.subr.bf16.mxu0 %v12947_v58  ;;  %9312 = vmatprep.subr.bf16.mxu1 %v12950_v59  ;;  %v13037_v58 = vld [vmem:[%s17658_s1 + $0x23a4] ss:$16 sps:$4 sm:$0xff]   ;;  %v13040_v59 = vld [vmem:[%s17658_s1 + $0x23ac] ss:$16 sps:$4 sm:$0xff]  }
 0x43b   :  { %8493 = vmatpush1.bf16.msra.mxu0 %v12945_v60  ;;  %9313 = vmatpush1.bf16.msra.mxu1 %v12948_v61  ;;  %v13035_v60 = vld [vmem:[%s17658_s1 + $0x23a0] ss:$16 sps:$4 sm:$0xff]   ;;  %v13038_v61 = vld [vmem:[%s17658_s1 + $0x23a8] ss:$16 sps:$4 sm:$0xff]  }
 0x43c   :  { %8494 = vmatprep.subr.bf16.mxu0 %v12953_v62  ;;  %9314 = vmatprep.subr.bf16.mxu1 %v12956_v63  ;;  %v13043_v62 = vld [vmem:[%s17658_s1 + $0x23c4] ss:$16 sps:$4 sm:$0xff]   ;;  %v13046_v63 = vld [vmem:[%s17658_s1 + $0x23cc] ss:$16 sps:$4 sm:$0xff]  }
 0x43f   :  { %8495 = vmatpush1.bf16.msra.mxu0 %v12951_v0  ;;  %9315 = vmatpush1.bf16.msra.mxu1 %v12954_v1  ;;  %v13041_v0 = vld [vmem:[%s17658_s1 + $0x23c0] ss:$16 sps:$4 sm:$0xff]   ;;  %v13044_v1 = vld [vmem:[%s17658_s1 + $0x23c8] ss:$16 sps:$4 sm:$0xff]  }
 0x440   :  { %8505 = vmatprep.subr.bf16.mxu0 %v12959_v3  ;;  %9325 = vmatprep.subr.bf16.mxu1 %v12962_v4  ;;  %v13052_v3 = vld [vmem:[%s17658_s1 + $0x23ec] ss:$16 sps:$4 sm:$0xff]   ;;  %v13047_v4 = vld [vmem:[%s17658_s1 + $0x23e0] ss:$16 sps:$4 sm:$0xff]  }
 0x442   :  { %8497 = vmatmul.mubr.bf16.vlgmr.msra.gmra.mrb[0].mxu0 %v98_v5  ;;  %9317 = vmatmul.mubr.bf16.vlgmr.msra.gmra.mrb[0].mxu1 %v98_v5  ;;  %v13050_v5 = vld [vmem:[%s17658_s1 + $0x23e8] ss:$16 sps:$4 sm:$0xff]  }
 0x443   :  { %8506 = vmatpush1.bf16.msra.mxu0 %v12957_v7  ;;  %9326 = vmatpush1.bf16.msra.mxu1 %v12960_v8  ;;  %v13055_v7 = vld [vmem:[%s17658_s1 + $0x2404] ss:$16 sps:$4 sm:$0xff]   ;;  %v13058_v8 = vld [vmem:[%s17658_s1 + $0x240c] ss:$16 sps:$4 sm:$0xff]  }
 0x444   :  { %8507 = vmatprep.subr.bf16.mxu0 %v12965_v9  ;;  %9327 = vmatprep.subr.bf16.mxu1 %v12968_v10  ;;  %v100_v9 = vpack.c.bf16 %v60_v6, %v60_v6  ;;  %v63_v10 = vld [vmem:[%s17659_s0 + $0x128] sm:$0xff]  ;;  %v13145_v6 = vld [vmem:[%s17658_s1 + $0x25e4] ss:$16 sps:$4 sm:$0xff]  }
 0x445   :  { %8537 = vmatprep.mubr.bf16.mxu0 %v101_v11  ;;  %9357 = vmatprep.mubr.bf16.mxu1 %v101_v11  ;;  %v13053_v11 = vld [vmem:[%s17658_s1 + $0x2400] ss:$16 sps:$4 sm:$0xff]  }
 0x447   :  { %8508 = vmatpush1.bf16.msra.mxu0 %v12963_v12  ;;  %9328 = vmatpush1.bf16.msra.mxu1 %v12966_v13  ;;  %v13056_v12 = vld [vmem:[%s17658_s1 + $0x2408] ss:$16 sps:$4 sm:$0xff]   ;;  %v13061_v13 = vld [vmem:[%s17658_s1 + $0x2424] ss:$16 sps:$4 sm:$0xff]  }
 0x448   :  { %8509 = vmatprep.subr.bf16.mxu0 %v12971_v14  ;;  %9329 = vmatprep.subr.bf16.mxu1 %v12974_v15  ;;  %v13064_v14 = vld [vmem:[%s17658_s1 + $0x242c] ss:$16 sps:$4 sm:$0xff]   ;;  %v103_v15 = vpack.c.bf16 %v63_v10, %v63_v10  ;;  %v62_v10 = vld [vmem:[%s17659_s0 + $0x120] sm:$0xff] }
 0x44b   :  { %8510 = vmatpush1.bf16.msra.mxu0 %v12969_v16  ;;  %9330 = vmatpush1.bf16.msra.mxu1 %v12972_v17  ;;  %v13059_v16 = vld [vmem:[%s17658_s1 + $0x2420] ss:$16 sps:$4 sm:$0xff]   ;;  %v13062_v17 = vld [vmem:[%s17658_s1 + $0x2428] ss:$16 sps:$4 sm:$0xff]  }
 0x44c   :  { %8511 = vmatprep.subr.bf16.mxu0 %v12977_v18  ;;  %9331 = vmatprep.subr.bf16.mxu1 %v12980_v19  ;;  %v13067_v18 = vld [vmem:[%s17658_s1 + $0x2444] ss:$16 sps:$4 sm:$0xff]   ;;  %v13070_v19 = vld [vmem:[%s17658_s1 + $0x244c] ss:$16 sps:$4 sm:$0xff]  }
 0x44f   :  { %8512 = vmatpush1.bf16.msra.mxu0 %v12975_v20  ;;  %9332 = vmatpush1.bf16.msra.mxu1 %v12978_v21  ;;  %v13065_v20 = vld [vmem:[%s17658_s1 + $0x2440] ss:$16 sps:$4 sm:$0xff]   ;;  %v13068_v21 = vld [vmem:[%s17658_s1 + $0x2448] ss:$16 sps:$4 sm:$0xff]  }
 0x450   :  { %8513 = vmatprep.subr.bf16.mxu0 %v12983_v22  ;;  %9333 = vmatprep.subr.bf16.mxu1 %v12986_v23  ;;  %v13073_v22 = vld [vmem:[%s17658_s1 + $0x2464] ss:$16 sps:$4 sm:$0xff]   ;;  %v13076_v23 = vld [vmem:[%s17658_s1 + $0x246c] ss:$16 sps:$4 sm:$0xff]  }
 0x453   :  { %8514 = vmatpush1.bf16.msra.mxu0 %v12981_v24  ;;  %9334 = vmatpush1.bf16.msra.mxu1 %v12984_v25  ;;  %v13071_v24 = vld [vmem:[%s17658_s1 + $0x2460] ss:$16 sps:$4 sm:$0xff]   ;;  %v13074_v25 = vld [vmem:[%s17658_s1 + $0x2468] ss:$16 sps:$4 sm:$0xff]  }
 0x454   :  { %8515 = vmatprep.subr.bf16.mxu0 %v12989_v26  ;;  %9335 = vmatprep.subr.bf16.mxu1 %v12992_v27  ;;  %v13079_v26 = vld [vmem:[%s17658_s1 + $0x2484] ss:$16 sps:$4 sm:$0xff]   ;;  %v13082_v27 = vld [vmem:[%s17658_s1 + $0x248c] ss:$16 sps:$4 sm:$0xff]  }
 0x457   :  { %8516 = vmatpush1.bf16.msra.mxu0 %v12987_v28  ;;  %9336 = vmatpush1.bf16.msra.mxu1 %v12990_v29  ;;  %v13077_v28 = vld [vmem:[%s17658_s1 + $0x2480] ss:$16 sps:$4 sm:$0xff]   ;;  %v13080_v29 = vld [vmem:[%s17658_s1 + $0x2488] ss:$16 sps:$4 sm:$0xff]  }
 0x458   :  { %8517 = vmatprep.subr.bf16.mxu0 %v12995_v30  ;;  %9337 = vmatprep.subr.bf16.mxu1 %v12998_v31  ;;  %v13085_v30 = vld [vmem:[%s17658_s1 + $0x24a4] ss:$16 sps:$4 sm:$0xff]   ;;  %v13088_v31 = vld [vmem:[%s17658_s1 + $0x24ac] ss:$16 sps:$4 sm:$0xff]  }
 0x45b   :  { %8518 = vmatpush1.bf16.msra.mxu0 %v12993_v32  ;;  %9338 = vmatpush1.bf16.msra.mxu1 %v12996_v33  ;;  %v13083_v32 = vld [vmem:[%s17658_s1 + $0x24a0] ss:$16 sps:$4 sm:$0xff]   ;;  %v13086_v33 = vld [vmem:[%s17658_s1 + $0x24a8] ss:$16 sps:$4 sm:$0xff]  }
 0x45c   :  { %8519 = vmatprep.subr.bf16.mxu0 %v13001_v34  ;;  %9339 = vmatprep.subr.bf16.mxu1 %v13004_v35  ;;  %v13091_v34 = vld [vmem:[%s17658_s1 + $0x24c4] ss:$16 sps:$4 sm:$0xff]   ;;  %v13094_v35 = vld [vmem:[%s17658_s1 + $0x24cc] ss:$16 sps:$4 sm:$0xff]  }
 0x45f   :  { %8520 = vmatpush1.bf16.msra.mxu0 %v12999_v36  ;;  %9340 = vmatpush1.bf16.msra.mxu1 %v13002_v37  ;;  %v13089_v36 = vld [vmem:[%s17658_s1 + $0x24c0] ss:$16 sps:$4 sm:$0xff]   ;;  %v13092_v37 = vld [vmem:[%s17658_s1 + $0x24c8] ss:$16 sps:$4 sm:$0xff]  }
 0x460   :  { %8521 = vmatprep.subr.bf16.mxu0 %v13007_v38  ;;  %9341 = vmatprep.subr.bf16.mxu1 %v13010_v39  ;;  %v13097_v38 = vld [vmem:[%s17658_s1 + $0x24e4] ss:$16 sps:$4 sm:$0xff]   ;;  %v13100_v39 = vld [vmem:[%s17658_s1 + $0x24ec] ss:$16 sps:$4 sm:$0xff]  }
 0x463   :  { %8522 = vmatpush1.bf16.msra.mxu0 %v13005_v40  ;;  %9342 = vmatpush1.bf16.msra.mxu1 %v13008_v41  ;;  %v13095_v40 = vld [vmem:[%s17658_s1 + $0x24e0] ss:$16 sps:$4 sm:$0xff]   ;;  %v13098_v41 = vld [vmem:[%s17658_s1 + $0x24e8] ss:$16 sps:$4 sm:$0xff]  }
 0x464   :  { %8523 = vmatprep.subr.bf16.mxu0 %v13013_v42  ;;  %9343 = vmatprep.subr.bf16.mxu1 %v13016_v43  ;;  %v13103_v42 = vld [vmem:[%s17658_s1 + $0x2504] ss:$16 sps:$4 sm:$0xff]   ;;  %v13106_v43 = vld [vmem:[%s17658_s1 + $0x250c] ss:$16 sps:$4 sm:$0xff]  }
 0x467   :  { %8524 = vmatpush1.bf16.msra.mxu0 %v13011_v44  ;;  %9344 = vmatpush1.bf16.msra.mxu1 %v13014_v45  ;;  %v13101_v44 = vld [vmem:[%s17658_s1 + $0x2500] ss:$16 sps:$4 sm:$0xff]   ;;  %v13104_v45 = vld [vmem:[%s17658_s1 + $0x2508] ss:$16 sps:$4 sm:$0xff]  }
 0x468   :  { %8525 = vmatprep.subr.bf16.mxu0 %v13019_v46  ;;  %9345 = vmatprep.subr.bf16.mxu1 %v13022_v47  ;;  %v13109_v46 = vld [vmem:[%s17658_s1 + $0x2524] ss:$16 sps:$4 sm:$0xff]   ;;  %v13112_v47 = vld [vmem:[%s17658_s1 + $0x252c] ss:$16 sps:$4 sm:$0xff]  }
 0x46b   :  { %8526 = vmatpush1.bf16.msra.mxu0 %v13017_v48  ;;  %9346 = vmatpush1.bf16.msra.mxu1 %v13020_v49  ;;  %v13107_v48 = vld [vmem:[%s17658_s1 + $0x2520] ss:$16 sps:$4 sm:$0xff]   ;;  %v13110_v49 = vld [vmem:[%s17658_s1 + $0x2528] ss:$16 sps:$4 sm:$0xff]  }
 0x46c   :  { %8527 = vmatprep.subr.bf16.mxu0 %v13025_v50  ;;  %9347 = vmatprep.subr.bf16.mxu1 %v13028_v51  ;;  %v13115_v50 = vld [vmem:[%s17658_s1 + $0x2544] ss:$16 sps:$4 sm:$0xff]   ;;  %v13118_v51 = vld [vmem:[%s17658_s1 + $0x254c] ss:$16 sps:$4 sm:$0xff]  }
 0x46f   :  { %8528 = vmatpush1.bf16.msra.mxu0 %v13023_v52  ;;  %9348 = vmatpush1.bf16.msra.mxu1 %v13026_v53  ;;  %v13113_v52 = vld [vmem:[%s17658_s1 + $0x2540] ss:$16 sps:$4 sm:$0xff]   ;;  %v13116_v53 = vld [vmem:[%s17658_s1 + $0x2548] ss:$16 sps:$4 sm:$0xff]  }
 0x470   :  { %8529 = vmatprep.subr.bf16.mxu0 %v13031_v54  ;;  %9349 = vmatprep.subr.bf16.mxu1 %v13034_v55  ;;  %v13121_v54 = vld [vmem:[%s17658_s1 + $0x2564] ss:$16 sps:$4 sm:$0xff]   ;;  %v13124_v55 = vld [vmem:[%s17658_s1 + $0x256c] ss:$16 sps:$4 sm:$0xff]  }
 0x473   :  { %8530 = vmatpush1.bf16.msra.mxu0 %v13029_v56  ;;  %9350 = vmatpush1.bf16.msra.mxu1 %v13032_v57  ;;  %v13119_v56 = vld [vmem:[%s17658_s1 + $0x2560] ss:$16 sps:$4 sm:$0xff]   ;;  %v13122_v57 = vld [vmem:[%s17658_s1 + $0x2568] ss:$16 sps:$4 sm:$0xff]  }
 0x474   :  { %8531 = vmatprep.subr.bf16.mxu0 %v13037_v58  ;;  %9351 = vmatprep.subr.bf16.mxu1 %v13040_v59  ;;  %v13127_v58 = vld [vmem:[%s17658_s1 + $0x2584] ss:$16 sps:$4 sm:$0xff]   ;;  %v13130_v59 = vld [vmem:[%s17658_s1 + $0x258c] ss:$16 sps:$4 sm:$0xff]  }
 0x477   :  { %8532 = vmatpush1.bf16.msra.mxu0 %v13035_v60  ;;  %9352 = vmatpush1.bf16.msra.mxu1 %v13038_v61  ;;  %v13125_v60 = vld [vmem:[%s17658_s1 + $0x2580] ss:$16 sps:$4 sm:$0xff]   ;;  %v13128_v61 = vld [vmem:[%s17658_s1 + $0x2588] ss:$16 sps:$4 sm:$0xff]  }
 0x478   :  { %8533 = vmatprep.subr.bf16.mxu0 %v13043_v62  ;;  %9353 = vmatprep.subr.bf16.mxu1 %v13046_v63  ;;  %v13133_v62 = vld [vmem:[%s17658_s1 + $0x25a4] ss:$16 sps:$4 sm:$0xff]   ;;  %v13136_v63 = vld [vmem:[%s17658_s1 + $0x25ac] ss:$16 sps:$4 sm:$0xff]  }
 0x47b   :  { %8534 = vmatpush1.bf16.msra.mxu0 %v13041_v0  ;;  %9354 = vmatpush1.bf16.msra.mxu1 %v13044_v1  ;;  %v13131_v0 = vld [vmem:[%s17658_s1 + $0x25a0] ss:$16 sps:$4 sm:$0xff]   ;;  %v13134_v1 = vld [vmem:[%s17658_s1 + $0x25a8] ss:$16 sps:$4 sm:$0xff]  }
 0x47c   :  { %8535 = vmatprep.subr.bf16.mxu0 %v13049_v2  ;;  %9355 = vmatprep.subr.bf16.mxu1 %v13052_v3  ;;  %v13139_v2 = vld [vmem:[%s17658_s1 + $0x25c4] ss:$16 sps:$4 sm:$0xff]   ;;  %v13142_v3 = vld [vmem:[%s17658_s1 + $0x25cc] ss:$16 sps:$4 sm:$0xff]  }
 0x47f   :  { %8536 = vmatpush1.bf16.msra.mxu0 %v13047_v4  ;;  %9356 = vmatpush1.bf16.msra.mxu1 %v13050_v5  ;;  %v13137_v4 = vld [vmem:[%s17658_s1 + $0x25c0] ss:$16 sps:$4 sm:$0xff]   ;;  %v13140_v5 = vld [vmem:[%s17658_s1 + $0x25c8] ss:$16 sps:$4 sm:$0xff]  }
 0x480   :  { %8546 = vmatprep.subr.bf16.mxu0 %v13055_v7  ;;  %9366 = vmatprep.subr.bf16.mxu1 %v13058_v8  ;;  %v13148_v7 = vld [vmem:[%s17658_s1 + $0x25ec] ss:$16 sps:$4 sm:$0xff]   ;;  %v13143_v8 = vld [vmem:[%s17658_s1 + $0x25e0] ss:$16 sps:$4 sm:$0xff]  }
 0x482   :  { %8538 = vmatmul.mubr.bf16.vlgmr.msra.gmra.mrb[0].mxu0 %v100_v9  ;;  %9358 = vmatmul.mubr.bf16.vlgmr.msra.gmra.mrb[0].mxu1 %v100_v9  ;;  %v13146_v9 = vld [vmem:[%s17658_s1 + $0x25e8] ss:$16 sps:$4 sm:$0xff]  }
 0x483   :  { %8547 = vmatpush1.bf16.msra.mxu0 %v13053_v11  ;;  %9367 = vmatpush1.bf16.msra.mxu1 %v13056_v12  ;;  %v13151_v11 = vld [vmem:[%s17658_s1 + $0x2604] ss:$16 sps:$4 sm:$0xff]   ;;  %v13154_v12 = vld [vmem:[%s17658_s1 + $0x260c] ss:$16 sps:$4 sm:$0xff]  }
 0x484   :  { %8548 = vmatprep.subr.bf16.mxu0 %v13061_v13  ;;  %9368 = vmatprep.subr.bf16.mxu1 %v13064_v14  ;;  %v102_v13 = vpack.c.bf16 %v62_v10, %v62_v10  ;;  %v65_v14 = vld [vmem:[%s17659_s0 + $0x138] sm:$0xff]  ;;  %v13241_v10 = vld [vmem:[%s17658_s1 + $0x27e4] ss:$16 sps:$4 sm:$0xff]  }
 0x485   :  { %8578 = vmatprep.mubr.bf16.mxu0 %v103_v15  ;;  %9398 = vmatprep.mubr.bf16.mxu1 %v103_v15  ;;  %v13149_v15 = vld [vmem:[%s17658_s1 + $0x2600] ss:$16 sps:$4 sm:$0xff]  }
 0x487   :  { %8549 = vmatpush1.bf16.msra.mxu0 %v13059_v16  ;;  %9369 = vmatpush1.bf16.msra.mxu1 %v13062_v17  ;;  %v13152_v16 = vld [vmem:[%s17658_s1 + $0x2608] ss:$16 sps:$4 sm:$0xff]   ;;  %v13157_v17 = vld [vmem:[%s17658_s1 + $0x2624] ss:$16 sps:$4 sm:$0xff]  }
 0x488   :  { %8550 = vmatprep.subr.bf16.mxu0 %v13067_v18  ;;  %9370 = vmatprep.subr.bf16.mxu1 %v13070_v19  ;;  %v13160_v18 = vld [vmem:[%s17658_s1 + $0x262c] ss:$16 sps:$4 sm:$0xff]   ;;  %v105_v19 = vpack.c.bf16 %v65_v14, %v65_v14 }
 0x489   :  { %v9513_v14 = vld [vmem:[%s17660_s3 + $0x208] sm:$0xff] }
 0x48b   :  { %8551 = vmatpush1.bf16.msra.mxu0 %v13065_v20  ;;  %9371 = vmatpush1.bf16.msra.mxu1 %v13068_v21  ;;  %v13155_v20 = vld [vmem:[%s17658_s1 + $0x2620] ss:$16 sps:$4 sm:$0xff]   ;;  %v13158_v21 = vld [vmem:[%s17658_s1 + $0x2628] ss:$16 sps:$4 sm:$0xff]  }
 0x48c   :  { %8552 = vmatprep.subr.bf16.mxu0 %v13073_v22  ;;  %9372 = vmatprep.subr.bf16.mxu1 %v13076_v23  ;;  %v13163_v22 = vld [vmem:[%s17658_s1 + $0x2644] ss:$16 sps:$4 sm:$0xff]   ;;  %v13166_v23 = vld [vmem:[%s17658_s1 + $0x264c] ss:$16 sps:$4 sm:$0xff]  }
 0x48f   :  { %8553 = vmatpush1.bf16.msra.mxu0 %v13071_v24  ;;  %9373 = vmatpush1.bf16.msra.mxu1 %v13074_v25  ;;  %v13161_v24 = vld [vmem:[%s17658_s1 + $0x2640] ss:$16 sps:$4 sm:$0xff]   ;;  %v13164_v25 = vld [vmem:[%s17658_s1 + $0x2648] ss:$16 sps:$4 sm:$0xff]  }
 0x490   :  { %8554 = vmatprep.subr.bf16.mxu0 %v13079_v26  ;;  %9374 = vmatprep.subr.bf16.mxu1 %v13082_v27  ;;  %v13169_v26 = vld [vmem:[%s17658_s1 + $0x2664] ss:$16 sps:$4 sm:$0xff]   ;;  %v13172_v27 = vld [vmem:[%s17658_s1 + $0x266c] ss:$16 sps:$4 sm:$0xff]  }
 0x493   :  { %8555 = vmatpush1.bf16.msra.mxu0 %v13077_v28  ;;  %9375 = vmatpush1.bf16.msra.mxu1 %v13080_v29  ;;  %v13167_v28 = vld [vmem:[%s17658_s1 + $0x2660] ss:$16 sps:$4 sm:$0xff]   ;;  %v13170_v29 = vld [vmem:[%s17658_s1 + $0x2668] ss:$16 sps:$4 sm:$0xff]  }
 0x494   :  { %8556 = vmatprep.subr.bf16.mxu0 %v13085_v30  ;;  %9376 = vmatprep.subr.bf16.mxu1 %v13088_v31  ;;  %v13175_v30 = vld [vmem:[%s17658_s1 + $0x2684] ss:$16 sps:$4 sm:$0xff]   ;;  %v13178_v31 = vld [vmem:[%s17658_s1 + $0x268c] ss:$16 sps:$4 sm:$0xff]  }
 0x497   :  { %8557 = vmatpush1.bf16.msra.mxu0 %v13083_v32  ;;  %9377 = vmatpush1.bf16.msra.mxu1 %v13086_v33  ;;  %v13173_v32 = vld [vmem:[%s17658_s1 + $0x2680] ss:$16 sps:$4 sm:$0xff]   ;;  %v13176_v33 = vld [vmem:[%s17658_s1 + $0x2688] ss:$16 sps:$4 sm:$0xff]  }
 0x498   :  { %8558 = vmatprep.subr.bf16.mxu0 %v13091_v34  ;;  %9378 = vmatprep.subr.bf16.mxu1 %v13094_v35  ;;  %v13181_v34 = vld [vmem:[%s17658_s1 + $0x26a4] ss:$16 sps:$4 sm:$0xff]   ;;  %v13184_v35 = vld [vmem:[%s17658_s1 + $0x26ac] ss:$16 sps:$4 sm:$0xff]  }
 0x49b   :  { %8559 = vmatpush1.bf16.msra.mxu0 %v13089_v36  ;;  %9379 = vmatpush1.bf16.msra.mxu1 %v13092_v37  ;;  %v13179_v36 = vld [vmem:[%s17658_s1 + $0x26a0] ss:$16 sps:$4 sm:$0xff]   ;;  %v13182_v37 = vld [vmem:[%s17658_s1 + $0x26a8] ss:$16 sps:$4 sm:$0xff]  }
 0x49c   :  { %8560 = vmatprep.subr.bf16.mxu0 %v13097_v38  ;;  %9380 = vmatprep.subr.bf16.mxu1 %v13100_v39  ;;  %v13187_v38 = vld [vmem:[%s17658_s1 + $0x26c4] ss:$16 sps:$4 sm:$0xff]   ;;  %v13190_v39 = vld [vmem:[%s17658_s1 + $0x26cc] ss:$16 sps:$4 sm:$0xff]  }
 0x49f   :  { %8561 = vmatpush1.bf16.msra.mxu0 %v13095_v40  ;;  %9381 = vmatpush1.bf16.msra.mxu1 %v13098_v41  ;;  %v13185_v40 = vld [vmem:[%s17658_s1 + $0x26c0] ss:$16 sps:$4 sm:$0xff]   ;;  %v13188_v41 = vld [vmem:[%s17658_s1 + $0x26c8] ss:$16 sps:$4 sm:$0xff]  }
 0x4a0   :  { %8562 = vmatprep.subr.bf16.mxu0 %v13103_v42  ;;  %9382 = vmatprep.subr.bf16.mxu1 %v13106_v43  ;;  %v13193_v42 = vld [vmem:[%s17658_s1 + $0x26e4] ss:$16 sps:$4 sm:$0xff]   ;;  %v13196_v43 = vld [vmem:[%s17658_s1 + $0x26ec] ss:$16 sps:$4 sm:$0xff]  }
 0x4a3   :  { %8563 = vmatpush1.bf16.msra.mxu0 %v13101_v44  ;;  %9383 = vmatpush1.bf16.msra.mxu1 %v13104_v45  ;;  %v13191_v44 = vld [vmem:[%s17658_s1 + $0x26e0] ss:$16 sps:$4 sm:$0xff]   ;;  %v13194_v45 = vld [vmem:[%s17658_s1 + $0x26e8] ss:$16 sps:$4 sm:$0xff]  }
 0x4a4   :  { %8564 = vmatprep.subr.bf16.mxu0 %v13109_v46  ;;  %9384 = vmatprep.subr.bf16.mxu1 %v13112_v47  ;;  %v13199_v46 = vld [vmem:[%s17658_s1 + $0x2704] ss:$16 sps:$4 sm:$0xff]   ;;  %v13202_v47 = vld [vmem:[%s17658_s1 + $0x270c] ss:$16 sps:$4 sm:$0xff]  }
 0x4a7   :  { %8565 = vmatpush1.bf16.msra.mxu0 %v13107_v48  ;;  %9385 = vmatpush1.bf16.msra.mxu1 %v13110_v49  ;;  %v13197_v48 = vld [vmem:[%s17658_s1 + $0x2700] ss:$16 sps:$4 sm:$0xff]   ;;  %v13200_v49 = vld [vmem:[%s17658_s1 + $0x2708] ss:$16 sps:$4 sm:$0xff]  }
 0x4a8   :  { %8566 = vmatprep.subr.bf16.mxu0 %v13115_v50  ;;  %9386 = vmatprep.subr.bf16.mxu1 %v13118_v51  ;;  %v13205_v50 = vld [vmem:[%s17658_s1 + $0x2724] ss:$16 sps:$4 sm:$0xff]   ;;  %v13208_v51 = vld [vmem:[%s17658_s1 + $0x272c] ss:$16 sps:$4 sm:$0xff]  }
 0x4ab   :  { %8567 = vmatpush1.bf16.msra.mxu0 %v13113_v52  ;;  %9387 = vmatpush1.bf16.msra.mxu1 %v13116_v53  ;;  %v13203_v52 = vld [vmem:[%s17658_s1 + $0x2720] ss:$16 sps:$4 sm:$0xff]   ;;  %v13206_v53 = vld [vmem:[%s17658_s1 + $0x2728] ss:$16 sps:$4 sm:$0xff]  }
 0x4ac   :  { %8568 = vmatprep.subr.bf16.mxu0 %v13121_v54  ;;  %9388 = vmatprep.subr.bf16.mxu1 %v13124_v55  ;;  %v13211_v54 = vld [vmem:[%s17658_s1 + $0x2744] ss:$16 sps:$4 sm:$0xff]   ;;  %v13214_v55 = vld [vmem:[%s17658_s1 + $0x274c] ss:$16 sps:$4 sm:$0xff]  }
 0x4af   :  { %8569 = vmatpush1.bf16.msra.mxu0 %v13119_v56  ;;  %9389 = vmatpush1.bf16.msra.mxu1 %v13122_v57  ;;  %v13209_v56 = vld [vmem:[%s17658_s1 + $0x2740] ss:$16 sps:$4 sm:$0xff]   ;;  %v13212_v57 = vld [vmem:[%s17658_s1 + $0x2748] ss:$16 sps:$4 sm:$0xff]  }
 0x4b0   :  { %8570 = vmatprep.subr.bf16.mxu0 %v13127_v58  ;;  %9390 = vmatprep.subr.bf16.mxu1 %v13130_v59  ;;  %v13217_v58 = vld [vmem:[%s17658_s1 + $0x2764] ss:$16 sps:$4 sm:$0xff]   ;;  %v13220_v59 = vld [vmem:[%s17658_s1 + $0x276c] ss:$16 sps:$4 sm:$0xff]  }
 0x4b3   :  { %8571 = vmatpush1.bf16.msra.mxu0 %v13125_v60  ;;  %9391 = vmatpush1.bf16.msra.mxu1 %v13128_v61  ;;  %v13215_v60 = vld [vmem:[%s17658_s1 + $0x2760] ss:$16 sps:$4 sm:$0xff]   ;;  %v13218_v61 = vld [vmem:[%s17658_s1 + $0x2768] ss:$16 sps:$4 sm:$0xff]  }
 0x4b4   :  { %8572 = vmatprep.subr.bf16.mxu0 %v13133_v62  ;;  %9392 = vmatprep.subr.bf16.mxu1 %v13136_v63  ;;  %v13223_v62 = vld [vmem:[%s17658_s1 + $0x2784] ss:$16 sps:$4 sm:$0xff]   ;;  %v13226_v63 = vld [vmem:[%s17658_s1 + $0x278c] ss:$16 sps:$4 sm:$0xff]  }
 0x4b7   :  { %8573 = vmatpush1.bf16.msra.mxu0 %v13131_v0  ;;  %9393 = vmatpush1.bf16.msra.mxu1 %v13134_v1  ;;  %v13221_v0 = vld [vmem:[%s17658_s1 + $0x2780] ss:$16 sps:$4 sm:$0xff]   ;;  %v13224_v1 = vld [vmem:[%s17658_s1 + $0x2788] ss:$16 sps:$4 sm:$0xff]  }
 0x4b8   :  { %8574 = vmatprep.subr.bf16.mxu0 %v13139_v2  ;;  %9394 = vmatprep.subr.bf16.mxu1 %v13142_v3  ;;  %v13229_v2 = vld [vmem:[%s17658_s1 + $0x27a4] ss:$16 sps:$4 sm:$0xff]   ;;  %v13232_v3 = vld [vmem:[%s17658_s1 + $0x27ac] ss:$16 sps:$4 sm:$0xff]  }
 0x4bb   :  { %8575 = vmatpush1.bf16.msra.mxu0 %v13137_v4  ;;  %9395 = vmatpush1.bf16.msra.mxu1 %v13140_v5  ;;  %v13227_v4 = vld [vmem:[%s17658_s1 + $0x27a0] ss:$16 sps:$4 sm:$0xff]   ;;  %v13230_v5 = vld [vmem:[%s17658_s1 + $0x27a8] ss:$16 sps:$4 sm:$0xff]  }
 0x4bc   :  { %8576 = vmatprep.subr.bf16.mxu0 %v13145_v6  ;;  %9396 = vmatprep.subr.bf16.mxu1 %v13148_v7  ;;  %v13235_v6 = vld [vmem:[%s17658_s1 + $0x27c4] ss:$16 sps:$4 sm:$0xff]   ;;  %v13238_v7 = vld [vmem:[%s17658_s1 + $0x27cc] ss:$16 sps:$4 sm:$0xff]  }
 0x4bf   :  { %8577 = vmatpush1.bf16.msra.mxu0 %v13143_v8  ;;  %9397 = vmatpush1.bf16.msra.mxu1 %v13146_v9  ;;  %v13233_v8 = vld [vmem:[%s17658_s1 + $0x27c0] ss:$16 sps:$4 sm:$0xff]   ;;  %v13236_v9 = vld [vmem:[%s17658_s1 + $0x27c8] ss:$16 sps:$4 sm:$0xff]  }
 0x4c0   :  { %8587 = vmatprep.subr.bf16.mxu0 %v13151_v11  ;;  %9407 = vmatprep.subr.bf16.mxu1 %v13154_v12  ;;  %v13244_v11 = vld [vmem:[%s17658_s1 + $0x27ec] ss:$16 sps:$4 sm:$0xff]  }
 0x4c1   :  { %v9449_v12 = vld [vmem:[%s17660_s3 + $0x8] sm:$0xff] }
 0x4c2   :  { %8579 = vmatmul.mubr.bf16.vlgmr.msra.gmra.mrb[0].mxu0 %v102_v13  ;;  %9399 = vmatmul.mubr.bf16.vlgmr.msra.gmra.mrb[0].mxu1 %v102_v13  ;;  %v9451_v13 = vld [vmem:[%s17660_s3 + $0x18] sm:$0xff] }
 0x4c3   :  { %8588 = vmatpush1.bf16.msra.mxu0 %v13149_v15  ;;  %9408 = vmatpush1.bf16.msra.mxu1 %v13152_v16  ;;  %v9515_v15 = vld [vmem:[%s17660_s3 + $0x218] sm:$0xff]  ;;  %v13239_v16 = vld [vmem:[%s17658_s1 + $0x27e0] ss:$16 sps:$4 sm:$0xff]  }
 0x4c4   :  { %8589 = vmatprep.subr.bf16.mxu0 %v13157_v17  ;;  %9409 = vmatprep.subr.bf16.mxu1 %v13160_v18  ;;  %v13242_v17 = vld [vmem:[%s17658_s1 + $0x27e8] ss:$16 sps:$4 sm:$0xff]   ;;  %v64_v18 = vld [vmem:[%s17659_s0 + $0x130] sm:$0xff] }
 0x4c5   :  { %8619 = vmatprep.mubr.bf16.mxu0 %v105_v19  ;;  %9439 = vmatprep.mubr.bf16.mxu1 %v105_v19  ;;  %v9448_v19 = vld [vmem:[%s17660_s3] sm:$0xff] }
 0x4c7   :  { %8590 = vmatpush1.bf16.msra.mxu0 %v13155_v20  ;;  %9410 = vmatpush1.bf16.msra.mxu1 %v13158_v21  ;;  %v9450_v20 = vld [vmem:[%s17660_s3 + $0x10] sm:$0xff]  ;;  %v11037_v21 = vpack.c.bf16 %v9451_v13, %v9449_v12  ;;  %v9533_v12 = vld [vmem:[%s17660_s3 + $0x2a8] sm:$0xff]  ;;  %v9535_v13 = vld [vmem:[%s17660_s3 + $0x2b8] sm:$0xff] }
 0x4c8   :  { %8591 = vmatprep.subr.bf16.mxu0 %v13163_v22  ;;  %9411 = vmatprep.subr.bf16.mxu1 %v13166_v23  ;;  %v11101_v22 = vpack.c.bf16 %v9515_v15, %v9513_v14  ;;  %v9512_v23 = vld [vmem:[%s17660_s3 + $0x200] sm:$0xff] }
 0x4cb   :  { %8592 = vmatpush1.bf16.msra.mxu0 %v13161_v24  ;;  %9412 = vmatpush1.bf16.msra.mxu1 %v13164_v25  ;;  %v9514_v24 = vld [vmem:[%s17660_s3 + $0x210] sm:$0xff]  ;;  %v9453_v25 = vld [vmem:[%s17660_s3 + $0x28] sm:$0xff] }
 0x4cc   :  { %8593 = vmatprep.subr.bf16.mxu0 %v13169_v26  ;;  %9413 = vmatprep.subr.bf16.mxu1 %v13172_v27  ;;  %v9455_v26 = vld [vmem:[%s17660_s3 + $0x38] sm:$0xff]  ;;  %v9517_v27 = vld [vmem:[%s17660_s3 + $0x228] sm:$0xff] }
 0x4cf   :  { %8594 = vmatpush1.bf16.msra.mxu0 %v13167_v28  ;;  %9414 = vmatpush1.bf16.msra.mxu1 %v13170_v29  ;;  %v9519_v28 = vld [vmem:[%s17660_s3 + $0x238] sm:$0xff]  ;;  %v104_v29 = vpack.c.bf16 %v64_v18, %v64_v18 }
 0x4d0   :  { %8595 = vmatprep.subr.bf16.mxu0 %v13175_v30  ;;  %9415 = vmatprep.subr.bf16.mxu1 %v13178_v31  ;;  %v11039_v30 = vpack.c.bf16 %v9450_v20, %v9448_v19  ;;  %v11103_v31 = vpack.c.bf16 %v9514_v24, %v9512_v23  ;;  %v11121_v19 = vpack.c.bf16 %v9535_v13, %v9533_v12  ;;  %v9532_v20 = vld [vmem:[%s17660_s3 + $0x2a0] sm:$0xff]  ;;  %v9475_v23 = vld [vmem:[%s17660_s3 + $0xd8] sm:$0xff]  ;;  %v9537_v24 = vld [vmem:[%s17660_s3 + $0x2c8] sm:$0xff] }
 0x4d1   :  { %v9488_v12 = vld [vmem:[%s17660_s3 + $0x140] sm:$0xff]  ;;  %v9490_v13 = vld [vmem:[%s17660_s3 + $0x150] sm:$0xff] }
 0x4d3   :  { %8596 = vmatpush1.bf16.msra.mxu0 %v13173_v32  ;;  %9416 = vmatpush1.bf16.msra.mxu1 %v13176_v33  ;;  %v9452_v32 = vld [vmem:[%s17660_s3 + $0x20] sm:$0xff]  ;;  %v9454_v33 = vld [vmem:[%s17660_s3 + $0x30] sm:$0xff] }
 0x4d4   :  { %8597 = vmatprep.subr.bf16.mxu0 %v13181_v34  ;;  %9417 = vmatprep.subr.bf16.mxu1 %v13184_v35  ;;  %v11041_v34 = vpack.c.bf16 %v9455_v26, %v9453_v25  ;;  %v11105_v35 = vpack.c.bf16 %v9519_v28, %v9517_v27  ;;  %v9539_v25 = vld [vmem:[%s17660_s3 + $0x2d8] sm:$0xff]  ;;  %v9472_v28 = vld [vmem:[%s17660_s3 + $0xc0] sm:$0xff] }
 0x4d7   :  { %8598 = vmatpush1.bf16.msra.mxu0 %v13179_v36  ;;  %9418 = vmatpush1.bf16.msra.mxu1 %v13182_v37  ;;  %v9516_v36 = vld [vmem:[%s17660_s3 + $0x220] sm:$0xff]  ;;  %v9518_v37 = vld [vmem:[%s17660_s3 + $0x230] sm:$0xff] }
 0x4d8   :  { %8599 = vmatprep.subr.bf16.mxu0 %v13187_v38  ;;  %9419 = vmatprep.subr.bf16.mxu1 %v13190_v39  ;;  %v9457_v38 = vld [vmem:[%s17660_s3 + $0x48] sm:$0xff]  ;;  %v9459_v39 = vld [vmem:[%s17660_s3 + $0x58] sm:$0xff] }
 0x4db   :  { %8600 = vmatpush1.bf16.msra.mxu0 %v13185_v40  ;;  %9420 = vmatpush1.bf16.msra.mxu1 %v13188_v41  ;;  %v9521_v40 = vld [vmem:[%s17660_s3 + $0x248] sm:$0xff]  ;;  %v9523_v41 = vld [vmem:[%s17660_s3 + $0x258] sm:$0xff] }
 0x4dc   :  { %8601 = vmatprep.subr.bf16.mxu0 %v13193_v42  ;;  %9421 = vmatprep.subr.bf16.mxu1 %v13196_v43  ;;  %v11043_v42 = vpack.c.bf16 %v9454_v33, %v9452_v32  ;;  %v11107_v43 = vpack.c.bf16 %v9518_v37, %v9516_v36  ;;  %v9536_v32 = vld [vmem:[%s17660_s3 + $0x2c0] sm:$0xff]  ;;  %v9538_v33 = vld [vmem:[%s17660_s3 + $0x2d0] sm:$0xff]  ;;  %v9541_v36 = vld [vmem:[%s17660_s3 + $0x2e8] sm:$0xff] }
 0x4dd   :  { %v9543_v37 = vld [vmem:[%s17660_s3 + $0x2f8] sm:$0xff] }
 0x4df   :  { %8602 = vmatpush1.bf16.msra.mxu0 %v13191_v44  ;;  %9422 = vmatpush1.bf16.msra.mxu1 %v13194_v45  ;;  %v9456_v44 = vld [vmem:[%s17660_s3 + $0x40] sm:$0xff]  ;;  %v9458_v45 = vld [vmem:[%s17660_s3 + $0x50] sm:$0xff] }
 0x4e0   :  { %8603 = vmatprep.subr.bf16.mxu0 %v13199_v46  ;;  %9423 = vmatprep.subr.bf16.mxu1 %v13202_v47  ;;  %v11045_v46 = vpack.c.bf16 %v9459_v39, %v9457_v38  ;;  %v11109_v47 = vpack.c.bf16 %v9523_v41, %v9521_v40  ;;  %v11127_v39 = vpack.c.bf16 %v9538_v33, %v9536_v32  ;;  %v9476_v40 = vld [vmem:[%s17660_s3 + $0xe0] sm:$0xff]  ;;  %v9478_v41 = vld [vmem:[%s17660_s3 + $0xf0] sm:$0xff]  ;;  %v9561_v32 = vld [vmem:[%s17660_s3 + $0x388] sm:$0xff] }
 0x4e1   :  { %v9563_v33 = vld [vmem:[%s17660_s3 + $0x398] sm:$0xff] }
 0x4e3   :  { %8604 = vmatpush1.bf16.msra.mxu0 %v13197_v48  ;;  %9424 = vmatpush1.bf16.msra.mxu1 %v13200_v49  ;;  %v9520_v48 = vld [vmem:[%s17660_s3 + $0x240] sm:$0xff]  ;;  %v9522_v49 = vld [vmem:[%s17660_s3 + $0x250] sm:$0xff] }
 0x4e4   :  { %8605 = vmatprep.subr.bf16.mxu0 %v13205_v50  ;;  %9425 = vmatprep.subr.bf16.mxu1 %v13208_v51  ;;  %v9461_v50 = vld [vmem:[%s17660_s3 + $0x68] sm:$0xff]  ;;  %v9463_v51 = vld [vmem:[%s17660_s3 + $0x78] sm:$0xff] }
 0x4e7   :  { %8606 = vmatpush1.bf16.msra.mxu0 %v13203_v52  ;;  %9426 = vmatpush1.bf16.msra.mxu1 %v13206_v53  ;;  %v9525_v52 = vld [vmem:[%s17660_s3 + $0x268] sm:$0xff]  ;;  %v9527_v53 = vld [vmem:[%s17660_s3 + $0x278] sm:$0xff] }
 0x4e8   :  { %8607 = vmatprep.subr.bf16.mxu0 %v13211_v54  ;;  %9427 = vmatprep.subr.bf16.mxu1 %v13214_v55  ;;  %v11047_v54 = vpack.c.bf16 %v9458_v45, %v9456_v44  ;;  %v11111_v55 = vpack.c.bf16 %v9522_v49, %v9520_v48  ;;  %v9540_v44 = vld [vmem:[%s17660_s3 + $0x2e0] sm:$0xff]  ;;  %v9542_v45 = vld [vmem:[%s17660_s3 + $0x2f0] sm:$0xff]  ;;  %v9545_v48 = vld [vmem:[%s17660_s3 + $0x308] sm:$0xff] }
 0x4e9   :  { %v9547_v49 = vld [vmem:[%s17660_s3 + $0x318] sm:$0xff] }
 0x4eb   :  { %8608 = vmatpush1.bf16.msra.mxu0 %v13209_v56  ;;  %9428 = vmatpush1.bf16.msra.mxu1 %v13212_v57  ;;  %v9460_v56 = vld [vmem:[%s17660_s3 + $0x60] sm:$0xff]  ;;  %v9462_v57 = vld [vmem:[%s17660_s3 + $0x70] sm:$0xff] }
 0x4ec   :  { %8609 = vmatprep.subr.bf16.mxu0 %v13217_v58  ;;  %9429 = vmatprep.subr.bf16.mxu1 %v13220_v59  ;;  %v11049_v58 = vpack.c.bf16 %v9463_v51, %v9461_v50  ;;  %v11113_v59 = vpack.c.bf16 %v9527_v53, %v9525_v52  ;;  %v11067_v50 = vpack.c.bf16 %v9478_v41, %v9476_v40  ;;  %v9480_v52 = vld [vmem:[%s17660_s3 + $0x100] sm:$0xff]  ;;  %v9482_v53 = vld [vmem:[%s17660_s3 + $0x110] sm:$0xff] }
 0x4ed   :  { %v11131_v51 = vpack.c.bf16 %v9542_v45, %v9540_v44  ;;  %v9560_v40 = vld [vmem:[%s17660_s3 + $0x380] sm:$0xff]  ;;  %v9562_v41 = vld [vmem:[%s17660_s3 + $0x390] sm:$0xff]  ;;  %v9565_v44 = vld [vmem:[%s17660_s3 + $0x3a8] sm:$0xff] }
 0x4ee   :  { %v9567_v45 = vld [vmem:[%s17660_s3 + $0x3b8] sm:$0xff] }
 0x4ef   :  { %8610 = vmatpush1.bf16.msra.mxu0 %v13215_v60  ;;  %9430 = vmatpush1.bf16.msra.mxu1 %v13218_v61  ;;  %v9524_v60 = vld [vmem:[%s17660_s3 + $0x260] sm:$0xff]  ;;  %v9526_v61 = vld [vmem:[%s17660_s3 + $0x270] sm:$0xff] }
 0x4f0   :  { %8611 = vmatprep.subr.bf16.mxu0 %v13223_v62  ;;  %9431 = vmatprep.subr.bf16.mxu1 %v13226_v63  ;;  %v9465_v62 = vld [vmem:[%s17660_s3 + $0x88] sm:$0xff]  ;;  %v9467_v63 = vld [vmem:[%s17660_s3 + $0x98] sm:$0xff] }
 0x4f3   :  { %8612 = vmatpush1.bf16.msra.mxu0 %v13221_v0  ;;  %9432 = vmatpush1.bf16.msra.mxu1 %v13224_v1  ;;  %v9529_v0 = vld [vmem:[%s17660_s3 + $0x288] sm:$0xff]  ;;  %v9531_v1 = vld [vmem:[%s17660_s3 + $0x298] sm:$0xff] }
 0x4f4   :  { %8613 = vmatprep.subr.bf16.mxu0 %v13229_v2  ;;  %9433 = vmatprep.subr.bf16.mxu1 %v13232_v3  ;;  %v11051_v2 = vpack.c.bf16 %v9462_v57, %v9460_v56  ;;  %v11115_v3 = vpack.c.bf16 %v9526_v61, %v9524_v60  ;;  %v9544_v56 = vld [vmem:[%s17660_s3 + $0x300] sm:$0xff]  ;;  %v9546_v57 = vld [vmem:[%s17660_s3 + $0x310] sm:$0xff]  ;;  %v9549_v60 = vld [vmem:[%s17660_s3 + $0x328] sm:$0xff] }
 0x4f5   :  { %v9551_v61 = vld [vmem:[%s17660_s3 + $0x338] sm:$0xff] }
 0x4f7   :  { %8614 = vmatpush1.bf16.msra.mxu0 %v13227_v4  ;;  %9434 = vmatpush1.bf16.msra.mxu1 %v13230_v5  ;;  %v9464_v4 = vld [vmem:[%s17660_s3 + $0x80] sm:$0xff]  ;;  %v9466_v5 = vld [vmem:[%s17660_s3 + $0x90] sm:$0xff] }
 0x4f8   :  { %8615 = vmatprep.subr.bf16.mxu0 %v13235_v6  ;;  %9435 = vmatprep.subr.bf16.mxu1 %v13238_v7  ;;  %v11053_v6 = vpack.c.bf16 %v9467_v63, %v9465_v62  ;;  %v11117_v7 = vpack.c.bf16 %v9531_v1, %v9529_v0  ;;  %v11055_v14 = vpack.c.bf16 %v9466_v5, %v9464_v4  ;;  %v9484_v0 = vld [vmem:[%s17660_s3 + $0x120] sm:$0xff]  ;;  %v9486_v1 = vld [vmem:[%s17660_s3 + $0x130] sm:$0xff] }
 0x4f9   :  { %v11071_v62 = vpack.c.bf16 %v9482_v53, %v9480_v52  ;;  %v11135_v63 = vpack.c.bf16 %v9546_v57, %v9544_v56  ;;  %v9548_v4 = vld [vmem:[%s17660_s3 + $0x320] sm:$0xff]  ;;  %v9550_v5 = vld [vmem:[%s17660_s3 + $0x330] sm:$0xff]  ;;  %v9569_v56 = vld [vmem:[%s17660_s3 + $0x3c8] sm:$0xff] }
 0x4fa   :  { %v9564_v52 = vld [vmem:[%s17660_s3 + $0x3a0] sm:$0xff]  ;;  %v9566_v53 = vld [vmem:[%s17660_s3 + $0x3b0] sm:$0xff]  ;;  %v9571_v57 = vld [vmem:[%s17660_s3 + $0x3d8] sm:$0xff] }
 0x4fb   :  { %8616 = vmatpush1.bf16.msra.mxu0 %v13233_v8  ;;  %9436 = vmatpush1.bf16.msra.mxu1 %v13236_v9  ;;  %v9528_v8 = vld [vmem:[%s17660_s3 + $0x280] sm:$0xff]  ;;  %v9530_v9 = vld [vmem:[%s17660_s3 + $0x290] sm:$0xff] }
 0x4fc   :  { %8617 = vmatprep.subr.bf16.mxu0 %v13241_v10  ;;  %9437 = vmatprep.subr.bf16.mxu1 %v13244_v11  ;;  %v9469_v10 = vld [vmem:[%s17660_s3 + $0xa8] sm:$0xff]  ;;  %v9471_v11 = vld [vmem:[%s17660_s3 + $0xb8] sm:$0xff]  ;;  %v11119_v15 = vpack.c.bf16 %v9530_v9, %v9528_v8 }
 0x4fd   :  { %v11057_v18 = vpack.c.bf16 %v9471_v11, %v9469_v10  ;;  %v9553_v8 = vld [vmem:[%s17660_s3 + $0x348] sm:$0xff]  ;;  %v9555_v9 = vld [vmem:[%s17660_s3 + $0x358] sm:$0xff]  ;;  %v11075_v10 = vpack.c.bf16 %v9486_v1, %v9484_v0  ;;  %v11139_v11 = vpack.c.bf16 %v9550_v5, %v9548_v4  ;;  %v9568_v0 = vld [vmem:[%s17660_s3 + $0x3c0] sm:$0xff] }
 0x4fe   :  { %v9570_v1 = vld [vmem:[%s17660_s3 + $0x3d0] sm:$0xff]  ;;  %v9509_v4 = vld [vmem:[%s17660_s3 + $0x1e8] sm:$0xff]  ;;  %v9511_v5 = vld [vmem:[%s17660_s3 + $0x1f8] sm:$0xff] }
 0x4ff   :  { %8618 = vmatpush1.bf16.msra.mxu0 %v13239_v16  ;;  %9438 = vmatpush1.bf16.msra.mxu1 %v13242_v17  ;;  %v9468_v16 = vld [vmem:[%s17660_s3 + $0xa0] sm:$0xff]  ;;  %v9470_v17 = vld [vmem:[%s17660_s3 + $0xb0] sm:$0xff] }
 0x500   :  { %11038 = vmatprep.subr.bf16.mxu1 %v11037_v21  ;;  %11102 = vmatprep.subr.bf16.mxu0 %v11101_v22  ;;  %v9534_v21 = vld [vmem:[%s17660_s3 + $0x2b0] sm:$0xff]  ;;  %v9473_v22 = vld [vmem:[%s17660_s3 + $0xc8] sm:$0xff]  ;;  %v11059_v26 = vpack.c.bf16 %v9470_v17, %v9468_v16  ;;  %v9552_v16 = vld [vmem:[%s17660_s3 + $0x340] sm:$0xff] }
 0x501   :  { %v11123_v27 = vpack.c.bf16 %v9534_v21, %v9532_v20  ;;  %v9554_v17 = vld [vmem:[%s17660_s3 + $0x350] sm:$0xff]  ;;  %v9557_v20 = vld [vmem:[%s17660_s3 + $0x368] sm:$0xff]  ;;  %v9559_v21 = vld [vmem:[%s17660_s3 + $0x378] sm:$0xff] }
 0x502   :  { %8620 = vmatmul.mubr.bf16.vlgmr.msra.gmra.mrb[0].mxu0 %v104_v29  ;;  %9440 = vmatmul.mubr.bf16.vlgmr.msra.gmra.mrb[0].mxu1 %v104_v29  ;;  %v9474_v29 = vld [vmem:[%s17660_s3 + $0xd0] sm:$0xff] }
 0x503   :  { %11040 = vmatpush1.bf16.msra.mxu1 %v11039_v30  ;;  %11104 = vmatpush1.bf16.msra.mxu0 %v11103_v31  ;;  %v11061_v30 = vpack.c.bf16 %v9475_v23, %v9473_v22  ;;  %v11125_v31 = vpack.c.bf16 %v9539_v25, %v9537_v24  ;;  %v11063_v38 = vpack.c.bf16 %v9474_v29, %v9472_v28  ;;  %v9492_v24 = vld [vmem:[%s17660_s3 + $0x160] sm:$0xff]  ;;  %v9494_v25 = vld [vmem:[%s17660_s3 + $0x170] sm:$0xff] }
 0x504   :  { %11042 = vmatprep.subr.bf16.mxu1 %v11041_v34  ;;  %11106 = vmatprep.subr.bf16.mxu0 %v11105_v35  ;;  %v9477_v34 = vld [vmem:[%s17660_s3 + $0xe8] sm:$0xff]  ;;  %v9479_v35 = vld [vmem:[%s17660_s3 + $0xf8] sm:$0xff]  ;;  %v11079_v22 = vpack.c.bf16 %v9490_v13, %v9488_v12  ;;  %v11143_v23 = vpack.c.bf16 %v9554_v17, %v9552_v16  ;;  %v9556_v28 = vld [vmem:[%s17660_s3 + $0x360] sm:$0xff]  ;;  %v1388_v16 = vlaneseq }
 0x505   :  { %v9558_v29 = vld [vmem:[%s17660_s3 + $0x370] sm:$0xff]  ;;  %v9572_v13 = vld [vmem:[%s17660_s3 + $0x3e0] sm:$0xff] }
 0x506   :  { %v1389_v17 = vshrl.u32 %v1388_v16, 7 }
 0x507   :  { %11044 = vmatpush1.bf16.msra.mxu1 %v11043_v42  ;;  %11108 = vmatpush1.bf16.msra.mxu0 %v11107_v43  ;;  %v11065_v42 = vpack.c.bf16 %v9479_v35, %v9477_v34  ;;  %v11129_v43 = vpack.c.bf16 %v9543_v37, %v9541_v36  ;;  %v11083_v34 = vpack.c.bf16 %v9494_v25, %v9492_v24  ;;  %v9496_v36 = vld [vmem:[%s17660_s3 + $0x180] sm:$0xff]  ;;  %v9498_v37 = vld [vmem:[%s17660_s3 + $0x190] sm:$0xff] }
 0x508   :  { %11046 = vmatprep.subr.bf16.mxu1 %v11045_v46  ;;  %11110 = vmatprep.subr.bf16.mxu0 %v11109_v47  ;;  %v9481_v46 = vld [vmem:[%s17660_s3 + $0x108] sm:$0xff]  ;;  %v9483_v47 = vld [vmem:[%s17660_s3 + $0x118] sm:$0xff]  ;;  %v11147_v35 = vpack.c.bf16 %v9558_v29, %v9556_v28 }
 0x50b   :  { %11048 = vmatpush1.bf16.msra.mxu1 %v11047_v54  ;;  %11112 = vmatpush1.bf16.msra.mxu0 %v11111_v55  ;;  %v11069_v54 = vpack.c.bf16 %v9483_v47, %v9481_v46  ;;  %v11133_v55 = vpack.c.bf16 %v9547_v49, %v9545_v48  ;;  %v11087_v46 = vpack.c.bf16 %v9498_v37, %v9496_v36  ;;  %v9500_v48 = vld [vmem:[%s17660_s3 + $0x1a0] sm:$0xff]  ;;  %v9502_v49 = vld [vmem:[%s17660_s3 + $0x1b0] sm:$0xff] }
 0x50c   :  { %11050 = vmatprep.subr.bf16.mxu1 %v11049_v58  ;;  %11114 = vmatprep.subr.bf16.mxu0 %v11113_v59  ;;  %v9485_v58 = vld [vmem:[%s17660_s3 + $0x128] sm:$0xff]  ;;  %v9487_v59 = vld [vmem:[%s17660_s3 + $0x138] sm:$0xff]  ;;  %v11151_v47 = vpack.c.bf16 %v9562_v41, %v9560_v40 }
 0x50f   :  { %11052 = vmatpush1.bf16.msra.mxu1 %v11051_v2  ;;  %11116 = vmatpush1.bf16.msra.mxu0 %v11115_v3  ;;  %v11073_v2 = vpack.c.bf16 %v9487_v59, %v9485_v58  ;;  %v11137_v3 = vpack.c.bf16 %v9551_v61, %v9549_v60  ;;  %v11091_v58 = vpack.c.bf16 %v9502_v49, %v9500_v48  ;;  %v9504_v60 = vld [vmem:[%s17660_s3 + $0x1c0] sm:$0xff] }
 0x510   :  { %11054 = vmatprep.subr.bf16.mxu1 %v11053_v6  ;;  %11118 = vmatprep.subr.bf16.mxu0 %v11117_v7  ;;  %v9489_v6 = vld [vmem:[%s17660_s3 + $0x148] sm:$0xff]  ;;  %v9491_v7 = vld [vmem:[%s17660_s3 + $0x158] sm:$0xff]  ;;  %v11155_v59 = vpack.c.bf16 %v9566_v53, %v9564_v52 }
 0x513   :  { %11056 = vmatpush1.bf16.msra.mxu1 %v11055_v14  ;;  %11120 = vmatpush1.bf16.msra.mxu0 %v11119_v15  ;;  %v11077_v14 = vpack.c.bf16 %v9491_v7, %v9489_v6  ;;  %v11141_v15 = vpack.c.bf16 %v9555_v9, %v9553_v8  ;;  %v9573_v6 = vld [vmem:[%s17660_s3 + $0x3e8] sm:$0xff]  ;;  %v11097_v7 = vpack.c.bf16 %v9511_v5, %v9509_v4  ;;  %v9575_v8 = vld [vmem:[%s17660_s3 + $0x3f8] sm:$0xff]  ;;  %v9508_v9 = vld [vmem:[%s17660_s3 + $0x1e0] sm:$0xff] }
 0x514   :  { %11058 = vmatprep.subr.bf16.mxu1 %v11057_v18  ;;  %11122 = vmatprep.subr.bf16.mxu0 %v11121_v19  ;;  %v9493_v18 = vld [vmem:[%s17660_s3 + $0x168] sm:$0xff]  ;;  %v9495_v19 = vld [vmem:[%s17660_s3 + $0x178] sm:$0xff] }
 0x517   :  { %11060 = vmatpush1.bf16.msra.mxu1 %v11059_v26  ;;  %11124 = vmatpush1.bf16.msra.mxu0 %v11123_v27  ;;  %v11081_v26 = vpack.c.bf16 %v9495_v19, %v9493_v18  ;;  %v11145_v27 = vpack.c.bf16 %v9559_v21, %v9557_v20  ;;  %v1394_v18 = vsub.s32 1, %v1389_v17  ;;  %v1402_v19 = vsub.s32 3, %v1389_v17  ;;  %v1386_v20 = vld [vmem:[%s17661_s2] sm:$0xf] }
 0x518   :  { %11062 = vmatprep.subr.bf16.mxu1 %v11061_v30  ;;  %11126 = vmatprep.subr.bf16.mxu0 %v11125_v31  ;;  %v9497_v30 = vld [vmem:[%s17660_s3 + $0x188] sm:$0xff]  ;;  %v9499_v31 = vld [vmem:[%s17660_s3 + $0x198] sm:$0xff]  ;;  %v1390_v21 = vsub.s32 0, %v1389_v17 }
 0x519   :  { %v1403_v24 = vrot.slane %v1386_v20, %v1402_v19 }
 0x51a   :  { %v1391_v25 = vrot.slane %v1386_v20, %v1390_v21 }
 0x51b   :  { %11064 = vmatpush1.bf16.msra.mxu1 %v11063_v38  ;;  %11128 = vmatpush1.bf16.msra.mxu0 %v11127_v39  ;;  %v11085_v38 = vpack.c.bf16 %v9499_v31, %v9497_v30  ;;  %v11149_v39 = vpack.c.bf16 %v9563_v33, %v9561_v32 }
 0x51c   :  { %11066 = vmatprep.subr.bf16.mxu1 %v11065_v42  ;;  %11130 = vmatprep.subr.bf16.mxu0 %v11129_v43  ;;  %v9501_v42 = vld [vmem:[%s17660_s3 + $0x1a8] sm:$0xff]  ;;  %v9503_v43 = vld [vmem:[%s17660_s3 + $0x1b8] sm:$0xff] }
 0x51f   :  { %11068 = vmatpush1.bf16.msra.mxu1 %v11067_v50  ;;  %11132 = vmatpush1.bf16.msra.mxu0 %v11131_v51  ;;  %v11089_v50 = vpack.c.bf16 %v9503_v43, %v9501_v42  ;;  %v11153_v51 = vpack.c.bf16 %v9567_v45, %v9565_v44 }
 0x520   :  { %11070 = vmatprep.subr.bf16.mxu1 %v11069_v54  ;;  %11134 = vmatprep.subr.bf16.mxu0 %v11133_v55  ;;  %v9505_v54 = vld [vmem:[%s17660_s3 + $0x1c8] sm:$0xff]  ;;  %v9507_v55 = vld [vmem:[%s17660_s3 + $0x1d8] sm:$0xff] }
 0x521   :  { %v11093_v61 = vpack.c.bf16 %v9507_v55, %v9505_v54 }
 0x523   :  { %11072 = vmatpush1.bf16.msra.mxu1 %v11071_v62  ;;  %11136 = vmatpush1.bf16.msra.mxu0 %v11135_v63  ;;  %v11157_v62 = vpack.c.bf16 %v9571_v57, %v9569_v56  ;;  %v9506_v63 = vld [vmem:[%s17660_s3 + $0x1d0] sm:$0xff]  ;;  %v9736_v57 = vld [vmem:[%s17665_s5] sm:$0xff] }
 0x524   :  { %11074 = vmatprep.subr.bf16.mxu1 %v11073_v2  ;;  %11138 = vmatprep.subr.bf16.mxu0 %v11137_v3  ;;  %v11095_v2 = vpack.c.bf16 %v9506_v63, %v9504_v60  ;;  %v11159_v3 = vpack.c.bf16 %v9570_v1, %v9568_v0 }
 0x527   :  { %11076 = vmatpush1.bf16.msra.mxu1 %v11075_v10  ;;  %11140 = vmatpush1.bf16.msra.mxu0 %v11139_v11  ;;  %v9510_v10 = vld [vmem:[%s17660_s3 + $0x1f0] sm:$0xff]  ;;  %v11161_v11 = vpack.c.bf16 %v9575_v8, %v9573_v6 }
 0x528   :  { %11078 = vmatprep.subr.bf16.mxu1 %v11077_v14  ;;  %11142 = vmatprep.subr.bf16.mxu0 %v11141_v15  ;;  %v11099_v12 = vpack.c.bf16 %v9510_v10, %v9508_v9  ;;  %v9574_v14 = vld [vmem:[%s17660_s3 + $0x3f0] sm:$0xff] }
 0x529   :  { %v11163_v15 = vpack.c.bf16 %v9574_v14, %v9572_v13 }
 0x52b   :  { %11080 = vmatpush1.bf16.msra.mxu1 %v11079_v22  ;;  %11144 = vmatpush1.bf16.msra.mxu0 %v11143_v23  ;;  %v1398_v22 = vsub.s32 2, %v1389_v17  ;;  %v1395_v23 = vrot.slane %v1386_v20, %v1394_v18 }
 0x52c   :  { %11082 = vmatprep.subr.bf16.mxu1 %v11081_v26  ;;  %11146 = vmatprep.subr.bf16.mxu0 %v11145_v27 }
 0x52d   :  { %v1399_v26 = vrot.slane %v1386_v20, %v1398_v22 }
 0x52f   :  { %11084 = vmatpush1.bf16.msra.mxu1 %v11083_v34  ;;  %11148 = vmatpush1.bf16.msra.mxu0 %v11147_v35 }
 0x530   :  { %11086 = vmatprep.subr.bf16.mxu1 %v11085_v38  ;;  %11150 = vmatprep.subr.bf16.mxu0 %v11149_v39  ;;  %v9576_v39 = vld [vmem:[%s17662_s4] sm:$0x3] }
 0x531   :  { %v9581_v40 = vrot.slane %v9576_v39, %v1390_v21  ;;  %v9585_v41 = vrot.slane %v9576_v39, %v1394_v18 }
 0x533   :  { %11088 = vmatpush1.bf16.msra.mxu1 %v11087_v46  ;;  %11152 = vmatpush1.bf16.msra.mxu0 %v11151_v47 }
 0x534   :  { %11090 = vmatprep.subr.bf16.mxu1 %v11089_v50  ;;  %11154 = vmatprep.subr.bf16.mxu0 %v11153_v51 }
 0x537   :  { %11092 = vmatpush1.bf16.msra.mxu1 %v11091_v58  ;;  %11156 = vmatpush1.bf16.msra.mxu0 %v11155_v59 }
 0x538   :  { %11094 = vmatprep.subr.bf16.mxu1 %v11093_v61  ;;  %11158 = vmatprep.subr.bf16.mxu0 %v11157_v62 }
 0x53b   :  { %11096 = vmatpush1.bf16.msra.mxu1 %v11095_v2  ;;  %11160 = vmatpush1.bf16.msra.mxu0 %v11159_v3 }
 0x53c   :  { %11098 = vmatprep.subr.bf16.mxu1 %v11097_v7  ;;  %11162 = vmatprep.subr.bf16.mxu0 %v11161_v11 }
 0x53f   :  { %11100 = vmatpush1.bf16.msra.mxu1 %v11099_v12  ;;  %11164 = vmatpush1.bf16.msra.mxu0 %v11163_v15 }
 0x5d5   :  { %v8621_v27 = vpop.f32.mrb[0].mxu0  ;;  %v9441_v28 = vpop.f32.mrb[0].mxu1 }
 0x5d6   :  { %v8623_v29 = vpop.f32.mrb[1].mxu0  ;;  %v9443_v30 = vpop.f32.mrb[1].mxu1  ;;  %v11165_v35 = vadd.f32 %v8621_v27, %v1391_v25  ;;  %v11167_v36 = vadd.f32 %v9441_v28, %v1399_v26 }
 0x5d7   :  { %v11166_v31 = vadd.f32 %v8623_v29, %v1395_v23  ;;  %v11168_v32 = vadd.f32 %v9443_v30, %v1403_v24  ;;  %v8625_v33 = vpop.f32.mrb[2].mxu0  ;;  %v9445_v34 = vpop.f32.mrb[2].mxu1 }
 0x5d8   :  { %v8626_v37 = vpop.f32.mrb[3].mxu0  ;;  %v9446_v38 = vpop.f32.mrb[3].mxu1 }
 0x5d9   :  { %9652 = vmatprep.mubr.f32.mxu1 %v11166_v31  ;;  %9723 = vmatprep.mubr.f32.mxu0 %v11168_v32 }
 0x5da   :  { %9653 = vmatmul.mubr.f32.vlgmr.msra.gmra.mrb[4].mxu1 %v11165_v35  ;;  %9724 = vmatmul.mubr.f32.vlgmr.msra.gmra.mrb[4].mxu0 %v11167_v36 }
 0x6ad   :  { %v9654_v42 = vpop.f32.mrb[4].mxu1  ;;  %v9725_v43 = vpop.f32.mrb[4].mxu0 }
 0x6ae   :  { %v9655_v44 = vadd.f32 %v9654_v42, %v9581_v40  ;;  %v9656_v45 = vpop.f32.mrb[5].mxu1  ;;  %v9727_v46 = vpop.f32.mrb[5].mxu0 }
 0x6af   :  { %v9657_v47 = vadd.f32 %v9656_v45, %v9585_v41 }
 0x6b0   :  { %v9726_v48 = vadd.f32 %v9725_v43, %v9655_v44 }
 0x6b1   :  { %v9728_v49 = vadd.f32 %v9727_v46, %v9657_v47 }
 0x6b2   :  { %9743 = vst [vmem:[%s17663_s7] sm:$0xff] %v9726_v48 }
 0x6b3   :  { %v9730_v50 = vsub.f32 0.0, %v9728_v49 }
 0x6b5   :  { %v9731_v51 = vmul.f32 1.442695, %v9730_v50 }
 0x6b7   :  { %13245 = vpow2.f32 %v9731_v51 }
 0x6c1   :  { %v13246_v52 = vpop.eup %13245 }
 0x6c2   :  { %v9733_v53 = vadd.f32 1.0, %v13246_v52 }
 0x6c4   :  { %13247 = vrcp.f32 %v9733_v53 }
 0x6ce   :  { %v13248_v54 = vpop.eup %13247 }
 0x6cf   :  { %v9737_v55 = vmul.f32 0.5, %v13248_v54  ;;  %9744 = vst [vmem:[%s17664_s8] sm:$0xff] %v13248_v54 }
 0x6d1   :  { %v9738_v56 = vmul.f32 1.442695, %v9737_v55 }
 0x6d3   :  { %13249 = vpow2.f32 %v9738_v56 }
 0x6dd   :  { %v13250_v58 = vpop.eup %13249 }
 0x6de   :  { %v9740_v59 = vmul.f32 %v13250_v58, %v9736_v57 }
 0x6e0   :  { %v9741_v60 = vadd.f32 %v9740_v59, %v9726_v48 }
 0x6e2   :  { %9742 = vst [vmem:[%s17666_s6] sm:$0xff] %v9741_v60 }

</bundles_post_ra>
